<compile_context>
chip_gen: v6e
topology: v6e:2x2x1
jax: 0.10.0
libtpu: 0.0.40
codegen_flags: <defaults>
</compile_context>

<pallas_src>
import jax
import jax.numpy as jnp
import numpy as np
from jax.experimental import pallas as pl
from jax.experimental.pallas import tpu as pltpu

# ------------------------------ configuration ------------------------------
INPUT_DIM = 128      # d_model of the transformer encoder layer
OUTPUT_DIM = 256     # fc_weight output dim
EMBED_DIM = 128      # fc_bias output dim
NUM_HEADS = 4
FFN_DIM = 2048       # nn.TransformerEncoderLayer default dim_feedforward
WT_NUM = 128         # fixed number of weight tokens in the module
SEQ_LEN = 8          # example sequence length (number of wavelengths)
FFN_CHUNK = 512      # FFN hidden-dim tile (multiple of 256 for v6e/v7x MXU)


# ------------------------------ in-kernel math ------------------------------
def _gelu_tanh(x):
    # tanh-form GELU: lowers to the EUP (own bundle slot) instead of a long
    # VALU polynomial over the (137, FFN_CHUNK) intermediate.
    # TODO(synk): PyTorch uses exact erf GELU; tanh form differs by <~1e-3,
    # inside the bf16 matmul noise / test tolerance.
    c = 0.7978845608028654  # sqrt(2/pi)
    return 0.5 * x * (1.0 + jnp.tanh(c * (x + 0.044715 * x * x * x)))


def _layernorm(x, w, b, eps=1e-5):
    mu = jnp.mean(x, axis=-1, keepdims=True)
    xc = x - mu
    var = jnp.mean(xc * xc, axis=-1, keepdims=True)
    return xc * jax.lax.rsqrt(var + eps) * w + b


# ------------------------------ the Pallas kernel ------------------------------
# vec_ref rows: 0 ln1_w, 1 ln1_b, 2 ln2_w, 3 ln2_b, 4 lin2_b, 5 out_proj_b,
#               6 fc_bias_b, 7 bias_token
# bwide_ref rows: 0 zvo_b (H*D), 1 inqk_b (2D), 2 fc_weight_b (O)   (zero padded)
def twg_kernel(wt_ref, x_ref, inqk_wT_ref, vo_wT_ref,
               lin1_wT_ref, lin2_wT_ref, fcw_wT_ref, fcb_wT_ref,
               vec_ref, bwide_ref, lin1_b_ref,
               weights_out_ref, bias_out_ref,
               xfull_ref, x1_ref, acc_ref):
    c = pl.program_id(0)
    nc = pl.num_programs(0)

    S, D = x_ref.shape
    L = WT_NUM + S + 1
    H = NUM_HEADS
    hd = D // H
    O = weights_out_ref.shape[1]

    # ---------- step 0: assemble tokens, attention, residual + LN1 ----------
    @pl.when(c == 0)
    def _prologue():
        # [weight_tokens; x; bias_token] into VMEM scratch (row offsets are
        # multiples of 8 sublanes -> plain stores).
        xfull_ref[0:WT_NUM, :] = wt_ref[...]
        xfull_ref[WT_NUM:WT_NUM + S, :] = x_ref[...]
        xfull_ref[WT_NUM + S:L, :] = vec_ref[7:8, :]          # bias_token

        x = xfull_ref[...]                                    # (L, D) f32
        xb = x.astype(jnp.bfloat16)

        # Q/K projection; 1/sqrt(hd) is pre-folded into the Q rows + bias.
        qk = (jnp.dot(xb, inqk_wT_ref[...],
                      preferred_element_type=jnp.float32)
              + bwide_ref[1:2, 0:2 * D])                      # (L, 2D)
        q = qk[:, 0:D]
        # One (L,D)->(D,L) transpose for all heads (no per-head vxpose).
        kT = qk[:, D:2 * D].T.astype(jnp.bfloat16)            # (D, L)

        # V path with out-projection pre-folded: Z_h = x @ (Wv_h^T Wo_h^T).
        z = (jnp.dot(xb, vo_wT_ref[...],
                     preferred_element_type=jnp.float32)
             + bwide_ref[0:1, 0:H * D])                       # (L, H*D)
        zb = z.astype(jnp.bfloat16)

        attn = jnp.zeros((L, D), jnp.float32)
        for h in range(H):
            qh = q[:, h * hd:(h + 1) * hd].astype(jnp.bfloat16)
            s = jnp.dot(qh, kT[h * hd:(h + 1) * hd, :],
                        preferred_element_type=jnp.float32)   # (L, L)
            s = s - jnp.max(s, axis=-1, keepdims=True)
            p = jnp.exp(s)
            p = p * pl.reciprocal(jnp.sum(p, axis=-1, keepdims=True),
                                  approx=True)
            # Clean K=L / N=D matmul (Wo already folded into Z).
            attn = attn + jnp.dot(p.astype(jnp.bfloat16),
                                  zb[:, h * D:(h + 1) * D],
                                  preferred_element_type=jnp.float32)
        attn = attn + vec_ref[5:6, :]                         # out_proj bias

        # Post-norm encoder layer (norm_first=False, dropout=0).
        x1_ref[...] = _layernorm(x + attn, vec_ref[0:1, :], vec_ref[1:2, :])
        acc_ref[...] = jnp.zeros_like(acc_ref)

    # ---------- every step: one FFN hidden chunk (pipelined weight DMA) ----------
    x1b = x1_ref[...].astype(jnp.bfloat16)
    h1 = (jnp.dot(x1b, lin1_wT_ref[...],
                  preferred_element_type=jnp.float32)
          + lin1_b_ref[pl.ds(c, 1), :])                       # (L, FFN_CHUNK)
    h1 = _gelu_tanh(h1)
    acc_ref[...] += jnp.dot(h1.astype(jnp.bfloat16), lin2_wT_ref[...],
                            preferred_element_type=jnp.float32)

    # ---------- last step: residual + LN2, output heads ----------
    @pl.when(c == nc - 1)
    def _epilogue():
        x1 = x1_ref[...]
        ff = acc_ref[...] + vec_ref[4:5, :]                   # lin2 bias
        x2 = _layernorm(x1 + ff, vec_ref[2:3, :], vec_ref[3:4, :])

        # weights = fc_weight(out[wt_num:-1] + pos_wave)
        seq = x2[WT_NUM:WT_NUM + S, :] + x_ref[...]
        weights_out_ref[...] = (jnp.dot(seq.astype(jnp.bfloat16), fcw_wT_ref[...],
                                        preferred_element_type=jnp.float32)
                                + bwide_ref[2:3, 0:O])
        # bias = fc_bias(out[-1])
        last = x2[WT_NUM + S:L, :]
        bias_out_ref[...] = (jnp.dot(last.astype(jnp.bfloat16), fcb_wT_ref[...],
                                     preferred_element_type=jnp.float32)
                             + vec_ref[6:7, :])


# ------------------------------ one-time parameter prep ------------------------------
def prepare_params(p):
    """Transpose / fold / pack / bf16-cast parameters once, outside the hot path."""
    D = p["in_proj_w"].shape[1]
    H = NUM_HEADS
    hd = D // H
    scale = 1.0 / float(np.sqrt(hd))

    in_w = p["in_proj_w"].astype(jnp.float32)
    in_b = p["in_proj_b"].astype(jnp.float32)
    wq, wk, wv = in_w[:D], in_w[D:2 * D], in_w[2 * D:]
    bq, bk, bv = in_b[:D], in_b[D:2 * D], in_b[2 * D:]

    # Fold attention score scaling into the Q rows (free at runtime).
    wq = wq * scale
    bq = bq * scale

    inqk_wT = jnp.concatenate([wq, wk], axis=0).T.astype(jnp.bfloat16)  # (D, 2D)
    inqk_b = jnp.concatenate([bq, bk], axis=0)                          # (2D,)

    # Pre-fold out_proj into the V projection, per head.
    woT = p["out_proj_w"].astype(jnp.float32).T                         # (D, D)
    vo_blocks, zvo_blocks = [], []
    for h in range(H):
        wv_h = wv[h * hd:(h + 1) * hd]                                  # (hd, D)
        woT_h = woT[h * hd:(h + 1) * hd]                                # (hd, D)
        vo_blocks.append(wv_h.T @ woT_h)                                # (D, D)
        zvo_blocks.append(bv[h * hd:(h + 1) * hd] @ woT_h)              # (D,)
    vo_wT = jnp.concatenate(vo_blocks, axis=1).astype(jnp.bfloat16)     # (D, H*D)
    zvo_b = jnp.concatenate(zvo_blocks, axis=0)                         # (H*D,)

    F = p["lin1_w"].shape[0]
    nc = F // FFN_CHUNK
    lin1_b = p["lin1_b"].astype(jnp.float32).reshape(nc, FFN_CHUNK)

    # Pack the eight (D,)-wide vectors into one (8, D) input.
    vec128 = jnp.stack([
        p["ln1_w"], p["ln1_b"], p["ln2_w"], p["ln2_b"],
        p["lin2_b"], p["out_proj_b"], p["fc_bias_b"],
        p["bias_token"][0],
    ], axis=0).astype(jnp.float32)                                      # (8, D)

    # Pack the three wide biases into one (3, wide) input (zero padded).
    fcw_b = p["fc_weight_b"].astype(jnp.float32)
    wide = max(zvo_b.shape[0], inqk_b.shape[0], fcw_b.shape[0])

    def _pad(v):
        return jnp.pad(v, (0, wide - v.shape[0]))

    bwide = jnp.stack([_pad(zvo_b), _pad(inqk_b), _pad(fcw_b)], axis=0)  # (3, wide)

    prepped = dict(
        weight_tokens=p["weight_tokens"].astype(jnp.float32),
        inqk_wT=inqk_wT,
        vo_wT=vo_wT,
        lin1_wT=p["lin1_w"].astype(jnp.float32).T.astype(jnp.bfloat16),  # (D, F)
        lin2_wT=p["lin2_w"].astype(jnp.float32).T.astype(jnp.bfloat16),  # (F, D)
        fcw_wT=p["fc_weight_w"].T.astype(jnp.bfloat16),                  # (D, O)
        fcb_wT=p["fc_bias_w"].T.astype(jnp.bfloat16),                    # (D, E)
        vec128=vec128,
        bwide=bwide,
        lin1_b=lin1_b,
    )
    return jax.tree_util.tree_map(jnp.asarray, prepped)


# ------------------------------ wrapper ------------------------------
@jax.jit
def dofa_weight_generator(x, pp):
    """x: (seq_len, input_dim) f32.  Returns (weights (S, output_dim), bias (embed_dim,))."""
    S, D = x.shape
    O = pp["fcw_wT"].shape[1]
    E = pp["fcb_wT"].shape[1]
    F = pp["lin1_wT"].shape[1]
    NC = F // FFN_CHUNK
    L = WT_NUM + S + 1

    args = (pp["weight_tokens"], x, pp["inqk_wT"], pp["vo_wT"],
            pp["lin1_wT"], pp["lin2_wT"], pp["fcw_wT"], pp["fcb_wT"],
            pp["vec128"], pp["bwide"], pp["lin1_b"])

    def resident(a):
        shape = a.shape
        return pl.BlockSpec(shape, lambda c, _s=shape: (0,) * len(_s))

    in_specs = [
        resident(pp["weight_tokens"]),
        resident(x),
        resident(pp["inqk_wT"]),
        resident(pp["vo_wT"]),
        pl.BlockSpec((D, FFN_CHUNK), lambda c: (0, c)),   # lin1_wT column tiles
        pl.BlockSpec((FFN_CHUNK, D), lambda c: (c, 0)),   # lin2_wT row tiles
        resident(pp["fcw_wT"]),
        resident(pp["fcb_wT"]),
        resident(pp["vec128"]),
        resident(pp["bwide"]),
        resident(pp["lin1_b"]),
    ]
    out_specs = (pl.BlockSpec((S, O), lambda c: (0, 0)),
                 pl.BlockSpec((1, E), lambda c: (0, 0)))

    weights, bias = pl.pallas_call(
        twg_kernel,
        out_shape=(jax.ShapeDtypeStruct((S, O), jnp.float32),
                   jax.ShapeDtypeStruct((1, E), jnp.float32)),
        grid_spec=pltpu.PrefetchScalarGridSpec(
            num_scalar_prefetch=0,
            grid=(NC,),
            in_specs=in_specs,
            out_specs=out_specs,
            scratch_shapes=[pltpu.VMEM((L, D), jnp.float32),   # assembled tokens
                            pltpu.VMEM((L, D), jnp.float32),   # x1 (post-LN1)
                            pltpu.VMEM((L, D), jnp.float32)]), # FFN accumulator
        compiler_params=pltpu.CompilerParams(
            dimension_semantics=("arbitrary",),
            vmem_limit_bytes=16 * 1024 * 1024),
    )(*args)
    return weights, bias[0]


# ------------------------------ pure-JAX reference (f32, exact GELU) ------------------------------
def reference(x, p):
    def linear(h, w, b):
        return h @ w.T + b

    def layernorm(h, w, b, eps=1e-5):
        mu = h.mean(-1, keepdims=True)
        var = ((h - mu) ** 2).mean(-1, keepdims=True)
        return (h - mu) / jnp.sqrt(var + eps) * w + b

    D = x.shape[-1]
    H = NUM_HEADS
    hd = D // H
    xf = jnp.concatenate([p["weight_tokens"], x, p["bias_token"]], axis=0)
    L = xf.shape[0]

    qkv = linear(xf, p["in_proj_w"], p["in_proj_b"])
    q, k, v = jnp.split(qkv, 3, axis=-1)
    qh = q.reshape(L, H, hd).transpose(1, 0, 2)
    kh = k.reshape(L, H, hd).transpose(1, 0, 2)
    vh = v.reshape(L, H, hd).transpose(1, 0, 2)
    s = jnp.einsum("hqd,hkd->hqk", qh, kh) / jnp.sqrt(hd)
    a = jax.nn.softmax(s, axis=-1)
    ctx = jnp.einsum("hqk,hkd->hqd", a, vh).transpose(1, 0, 2).reshape(L, D)
    attn = linear(ctx, p["out_proj_w"], p["out_proj_b"])

    h = layernorm(xf + attn, p["ln1_w"], p["ln1_b"])
    ff = linear(jax.nn.gelu(linear(h, p["lin1_w"], p["lin1_b"]), approximate=False),
                p["lin2_w"], p["lin2_b"])
    h = layernorm(h + ff, p["ln2_w"], p["ln2_b"])

    weights = linear(h[WT_NUM:-1] + x, p["fc_weight_w"], p["fc_weight_b"])
    bias = linear(h[-1], p["fc_bias_w"], p["fc_bias_b"])
    return weights, bias


# ------------------------------ parameter init ------------------------------
def init_params(key):
    D, O, E, F = INPUT_DIM, OUTPUT_DIM, EMBED_DIM, FFN_DIM
    ks = jax.random.split(key, 16)

    def n(k, shape, std=0.02):
        return (std * jax.random.normal(k, shape)).astype(jnp.float32)

    return dict(
        weight_tokens=n(ks[0], (WT_NUM, D)),      # nn.init.normal_(std=0.02)
        bias_token=n(ks[1], (1, D)),
        in_proj_w=n(ks[2], (3 * D, D)),           # PyTorch (out_features, in_features)
        in_proj_b=n(ks[3], (3 * D,)),
        out_proj_w=n(ks[4], (D, D)),
        out_proj_b=n(ks[5], (D,)),
        ln1_w=jnp.ones((D,), jnp.float32),
        ln1_b=jnp.zeros((D,), jnp.float32),
        lin1_w=n(ks[6], (F, D)),
        lin1_b=n(ks[7], (F,)),
        lin2_w=n(ks[8], (D, F)),
        lin2_b=n(ks[9], (D,)),
        ln2_w=jnp.ones((D,), jnp.float32),
        ln2_b=jnp.zeros((D,), jnp.float32),
        fc_weight_w=n(ks[10], (O, D)),
        fc_weight_b=n(ks[11], (O,)),
        fc_bias_w=n(ks[12], (E, D)),
        fc_bias_b=n(ks[13], (E,)),
    )


# ------------------------------ main ------------------------------
if __name__ == "__main__":
    key = jax.random.PRNGKey(0)
    k_param, k_x = jax.random.split(key)
    params = init_params(k_param)
    prepped = jax.block_until_ready(prepare_params(params))   # one-time prep
    x = jax.random.normal(k_x, (SEQ_LEN, INPUT_DIM), jnp.float32)  # (seq, input_dim)

    weights, bias = dofa_weight_generator(x, prepped)
    jax.block_until_ready((weights, bias))

    w_ref, b_ref = reference(x, params)
    assert weights.shape == (SEQ_LEN, OUTPUT_DIM) and bias.shape == (EMBED_DIM,)
    # bf16 matmul operands (f32 accumulation) + tanh GELU + approx reciprocal
    # keep errors well under ~1e-2 on outputs of ~0.3 std.
    assert np.allclose(np.asarray(weights), np.asarray(w_ref), atol=1e-2, rtol=2e-2)
    assert np.allclose(np.asarray(bias), np.asarray(b_ref), atol=1e-2, rtol=2e-2)

    print("KERNEL_OK")
</pallas_src>

<mosaic_0001>
module attributes {stable_mosaic.version = 11 : i64} {
  func.func @twg_kernel(%arg0: i32, %arg1: memref<128x128xf32, #tpu.memory_space<vmem>>, %arg2: memref<8x128xf32, #tpu.memory_space<vmem>>, %arg3: memref<128x256xbf16, #tpu.memory_space<vmem>>, %arg4: memref<128x512xbf16, #tpu.memory_space<vmem>>, %arg5: memref<128x512xbf16, #tpu.memory_space<vmem>>, %arg6: memref<512x128xbf16, #tpu.memory_space<vmem>>, %arg7: memref<128x256xbf16, #tpu.memory_space<vmem>>, %arg8: memref<128x128xbf16, #tpu.memory_space<vmem>>, %arg9: memref<8x128xf32, #tpu.memory_space<vmem>>, %arg10: memref<3x512xf32, #tpu.memory_space<vmem>>, %arg11: memref<4x512xf32, #tpu.memory_space<vmem>>, %arg12: memref<8x256xf32, #tpu.memory_space<vmem>>, %arg13: memref<1x128xf32, #tpu.memory_space<vmem>>, %arg14: memref<137x128xf32, #tpu.memory_space<vmem>>, %arg15: memref<137x128xf32, #tpu.memory_space<vmem>>, %arg16: memref<137x128xf32, #tpu.memory_space<vmem>>) attributes {dimension_semantics = [#tpu.dimension_semantics<arbitrary>], iteration_bounds = array<i64: 4>, scalar_prefetch = 0 : i64, scratch_operands = 3 : i64, tpu.core_type = #tpu.core_type<tc>, window_params = [{pipeline_mode = #tpu.pipeline_mode<synchronous>, transform_indices = @transform_0, window_bounds = array<i64: 128, 128>}, {pipeline_mode = #tpu.pipeline_mode<synchronous>, transform_indices = @transform_1, window_bounds = array<i64: 8, 128>}, {pipeline_mode = #tpu.pipeline_mode<synchronous>, transform_indices = @transform_2, window_bounds = array<i64: 128, 256>}, {pipeline_mode = #tpu.pipeline_mode<synchronous>, transform_indices = @transform_3, window_bounds = array<i64: 128, 512>}, {transform_indices = @transform_4, window_bounds = array<i64: 128, 512>}, {transform_indices = @transform_5, window_bounds = array<i64: 512, 128>}, {pipeline_mode = #tpu.pipeline_mode<synchronous>, transform_indices = @transform_6, window_bounds = array<i64: 128, 256>}, {pipeline_mode = #tpu.pipeline_mode<synchronous>, transform_indices = @transform_7, window_bounds = array<i64: 128, 128>}, {pipeline_mode = #tpu.pipeline_mode<synchronous>, transform_indices = @transform_8, window_bounds = array<i64: 8, 128>}, {pipeline_mode = #tpu.pipeline_mode<synchronous>, transform_indices = @transform_9, window_bounds = array<i64: 3, 512>}, {pipeline_mode = #tpu.pipeline_mode<synchronous>, transform_indices = @transform_10, window_bounds = array<i64: 4, 512>}, {pipeline_mode = #tpu.pipeline_mode<synchronous>, transform_indices = @transform_11, window_bounds = array<i64: 8, 256>}, {pipeline_mode = #tpu.pipeline_mode<synchronous>, transform_indices = @transform_12, window_bounds = array<i64: 1, 128>}]} {
    %c0_i32 = arith.constant 0 : i32
    %0 = arith.cmpi eq, %arg0, %c0_i32 : i32
    %1 = arith.extui %0 : i1 to i32
    %c0_i32_0 = arith.constant 0 : i32
    %2 = arith.cmpi ne, %1, %c0_i32_0 : i32
    scf.if %2 {
      %c0_17 = arith.constant 0 : index
      %c0_18 = arith.constant 0 : index
      %33 = vector.load %arg1[%c0_17, %c0_18] : memref<128x128xf32, #tpu.memory_space<vmem>>, vector<128x128xf32>
      %c0_19 = arith.constant 0 : index
      %c0_20 = arith.constant 0 : index
      %34 = vector.load %arg14[%c0_19, %c0_20] : memref<137x128xf32, #tpu.memory_space<vmem>>, vector<128x128xf32>
      tpu.vector_store %arg14[%c0_19, %c0_20], %33 {strides = array<i32>} : memref<137x128xf32, #tpu.memory_space<vmem>>, vector<128x128xf32>,
      %c0_21 = arith.constant 0 : index
      %c0_22 = arith.constant 0 : index
      %35 = vector.load %arg2[%c0_21, %c0_22] : memref<8x128xf32, #tpu.memory_space<vmem>>, vector<8x128xf32>
      %c128 = arith.constant 128 : index
      %c0_23 = arith.constant 0 : index
      %36 = vector.load %arg14[%c128, %c0_23] : memref<137x128xf32, #tpu.memory_space<vmem>>, vector<8x128xf32>
      tpu.vector_store %arg14[%c128, %c0_23], %35 {strides = array<i32>} : memref<137x128xf32, #tpu.memory_space<vmem>>, vector<8x128xf32>,
      %c7 = arith.constant 7 : index
      %c0_24 = arith.constant 0 : index
      %37 = vector.load %arg9[%c7, %c0_24] : memref<8x128xf32, #tpu.memory_space<vmem>>, vector<1x128xf32>
      %c136 = arith.constant 136 : index
      %c0_25 = arith.constant 0 : index
      %38 = vector.load %arg14[%c136, %c0_25] : memref<137x128xf32, #tpu.memory_space<vmem>>, vector<1x128xf32>
      tpu.vector_store %arg14[%c136, %c0_25], %37 {strides = array<i32>} : memref<137x128xf32, #tpu.memory_space<vmem>>, vector<1x128xf32>,
      %c0_26 = arith.constant 0 : index
      %c0_27 = arith.constant 0 : index
      %39 = vector.load %arg14[%c0_26, %c0_27] : memref<137x128xf32, #tpu.memory_space<vmem>>, vector<137x128xf32>
      %40 = arith.truncf %39 : vector<137x128xf32> to vector<137x128xbf16>
      %c0_28 = arith.constant 0 : index
      %c0_29 = arith.constant 0 : index
      %41 = vector.load %arg3[%c0_28, %c0_29] : memref<128x256xbf16, #tpu.memory_space<vmem>>, vector<128x256xbf16>
      %cst_30 = arith.constant dense<0.000000e+00> : vector<137x256xf32>
      %42 = tpu.matmul %40, %41, %cst_30 {dimension_numbers = #tpu.dot_dimension_numbers<[1], [0], [0], [1], [0, 0, 1, 1], [], []>} : vector<137x128xbf16>, vector<128x256xbf16>, vector<137x256xf32> -> vector<137x256xf32>
      %c1 = arith.constant 1 : index
      %c0_31 = arith.constant 0 : index
      %43 = vector.load %arg10[%c1, %c0_31] : memref<3x512xf32, #tpu.memory_space<vmem>>, vector<1x256xf32>
      %44 = vector.broadcast %43 : vector<1x256xf32> to vector<137x256xf32>
      %45 = arith.addf %42, %44 : vector<137x256xf32>
      %46 = vector.extract_strided_slice %45 {offsets = [0, 0], sizes = [137, 128], strides = [1, 1]} : vector<137x256xf32> to vector<137x128xf32>
      %47 = vector.extract_strided_slice %45 {offsets = [0, 128], sizes = [137, 128], strides = [1, 1]} : vector<137x256xf32> to vector<137x128xf32>
      %48 = tpu.transpose %47, [1, 0] : vector<137x128xf32> -> vector<128x137xf32>
      %49 = arith.truncf %48 : vector<128x137xf32> to vector<128x137xbf16>
      %c0_32 = arith.constant 0 : index
      %c0_33 = arith.constant 0 : index
      %50 = vector.load %arg4[%c0_32, %c0_33] : memref<128x512xbf16, #tpu.memory_space<vmem>>, vector<128x512xbf16>
      %cst_34 = arith.constant dense<0.000000e+00> : vector<137x512xf32>
      %51 = tpu.matmul %40, %50, %cst_34 {dimension_numbers = #tpu.dot_dimension_numbers<[1], [0], [0], [1], [0, 0, 1, 1], [], []>} : vector<137x128xbf16>, vector<128x512xbf16>, vector<137x512xf32> -> vector<137x512xf32>
      %c0_35 = arith.constant 0 : index
      %c0_36 = arith.constant 0 : index
      %52 = vector.load %arg10[%c0_35, %c0_36] : memref<3x512xf32, #tpu.memory_space<vmem>>, vector<1x512xf32>
      %53 = vector.broadcast %52 : vector<1x512xf32> to vector<137x512xf32>
      %54 = arith.addf %51, %53 : vector<137x512xf32>
      %55 = arith.truncf %54 : vector<137x512xf32> to vector<137x512xbf16>
      %cst_37 = arith.constant 0.000000e+00 : f32
      %56 = vector.broadcast %cst_37 : f32 to vector<137x128xf32>
      %57 = vector.extract_strided_slice %46 {offsets = [0, 0], sizes = [137, 32], strides = [1, 1]} : vector<137x128xf32> to vector<137x32xf32>
      %58 = arith.truncf %57 : vector<137x32xf32> to vector<137x32xbf16>
      %59 = vector.extract_strided_slice %49 {offsets = [0, 0], sizes = [32, 137], strides = [1, 1]} : vector<128x137xbf16> to vector<32x137xbf16>
      %cst_38 = arith.constant dense<0.000000e+00> : vector<137x137xf32>
      %60 = tpu.matmul %58, %59, %cst_38 {dimension_numbers = #tpu.dot_dimension_numbers<[1], [0], [0], [1], [0, 0, 1, 1], [], []>} : vector<137x32xbf16>, vector<32x137xbf16>, vector<137x137xf32> -> vector<137x137xf32>
      %cst_39 = arith.constant dense<0xFF800000> : vector<137xf32>
      %61 = vector.multi_reduction <maximumf>, %60, %cst_39 [1] : vector<137x137xf32> to vector<137xf32>
      %62 = vector.shape_cast %61 : vector<137xf32> to vector<137x1xf32>
      %63 = vector.broadcast %62 : vector<137x1xf32> to vector<137x137xf32>
      %64 = arith.subf %60, %63 : vector<137x137xf32>
      %65 = math.exp %64 : vector<137x137xf32>
      %cst_40 = arith.constant dense<0.000000e+00> : vector<137xf32>
      %66 = vector.multi_reduction <add>, %65, %cst_40 [1] : vector<137x137xf32> to vector<137xf32>
      %67 = vector.shape_cast %66 : vector<137xf32> to vector<137x1xf32>
      %68 = tpu.reciprocal %67 {approx = true} : vector<137x1xf32> -> vector<137x1xf32>
      %69 = vector.broadcast %68 : vector<137x1xf32> to vector<137x137xf32>
      %70 = arith.mulf %65, %69 : vector<137x137xf32>
      %71 = arith.truncf %70 : vector<137x137xf32> to vector<137x137xbf16>
      %72 = vector.extract_strided_slice %55 {offsets = [0, 0], sizes = [137, 128], strides = [1, 1]} : vector<137x512xbf16> to vector<137x128xbf16>
      %cst_41 = arith.constant dense<0.000000e+00> : vector<137x128xf32>
      %73 = tpu.matmul %71, %72, %cst_41 {dimension_numbers = #tpu.dot_dimension_numbers<[1], [0], [0], [1], [0, 0, 1, 1], [], []>} : vector<137x137xbf16>, vector<137x128xbf16>, vector<137x128xf32> -> vector<137x128xf32>
      %74 = arith.addf %56, %73 : vector<137x128xf32>
      %75 = vector.extract_strided_slice %46 {offsets = [0, 32], sizes = [137, 32], strides = [1, 1]} : vector<137x128xf32> to vector<137x32xf32>
      %76 = arith.truncf %75 : vector<137x32xf32> to vector<137x32xbf16>
      %77 = vector.extract_strided_slice %49 {offsets = [32, 0], sizes = [32, 137], strides = [1, 1]} : vector<128x137xbf16> to vector<32x137xbf16>
      %cst_42 = arith.constant dense<0.000000e+00> : vector<137x137xf32>
      %78 = tpu.matmul %76, %77, %cst_42 {dimension_numbers = #tpu.dot_dimension_numbers<[1], [0], [0], [1], [0, 0, 1, 1], [], []>} : vector<137x32xbf16>, vector<32x137xbf16>, vector<137x137xf32> -> vector<137x137xf32>
      %cst_43 = arith.constant dense<0xFF800000> : vector<137xf32>
      %79 = vector.multi_reduction <maximumf>, %78, %cst_43 [1] : vector<137x137xf32> to vector<137xf32>
      %80 = vector.shape_cast %79 : vector<137xf32> to vector<137x1xf32>
      %81 = vector.broadcast %80 : vector<137x1xf32> to vector<137x137xf32>
      %82 = arith.subf %78, %81 : vector<137x137xf32>
      %83 = math.exp %82 : vector<137x137xf32>
      %cst_44 = arith.constant dense<0.000000e+00> : vector<137xf32>
      %84 = vector.multi_reduction <add>, %83, %cst_44 [1] : vector<137x137xf32> to vector<137xf32>
      %85 = vector.shape_cast %84 : vector<137xf32> to vector<137x1xf32>
      %86 = tpu.reciprocal %85 {approx = true} : vector<137x1xf32> -> vector<137x1xf32>
      %87 = vector.broadcast %86 : vector<137x1xf32> to vector<137x137xf32>
      %88 = arith.mulf %83, %87 : vector<137x137xf32>
      %89 = arith.truncf %88 : vector<137x137xf32> to vector<137x137xbf16>
      %90 = vector.extract_strided_slice %55 {offsets = [0, 128], sizes = [137, 128], strides = [1, 1]} : vector<137x512xbf16> to vector<137x128xbf16>
      %cst_45 = arith.constant dense<0.000000e+00> : vector<137x128xf32>
      %91 = tpu.matmul %89, %90, %cst_45 {dimension_numbers = #tpu.dot_dimension_numbers<[1], [0], [0], [1], [0, 0, 1, 1], [], []>} : vector<137x137xbf16>, vector<137x128xbf16>, vector<137x128xf32> -> vector<137x128xf32>
      %92 = arith.addf %74, %91 : vector<137x128xf32>
      %93 = vector.extract_strided_slice %46 {offsets = [0, 64], sizes = [137, 32], strides = [1, 1]} : vector<137x128xf32> to vector<137x32xf32>
      %94 = arith.truncf %93 : vector<137x32xf32> to vector<137x32xbf16>
      %95 = vector.extract_strided_slice %49 {offsets = [64, 0], sizes = [32, 137], strides = [1, 1]} : vector<128x137xbf16> to vector<32x137xbf16>
      %cst_46 = arith.constant dense<0.000000e+00> : vector<137x137xf32>
      %96 = tpu.matmul %94, %95, %cst_46 {dimension_numbers = #tpu.dot_dimension_numbers<[1], [0], [0], [1], [0, 0, 1, 1], [], []>} : vector<137x32xbf16>, vector<32x137xbf16>, vector<137x137xf32> -> vector<137x137xf32>
      %cst_47 = arith.constant dense<0xFF800000> : vector<137xf32>
      %97 = vector.multi_reduction <maximumf>, %96, %cst_47 [1] : vector<137x137xf32> to vector<137xf32>
      %98 = vector.shape_cast %97 : vector<137xf32> to vector<137x1xf32>
      %99 = vector.broadcast %98 : vector<137x1xf32> to vector<137x137xf32>
      %100 = arith.subf %96, %99 : vector<137x137xf32>
      %101 = math.exp %100 : vector<137x137xf32>
      %cst_48 = arith.constant dense<0.000000e+00> : vector<137xf32>
      %102 = vector.multi_reduction <add>, %101, %cst_48 [1] : vector<137x137xf32> to vector<137xf32>
      %103 = vector.shape_cast %102 : vector<137xf32> to vector<137x1xf32>
      %104 = tpu.reciprocal %103 {approx = true} : vector<137x1xf32> -> vector<137x1xf32>
      %105 = vector.broadcast %104 : vector<137x1xf32> to vector<137x137xf32>
      %106 = arith.mulf %101, %105 : vector<137x137xf32>
      %107 = arith.truncf %106 : vector<137x137xf32> to vector<137x137xbf16>
      %108 = vector.extract_strided_slice %55 {offsets = [0, 256], sizes = [137, 128], strides = [1, 1]} : vector<137x512xbf16> to vector<137x128xbf16>
      %cst_49 = arith.constant dense<0.000000e+00> : vector<137x128xf32>
      %109 = tpu.matmul %107, %108, %cst_49 {dimension_numbers = #tpu.dot_dimension_numbers<[1], [0], [0], [1], [0, 0, 1, 1], [], []>} : vector<137x137xbf16>, vector<137x128xbf16>, vector<137x128xf32> -> vector<137x128xf32>
      %110 = arith.addf %92, %109 : vector<137x128xf32>
      %111 = vector.extract_strided_slice %46 {offsets = [0, 96], sizes = [137, 32], strides = [1, 1]} : vector<137x128xf32> to vector<137x32xf32>
      %112 = arith.truncf %111 : vector<137x32xf32> to vector<137x32xbf16>
      %113 = vector.extract_strided_slice %49 {offsets = [96, 0], sizes = [32, 137], strides = [1, 1]} : vector<128x137xbf16> to vector<32x137xbf16>
      %cst_50 = arith.constant dense<0.000000e+00> : vector<137x137xf32>
      %114 = tpu.matmul %112, %113, %cst_50 {dimension_numbers = #tpu.dot_dimension_numbers<[1], [0], [0], [1], [0, 0, 1, 1], [], []>} : vector<137x32xbf16>, vector<32x137xbf16>, vector<137x137xf32> -> vector<137x137xf32>
      %cst_51 = arith.constant dense<0xFF800000> : vector<137xf32>
      %115 = vector.multi_reduction <maximumf>, %114, %cst_51 [1] : vector<137x137xf32> to vector<137xf32>
      %116 = vector.shape_cast %115 : vector<137xf32> to vector<137x1xf32>
      %117 = vector.broadcast %116 : vector<137x1xf32> to vector<137x137xf32>
      %118 = arith.subf %114, %117 : vector<137x137xf32>
      %119 = math.exp %118 : vector<137x137xf32>
      %cst_52 = arith.constant dense<0.000000e+00> : vector<137xf32>
      %120 = vector.multi_reduction <add>, %119, %cst_52 [1] : vector<137x137xf32> to vector<137xf32>
      %121 = vector.shape_cast %120 : vector<137xf32> to vector<137x1xf32>
      %122 = tpu.reciprocal %121 {approx = true} : vector<137x1xf32> -> vector<137x1xf32>
      %123 = vector.broadcast %122 : vector<137x1xf32> to vector<137x137xf32>
      %124 = arith.mulf %119, %123 : vector<137x137xf32>
      %125 = arith.truncf %124 : vector<137x137xf32> to vector<137x137xbf16>
      %126 = vector.extract_strided_slice %55 {offsets = [0, 384], sizes = [137, 128], strides = [1, 1]} : vector<137x512xbf16> to vector<137x128xbf16>
      %cst_53 = arith.constant dense<0.000000e+00> : vector<137x128xf32>
      %127 = tpu.matmul %125, %126, %cst_53 {dimension_numbers = #tpu.dot_dimension_numbers<[1], [0], [0], [1], [0, 0, 1, 1], [], []>} : vector<137x137xbf16>, vector<137x128xbf16>, vector<137x128xf32> -> vector<137x128xf32>
      %128 = arith.addf %110, %127 : vector<137x128xf32>
      %c5 = arith.constant 5 : index
      %c0_54 = arith.constant 0 : index
      %129 = vector.load %arg9[%c5, %c0_54] : memref<8x128xf32, #tpu.memory_space<vmem>>, vector<1x128xf32>
      %130 = vector.broadcast %129 : vector<1x128xf32> to vector<137x128xf32>
      %131 = arith.addf %128, %130 : vector<137x128xf32>
      %132 = arith.addf %39, %131 : vector<137x128xf32>
      %c0_55 = arith.constant 0 : index
      %c0_56 = arith.constant 0 : index
      %133 = vector.load %arg9[%c0_55, %c0_56] : memref<8x128xf32, #tpu.memory_space<vmem>>, vector<1x128xf32>
      %c1_57 = arith.constant 1 : index
      %c0_58 = arith.constant 0 : index
      %134 = vector.load %arg9[%c1_57, %c0_58] : memref<8x128xf32, #tpu.memory_space<vmem>>, vector<1x128xf32>
      %cst_59 = arith.constant dense<0.000000e+00> : vector<137xf32>
      %135 = vector.multi_reduction <add>, %132, %cst_59 [1] : vector<137x128xf32> to vector<137xf32>
      %136 = vector.shape_cast %135 : vector<137xf32> to vector<137x1xf32>
      %cst_60 = arith.constant 1.280000e+02 : f32
      %137 = vector.broadcast %cst_60 : f32 to vector<137x1xf32>
      %138 = arith.divf %136, %137 : vector<137x1xf32>
      %139 = vector.broadcast %138 : vector<137x1xf32> to vector<137x128xf32>
      %140 = arith.subf %132, %139 : vector<137x128xf32>
      %141 = arith.mulf %140, %140 : vector<137x128xf32>
      %cst_61 = arith.constant dense<0.000000e+00> : vector<137xf32>
      %142 = vector.multi_reduction <add>, %141, %cst_61 [1] : vector<137x128xf32> to vector<137xf32>
      %143 = vector.shape_cast %142 : vector<137xf32> to vector<137x1xf32>
      %cst_62 = arith.constant 1.280000e+02 : f32
      %144 = vector.broadcast %cst_62 : f32 to vector<137x1xf32>
      %145 = arith.divf %143, %144 : vector<137x1xf32>
      %cst_63 = arith.constant 9.99999974E-6 : f32
      %146 = vector.broadcast %cst_63 : f32 to vector<137x1xf32>
      %147 = arith.addf %145, %146 : vector<137x1xf32>
      %148 = math.rsqrt %147 : vector<137x1xf32>
      %149 = vector.broadcast %148 : vector<137x1xf32> to vector<137x128xf32>
      %150 = arith.mulf %140, %149 : vector<137x128xf32>
      %151 = vector.broadcast %133 : vector<1x128xf32> to vector<137x128xf32>
      %152 = arith.mulf %150, %151 : vector<137x128xf32>
      %153 = vector.broadcast %134 : vector<1x128xf32> to vector<137x128xf32>
      %154 = arith.addf %152, %153 : vector<137x128xf32>
      %c0_64 = arith.constant 0 : index
      %c0_65 = arith.constant 0 : index
      %155 = vector.load %arg15[%c0_64, %c0_65] : memref<137x128xf32, #tpu.memory_space<vmem>>, vector<137x128xf32>
      tpu.vector_store %arg15[%c0_64, %c0_65], %154 {strides = array<i32>} : memref<137x128xf32, #tpu.memory_space<vmem>>, vector<137x128xf32>,
      %cst_66 = arith.constant 0.000000e+00 : f32
      %156 = vector.broadcast %cst_66 : f32 to vector<137x128xf32>
      %c0_67 = arith.constant 0 : index
      %c0_68 = arith.constant 0 : index
      %157 = vector.load %arg16[%c0_67, %c0_68] : memref<137x128xf32, #tpu.memory_space<vmem>>, vector<137x128xf32>
      tpu.vector_store %arg16[%c0_67, %c0_68], %156 {strides = array<i32>} : memref<137x128xf32, #tpu.memory_space<vmem>>, vector<137x128xf32>,
    } else {
    }
    %c0 = arith.constant 0 : index
    %c0_1 = arith.constant 0 : index
    %3 = vector.load %arg15[%c0, %c0_1] : memref<137x128xf32, #tpu.memory_space<vmem>>, vector<137x128xf32>
    %4 = arith.truncf %3 : vector<137x128xf32> to vector<137x128xbf16>
    %c0_2 = arith.constant 0 : index
    %c0_3 = arith.constant 0 : index
    %5 = vector.load %arg5[%c0_2, %c0_3] : memref<128x512xbf16, #tpu.memory_space<vmem>>, vector<128x512xbf16>
    %cst = arith.constant dense<0.000000e+00> : vector<137x512xf32>
    %6 = tpu.matmul %4, %5, %cst {dimension_numbers = #tpu.dot_dimension_numbers<[1], [0], [0], [1], [0, 0, 1, 1], [], []>} : vector<137x128xbf16>, vector<128x512xbf16>, vector<137x512xf32> -> vector<137x512xf32>
    %7 = arith.index_cast %arg0 : i32 to index
    %c0_4 = arith.constant 0 : index
    %8 = vector.load %arg11[%7, %c0_4] : memref<4x512xf32, #tpu.memory_space<vmem>>, vector<1x512xf32>
    %9 = vector.broadcast %8 : vector<1x512xf32> to vector<137x512xf32>
    %10 = arith.addf %6, %9 : vector<137x512xf32>
    %cst_5 = arith.constant 5.000000e-01 : f32
    %11 = vector.broadcast %cst_5 : f32 to vector<137x512xf32>
    %12 = arith.mulf %11, %10 : vector<137x512xf32>
    %cst_6 = arith.constant 4.471500e-02 : f32
    %13 = vector.broadcast %cst_6 : f32 to vector<137x512xf32>
    %14 = arith.mulf %13, %10 : vector<137x512xf32>
    %15 = arith.mulf %14, %10 : vector<137x512xf32>
    %16 = arith.mulf %15, %10 : vector<137x512xf32>
    %17 = arith.addf %10, %16 : vector<137x512xf32>
    %cst_7 = arith.constant 0.797884583 : f32
    %18 = vector.broadcast %cst_7 : f32 to vector<137x512xf32>
    %19 = arith.mulf %18, %17 : vector<137x512xf32>
    %20 = math.tanh %19 : vector<137x512xf32>
    %cst_8 = arith.constant 1.000000e+00 : f32
    %21 = vector.broadcast %cst_8 : f32 to vector<137x512xf32>
    %22 = arith.addf %21, %20 : vector<137x512xf32>
    %23 = arith.mulf %12, %22 : vector<137x512xf32>
    %c0_9 = arith.constant 0 : index
    %c0_10 = arith.constant 0 : index
    %24 = vector.load %arg16[%c0_9, %c0_10] : memref<137x128xf32, #tpu.memory_space<vmem>>, vector<137x128xf32>
    %25 = arith.truncf %23 : vector<137x512xf32> to vector<137x512xbf16>
    %c0_11 = arith.constant 0 : index
    %c0_12 = arith.constant 0 : index
    %26 = vector.load %arg6[%c0_11, %c0_12] : memref<512x128xbf16, #tpu.memory_space<vmem>>, vector<512x128xbf16>
    %cst_13 = arith.constant dense<0.000000e+00> : vector<137x128xf32>
    %27 = tpu.matmul %25, %26, %cst_13 {dimension_numbers = #tpu.dot_dimension_numbers<[1], [0], [0], [1], [0, 0, 1, 1], [], []>} : vector<137x512xbf16>, vector<512x128xbf16>, vector<137x128xf32> -> vector<137x128xf32>
    %28 = arith.addf %24, %27 : vector<137x128xf32>
    %c0_14 = arith.constant 0 : index
    %c0_15 = arith.constant 0 : index
    %29 = vector.load %arg16[%c0_14, %c0_15] : memref<137x128xf32, #tpu.memory_space<vmem>>, vector<137x128xf32>
    tpu.vector_store %arg16[%c0_14, %c0_15], %28 {strides = array<i32>} : memref<137x128xf32, #tpu.memory_space<vmem>>, vector<137x128xf32>,
    %c3_i32 = arith.constant 3 : i32
    %30 = arith.cmpi eq, %arg0, %c3_i32 : i32
    %31 = arith.extui %30 : i1 to i32
    %c0_i32_16 = arith.constant 0 : i32
    %32 = arith.cmpi ne, %31, %c0_i32_16 : i32
    scf.if %32 {
      %c0_17 = arith.constant 0 : index
      %c0_18 = arith.constant 0 : index
      %33 = vector.load %arg15[%c0_17, %c0_18] : memref<137x128xf32, #tpu.memory_space<vmem>>, vector<137x128xf32>
      %c0_19 = arith.constant 0 : index
      %c0_20 = arith.constant 0 : index
      %34 = vector.load %arg16[%c0_19, %c0_20] : memref<137x128xf32, #tpu.memory_space<vmem>>, vector<137x128xf32>
      %c4 = arith.constant 4 : index
      %c0_21 = arith.constant 0 : index
      %35 = vector.load %arg9[%c4, %c0_21] : memref<8x128xf32, #tpu.memory_space<vmem>>, vector<1x128xf32>
      %36 = vector.broadcast %35 : vector<1x128xf32> to vector<137x128xf32>
      %37 = arith.addf %34, %36 : vector<137x128xf32>
      %38 = arith.addf %33, %37 : vector<137x128xf32>
      %c2 = arith.constant 2 : index
      %c0_22 = arith.constant 0 : index
      %39 = vector.load %arg9[%c2, %c0_22] : memref<8x128xf32, #tpu.memory_space<vmem>>, vector<1x128xf32>
      %c3 = arith.constant 3 : index
      %c0_23 = arith.constant 0 : index
      %40 = vector.load %arg9[%c3, %c0_23] : memref<8x128xf32, #tpu.memory_space<vmem>>, vector<1x128xf32>
      %cst_24 = arith.constant dense<0.000000e+00> : vector<137xf32>
      %41 = vector.multi_reduction <add>, %38, %cst_24 [1] : vector<137x128xf32> to vector<137xf32>
      %42 = vector.shape_cast %41 : vector<137xf32> to vector<137x1xf32>
      %cst_25 = arith.constant 1.280000e+02 : f32
      %43 = vector.broadcast %cst_25 : f32 to vector<137x1xf32>
      %44 = arith.divf %42, %43 : vector<137x1xf32>
      %45 = vector.broadcast %44 : vector<137x1xf32> to vector<137x128xf32>
      %46 = arith.subf %38, %45 : vector<137x128xf32>
      %47 = arith.mulf %46, %46 : vector<137x128xf32>
      %cst_26 = arith.constant dense<0.000000e+00> : vector<137xf32>
      %48 = vector.multi_reduction <add>, %47, %cst_26 [1] : vector<137x128xf32> to vector<137xf32>
      %49 = vector.shape_cast %48 : vector<137xf32> to vector<137x1xf32>
      %cst_27 = arith.constant 1.280000e+02 : f32
      %50 = vector.broadcast %cst_27 : f32 to vector<137x1xf32>
      %51 = arith.divf %49, %50 : vector<137x1xf32>
      %cst_28 = arith.constant 9.99999974E-6 : f32
      %52 = vector.broadcast %cst_28 : f32 to vector<137x1xf32>
      %53 = arith.addf %51, %52 : vector<137x1xf32>
      %54 = math.rsqrt %53 : vector<137x1xf32>
      %55 = vector.broadcast %54 : vector<137x1xf32> to vector<137x128xf32>
      %56 = arith.mulf %46, %55 : vector<137x128xf32>
      %57 = vector.broadcast %39 : vector<1x128xf32> to vector<137x128xf32>
      %58 = arith.mulf %56, %57 : vector<137x128xf32>
      %59 = vector.broadcast %40 : vector<1x128xf32> to vector<137x128xf32>
      %60 = arith.addf %58, %59 : vector<137x128xf32>
      %61 = vector.extract_strided_slice %60 {offsets = [128, 0], sizes = [8, 128], strides = [1, 1]} : vector<137x128xf32> to vector<8x128xf32>
      %c0_29 = arith.constant 0 : index
      %c0_30 = arith.constant 0 : index
      %62 = vector.load %arg2[%c0_29, %c0_30] : memref<8x128xf32, #tpu.memory_space<vmem>>, vector<8x128xf32>
      %63 = arith.addf %61, %62 : vector<8x128xf32>
      %64 = arith.truncf %63 : vector<8x128xf32> to vector<8x128xbf16>
      %c0_31 = arith.constant 0 : index
      %c0_32 = arith.constant 0 : index
      %65 = vector.load %arg7[%c0_31, %c0_32] : memref<128x256xbf16, #tpu.memory_space<vmem>>, vector<128x256xbf16>
      %cst_33 = arith.constant dense<0.000000e+00> : vector<8x256xf32>
      %66 = tpu.matmul %64, %65, %cst_33 {dimension_numbers = #tpu.dot_dimension_numbers<[1], [0], [0], [1], [0, 0, 1, 1], [], []>} : vector<8x128xbf16>, vector<128x256xbf16>, vector<8x256xf32> -> vector<8x256xf32>
      %c2_34 = arith.constant 2 : index
      %c0_35 = arith.constant 0 : index
      %67 = vector.load %arg10[%c2_34, %c0_35] : memref<3x512xf32, #tpu.memory_space<vmem>>, vector<1x256xf32>
      %68 = vector.broadcast %67 : vector<1x256xf32> to vector<8x256xf32>
      %69 = arith.addf %66, %68 : vector<8x256xf32>
      %c0_36 = arith.constant 0 : index
      %c0_37 = arith.constant 0 : index
      %70 = vector.load %arg12[%c0_36, %c0_37] : memref<8x256xf32, #tpu.memory_space<vmem>>, vector<8x256xf32>
      tpu.vector_store %arg12[%c0_36, %c0_37], %69 {strides = array<i32>} : memref<8x256xf32, #tpu.memory_space<vmem>>, vector<8x256xf32>,
      %71 = vector.extract_strided_slice %60 {offsets = [136, 0], sizes = [1, 128], strides = [1, 1]} : vector<137x128xf32> to vector<1x128xf32>
      %72 = arith.truncf %71 : vector<1x128xf32> to vector<1x128xbf16>
      %c0_38 = arith.constant 0 : index
      %c0_39 = arith.constant 0 : index
      %73 = vector.load %arg8[%c0_38, %c0_39] : memref<128x128xbf16, #tpu.memory_space<vmem>>, vector<128x128xbf16>
      %cst_40 = arith.constant dense<0.000000e+00> : vector<1x128xf32>
      %74 = tpu.matmul %72, %73, %cst_40 {dimension_numbers = #tpu.dot_dimension_numbers<[1], [0], [0], [1], [0, 0, 1, 1], [], []>} : vector<1x128xbf16>, vector<128x128xbf16>, vector<1x128xf32> -> vector<1x128xf32>
      %c6 = arith.constant 6 : index
      %c0_41 = arith.constant 0 : index
      %75 = vector.load %arg9[%c6, %c0_41] : memref<8x128xf32, #tpu.memory_space<vmem>>, vector<1x128xf32>
      %76 = arith.addf %74, %75 : vector<1x128xf32>
      %c0_42 = arith.constant 0 : index
      %c0_43 = arith.constant 0 : index
      %77 = vector.load %arg13[%c0_42, %c0_43] : memref<1x128xf32, #tpu.memory_space<vmem>>, vector<1x128xf32>
      tpu.vector_store %arg13[%c0_42, %c0_43], %76 {strides = array<i32>} : memref<1x128xf32, #tpu.memory_space<vmem>>, vector<1x128xf32>,
    } else {
    }
    return
  }
  func.func @transform_0(%arg0: i32) -> (i32, i32) {
    %c0_i32 = arith.constant 0 : i32
    %c0_i32_0 = arith.constant 0 : i32
    %c0_i32_1 = arith.constant 0 : i32
    return %c0_i32, %c0_i32_0 : i32, i32
  }
  func.func @transform_1(%arg0: i32) -> (i32, i32) {
    %c0_i32 = arith.constant 0 : i32
    %c0_i32_0 = arith.constant 0 : i32
    %c0_i32_1 = arith.constant 0 : i32
    return %c0_i32, %c0_i32_0 : i32, i32
  }
  func.func @transform_2(%arg0: i32) -> (i32, i32) {
    %c0_i32 = arith.constant 0 : i32
    %c0_i32_0 = arith.constant 0 : i32
    %c0_i32_1 = arith.constant 0 : i32
    return %c0_i32, %c0_i32_0 : i32, i32
  }
  func.func @transform_3(%arg0: i32) -> (i32, i32) {
    %c0_i32 = arith.constant 0 : i32
    %c0_i32_0 = arith.constant 0 : i32
    %c0_i32_1 = arith.constant 0 : i32
    return %c0_i32, %c0_i32_0 : i32, i32
  }
  func.func @transform_4(%arg0: i32) -> (i32, i32) {
    %c0_i32 = arith.constant 0 : i32
    %c0_i32_0 = arith.constant 0 : i32
    return %c0_i32, %arg0 : i32, i32
  }
  func.func @transform_5(%arg0: i32) -> (i32, i32) {
    %c0_i32 = arith.constant 0 : i32
    %c0_i32_0 = arith.constant 0 : i32
    return %arg0, %c0_i32 : i32, i32
  }
  func.func @transform_6(%arg0: i32) -> (i32, i32) {
    %c0_i32 = arith.constant 0 : i32
    %c0_i32_0 = arith.constant 0 : i32
    %c0_i32_1 = arith.constant 0 : i32
    return %c0_i32, %c0_i32_0 : i32, i32
  }
  func.func @transform_7(%arg0: i32) -> (i32, i32) {
    %c0_i32 = arith.constant 0 : i32
    %c0_i32_0 = arith.constant 0 : i32
    %c0_i32_1 = arith.constant 0 : i32
    return %c0_i32, %c0_i32_0 : i32, i32
  }
  func.func @transform_8(%arg0: i32) -> (i32, i32) {
    %c0_i32 = arith.constant 0 : i32
    %c0_i32_0 = arith.constant 0 : i32
    %c0_i32_1 = arith.constant 0 : i32
    return %c0_i32, %c0_i32_0 : i32, i32
  }
  func.func @transform_9(%arg0: i32) -> (i32, i32) {
    %c0_i32 = arith.constant 0 : i32
    %c0_i32_0 = arith.constant 0 : i32
    %c0_i32_1 = arith.constant 0 : i32
    return %c0_i32, %c0_i32_0 : i32, i32
  }
  func.func @transform_10(%arg0: i32) -> (i32, i32) {
    %c0_i32 = arith.constant 0 : i32
    %c0_i32_0 = arith.constant 0 : i32
    %c0_i32_1 = arith.constant 0 : i32
    return %c0_i32, %c0_i32_0 : i32, i32
  }
  func.func @transform_11(%arg0: i32) -> (i32, i32) {
    %c0_i32 = arith.constant 0 : i32
    %c0_i32_0 = arith.constant 0 : i32
    %c0_i32_1 = arith.constant 0 : i32
    return %c0_i32, %c0_i32_0 : i32, i32
  }
  func.func @transform_12(%arg0: i32) -> (i32, i32) {
    %c0_i32 = arith.constant 0 : i32
    %c0_i32_0 = arith.constant 0 : i32
    %c0_i32_1 = arith.constant 0 : i32
    return %c0_i32, %c0_i32_0 : i32, i32
  }
}

</mosaic_0001>

<bundles_post_ra>
// kernel: dofa_weight_generator.1
= control target key start
LH: loop header
LB: loop body
LE: loop exit
PB: predicated region body
PF: predicated region fallthrough
CT: control target
= control target key end

     0   :  { %s12208_s0 = inlined_call_operand.hbm [shape: f32[128,128], index: 0, kind: input, shape index: {}]   ;;  %s12209_s1 = inlined_call_operand.hbm [shape: f32[8,128], index: 1, kind: input, shape index: {}]   ;;  %s12210_s2 = inlined_call_operand.hbm [shape: bf16[128,256], index: 2, kind: input, shape index: {}]   ;;  %s12211_s3 = inlined_call_operand.hbm [shape: bf16[128,512], index: 3, kind: input, shape index: {}]   ;;  %s12212_s4 = inlined_call_operand.hbm [shape: bf16[128,2048], index: 4, kind: input, shape index: {}]   ;;  %s12213_s5 = inlined_call_operand.hbm [shape: bf16[2048,128], index: 5, kind: input, shape index: {}]   ;;  %s12214_s6 = inlined_call_operand.hbm [shape: bf16[128,256], index: 6, kind: input, shape index: {}]   ;;  %s12215_s7 = inlined_call_operand.hbm [shape: bf16[128,128], index: 7, kind: input, shape index: {}]   ;;  %s12216_s8 = inlined_call_operand.vmem [shape: f32[8,128], index: 8, kind: input, shape index: {}]   ;;  %s12217_s9 = inlined_call_operand.hbm [shape: f32[3,512], index: 9, kind: input, shape index: {}]   ;;  %s12218_s10 = inlined_call_operand.hbm [shape: f32[4,512], index: 10, kind: input, shape index: {}]   ;;  %s12219_s11 = inlined_call_operand.hbm [shape: f32[8,256], index: 11, kind: output, shape index: {0}]   ;;  %s12220_s12 = inlined_call_operand.hbm [shape: f32[1,128], index: 12, kind: output, shape index: {1}]  }
   0x1   :  { %12416 = sst [smem:[#allocation188_spill]] %s12208_s0 }
   0x2   :  { %12417 = sst [smem:[#allocation189_spill]] %s12209_s1 }
   0x3   :  { %12418 = sst [smem:[#allocation190_spill]] %s12210_s2 }
   0x4   :  { %12419 = sst [smem:[#allocation191_spill]] %s12211_s3 }
   0x5   :  { %12420 = sst [smem:[#allocation192_spill]] %s12212_s4 }
   0x6   :  { %12421 = sst [smem:[#allocation193_spill]] %s12217_s9 }
   0x7   :  { %18 = vsyncpa [#allocation6], 0 }
   0x8   :  { %19 = vsyncpa [#allocation9], 0 }
   0x9   :  { %20 = vsyncpa [#allocation12], 0 }
   0xa   :  { %21 = vsyncpa [#allocation18], 0 }
   0xb   :  { %22 = vsyncpa [#allocation7], 0 }
   0xc   :  { %23 = vsyncpa [#allocation22], 0  ;;  %s8409_s21 = smov 0   ;;  %s8411_s22 = smov 0  }
   0xd   :  { %s8413_s23 = smov 0   ;;  %s8415_s24 = smov 0  }
   0xe LB: > { %s8315_s25 = smov [#allocation5]   ;;  %s8430_s27 = sadd.s32 4294967295, %s8313_s24   ;;  %s8313_s24 = sphi %s8415_s24, %s12938_s24   ;;  %s8309_s23 = sphi %s8413_s23, %s12937_s23   ;;  %s8305_s22 = sphi %s8411_s22, %s12936_s22   ;;  %s8301_s21 = sphi %s8409_s21, %s12935_s21  }
   0xf   : > { %s329_s26 = sshll.u32 %s8315_s25, 4  ;;  %p6521_p0 = scmp.ge.s32.totalorder %s8313_s24, 1  ;;  %s330_s26 = int_to_ptr.vmem [resolvable:$true] %s329_s26 }
  0x10   : > { %p12225_p1 = scmp.eq.s32.totalorder %s8430_s27, 0  ;;  %p317_p2 = scmp.lt.s32.totalorder %s8313_s24, 5 }
  0x11   : > { %s8316_s29 = smov [#allocation8]   ;;  %s8317_s14 = smov [#allocation10]  }
  0x12   : > { %p8436_p4 = pnand %p6521_p0, %p317_p2  ;;  %s343_s30 = sshll.u32 %s8316_s29, 4  ;;  %s344_s30 = int_to_ptr.vmem [resolvable:$true] %s343_s30 }
  0x13   : > { %s353_s15 = sshll.u32 %s8317_s14, 4  ;;  %s7946_s17 = scalar_lea.vmem %s330_s26, 2048  ;;  %s8448_s15 = int_to_ptr.vmem [resolvable:$true] %s353_s15 }
  0x14   : > { %s12422_s28 = scalar_select %p8436_p4, 1, 0 }
  0x15   : > { %p7004_p5 = pneg %p8436_p4  ;;  %p7947_p8 = scmp.ne.s32.totalorder %s330_s26, %s7946_s17 }
  0x16   : > { %p7954_p11 = scmp.lt.s32.totalorder %s330_s26, %s330_s26  ;;  %p7955_p12 = scmp.lt.s32.totalorder %s7946_s17, %s7946_s17 }
  0x17   : > { %p8444_p6 = pnand %p7004_p5, %p12225_p1 }
  0x18   : > { %p7956_p13 = por %p7955_p12, %p7954_p11 }
  0x19   : > { %s12423_s13 = scalar_select %p8444_p6, 1, 0 }
  0x1a   : > { %p8452_p7 = pneg %p8444_p6 }
  0x1c   : > { %p7949_p9 = pnand %p7947_p8, %p8452_p7 }
  0x1e   : > { %p7950_p10 = pneg %p7949_p9 }
  0x20   : > { %p7957_p0 = pnand %p7956_p13, %p7950_p10 }
  0x22   : > { %7960 = shalt.err (!%p7957_p0)
}
  0x23   : > { %s12221_s18 = smov 128   ;;  %s12222_s19 = smov 8  }
  0x24   : > { %s12425_s0 = sld [smem:[#allocation188_spill]]  ;;  %s7972_s29 = scalar_lea.vmem %s344_s30, 128 }
  0x25   : > { %p7973_p2 = scmp.ne.s32.totalorder %s344_s30, %s7972_s29  ;;  %p7980_p9 = scmp.lt.s32.totalorder %s344_s30, %s344_s30 }
  0x26   : > { %p7981_p10 = scmp.lt.s32.totalorder %s7972_s29, %s7972_s29 }
  0x27   : > { %p7975_p5 = pnand %p7973_p2, %p8452_p7 }
  0x28   : > { %p7982_p11 = por %p7981_p10, %p7980_p9 }
  0x29   : > { %p7976_p8 = pneg %p7975_p5 }
  0x2a   : > { %7007 = dma.hbm_to_vmem [thread:$0]  (!%p8444_p6), %s12425_s0, 2048, %s330_s26, [#allocation6], %s12221_s18, %s12221_s18, %s12222_s19  }
  0x2b   : > { %p7983_p12 = pnand %p7982_p11, %p7976_p8 }
  0x2d   : > { %7986 = shalt.err (!%p7983_p12)
}
  0x2e   : > { %s12426_s1 = sld [smem:[#allocation189_spill]]  ;;  %s7998_s26 = scalar_lea.vmem %s8448_s15, 2048 }
  0x2f   : > { %p7999_p13 = scmp.ne.s32.totalorder %s8448_s15, %s7998_s26  ;;  %p8006_p5 = scmp.lt.s32.totalorder %s8448_s15, %s8448_s15 }
  0x30   : > { %p8007_p9 = scmp.lt.s32.totalorder %s7998_s26, %s7998_s26 }
  0x31   : > { %p8001_p0 = pnand %p7999_p13, %p8452_p7 }
  0x32   : > { %p8008_p8 = por %p8007_p9, %p8006_p5 }
  0x33   : > { %p8002_p2 = pneg %p8001_p0 }
  0x34   : > { %7010 = dma.hbm_to_vmem [thread:$0]  (!%p8444_p6), %s12426_s1, 128, %s344_s30, [#allocation9]  }
  0x35   : > { %p8009_p10 = pnand %p8008_p8, %p8002_p2 }
  0x37   : > { %8012 = shalt.err (!%p8009_p10)
}
  0x38   : > { %s12427_s2 = sld [smem:[#allocation190_spill]]  ;;  %s8320_s30 = smov [#allocation11]  }
  0x39   : > { %s366_s29 = sshll.u32 %s8320_s30, 4  ;;  %s367_s29 = int_to_ptr.vmem [resolvable:$true] %s366_s29 }
  0x3a   : > { %s8024_s14 = scalar_lea.vmem %s367_s29, 4096  ;;  %p8032_p0 = scmp.lt.s32.totalorder %s367_s29, %s367_s29 }
  0x3b   : > { %p8025_p11 = scmp.ne.s32.totalorder %s367_s29, %s8024_s14  ;;  %p8033_p2 = scmp.lt.s32.totalorder %s8024_s14, %s8024_s14 }
  0x3d   : > { %p8027_p12 = pnand %p8025_p11, %p8452_p7  ;;  %p8034_p5 = por %p8033_p2, %p8032_p0 }
  0x3e   : > { %7013 = dma.hbm_to_vmem [thread:$0]  (!%p8444_p6), %s12427_s2, 2048, %s8448_s15, [#allocation9], %s12221_s18, %s12221_s18, %s12222_s19  }
  0x3f   : > { %p8028_p13 = pneg %p8027_p12 }
  0x41   : > { %p8035_p9 = pnand %p8034_p5, %p8028_p13 }
  0x43   : > { %8038 = shalt.err (!%p8035_p9)
}
  0x44   : > { %s12223_s17 = smov 256   ;;  %s12224_s26 = smov 16  }
  0x45   : > { %s12428_s3 = sld [smem:[#allocation191_spill]]  ;;  %s8323_s25 = smov [#allocation17]  }
  0x46   : > { %s409_s30 = sshll.u32 %s8323_s25, 4  ;;  %s410_s30 = int_to_ptr.vmem [resolvable:$true] %s409_s30 }
  0x47   : > { %s8050_s18 = scalar_lea.vmem %s410_s30, 256  ;;  %p8058_p12 = scmp.lt.s32.totalorder %s410_s30, %s410_s30 }
  0x48   : > { %p8051_p8 = scmp.ne.s32.totalorder %s410_s30, %s8050_s18  ;;  %p8059_p13 = scmp.lt.s32.totalorder %s8050_s18, %s8050_s18 }
  0x4a   : > { %p8053_p10 = pnand %p8051_p8, %p8452_p7  ;;  %p8060_p0 = por %p8059_p13, %p8058_p12 }
  0x4b   : > { %7016 = dma.hbm_to_vmem [thread:$0]  (!%p8444_p6), %s12428_s3, 4096, %s367_s29, [#allocation12], %s12223_s17, %s12223_s17, %s12224_s26  }
  0x4c   : > { %p8054_p11 = pneg %p8053_p10 }
  0x4e   : > { %p8061_p2 = pnand %p8060_p0, %p8054_p11 }
  0x50   : > { %8064 = shalt.err (!%p8061_p2)
}
  0x51   : > { %s12429_s9 = sld [smem:[#allocation193_spill]]  ;;  %s8506_s18 = sadd.s32 1, %s8313_s24  }
  0x52   : > { %s117_s29 = ssub.s32 %s8313_s24, %s8506_s18  ;;  %s120_s19 = sadd.s32 1, %s8309_s23 }
  0x53   : > { %p118_p5 = scmp.eq.s32.totalorder %s117_s29, 0  ;;  %p127_p9 = scmp.ne.s32.totalorder %s8309_s23, %s8305_s22 }
  0x54   : > { %p128_p8 = scmp.eq.s32.totalorder %s8313_s24, 0  ;;  %p133_p10 = scmp.ne.s32.totalorder %s8305_s22, %s8301_s21 }
  0x55   : > { %s8517_s15 = scalar_select %p118_p5, %s8309_s23, %s120_s19  }
  0x56   : > { %p129_p11 = por %p128_p8, %p127_p9  ;;  %p8521_p12 = por %p12225_p1, %p133_p10 }
  0x57   : > { %7025 = dma.hbm_to_vmem [thread:$0]  (!%p8444_p6), %s12429_s9, 256, %s410_s30, [#allocation18]  }
  0x58   : > { %12430 = sst [smem:[#allocation32_spill]] %s8517_s15  ;;  %p7044_p13 = scmp.lt.s32.totalorder %s8313_s24, 4 }
  0x59   : > { %s12431_s20 = scalar_select %p8521_p12, 1, 0 }
  0x5a   : > { %s431_s25 = sand.u32 1, %s8313_s24   ;;  %s433_s30 = sand.u32 1, %s8309_s23  }
  0x5b   : > { %s8528_s14 = sshll.u32 %s433_s30, 8  ;;  %s6772_s17 = sshll.u32 %s8313_s24, 8 }
  0x5c   : > { %s12432_s4 = sld [smem:[#allocation192_spill]]  ;;  %s435_s21 = scalar_lea.vmem [#allocation13], %s8528_s14 }
  0x5d   : > { %s442_s19 = sshll.u32 %s435_s21, 4  ;;  %p8537_p0 = pnand %p7044_p13, %p129_p11  ;;  %s8541_s19 = int_to_ptr.vmem [resolvable:$true] %s442_s19 }
  0x5e   : > { %s8543_s30 = scalar_lea.sflag [#allocation6], %s431_s25 }
  0x5f   : > { %p8067_p5 = pneg %p8537_p0 }
  0x62   : > { %s8534_s0 = scalar_lea.hbm %s12432_s4, %s6772_s17  ;;  %s8070_s29 = scalar_lea.hbm %s12432_s4, 16384 }
  0x63   : > { %s8065_s2 = scalar_lea.hbm %s8534_s0, 4096  ;;  %p8071_p10 = scmp.lt.s32.totalorder %s8534_s0, %s12432_s4 }
  0x64   : > { %p8066_p2 = scmp.ne.s32.totalorder %s8534_s0, %s8065_s2  ;;  %p8072_p11 = scmp.lt.s32.totalorder %s8070_s29, %s8065_s2 }
  0x66   : > { %p8068_p9 = pnand %p8067_p5, %p8066_p2  ;;  %p8073_p13 = por %p8072_p11, %p8071_p10 }
  0x68   : > { %p8069_p8 = pneg %p8068_p9 }
  0x6a   : > { %p8074_p3 = pnand %p8073_p13, %p8069_p8 }
  0x6c   : > { %8077 = shalt.err (!%p8074_p3)
}
  0x6d   : > { %s8078_s25 = scalar_lea.vmem %s8541_s19, 4096  ;;  %s8324_s17 = smov [#allocation13]  }
  0x6e   : > { %p8079_p1 = scmp.ne.s32.totalorder %s8541_s19, %s8078_s25  ;;  %s8083_s26 = sshll.u32 %s8324_s17, 4  ;;  %s8084_s26 = int_to_ptr.vmem [resolvable:$false] %s8083_s26 }
  0x6f   : > { %s8085_s9 = scalar_lea.vmem %s8084_s26, 8192  ;;  %p8086_p12 = scmp.lt.s32.totalorder %s8541_s19, %s8084_s26 }
  0x70   : > { %p8081_p2 = pnand %p8079_p1, %p8067_p5  ;;  %p8087_p4 = scmp.lt.s32.totalorder %s8085_s9, %s8078_s25 }
  0x72   : > { %p8082_p9 = pneg %p8081_p2  ;;  %p8088_p6 = por %p8087_p4, %p8086_p12 }
  0x74   : > { %p8089_p10 = pnand %p8088_p6, %p8082_p9 }
  0x76   : > { %8092 = shalt.err (!%p8089_p10)
}
  0x77   : > { %s8325_s2 = smov 1024   ;;  %s12434_s3 = smov 16  }
  0x78   : > { %s12435_s29 = smov 256   ;;  %s8326_s21 = smov [#allocation15]  }
  0x79   : > { %7032 = dma.hbm_to_vmem [thread:$0]  (!%p8537_p0), %s8534_s0, 4096, %s8541_s19, %s8543_s30, %s8325_s2, %s12435_s29, %s12434_s3  }
  0x7a   : > { %s379_s4 = sshll.u32 %s8326_s21, 4  ;;  %s8327_s17 = smov [#allocation16]   ;;  %s380_s4 = int_to_ptr.vmem [resolvable:$true] %s379_s4 }
  0x7b   : > { %s392_s15 = sshll.u32 %s8327_s17, 4  ;;  %s8104_s26 = scalar_lea.vmem %s380_s4, 2048  ;;  %s393_s15 = int_to_ptr.vmem [resolvable:$true] %s392_s15 }
  0x7c   : > { %p8105_p1 = scmp.ne.s32.totalorder %s380_s4, %s8104_s26  ;;  %p8112_p6 = scmp.lt.s32.totalorder %s380_s4, %s380_s4 }
  0x7d   : > { %p8113_p12 = scmp.lt.s32.totalorder %s8104_s26, %s8104_s26 }
  0x7e   : > { %p8107_p3 = pnand %p8105_p1, %p8452_p7 }
  0x7f   : > { %p8114_p8 = por %p8113_p12, %p8112_p6 }
  0x80   : > { %p8108_p4 = pneg %p8107_p3 }
  0x82   : > { %p8115_p11 = pnand %p8114_p8, %p8108_p4 }
  0x84   : > { %8118 = shalt.err (!%p8115_p11)
}
  0x85   : > { %p12436_p13 = scmp.ne.s32.totalorder %s12423_s13, 0  ;;  %s12437_s9 = smov 8  }
  0x86   : > { %s12438_s25 = smov 128   ;;  %s8130_s2 = scalar_lea.vmem %s393_s15, 1024 }
  0x87   : > { %7019 = dma.hbm_to_vmem [thread:$0]  (!%p12436_p13), %s12214_s6, 2048, %s380_s4, [#allocation9], %s12438_s25, %s12438_s25, %s12437_s9  }
  0x88   : > { %p8131_p2 = scmp.ne.s32.totalorder %s393_s15, %s8130_s2  ;;  %p8138_p1 = scmp.lt.s32.totalorder %s393_s15, %s393_s15 }
  0x89   : > { %p8139_p3 = scmp.lt.s32.totalorder %s8130_s2, %s8130_s2 }
  0x8a   : > { %p8133_p9 = pnand %p8131_p2, %p8452_p7 }
  0x8b   : > { %p8140_p4 = por %p8139_p3, %p8138_p1 }
  0x8c   : > { %p8134_p10 = pneg %p8133_p9 }
  0x8e   : > { %p8141_p6 = pnand %p8140_p4, %p8134_p10 }
  0x90   : > { %8144 = shalt.err (!%p8141_p6)
}
  0x91   : > { %s8328_s3 = smov 64   ;;  %s8329_s29 = smov 4  }
  0x92   : > { %7022 = dma.hbm_to_vmem [thread:$0]  (!%p12436_p13), %s12215_s7, 1024, %s393_s15, [#allocation12], %s8328_s3, %s8328_s3, %s8329_s29  }
  0x93   : > { %s8330_s17 = smov [#allocation19]   ;;  %s6773_s9 = sshll.u32 %s8313_s24, 12 }
  0x94   : > { %s420_s26 = sshll.u32 %s8330_s17, 4  ;;  %s421_s26 = int_to_ptr.vmem [resolvable:$true] %s420_s26 }
  0x95   : > { %s8156_s25 = scalar_lea.vmem %s421_s26, 256  ;;  %p8164_p2 = scmp.lt.s32.totalorder %s421_s26, %s421_s26 }
  0x96   : > { %p8157_p12 = scmp.ne.s32.totalorder %s421_s26, %s8156_s25  ;;  %p8165_p9 = scmp.lt.s32.totalorder %s8156_s25, %s8156_s25 }
  0x98   : > { %p8159_p8 = pnand %p8157_p12, %p8452_p7  ;;  %p8166_p10 = por %p8165_p9, %p8164_p2 }
  0x9a   : > { %p8160_p11 = pneg %p8159_p8 }
  0x9c   : > { %p8167_p1 = pnand %p8166_p10, %p8160_p11 }
  0x9e   : > { %8170 = shalt.err (!%p8167_p1)
}
  0x9f   : > { %7028 = dma.hbm_to_vmem [thread:$0]  (!%p12436_p13), %s12218_s10, 256, %s421_s26, [#allocation18]  }
  0xa0   : > { %s8603_s2 = scalar_lea.hbm %s12213_s5, %s6773_s9  ;;  %s456_s16 = scalar_lea.vmem [#allocation14], %s8528_s14 }
  0xa1   : > { %s463_s4 = sshll.u32 %s456_s16, 4  ;;  %s8171_s21 = scalar_lea.hbm %s8603_s2, 4096  ;;  %s464_s4 = int_to_ptr.vmem [resolvable:$true] %s463_s4 }
  0xa2   : > { %p8172_p7 = scmp.ne.s32.totalorder %s8603_s2, %s8171_s21  ;;  %s8176_s26 = scalar_lea.hbm %s12213_s5, 16384 }
  0xa3   : > { %p8177_p13 = scmp.lt.s32.totalorder %s8603_s2, %s12213_s5  ;;  %p8178_p6 = scmp.lt.s32.totalorder %s8176_s26, %s8171_s21 }
  0xa4   : > { %p8174_p3 = pnand %p8172_p7, %p8067_p5 }
  0xa5   : > { %p8179_p12 = por %p8178_p6, %p8177_p13 }
  0xa6   : > { %p8175_p4 = pneg %p8174_p3 }
  0xa8   : > { %p8180_p8 = pnand %p8179_p12, %p8175_p4 }
  0xaa   : > { %8183 = shalt.err (!%p8180_p8)
}
  0xab   : > { %s8184_s14 = scalar_lea.vmem %s464_s4, 4096  ;;  %s8331_s9 = smov [#allocation14]  }
  0xac   : > { %p8185_p11 = scmp.ne.s32.totalorder %s464_s4, %s8184_s14  ;;  %s8189_s19 = sshll.u32 %s8331_s9, 4  ;;  %s8190_s19 = int_to_ptr.vmem [resolvable:$false] %s8189_s19 }
  0xad   : > { %s8191_s15 = scalar_lea.vmem %s8190_s19, 8192  ;;  %p8192_p10 = scmp.lt.s32.totalorder %s464_s4, %s8190_s19 }
  0xae   : > { %p8187_p2 = pnand %p8185_p11, %p8067_p5  ;;  %p8193_p1 = scmp.lt.s32.totalorder %s8191_s15, %s8184_s14 }
  0xb0   : > { %p8188_p9 = pneg %p8187_p2  ;;  %p8194_p7 = por %p8193_p1, %p8192_p10 }
  0xb2   : > { %p8195_p3 = pnand %p8194_p7, %p8188_p9 }
  0xb4   : > { %8198 = shalt.err (!%p8195_p3)
}
  0xb5   : > { %7035 = dma.hbm_to_vmem [thread:$0]  (!%p8537_p0), %s8603_s2, 4096, %s464_s4, %s8543_s30, %s8328_s3, %s8328_s3, %s8329_s29  }
  0xb6   : > { %p12439_p5 = scmp.ne.s32.totalorder %s12422_s28, 0 }
  0xb8   : > { %475 = sbr.rel (%p12439_p5) target bundleno = 3710 (0xe7e), region = 64 }
  0xbd   : > { %p12440_p4 = scmp.eq.s32.totalorder %s8430_s27, 0 }
  0xbf   : > { %8264 = dma.done.wait (%p12440_p4), [#allocation6], 2048   ;;  %p12441_p13 = pmov %p12440_p4 }
  0xc0   : > { %p12442_p6 = pmov %p12440_p4 }
  0xc1   : > { %8266 = vsyncadd (%p12441_p13), [#allocation6], 4294965248 }
  0xc2   : > { %8268 = dma.done.wait (%p12442_p6), [#allocation9], 2176   ;;  %p12443_p12 = pmov %p12440_p4 }
  0xc3   : > { %p12444_p8 = pmov %p12440_p4 }
  0xc4   : > { %8270 = vsyncadd (%p12443_p12), [#allocation9], 4294965120 }
  0xc5   : > { %8272 = dma.done.wait (%p12444_p8), [#allocation12], 4096   ;;  %p12445_p0 = pmov %p12440_p4 }
  0xc6   : > { %s493_s1 = sand.u32 1, %s8430_s27   ;;  %s495_s28 = sand.u32 1, %s8305_s22  }
  0xc7   : > { %8274 = vsyncadd (%p12445_p0), [#allocation12], 4294963200  ;;  %s6542_s30 = sshll.u32 %s495_s28, 8  ;;  %s494_s3 = scalar_lea.sflag [#allocation6], %s493_s1 }
  0xc8   : > { %s8644_s29 = scalar_lea.vmem [#allocation13], %s6542_s30  ;;  %p12446_p11 = scmp.ne.s32.totalorder %s12431_s20, 0 }
  0xca   : > { %8276 = dma.done.wait (%p12446_p11), %s494_s3, 8192  }
  0xcb   : > { %8278 = vsyncadd (%p12446_p11), %s494_s3, 4294959104  ;;  %s8650_s24 = scalar_lea.vmem [#allocation14], %s6542_s30  ;;  %p12447_p2 = pmov %p12445_p0 }
  0xcc   : > { %p12448_p9 = pmov %p12445_p0 }
  0xcd   : > { %8280 = dma.done.wait (%p12447_p2), [#allocation9], 2048  }
  0xce   : > { %8282 = vsyncadd (%p12448_p9), [#allocation9], 4294965248  ;;  %p12449_p10 = pmov %p12445_p0 }
  0xcf   : > { %p12450_p1 = pmov %p12445_p0 }
  0xd0   : > { %8284 = dma.done.wait (%p12449_p10), [#allocation12], 1024  }
  0xd1   : > { %8286 = vsyncadd (%p12450_p1), [#allocation12], 4294966272  ;;  %p12451_p7 = pmov %p12445_p0 }
  0xd2   : > { %p12452_p3 = pmov %p12445_p0 }
  0xd3   : > { %8288 = dma.done.wait (%p12451_p7), [#allocation18], 512  }
  0xd4   : > { %8290 = vsyncadd (%p12452_p3), [#allocation18], 4294966784  ;;  %p12453_p5 = scmp.ne.s32.totalorder %s8430_s27, 0 }
  0xd6   : > { %569 = sbr.rel (%p12453_p5) target bundleno = 2528 (0x9e0), region = 108 }
  0xdb   : > { %v7116_v0 = vld [vmem:[#allocation10 + $0x74] ss:$8 sps:$4 sm:$0xff]   ;;  %v7118_v1 = vld [vmem:[#allocation10 + $0x70] ss:$8 sps:$4 sm:$0xff]   ;;  %v12230_v2 = vmov 0   ;;  %v8333_v3 = vmov 0.0   ;;  %v652_v62 = vlaneseq }
  0xdc   : > { %774 = vmatprep.mubr.bf16.mxu0 %v12230_v2  ;;  %814 = vmatprep.mubr.bf16.mxu1 %v12230_v2  ;;  %4307 = vst [vmem:[#allocation4 + $0x80] sm:$0xff] %v8333_v3  ;;  %4308 = vst [vmem:[#allocation4 + $0x68] sm:$0xff] %v8333_v3  ;;  %v7119_v4 = vld [vmem:[#allocation10 + $0x64] ss:$8 sps:$4 sm:$0xff]   ;;  %v7121_v5 = vld [vmem:[#allocation10 + $0x60] ss:$8 sps:$4 sm:$0xff]  }
  0xdd   : > { %4309 = vst [vmem:[#allocation4 + $0x38] sm:$0xff] %v8333_v3  ;;  %4310 = vst [vmem:[#allocation4] sm:$0xff] %v8333_v3  ;;  %742 = vmatprep.subr.bf16.mxu0 %v7116_v0  ;;  %6944 = vmatprep.subr.bf16.mxu1 %v7116_v0  ;;  %v7122_v6 = vld [vmem:[#allocation10 + $0x54] ss:$8 sps:$4 sm:$0xff]   ;;  %v7124_v7 = vld [vmem:[#allocation10 + $0x50] ss:$8 sps:$4 sm:$0xff]  }
  0xde   : > { %4311 = vst [vmem:[#allocation4 + $0x48] sm:$0xff] %v8333_v3  ;;  %4312 = vst [vmem:[#allocation4 + $0x10] sm:$0xff] %v8333_v3  ;;  %743 = vmatpush1.bf16.msra.mxu0 %v7118_v1  ;;  %6952 = vmatpush1.bf16.msra.mxu1 %v7118_v1  ;;  %v7125_v8 = vld [vmem:[#allocation10 + $0x44] ss:$8 sps:$4 sm:$0xff]   ;;  %v7127_v9 = vld [vmem:[#allocation10 + $0x40] ss:$8 sps:$4 sm:$0xff]  }
  0xdf   : > { %4313 = vst [vmem:[#allocation4 + $0x88] sm:$0xff] %v8333_v3  ;;  %4314 = vst [vmem:[#allocation4 + $0x28] sm:$0xff] %v8333_v3  ;;  %744 = vmatprep.subr.bf16.mxu0 %v7119_v4  ;;  %6945 = vmatprep.subr.bf16.mxu1 %v7119_v4  ;;  %v7128_v10 = vld [vmem:[#allocation10 + $0x34] ss:$8 sps:$4 sm:$0xff]   ;;  %v571_v12 = vld [vmem:[#allocation5 + $0x8] sm:$0xff]  ;;  %v8777_v63 = vshrl.u32 %v652_v62, 7 }
  0xe0   : > { %4315 = vst [vmem:[#allocation4 + $0x58] sm:$0xff] %v8333_v3  ;;  %4316 = vst [vmem:[#allocation4 + $0x78] sm:$0xff] %v8333_v3  ;;  %v8668_v11 = vld [vmem:[#allocation5] sm:$0xff]  ;;  %v579_v14 = vld [vmem:[#allocation5 + $0x48] sm:$0xff]  ;;  %s8334_s16 = smov 96   ;;  %vm1450_vm0 = vcmask 261120  }
  0xe1   : > { %4317 = vst [vmem:[#allocation4 + $0x30] sm:$0xff] %v8333_v3  ;;  %4318 = vst [vmem:[#allocation4 + $0x18] sm:$0xff] %v8333_v3  ;;  %v578_v13 = vld [vmem:[#allocation5 + $0x40] sm:$0xff]  ;;  %v8671_v15 = vld [vmem:[#allocation5 + $0x10] sm:$0xff]  ;;  %v8711_v37 = vpack.c.bf16 %v571_v12, %v8668_v11  ;;  %v654_v0 = vsub.s32 0, %v8777_v63  ;;  %v658_v1 = vsub.s32 1, %v8777_v63 }
  0xe2   : > { %4319 = vst [vmem:[#allocation4 + $0x50] sm:$0xff] %v8333_v3  ;;  %4320 = vst [vmem:[#allocation4 + $0x70] sm:$0xff] %v8333_v3  ;;  %745 = vmatpush1.bf16.msra.mxu0 %v7121_v5  ;;  %6953 = vmatpush1.bf16.msra.mxu1 %v7121_v5  ;;  %v8673_v16 = vld [vmem:[#allocation5 + $0x18] sm:$0xff]  ;;  %v8675_v17 = vld [vmem:[#allocation5 + $0x50] sm:$0xff]  ;;  %v8713_v38 = vpack.c.bf16 %v579_v14, %v578_v13  ;;  %vm2460_vm1 = vcmask 1043456   ;;  %vm2461_vm2 = vcmask 1044480  }
  0xe3   : > { %4321 = vst [vmem:[#allocation4 + $0x20] sm:$0xff] %v8333_v3  ;;  %4322 = vst [vmem:[#allocation4 + $0x40] sm:$0xff] %v8333_v3  ;;  %746 = vmatprep.subr.bf16.mxu0 %v7122_v6  ;;  %6946 = vmatprep.subr.bf16.mxu1 %v7122_v6  ;;  %v7130_v18 = vld [vmem:[#allocation10 + $0x30] ss:$8 sps:$4 sm:$0xff]   ;;  %v8682_v21 = vld [vmem:[#allocation5 + $0x28] sm:$0xff]  ;;  %v8721_v43 = vpack.c.bf16 %v8673_v16, %v8671_v15  ;;  %vm1601_vm3 = vcmask 72704  }
  0xe4   : > { %4323 = vst [vmem:[#allocation4 + $0x60] sm:$0xff] %v8333_v3  ;;  %4324 = vst [vmem:[#allocation4 + $0x8] sm:$0x1] %v8333_v3  ;;  %v581_v19 = vld [vmem:[#allocation5 + $0x58] sm:$0xff]  ;;  %v8680_v20 = vld [vmem:[#allocation5 + $0x20] sm:$0xff]  ;;  %vm1670_vm4 = vcmask 1040384  }
  0xe5   : > { %586 = vst [vmem:[#allocation2] sm:$0xff] %v8668_v11  ;;  %587 = vst [vmem:[#allocation2 + $0x38] sm:$0xff] %v571_v12  ;;  %v7131_v22 = vld [vmem:[#allocation10 + $0x24] ss:$8 sps:$4 sm:$0xff]   ;;  %v8686_v23 = vld [vmem:[#allocation5 + $0x60] sm:$0xff]  ;;  %v8724_v44 = vpack.c.bf16 %v581_v19, %v8675_v17  ;;  %v8732_v49 = vpack.c.bf16 %v8682_v21, %v8680_v20  ;;  %vm1672_vm5 = vcmask 65536  }
  0xe6   : > { %747 = vmatpush1.bf16.msra.mxu0 %v7124_v7  ;;  %6954 = vmatpush1.bf16.msra.mxu1 %v7124_v7  ;;  %594 = vst [vmem:[#allocation2 + $0x88] sm:$0xff] %v578_v13  ;;  %595 = vst [vmem:[#allocation2 + $0x40] sm:$0xff] %v579_v14  ;;  %v8688_v24 = vld [vmem:[#allocation5 + $0x68] sm:$0xff]  ;;  %v8690_v25 = vld [vmem:[#allocation5 + $0x30] sm:$0xff]  ;;  %s8336_s4 = smov 64   ;;  %s8337_s21 = smov 32  }
  0xe7   : > { %748 = vmatprep.subr.bf16.mxu0 %v7125_v8  ;;  %6947 = vmatprep.subr.bf16.mxu1 %v7125_v8  ;;  %588 = vst [vmem:[#allocation2 + $0x78] sm:$0xff] %v8671_v15  ;;  %589 = vst [vmem:[#allocation2 + $0x58] sm:$0xff] %v8673_v16  ;;  %v8694_v26 = vld [vmem:[#allocation5 + $0x38] sm:$0xff]  ;;  %v8697_v27 = vld [vmem:[#allocation5 + $0x70] sm:$0xff]  ;;  %v8736_v50 = vpack.c.bf16 %v8688_v24, %v8686_v23 }
  0xe8   : > { %596 = vst [vmem:[#allocation2 + $0x50] sm:$0xff] %v8675_v17  ;;  %597 = vst [vmem:[#allocation2 + $0x28] sm:$0xff] %v581_v19  ;;  %v8699_v28 = vld [vmem:[#allocation5 + $0x78] sm:$0xff]  ;;  %v8704_v29 = vld [vmem:[#allocation8] sm:$0xff]  ;;  %v8744_v55 = vpack.c.bf16 %v8694_v26, %v8690_v25 }
  0xe9   : > { %590 = vst [vmem:[#allocation2 + $0x20] sm:$0xff] %v8680_v20  ;;  %591 = vst [vmem:[#allocation2 + $0x8] sm:$0xff] %v8682_v21  ;;  %v604_v30 = vld [vmem:[%s12216_s8 + $0x7] sm:$0x1]  ;;  %v7133_v31 = vld [vmem:[#allocation10 + $0x20] ss:$8 sps:$4 sm:$0xff]   ;;  %v8748_v56 = vpack.c.bf16 %v8699_v28, %v8697_v27 }
  0xea   : > { %749 = vmatpush1.bf16.msra.mxu0 %v7127_v9  ;;  %6955 = vmatpush1.bf16.msra.mxu1 %v7127_v9  ;;  %598 = vst [vmem:[#allocation2 + $0x10] sm:$0xff] %v8686_v23  ;;  %599 = vst [vmem:[#allocation2 + $0x48] sm:$0xff] %v8688_v24  ;;  %v7134_v32 = vld [vmem:[#allocation10 + $0x14] ss:$8 sps:$4 sm:$0xff]   ;;  %v7136_v33 = vld [vmem:[#allocation10 + $0x10] ss:$8 sps:$4 sm:$0xff]  }
  0xeb   : > { %592 = vst [vmem:[#allocation2 + $0x70] sm:$0xff] %v8690_v25  ;;  %750 = vmatprep.subr.bf16.mxu0 %v7128_v10  ;;  %6948 = vmatprep.subr.bf16.mxu1 %v7128_v10  ;;  %593 = vst [vmem:[#allocation2 + $0x80] sm:$0xff] %v8694_v26  ;;  %v7137_v34 = vld [vmem:[#allocation10 + $0x4] ss:$8 sps:$4 sm:$0xff]   ;;  %v7139_v35 = vld [vmem:[#allocation10] ss:$8 sps:$4 sm:$0xff]  }
  0xec   : > { %600 = vst [vmem:[#allocation2 + $0x30] sm:$0xff] %v8697_v27  ;;  %601 = vst [vmem:[#allocation2 + $0x18] sm:$0xff] %v8699_v28  ;;  %v7142_v36 = vld [vmem:[#allocation11 + $0xe4] ss:$16 sps:$4 sm:$0xff]   ;;  %v7140_v39 = vld [vmem:[#allocation11 + $0xe0] ss:$16 sps:$4 sm:$0xff]  }
  0xed   : > { %603 = vst [vmem:[#allocation2 + $0x68] sm:$0xff] %v8704_v29  ;;  %605 = vst [vmem:[#allocation2 + $0x60] sm:$0x1] %v604_v30  ;;  %v7145_v40 = vld [vmem:[#allocation11 + $0xc4] ss:$16 sps:$4 sm:$0xff]  }
  0xee   : > { %751 = vmatpush1.bf16.msra.mxu0 %v7130_v18  ;;  %6956 = vmatpush1.bf16.msra.mxu1 %v7130_v18  ;;  %v7143_v41 = vld [vmem:[#allocation11 + $0xc0] ss:$16 sps:$4 sm:$0xff]   ;;  %v7148_v42 = vld [vmem:[#allocation11 + $0xa4] ss:$16 sps:$4 sm:$0xff]   ;;  %12454 = vst [vmem:[#allocation33_spill] sm:$0xff] %v8777_v63 }
  0xef   : > { %752 = vmatprep.subr.bf16.mxu0 %v7131_v22  ;;  %6949 = vmatprep.subr.bf16.mxu1 %v7131_v22  ;;  %v7146_v45 = vld [vmem:[#allocation11 + $0xa0] ss:$16 sps:$4 sm:$0xff]   ;;  %v7151_v46 = vld [vmem:[#allocation11 + $0x84] ss:$16 sps:$4 sm:$0xff]   ;;  %v7164_v11 = vld [vmem:[#allocation11 + $0xe8] ss:$16 sps:$4 sm:$0xff]  }
  0xf0   : > { %v7149_v47 = vld [vmem:[#allocation11 + $0x80] ss:$16 sps:$4 sm:$0xff]   ;;  %v7154_v48 = vld [vmem:[#allocation11 + $0x64] ss:$16 sps:$4 sm:$0xff]   ;;  %v7166_v12 = vld [vmem:[#allocation11 + $0xec] ss:$16 sps:$4 sm:$0xff]  }
  0xf1   : > { %v7152_v51 = vld [vmem:[#allocation11 + $0x60] ss:$16 sps:$4 sm:$0xff]   ;;  %v7157_v52 = vld [vmem:[#allocation11 + $0x44] ss:$16 sps:$4 sm:$0xff]   ;;  %v7167_v21 = vld [vmem:[#allocation11 + $0xc8] ss:$16 sps:$4 sm:$0xff]  }
  0xf2   : > { %753 = vmatpush1.bf16.msra.mxu0 %v7133_v31  ;;  %6957 = vmatpush1.bf16.msra.mxu1 %v7133_v31  ;;  %v7155_v53 = vld [vmem:[#allocation11 + $0x40] ss:$16 sps:$4 sm:$0xff]   ;;  %v7160_v54 = vld [vmem:[#allocation11 + $0x24] ss:$16 sps:$4 sm:$0xff]   ;;  %v7169_v22 = vld [vmem:[#allocation11 + $0xcc] ss:$16 sps:$4 sm:$0xff]  }
  0xf3   : > { %754 = vmatprep.subr.bf16.mxu0 %v7134_v32  ;;  %6950 = vmatprep.subr.bf16.mxu1 %v7134_v32  ;;  %v7158_v57 = vld [vmem:[#allocation11 + $0x20] ss:$16 sps:$4 sm:$0xff]   ;;  %v7163_v58 = vld [vmem:[#allocation11 + $0x4] ss:$16 sps:$4 sm:$0xff]   ;;  %v7172_v31 = vld [vmem:[#allocation11 + $0xac] ss:$16 sps:$4 sm:$0xff]  }
  0xf4   : > { %v623_v59 = vld [vmem:[#allocation2 + $0x60] sm:$0x1]  ;;  %v7161_v60 = vld [vmem:[#allocation11] ss:$16 sps:$4 sm:$0xff]  }
  0xf5   : > { %v8755_v61 = vpack.c.bf16 %v623_v59, %v8704_v29  ;;  %v650_v3 = vld [vmem:[#allocation17 + $0x1] ss:$4 sm:$0x3]  ;;  %v7176_v59 = vld [vmem:[#allocation11 + $0x68] ss:$16 sps:$4 sm:$0xff]  }
  0xf6   : > { %755 = vmatpush1.bf16.msra.mxu0 %v7136_v33  ;;  %6958 = vmatpush1.bf16.msra.mxu1 %v7136_v33  ;;  %v8783_v4 = vrot.slane %v650_v3, %v654_v0  ;;  %v8787_v5 = vrot.slane %v650_v3, %v658_v1  ;;  %v7170_v33 = vld [vmem:[#allocation11 + $0xa8] ss:$16 sps:$4 sm:$0xff]  }
  0xf7   : > { %756 = vmatprep.subr.bf16.mxu0 %v7137_v34  ;;  %6951 = vmatprep.subr.bf16.mxu1 %v7137_v34 }
  0xfa   : > { %757 = vmatpush1.bf16.msra.mxu0 %v7139_v35  ;;  %6959 = vmatpush1.bf16.msra.mxu1 %v7139_v35 }
  0xfb   : > { %1159 = vmatprep.subr.bf16.mxu1 %v7142_v36  ;;  %1282 = vmatprep.subr.bf16.mxu0 %v7166_v12  ;;  %v7175_v36 = vld [vmem:[#allocation11 + $0x8c] ss:$16 sps:$4 sm:$0xff]  }
  0xfd   : > { %775 = vmatmul.mubr.bf16.vlgmr.msra.gmra.mxu0 %v8711_v37  ;;  %815 = vmatmul.mubr.bf16.vlgmr.msra.gmra.mxu1 %v8713_v38 }
  0xfe   : > { %784 = vmatprep.mubr.bf16.mxu0 %v12230_v2  ;;  %824 = vmatprep.mubr.bf16.mxu1 %v12230_v2 }
  0xff   : > { %1160 = vmatpush1.bf16.msra.mxu1 %v7140_v39  ;;  %1283 = vmatpush1.bf16.msra.mxu0 %v7164_v11 }
 0x100   : > { %1161 = vmatprep.subr.bf16.mxu1 %v7145_v40  ;;  %1284 = vmatprep.subr.bf16.mxu0 %v7169_v22  ;;  %v7182_v22 = vld [vmem:[#allocation11 + $0x28] ss:$16 sps:$4 sm:$0xff]  }
 0x103   : > { %1162 = vmatpush1.bf16.msra.mxu1 %v7143_v41  ;;  %1285 = vmatpush1.bf16.msra.mxu0 %v7167_v21  ;;  %v7173_v41 = vld [vmem:[#allocation11 + $0x88] ss:$16 sps:$4 sm:$0xff]  }
 0x104   : > { %1163 = vmatprep.subr.bf16.mxu1 %v7148_v42  ;;  %1286 = vmatprep.subr.bf16.mxu0 %v7172_v31 }
 0x105   : > { %785 = vmatmul.mubr.bf16.gmra.mxu0 %v8721_v43  ;;  %825 = vmatmul.mubr.bf16.gmra.mxu1 %v8724_v44 }
 0x106   : > { %794 = vmatprep.mubr.bf16.mxu0 %v12230_v2  ;;  %834 = vmatprep.mubr.bf16.mxu1 %v12230_v2 }
 0x107   : > { %1164 = vmatpush1.bf16.msra.mxu1 %v7146_v45  ;;  %1287 = vmatpush1.bf16.msra.mxu0 %v7170_v33 }
 0x108   : > { %1165 = vmatprep.subr.bf16.mxu1 %v7151_v46  ;;  %1288 = vmatprep.subr.bf16.mxu0 %v7175_v36  ;;  %v7185_v36 = vld [vmem:[#allocation11 + $0x8] ss:$16 sps:$4 sm:$0xff]  }
 0x10b   : > { %1166 = vmatpush1.bf16.msra.mxu1 %v7149_v47  ;;  %1289 = vmatpush1.bf16.msra.mxu0 %v7173_v41 }
 0x10c   : > { %1167 = vmatprep.subr.bf16.mxu1 %v7154_v48 }
 0x10d   : > { %795 = vmatmul.mubr.bf16.gmra.mxu0 %v8732_v49  ;;  %835 = vmatmul.mubr.bf16.gmra.mxu1 %v8736_v50 }
 0x10e   : > { %804 = vmatprep.mubr.bf16.mxu0 %v12230_v2  ;;  %844 = vmatprep.mubr.bf16.mxu1 %v12230_v2 }
 0x10f   : > { %1168 = vmatpush1.bf16.msra.mxu1 %v7152_v51 }
 0x110   : > { %1169 = vmatprep.subr.bf16.mxu1 %v7157_v52 }
 0x113   : > { %1170 = vmatpush1.bf16.msra.mxu1 %v7155_v53 }
 0x114   : > { %1171 = vmatprep.subr.bf16.mxu1 %v7160_v54 }
 0x115   : > { %805 = vmatmul.mubr.bf16.gmra.mxu0 %v8744_v55  ;;  %845 = vmatmul.mubr.bf16.gmra.mxu1 %v8748_v56 }
 0x116   : > { %854 = vmatprep.mubr.bf16.mxu1 %v12230_v2  ;;  %1314 = vmatprep.mubr.bf16.mxu0 %v12230_v2 }
 0x117   : > { %1172 = vmatpush1.bf16.msra.mxu1 %v7158_v57  ;;  %v7178_v57 = vld [vmem:[#allocation11 + $0x6c] ss:$16 sps:$4 sm:$0xff]  }
 0x118   : > { %1173 = vmatprep.subr.bf16.mxu1 %v7163_v58  ;;  %1290 = vmatprep.subr.bf16.mxu0 %v7178_v57 }
 0x119   : > { %1291 = vmatpush1.bf16.msra.mxu0 %v7176_v59 }
 0x11b   : > { %1174 = vmatpush1.bf16.msra.mxu1 %v7161_v60  ;;  %v7181_v60 = vld [vmem:[#allocation11 + $0x4c] ss:$16 sps:$4 sm:$0xff]  }
 0x11c   : > { %1292 = vmatprep.subr.bf16.mxu0 %v7181_v60 }
 0x11d   : > { %855 = vmatmul.mubr.bf16.gmra.mxu1 %v8755_v61 }
 0x11e   : > { %1191 = vmatprep.mubr.bf16.mxu1 %v12230_v2 }
 0x125   : > { %1192 = vmatmul.mubr.bf16.vlgmr.msra.gmra.mxu1 %v8711_v37 }
 0x126   : > { %1201 = vmatprep.mubr.bf16.mxu1 %v12230_v2 }
 0x12d   : > { %1202 = vmatmul.mubr.bf16.gmra.mxu1 %v8721_v43 }
 0x12e   : > { %1211 = vmatprep.mubr.bf16.mxu1 %v12230_v2 }
 0x135   : > { %1212 = vmatmul.mubr.bf16.gmra.mxu1 %v8732_v49 }
 0x136   : > { %1221 = vmatprep.mubr.bf16.mxu1 %v12230_v2 }
 0x13d   : > { %1222 = vmatmul.mubr.bf16.gmra.mxu1 %v8744_v55 }
 0x13e   : > { %1231 = vmatprep.mubr.bf16.mxu1 %v12230_v2 }
 0x145   : > { %1232 = vmatmul.mubr.bf16.gmra.mxu1 %v8713_v38 }
 0x146   : > { %1241 = vmatprep.mubr.bf16.mxu1 %v12230_v2 }
 0x14d   : > { %1242 = vmatmul.mubr.bf16.gmra.mxu1 %v8724_v44 }
 0x14e   : > { %1251 = vmatprep.mubr.bf16.mxu1 %v12230_v2 }
 0x155   : > { %1252 = vmatmul.mubr.bf16.gmra.mxu1 %v8736_v50 }
 0x156   : > { %1261 = vmatprep.mubr.bf16.mxu1 %v12230_v2 }
 0x15d   : > { %1262 = vmatmul.mubr.bf16.gmra.mxu1 %v8748_v56 }
 0x15e   : > { %1271 = vmatprep.mubr.bf16.mxu1 %v12230_v2 }
 0x165   : > { %1272 = vmatmul.mubr.bf16.gmra.mxu1 %v8755_v61 }
 0x166   : > { %1510 = vmatprep.mubr.bf16.mxu1 %v12230_v2 }
 0x1bd   : > { %v776_v6 = vpop.f32.mrf.mxu0  ;;  %v816_v7 = vpop.f32.mrf.mxu1 }
 0x1be   : > { %v817_v8 = vadd.f32 %v816_v7, %v8783_v4  ;;  %v777_v16 = vadd.f32 %v776_v6, %v8783_v4 }
 0x1bf   : > { %v8790_v9 = vpop.f32.mrf.mxu0  ;;  %v818_v10 = vpop.f32.mrf.mxu1 }
 0x1c0   : > { %v8793_v13 = vadd.f32 %v818_v10, %v8787_v5  ;;  %v7179_v10 = vld [vmem:[#allocation11 + $0x48] ss:$16 sps:$4 sm:$0xff]  }
 0x1c1   : > { %v780_v14 = vpop.f32.mrf.mxu0  ;;  %v820_v15 = vpop.f32.mrf.mxu1  ;;  %1293 = vmatpush1.bf16.msra.mxu0 %v7179_v10 }
 0x1c2   : > { %v781_v17 = vadd.f32 %v780_v14, %v8783_v4  ;;  %v821_v18 = vadd.f32 %v820_v15, %v8783_v4  ;;  %v7184_v14 = vld [vmem:[#allocation11 + $0x2c] ss:$16 sps:$4 sm:$0xff]  }
 0x1c3   : > { %v8798_v19 = vpop.f32.mrf.mxu0  ;;  %v8800_v20 = vpop.f32.mrf.mxu1  ;;  %1294 = vmatprep.subr.bf16.mxu0 %v7184_v14  ;;  %v8878_v14 = vld [vmem:[#allocation17] ss:$4 sm:$0xf] }
 0x1c4   : > { %v8802_v23 = vpack.c.bf16 %v781_v17, %v777_v16  ;;  %v8804_v24 = vpack.c.bf16 %v821_v18, %v817_v8 }
 0x1c5   : > { %v786_v25 = vpop.f32.mrf.mxu0  ;;  %v826_v26 = vpop.f32.mrf.mxu1  ;;  %1295 = vmatpush1.bf16.msra.mxu0 %v7182_v22 }
 0x1c6   : > { %v787_v27 = vadd.f32 %v786_v25, %v8783_v4  ;;  %1939 = vrot.lane.b32.xlu0 %v8802_v23, %s8334_s16  ;;  %v827_v28 = vadd.f32 %v826_v26, %v8783_v4 }
 0x1c7   : > { %v8810_v29 = vpop.f32.mrf.mxu0  ;;  %v828_v30 = vpop.f32.mrf.mxu1 }
 0x1c8   : > { %v8813_v32 = vadd.f32 %v828_v30, %v8787_v5 }
 0x1c9   : > { %v790_v34 = vpop.f32.mrf.mxu0  ;;  %v830_v35 = vpop.f32.mrf.mxu1 }
 0x1ca   : > { %v791_v39 = vadd.f32 %v790_v34, %v8783_v4  ;;  %v831_v40 = vadd.f32 %v830_v35, %v8783_v4 }
 0x1cb   : > { %v8817_v42 = vpop.f32.mrf.mxu0  ;;  %v8819_v45 = vpop.f32.mrf.mxu1 }
 0x1cc   : > { %v8821_v46 = vpack.c.bf16 %v791_v39, %v787_v27  ;;  %v8823_v47 = vpack.c.bf16 %v831_v40, %v827_v28  ;;  %v7187_v27 = vld [vmem:[#allocation11 + $0xc] ss:$16 sps:$4 sm:$0xff]  }
 0x1cd   : > { %v796_v48 = vpop.f32.mrf.mxu0  ;;  %v836_v51 = vpop.f32.mrf.mxu1  ;;  %1296 = vmatprep.subr.bf16.mxu0 %v7187_v27 }
 0x1ce   : > { %v837_v52 = vadd.f32 %v836_v51, %v8783_v4  ;;  %v797_v6 = vadd.f32 %v796_v48, %v8783_v4  ;;  %1297 = vmatpush1.bf16.msra.mxu0 %v7185_v36 }
 0x1cf   : > { %v8826_v53 = vpop.f32.mrf.mxu0  ;;  %v838_v54 = vpop.f32.mrf.mxu1 }
 0x1d0   : > { %v8829_v58 = vadd.f32 %v838_v54, %v8787_v5 }
 0x1d1   : > { %v800_v62 = vpop.f32.mrf.mxu0  ;;  %v840_v3 = vpop.f32.mrf.mxu1  ;;  %1315 = vmatmul.mubr.bf16.vlgmr.msra.gmra.mxu0 %v8711_v37 }
 0x1d2   : > { %v801_v7 = vadd.f32 %v800_v62, %v8783_v4  ;;  %v841_v8 = vadd.f32 %v840_v3, %v8783_v4  ;;  %1324 = vmatprep.mubr.bf16.mxu0 %v12230_v2 }
 0x1d3   : > { %v8834_v11 = vpop.f32.mrf.mxu0  ;;  %v8836_v12 = vpop.f32.mrf.mxu1 }
 0x1d4   : > { %v8838_v15 = vpack.c.bf16 %v801_v7, %v797_v6  ;;  %v8840_v16 = vpack.c.bf16 %v841_v8, %v837_v52 }
 0x1d5   : > { %v806_v17 = vpop.f32.mrf.mxu0  ;;  %v846_v18 = vpop.f32.mrf.mxu1 }
 0x1d6   : > { %1943 = vrot.lane.b32.xlu1 %v8838_v15, %s8334_s16  ;;  %v847_v21 = vadd.f32 %v846_v18, %v8783_v4  ;;  %v807_v33 = vadd.f32 %v806_v17, %v8783_v4  ;;  %v8883_v17 = vrot.slane %v8878_v14, %v654_v0 }
 0x1d7   : > { %v8845_v25 = vpop.f32.mrf.mxu0  ;;  %v848_v26 = vpop.f32.mrf.mxu1 }
 0x1d8   : > { %v8848_v28 = vadd.f32 %v848_v26, %v8787_v5 }
 0x1d9   : > { %v810_v30 = vpop.f32.mrf.mxu0  ;;  %v850_v31 = vpop.f32.mrf.mxu1  ;;  %1325 = vmatmul.mubr.bf16.gmra.mxu0 %v8721_v43 }
 0x1da   : > { %v811_v34 = vadd.f32 %v810_v30, %v8783_v4  ;;  %v851_v35 = vadd.f32 %v850_v31, %v8783_v4  ;;  %1334 = vmatprep.mubr.bf16.mxu0 %v12230_v2 }
 0x1db   : > { %v8853_v39 = vpop.f32.mrf.mxu1 }
 0x1dc   : > { %v8855_v40 = vpack.c.bf16 %v811_v34, %v807_v33  ;;  %v8857_v41 = vpack.c.bf16 %v851_v35, %v847_v21  ;;  %v779_v33 = vadd.f32 %v8790_v9, %v8787_v5  ;;  %v783_v35 = vadd.f32 %v8798_v19, %v8787_v5 }
 0x1dd   : > { %v856_v48 = vpop.f32.mrf.mxu1  ;;  %v793_v19 = vadd.f32 %v8817_v42, %v8787_v5  ;;  %v803_v42 = vadd.f32 %v8834_v11, %v8787_v5 }
 0x1de   : > { %12455 = vst [vmem:[#allocation34_spill] sm:$0xff] %v8857_v41  ;;  %1945 = vrot.lane.b32.xlu1 %v8855_v40, %s8334_s16  ;;  %v857_v51 = vadd.f32 %v856_v48, %v8783_v4  ;;  %v789_v48 = vadd.f32 %v8810_v29, %v8787_v5 }
 0x1df   : > { %v858_v52 = vpop.f32.mrf.mxu1 }
 0x1e0   : > { %v859_v57 = vadd.f32 %v858_v52, %v8787_v5 }
 0x1e1   : > { %v860_v54 = vpop.f32.mrf.mxu1  ;;  %1335 = vmatmul.mubr.bf16.gmra.mxu0 %v8732_v49 }
 0x1e2   : > { %v861_v59 = vadd.f32 %v860_v54, %v8783_v4  ;;  %1344 = vmatprep.mubr.bf16.mxu0 %v12230_v2 }
 0x1e3   : > { %v862_v60 = vpop.f32.mrf.mxu1 }
 0x1e4   : > { %v8866_v62 = vpack.c.bf16 %v861_v59, %v857_v51  ;;  %897 = vxpose.xlu0.b32.start [1/2] (short) %v859_v57, 128  ;;  %v863_v6 = vadd.f32 %v862_v60, %v8787_v5  ;;  %v799_v57 = vadd.f32 %v8826_v53, %v8787_v5  ;;  %v812_v60 = vpop.f32.mrf.mxu0  ;;  %v833_v53 = vadd.f32 %v8819_v45, %v8787_v5 }
 0x1e5   : > { %v1193_v3 = vpop.f32.mrf.mxu1 }
 0x1e6   : > { %12456 = vst [vmem:[#allocation35_spill] sm:$0xff] %v8866_v62  ;;  %v8887_v18 = vadd.f32 %v1193_v3, %v8883_v17  ;;  %v813_v3 = vadd.f32 %v812_v60, %v8787_v5 }
 0x1e7   : > { %v8869_v7 = vpop.f32.mrf.mxu1 }
 0x1e8   : > { %898 = vxpose.xlu0.b32.end [2/2] (short) %v863_v6, 128 }
 0x1e9   : > { %v1197_v8 = vpop.f32.mrf.mxu1  ;;  %1345 = vmatmul.mubr.bf16.gmra.mxu0 %v8744_v55 }
 0x1ea   : > { %v8890_v21 = vadd.f32 %v1197_v8, %v8883_v17  ;;  %1354 = vmatprep.mubr.bf16.mxu0 %v12230_v2 }
 0x1eb   : > { %v8873_v37 = vpop.f32.mrf.mxu1 }
 0x1ed   : > { %v1203_v4 = vpop.f32.mrf.mxu1 }
 0x1ee   : > { %v8901_v27 = vadd.f32 %v1203_v4, %v8883_v17 }
 0x1ef   : > { %v8875_v10 = vpop.f32.mrf.mxu1 }
 0x1f1   : > { %v1207_v43 = vpop.f32.mrf.mxu1  ;;  %1355 = vmatmul.mubr.bf16.gmra.mxu0 %v8713_v38 }
 0x1f2   : > { %1364 = vmatprep.mubr.bf16.mxu0 %v12230_v2  ;;  %v8906_v31 = vadd.f32 %v1207_v43, %v8883_v17 }
 0x1f3   : > { %v8894_v49 = vpop.f32.mrf.mxu1 }
 0x1f5   : > { %v1213_v0 = vpop.f32.mrf.mxu1 }
 0x1f6   : > { %v8917_v38 = vadd.f32 %v1213_v0, %v8883_v17 }
 0x1f7   : > { %v8898_v26 = vpop.f32.mrf.mxu1 }
 0x1f9   : > { %v1217_v30 = vpop.f32.mrf.mxu1  ;;  %1365 = vmatmul.mubr.bf16.gmra.mxu0 %v8724_v44 }
 0x1fa   : > { %1374 = vmatprep.mubr.bf16.mxu0 %v12230_v2  ;;  %v8922_v9 = vadd.f32 %v1217_v30, %v8883_v17 }
 0x1fb   : > { %v8912_v34 = vpop.f32.mrf.mxu1 }
 0x1fd   : > { %v1223_v36 = vpop.f32.mrf.mxu1 }
 0x1fe   : > { %v8933_v44 = vadd.f32 %v1223_v36, %v8883_v17 }
 0x1ff   : > { %v8928_v52 = vpop.f32.mrf.mxu1 }
 0x201   : > { %1375 = vmatmul.mubr.bf16.gmra.mxu0 %v8736_v50  ;;  %v1227_v54 = vpop.f32.mrf.mxu1  ;;  %v809_v50 = vadd.f32 %v8845_v25, %v8787_v5 }
 0x202   : > { %1384 = vmatprep.mubr.bf16.mxu0 %v12230_v2  ;;  %v8938_v29 = vadd.f32 %v1227_v54, %v8883_v17 }
 0x207   : > { %865 = vxpose.xlu1.b32.start [1/16] %v779_v33, 128 }
 0x209   : > { %1385 = vmatmul.mubr.bf16.gmra.mxu0 %v8748_v56  ;;  %v823_v56 = vadd.f32 %v8800_v20, %v8787_v5  ;;  %v8967_v20 = vpop.f32.mrf.mxu1 }
 0x20a   : > { %1394 = vmatprep.mubr.bf16.mxu0 %v12230_v2 }
 0x20b   : > { %866 = vxpose.xlu1.b32.cont [2/16] %v783_v35, 128 }
 0x20f   : > { %867 = vxpose.xlu1.b32.cont [3/16] %v789_v48, 128 }
 0x211   : > { %1395 = vmatmul.mubr.bf16.gmra.mxu0 %v8755_v61  ;;  %v843_v61 = vadd.f32 %v8836_v12, %v8787_v5 }
 0x212   : > { %2016 = vmatprep.mubr.bf16.mxu0 %v12230_v2 }
 0x213   : > { %868 = vxpose.xlu1.b32.cont [4/16] %v793_v19, 128 }
 0x217   : > { %869 = vxpose.xlu1.b32.cont [5/16] %v799_v57, 128 }
 0x21b   : > { %870 = vxpose.xlu1.b32.cont [6/16] %v803_v42, 128 }
 0x21f   : > { %871 = vxpose.xlu1.b32.cont [7/16] %v809_v50, 128 }
 0x223   : > { %872 = vxpose.xlu1.b32.cont [8/16] %v813_v3, 128 }
 0x227   : > { %873 = vxpose.xlu1.b32.cont [9/16] %v8793_v13, 128  ;;  %v853_v13 = vadd.f32 %v8853_v39, %v8787_v5 }
 0x22b   : > { %874 = vxpose.xlu1.b32.cont [10/16] %v823_v56, 128 }
 0x22f   : > { %875 = vxpose.xlu1.b32.cont [11/16] %v8813_v32, 128  ;;  %v8969_v32 = vpop.f32.mrf.mxu1 }
 0x231   : > { %v8971_v45 = vpop.f32.mrf.mxu1 }
 0x233   : > { %876 = vxpose.xlu1.b32.cont [12/16] %v833_v53, 128 }
 0x237   : > { %877 = vxpose.xlu1.b32.cont [13/16] %v8829_v58, 128  ;;  %v8973_v58 = vpop.f32.mrf.mxu1 }
 0x238   : > { %v8975_v11 = vpop.permute.xlu0 %1939 }
 0x239   : > { %v8977_v12 = vpop.f32.mrf.mxu1 }
 0x23b   : > { %878 = vxpose.xlu1.b32.cont [14/16] %v843_v61, 128  ;;  %v8981_v5 = vpop.f32.mrf.mxu1 }
 0x23d   : > { %v1245_v39 = vpop.f32.mrf.mxu1 }
 0x23f   : > { %879 = vxpose.xlu1.b32.cont [15/16] %v8848_v28, 128  ;;  %v8987_v8 = vpop.f32.mrf.mxu1 }
 0x241   : > { %v1249_v0 = vpop.f32.mrf.mxu1 }
 0x243   : > { %880 = vxpose.xlu1.b32.end [16/16] %v853_v13, 128  ;;  %v8995_v33 = vpop.f32.mrf.mxu1 }
 0x245   : > { %v1255_v36 = vpop.f32.mrf.mxu1 }
 0x247   : > { %v9001_v54 = vpop.f32.mrf.mxu1 }
 0x248   : > { %v8999_v19 = vpop.permute.xlu1 %1943 }
 0x249   : > { %1941 = vrot.lane.b32.xlu0 %v8821_v46, %s8334_s16  ;;  %v1259_v60 = vpop.f32.mrf.mxu1 }
 0x24b   : > { %v1263_v56 = vpop.f32.mrf.mxu1 }
 0x24d   : > { %v1265_v61 = vpop.f32.mrf.mxu1 }
 0x250   : > { %v9003_v50 = vpop.permute.xlu1 %1945 }
 0x251   : > { %12457 = vst [vmem:[#allocation36_spill] sm:$0xff] %v9003_v50 }
 0x260   : > { %v913_v25 = vpop.trf.xlu0 }
 0x261   : > { %1947 = vrot.lane.b32.xlu1 %v8804_v24, %s8334_s16 }
 0x264   : > { %v914_v28 = vpop.trf.xlu0 }
 0x265   : > { %1949 = vrot.lane.b32.xlu1 %v8823_v47, %s8334_s16 }
 0x268   : > { %v915_v6 = vpop.trf.xlu0 }
 0x269   : > { %1951 = vrot.lane.b32.xlu1 %v8840_v16, %s8334_s16 }
 0x26c   : > { %v916_v4 = vpop.trf.xlu0 }
 0x26d   : > { %1953 = vrot.lane.b32.xlu1 %v8857_v41, %s8334_s16  ;;  %v932_v43 = vpack.c.bf16 %v916_v4, %v915_v6  ;;  %v1267_v6 = vpop.f32.mrf.mxu1 }
 0x26f   : > { %1490 = vmatprep.subr.bf16.mxu1 %v932_v43  ;;  %v9010_v43 = vrot.slane %v8878_v14, %v658_v1  ;;  %v1269_v55 = vpop.f32.mrf.mxu1 }
 0x270   : > { %v8991_v30 = vpop.trf.xlu0 }
 0x271   : > { %1955 = vrot.lane.b32.xlu1 %v8866_v62, %s8334_s16  ;;  %v1266_v51 = vadd.f32 %v1265_v61, %v9010_v43  ;;  %v1270_v59 = vadd.f32 %v1269_v55, %v9010_v43  ;;  %v1260_v1 = vadd.f32 %v1259_v60, %v9010_v43  ;;  %v1236_v60 = vadd.f32 %v8971_v45, %v9010_v43  ;;  %v9035_v61 = vpop.f32.mrf.mxu1 }
 0x273   : > { %v1434_v41 = vpack.c.bf16 %v1270_v59, %v1266_v51  ;;  %v989_v51 = vsub.s32 2, %v8777_v63 }
 0x274   : > { %v8997_v35 = vpop.trf.xlu0 }
 0x278   : > { %v919_v48 = vpop.trf.xlu0 }
 0x27c   : > { %v920_v57 = vpop.trf.xlu0 }
 0x27d   : > { %v936_v42 = vpack.c.bf16 %v920_v57, %v919_v48  ;;  %v930_v57 = vpack.c.bf16 %v914_v28, %v913_v25 }
 0x27f   : > { %1996 = vmatprep.subr.bf16.mxu0 %v936_v42 }
 0x280   : > { %v9005_v4 = vpop.trf.xlu0 }
 0x281   : > { %12458 = vst [vmem:[#allocation37_spill] sm:$0xff] %v9005_v4  ;;  %v1256_v4 = vadd.f32 %v1255_v36, %v9010_v43  ;;  %v1250_v36 = vadd.f32 %v1249_v0, %v9010_v43  ;;  %v9038_v0 = vrot.slane %v8878_v14, %v989_v51  ;;  %v1264_v14 = vadd.f32 %v1263_v56, %v8883_v17 }
 0x282   : > { %v1216_v56 = vadd.f32 %v8898_v26, %v9010_v43 }
 0x283   : > { %v881_v3 = vpop.trf.xlu1  ;;  %v1430_v55 = vpack.c.bf16 %v1260_v1, %v1256_v4  ;;  %v1230_v4 = vadd.f32 %v8967_v20, %v9010_v43 }
 0x284   : > { %v9012_v42 = vpop.trf.xlu0 }
 0x287   : > { %v882_v53 = vpop.trf.xlu1 }
 0x288   : > { %v929_v62 = vpack.c.bf16 %v882_v53, %v881_v3  ;;  %v9019_v25 = vpop.trf.xlu0  ;;  %v1240_v3 = vadd.f32 %v8977_v12, %v9010_v43  ;;  %v1226_v12 = vadd.f32 %v8928_v52, %v9010_v43  ;;  %v1275_v52 = vpop.f32.mrf.mxu1 }
 0x28a   : > { %v9076_v26 = vpop.f32.mrf.mxu1 }
 0x28b   : > { %v883_v13 = vpop.trf.xlu1 }
 0x28c   : > { %v9028_v59 = vpop.trf.xlu0 }
 0x28f   : > { %v884_v22 = vpop.trf.xlu1 }
 0x290   : > { %v931_v48 = vpack.c.bf16 %v884_v22, %v883_v13  ;;  %v12459_v22 = vmov 0   ;;  %v934_v13 = vpack.c.bf16 %v8997_v35, %v8991_v30  ;;  %v9053_v1 = vpop.trf.xlu0 }
 0x291   : > { %v1316_v45 = vpop.f32.mrf.mxu0  ;;  %12461 = vst [vmem:[#allocation39_spill] sm:$0xff] %v9053_v1 }
 0x292   : > { %1491 = vmatpush1.bf16.msra.mxu1 %v931_v48  ;;  %v1422_v48 = vpack.c.bf16 %v1240_v3, %v1236_v60  ;;  %v9057_v20 = vadd.f32 %v1316_v45, %v9038_v0  ;;  %v1206_v3 = vadd.f32 %v8875_v10, %v9010_v43  ;;  %v1244_v10 = vadd.f32 %v8981_v5, %v8883_v17 }
 0x293   : > { %v885_v2 = vpop.trf.xlu1  ;;  %1492 = vmatprep.subr.bf16.mxu1 %v930_v57  ;;  %v1268_v57 = vadd.f32 %v1267_v6, %v8883_v17  ;;  %v9051_v30 = vpop.f32.mrf.mxu0  ;;  %v1220_v6 = vadd.f32 %v8912_v34, %v9010_v43  ;;  %v1196_v5 = vadd.f32 %v8869_v7, %v9010_v43 }
 0x294   : > { %12460 = vst [vmem:[#allocation38_spill] sm:$0xff] %v9051_v30  ;;  %12462 = vst [vmem:[#allocation40_spill] sm:$0xff] %v9057_v20 }
 0x295   : > { %v1433_v51 = vpack.c.bf16 %v1268_v57, %v1264_v14  ;;  %v1238_v57 = vadd.f32 %v8973_v58, %v8883_v17 }
 0x296   : > { %1493 = vmatpush1.bf16.msra.mxu1 %v929_v62  ;;  %v1246_v62 = vadd.f32 %v1245_v39, %v9010_v43 }
 0x297   : > { %v886_v50 = vpop.trf.xlu1  ;;  %2467 = vmatprep.subr.bf16.mxu1 %v12459_v22 }
 0x298   : > { %v933_v35 = vpack.c.bf16 %v886_v50, %v885_v2  ;;  %v1254_v50 = vadd.f32 %v8995_v33, %v8883_v17  ;;  %v1210_v33 = vadd.f32 %v8894_v49, %v9010_v43  ;;  %v1248_v49 = vadd.f32 %v8987_v8, %v8883_v17 }
 0x299   : > { %6597 = vmatmul.mubr.msk.bf16.vlgmr.msra.gmra.mxu1 %vm1450_vm0, %v8802_v23  ;;  %v1200_v8 = vadd.f32 %v8873_v37, %v9010_v43 }
 0x29a   : > { %1520 = vmatprep.mubr.bf16.mxu1 %v12459_v22  ;;  %2468 = vmatpush1.bf16.msra.mxu1 %v1434_v41  ;;  %v1426_v41 = vpack.c.bf16 %v1250_v36, %v1246_v62  ;;  %v1418_v62 = vpack.c.bf16 %v1230_v4, %v1226_v12  ;;  %v1258_v36 = vadd.f32 %v9001_v54, %v8883_v17 }
 0x29b   : > { %v887_v28 = vpop.trf.xlu1  ;;  %2469 = vmatprep.subr.bf16.mxu1 %v12459_v22  ;;  %v1410_v4 = vpack.c.bf16 %v1210_v33, %v1206_v3 }
 0x29e   : > { %2470 = vmatpush1.bf16.msra.mxu1 %v1430_v55 }
 0x29f   : > { %v888_v53 = vpop.trf.xlu1  ;;  %2471 = vmatprep.subr.bf16.mxu1 %v12459_v22 }
 0x2a0   : > { %v935_v39 = vpack.c.bf16 %v888_v53, %v887_v28  ;;  %v1320_v28 = vpop.f32.mrf.mxu0  ;;  %v1414_v53 = vpack.c.bf16 %v1220_v6, %v1216_v56  ;;  %v1276_v56 = vadd.f32 %v1275_v52, %v9010_v43  ;;  %v8335_v52 = vmov 65535  }
 0x2a1   : > { %6598 = vmatmul.mubr.msk.bf16.gmra.mxu1 %vm1450_vm0, %v8821_v46  ;;  %v9066_v2 = vadd.f32 %v1320_v28, %v9038_v0  ;;  %v1425_v28 = vpack.c.bf16 %v1248_v49, %v1244_v10 }
 0x2a2   : > { %1997 = vmatpush1.bf16.msra.mxu0 %v935_v39  ;;  %1530 = vmatprep.mubr.bf16.mxu1 %v12459_v22  ;;  %v9072_v60 = vpop.f32.mrf.mxu0  ;;  %v1429_v39 = vpack.c.bf16 %v1258_v36, %v1254_v50  ;;  %v1406_v50 = vpack.c.bf16 %v1200_v8, %v1196_v5 }
 0x2a3   : > { %1998 = vmatprep.subr.bf16.mxu0 %v934_v13  ;;  %2472 = vmatpush1.bf16.msra.mxu1 %v1426_v41  ;;  %v9059_v55 = vpop.trf.xlu1  ;;  %12463 = vst [vmem:[#allocation41_spill] sm:$0xff] %v9066_v2  ;;  %12464 = vst [vmem:[#allocation42_spill] sm:$0xff] %v9072_v60  ;;  %v9088_v41 = vpop.trf.xlu0 }
 0x2a4   : > { %2473 = vmatprep.subr.bf16.mxu1 %v12459_v22  ;;  %v1326_v54 = vpop.f32.mrf.mxu0  ;;  %12465 = vst [vmem:[#allocation43_spill] sm:$0xff] %v9088_v41 }
 0x2a5   : > { %v9102_v12 = vadd.f32 %v1326_v54, %v9038_v0 }
 0x2a6   : > { %1999 = vmatpush1.bf16.msra.mxu0 %v933_v35  ;;  %v9098_v45 = vpop.f32.mrf.mxu0 }
 0x2a7   : > { %2474 = vmatpush1.bf16.msra.mxu1 %v1422_v48  ;;  %2602 = vmatprep.subr.bf16.mxu0 %v12459_v22  ;;  %v9096_v13 = vpop.trf.xlu1  ;;  %12466 = vst [vmem:[#allocation44_spill] sm:$0xff] %v9098_v45  ;;  %12467 = vst [vmem:[#allocation45_spill] sm:$0xff] %v9102_v12  ;;  %v1234_v48 = vadd.f32 %v8969_v32, %v8883_v17  ;;  %v9120_v37 = vpop.trf.xlu0 }
 0x2a8   : > { %2475 = vmatprep.subr.bf16.mxu1 %v12459_v22  ;;  %v1330_v14 = vpop.f32.mrf.mxu0 }
 0x2a9   : > { %6599 = vmatmul.mubr.msk.bf16.gmra.mxu1 %vm1450_vm0, %v8838_v15  ;;  %6606 = vmatmul.mubr.msk.bf16.vlgmr.msra.gmra.mxu0 %vm1450_vm0, %v8975_v11  ;;  %v1279_v11 = vpop.f32.mrf.mxu1  ;;  %v9114_v35 = vadd.f32 %v1330_v14, %v9038_v0  ;;  %v1421_v36 = vpack.c.bf16 %v1238_v57, %v1234_v48  ;;  %v940_v48 = vpack.c.bf16 %v9028_v59, %v9019_v25 }
 0x2aa   : > { %1540 = vmatprep.mubr.bf16.mxu1 %v12459_v22  ;;  %2026 = vmatprep.mubr.bf16.mxu0 %v12459_v22  ;;  %v1280_v7 = vadd.f32 %v1279_v11, %v9010_v43  ;;  %v9118_v6 = vpop.f32.mrf.mxu0  ;;  %v2462_v43 = vsel %vm2460_vm1, 4294967295, %v8335_v52  ;;  %v12476_v57 = vpack.c.bf16 %v8938_v29, %v8933_v44  ;;  %v1274_v59 = vadd.f32 %v9035_v61, %v8883_v17 }
 0x2ab   : > { %2476 = vmatpush1.bf16.msra.mxu1 %v1418_v62  ;;  %2603 = vmatpush1.bf16.msra.mxu0 %v1433_v51  ;;  %12468 = vst [vmem:[#allocation46_spill] sm:$0xff] %v9114_v35  ;;  %12469 = vst [vmem:[#allocation47_spill] sm:$0xff] %v9118_v6  ;;  %v9128_v58 = vpop.trf.xlu1  ;;  %v9134_v33 = vsel %vm2461_vm2, %v2462_v43, 0  ;;  %v9141_v10 = vpop.trf.xlu0  ;;  %v1278_v44 = vadd.f32 %v9076_v26, %v8883_v17  ;;  %v12481_v52 = vpack.c.bf16 %v8922_v9, %v8917_v38 }
 0x2ac   : > { %2477 = vmatprep.subr.bf16.mxu1 %v12459_v22  ;;  %2604 = vmatprep.subr.bf16.mxu0 %v12459_v22  ;;  %v1336_v62 = vpop.f32.mrf.mxu0  ;;  %v1438_v51 = vpack.c.bf16 %v1280_v7, %v1276_v56  ;;  %12471 = vst [vmem:[#allocation49_spill] sm:$0xff] %v9134_v33  ;;  %12473 = vst [vmem:[#allocation51_spill] sm:$0xff] %v9141_v10  ;;  %v12484_v38 = vpack.c.bf16 %v8906_v31, %v8901_v27 }
 0x2ad   : > { %v9138_v54 = vadd.f32 %v1336_v62, %v9038_v0  ;;  %v1437_v62 = vpack.c.bf16 %v1278_v44, %v1274_v59  ;;  %v12488_v27 = vpack.c.bf16 %v8890_v21, %v8887_v18  ;;  %v12497_v44 = vld [vmem:[#allocation34_spill] sm:$0xff] }
 0x2ae   : > { %v9132_v3 = vpop.f32.mrf.mxu0  ;;  %v2465_v11 = vand.u32 %v9134_v33, %v1438_v51 }
 0x2af   : > { %2478 = vmatpush1.bf16.msra.mxu1 %v1414_v53  ;;  %2605 = vmatpush1.bf16.msra.mxu0 %v1429_v39  ;;  %12470 = vst [vmem:[#allocation48_spill] sm:$0xff] %v9132_v3  ;;  %12472 = vst [vmem:[#allocation50_spill] sm:$0xff] %v9138_v54  ;;  %v9146_v39 = vpop.trf.xlu1  ;;  %v2600_v51 = vand.u32 %v9134_v33, %v1437_v62 }
 0x2b0   : > { %2479 = vmatprep.subr.bf16.mxu1 %v12459_v22  ;;  %2606 = vmatprep.subr.bf16.mxu0 %v12459_v22  ;;  %v1340_v53 = vpop.f32.mrf.mxu0 }
 0x2b1   : > { %6600 = vmatmul.mubr.msk.bf16.gmra.mxu1 %vm1450_vm0, %v8855_v40  ;;  %v9144_v49 = vadd.f32 %v1340_v53, %v9038_v0 }
 0x2b2   : > { %1550 = vmatprep.mubr.bf16.mxu1 %v12459_v22  ;;  %v9149_v5 = vpop.f32.mrf.mxu0 }
 0x2b3   : > { %2480 = vmatpush1.bf16.msra.mxu1 %v1410_v4  ;;  %2607 = vmatpush1.bf16.msra.mxu0 %v1425_v28  ;;  %12474 = vst [vmem:[#allocation52_spill] sm:$0xff] %v9144_v49  ;;  %12475 = vst [vmem:[#allocation53_spill] sm:$0xff] %v9149_v5  ;;  %v9166_v56 = vpop.trf.xlu1 }
 0x2b4   : > { %2481 = vmatprep.subr.bf16.mxu1 %v12459_v22  ;;  %2608 = vmatprep.subr.bf16.mxu0 %v12459_v22  ;;  %v1346_v4 = vpop.f32.mrf.mxu0  ;;  %12478 = vst [vmem:[#allocation55_spill] sm:$0xff] %v9166_v56 }
 0x2b5   : > { %v9170_v7 = vadd.f32 %v1346_v4, %v9038_v0 }
 0x2b6   : > { %v9164_v28 = vpop.f32.mrf.mxu0 }
 0x2b7   : > { %2482 = vmatpush1.bf16.msra.mxu1 %v1406_v50  ;;  %2609 = vmatpush1.bf16.msra.mxu0 %v1421_v36  ;;  %12477 = vst [vmem:[#allocation54_spill] sm:$0xff] %v9164_v28  ;;  %12479 = vst [vmem:[#allocation56_spill] sm:$0xff] %v9170_v7  ;;  %v9191_v26 = vpop.trf.xlu1 }
 0x2b8   : > { %2497 = vmatprep.subr.bf16.mxu1 %v12459_v22  ;;  %2610 = vmatprep.subr.bf16.mxu0 %v12459_v22  ;;  %v1350_v25 = vpop.f32.mrf.mxu0  ;;  %12483 = vst [vmem:[#allocation59_spill] sm:$0xff] %v9191_v26 }
 0x2b9   : > { %6601 = vmatmul.mubr.msk.bf16.gmra.mxu1 %vm1450_vm0, %v8804_v24  ;;  %v9178_v29 = vadd.f32 %v1350_v25, %v9038_v0 }
 0x2ba   : > { %1560 = vmatprep.mubr.bf16.mxu1 %v12459_v22  ;;  %v9183_v43 = vpop.f32.mrf.mxu0 }
 0x2bb   : > { %v1942_v14 = vpop.permute.xlu0 %1941  ;;  %2498 = vmatpush2.bf16.msra.mxu1 %v2465_v11  ;;  %2611 = vmatpush1.bf16.msra.mxu0 %v12476_v57  ;;  %12480 = vst [vmem:[#allocation57_spill] sm:$0xff] %v9178_v29  ;;  %12482 = vst [vmem:[#allocation58_spill] sm:$0xff] %v9183_v43 }
 0x2bc   : > { %6607 = vmatmul.mubr.msk.bf16.gmra.mxu0 %vm1450_vm0, %v1942_v14  ;;  %2764 = vmatprep.subr.bf16.mxu1 %v940_v48  ;;  %v1356_v17 = vpop.f32.mrf.mxu0  ;;  %v12491_v48 = vld [vmem:[#allocation36_spill] sm:$0xff] }
 0x2bd   : > { %2036 = vmatprep.mubr.bf16.mxu0 %v12459_v22  ;;  %2612 = vmatprep.subr.bf16.mxu0 %v12459_v22  ;;  %v9203_v50 = vadd.f32 %v1356_v17, %v9038_v0 }
 0x2be   : > { %v9198_v9 = vpop.f32.mrf.mxu0 }
 0x2bf   : > { %2613 = vmatpush1.bf16.msra.mxu0 %v12481_v52  ;;  %12485 = vst [vmem:[#allocation60_spill] sm:$0xff] %v9198_v9  ;;  %12486 = vst [vmem:[#allocation61_spill] sm:$0xff] %v9203_v50 }
 0x2c0   : > { %2614 = vmatprep.subr.bf16.mxu0 %v12459_v22  ;;  %v1360_v36 = vpop.f32.mrf.mxu0 }
 0x2c1   : > { %6602 = vmatmul.mubr.msk.bf16.gmra.mxu1 %vm1450_vm0, %v8823_v47  ;;  %v9207_v53 = vadd.f32 %v1360_v36, %v9038_v0 }
 0x2c2   : > { %1570 = vmatprep.mubr.bf16.mxu1 %v12459_v22  ;;  %v9212_v31 = vpop.f32.mrf.mxu0 }
 0x2c3   : > { %2615 = vmatpush1.bf16.msra.mxu0 %v12484_v38  ;;  %12487 = vst [vmem:[#allocation62_spill] sm:$0xff] %v9207_v53  ;;  %12489 = vst [vmem:[#allocation63_spill] sm:$0xff] %v9212_v31 }
 0x2c4   : > { %6608 = vmatmul.mubr.msk.bf16.gmra.mxu0 %vm1450_vm0, %v8999_v19  ;;  %2616 = vmatprep.subr.bf16.mxu0 %v12459_v22  ;;  %v9217_v19 = vpop.trf.xlu1  ;;  %v1366_v4 = vpop.f32.mrf.mxu0 }
 0x2c5   : > { %2046 = vmatprep.mubr.bf16.mxu0 %v12459_v22  ;;  %12490 = vst [vmem:[#allocation64_spill] sm:$0xff] %v9217_v19  ;;  %v9229_v21 = vadd.f32 %v1366_v4, %v9038_v0 }
 0x2c6   : > { %v9224_v18 = vpop.f32.mrf.mxu0 }
 0x2c7   : > { %2617 = vmatpush1.bf16.msra.mxu0 %v12488_v27  ;;  %12492 = vst [vmem:[#allocation36_spill] sm:$0xff] %v9224_v18  ;;  %12493 = vst [vmem:[#allocation65_spill] sm:$0xff] %v9229_v21 }
 0x2c8   : > { %2632 = vmatprep.subr.bf16.mxu0 %v12459_v22  ;;  %v1370_v14 = vpop.f32.mrf.mxu0  ;;  %v9231_v57 = vpop.trf.xlu1 }
 0x2c9   : > { %6603 = vmatmul.mubr.msk.bf16.gmra.mxu1 %vm1450_vm0, %v8840_v16  ;;  %12494 = vst [vmem:[#allocation66_spill] sm:$0xff] %v9231_v57  ;;  %v9234_v25 = vadd.f32 %v1370_v14, %v9038_v0 }
 0x2ca   : > { %1580 = vmatprep.mubr.bf16.mxu1 %v12459_v22  ;;  %v9236_v59 = vpop.f32.mrf.mxu0 }
 0x2cb   : > { %2633 = vmatpush2.bf16.msra.mxu0 %v2600_v51  ;;  %12495 = vst [vmem:[#allocation67_spill] sm:$0xff] %v9234_v25  ;;  %12496 = vst [vmem:[#allocation68_spill] sm:$0xff] %v9236_v59 }
 0x2cc   : > { %6609 = vmatmul.mubr.msk.bf16.gmra.mxu0 %vm1450_vm0, %v12491_v48  ;;  %3231 = vmatprep.subr.bf16.mxu0 %v12459_v22  ;;  %v1376_v17 = vpop.f32.mrf.mxu0  ;;  %v12502_v48 = vld [vmem:[#allocation35_spill] sm:$0xff] }
 0x2cd   : > { %2056 = vmatprep.mubr.bf16.mxu0 %v12459_v22  ;;  %v9248_v36 = vadd.f32 %v1376_v17, %v9038_v0 }
 0x2ce   : > { %v9244_v38 = vpop.f32.mrf.mxu0 }
 0x2cf   : > { %12498 = vst [vmem:[#allocation34_spill] sm:$0xff] %v9244_v38  ;;  %12499 = vst [vmem:[#allocation69_spill] sm:$0xff] %v9248_v36 }
 0x2d0   : > { %v1380_v51 = vpop.f32.mrf.mxu0 }
 0x2d1   : > { %6604 = vmatmul.mubr.msk.bf16.gmra.mxu1 %vm1450_vm0, %v12497_v44  ;;  %v9251_v27 = vadd.f32 %v1380_v51, %v9038_v0 }
 0x2d2   : > { %1590 = vmatprep.mubr.bf16.mxu1 %v12459_v22  ;;  %v9253_v4 = vpop.f32.mrf.mxu0 }
 0x2d3   : > { %v1948_v62 = vpop.permute.xlu1 %1947  ;;  %12500 = vst [vmem:[#allocation70_spill] sm:$0xff] %v9251_v27  ;;  %12501 = vst [vmem:[#allocation71_spill] sm:$0xff] %v9253_v4 }
 0x2d4   : > { %6610 = vmatmul.mubr.msk.bf16.gmra.mxu0 %vm1450_vm0, %v1948_v62  ;;  %v1386_v62 = vpop.f32.mrf.mxu0 }
 0x2d5   : > { %2066 = vmatprep.mubr.bf16.mxu0 %v12459_v22  ;;  %v9264_v17 = vadd.f32 %v1386_v62, %v9038_v0 }
 0x2d6   : > { %v9260_v32 = vpop.f32.mrf.mxu0 }
 0x2d7   : > { %v1950_v34 = vpop.permute.xlu1 %1949  ;;  %12503 = vst [vmem:[#allocation35_spill] sm:$0xff] %v9260_v32  ;;  %12504 = vst [vmem:[#allocation72_spill] sm:$0xff] %v9264_v17 }
 0x2d8   : > { %v1390_v51 = vpop.f32.mrf.mxu0 }
 0x2d9   : > { %6605 = vmatmul.mubr.msk.bf16.gmra.mxu1 %vm1450_vm0, %v12502_v48  ;;  %v9267_v8 = vadd.f32 %v1390_v51, %v9038_v0 }
 0x2da   : > { %v9269_v61 = vpop.f32.mrf.mxu0 }
 0x2db   : > { %12505 = vst [vmem:[#allocation73_spill] sm:$0xff] %v9267_v8  ;;  %12506 = vst [vmem:[#allocation74_spill] sm:$0xff] %v9269_v61  ;;  %v1952_v14 = vpop.permute.xlu1 %1951 }
 0x2dc   : > { %6611 = vmatmul.mubr.msk.bf16.gmra.mxu0 %vm1450_vm0, %v1950_v34  ;;  %v1396_v52 = vpop.f32.mrf.mxu0 }
 0x2dd   : > { %2076 = vmatprep.mubr.bf16.mxu0 %v12459_v22  ;;  %v9278_v62 = vadd.f32 %v1396_v52, %v9038_v0 }
 0x2de   : > { %v9274_v34 = vpop.f32.mrf.mxu0 }
 0x2df   : > { %12507 = vst [vmem:[#allocation75_spill] sm:$0xff] %v9274_v34  ;;  %12508 = vst [vmem:[#allocation76_spill] sm:$0xff] %v9278_v62  ;;  %v1954_v60 = vpop.permute.xlu1 %1953 }
 0x2e0   : > { %v1400_v6 = vpop.f32.mrf.mxu0 }
 0x2e1   : > { %v9281_v51 = vadd.f32 %v1400_v6, %v9038_v0 }
 0x2e2   : > { %v9288_v11 = vpop.f32.mrf.mxu0 }
 0x2e3   : > { %12509 = vst [vmem:[#allocation77_spill] sm:$0xff] %v9281_v51  ;;  %12510 = vst [vmem:[#allocation78_spill] sm:$0xff] %v9288_v11 }
 0x2e4   : > { %6612 = vmatmul.mubr.msk.bf16.gmra.mxu0 %vm1450_vm0, %v1952_v14  ;;  %v1956_v14 = vpop.permute.xlu1 %1955 }
 0x2e5   : > { %2086 = vmatprep.mubr.bf16.mxu0 %v12459_v22 }
 0x2ec   : > { %6613 = vmatmul.mubr.msk.bf16.gmra.mxu0 %vm1450_vm0, %v1954_v60 }
 0x2ed   : > { %2096 = vmatprep.mubr.bf16.mxu0 %v12459_v22 }
 0x2f4   : > { %6614 = vmatmul.mubr.msk.bf16.gmra.mxu0 %vm1450_vm0, %v1956_v14 }
 0x369   : > { %v9290_v34 = vpop.f32.mrf.mxu0 }
 0x36b   : > { %v9292_v52 = vpop.f32.mrf.mxu0 }
 0x36c   : > { %v2107_v0 = vsel %vm1601_vm3, %v9292_v52, -inf }
 0x36d   : > { %v9296_v6 = vpop.f32.mrf.mxu0  ;;  %v2108_v45 = vmax.f32 %v9290_v34, %v2107_v0 }
 0x36f   : > { %2109 = vmax.xlane.f32.xlu1 %v2108_v45  ;;  %v9299_v60 = vpop.f32.mrf.mxu0 }
 0x370   : > { %v2111_v14 = vsel %vm1601_vm3, %v9299_v60, -inf }
 0x371   : > { %v2112_v11 = vmax.f32 %v9296_v6, %v2111_v14 }
 0x373   : > { %2113 = vmax.xlane.f32.xlu0 %v2112_v11 }
 0x37c   : > { %v9304_v30 = vpop.f32.mrf.mxu0 }
 0x37e   : > { %v9306_v5 = vpop.f32.mrf.mxu0 }
 0x37f   : > { %v2115_v43 = vsel %vm1601_vm3, %v9306_v5, -inf }
 0x380   : > { %v9310_v28 = vpop.f32.mrf.mxu0  ;;  %v2116_v0 = vmax.f32 %v9304_v30, %v2115_v43 }
 0x382   : > { %2117 = vmax.xlane.f32.xlu1 %v2116_v0  ;;  %v9313_v45 = vpop.f32.mrf.mxu0 }
 0x383   : > { %v2119_v3 = vsel %vm1601_vm3, %v9313_v45, -inf }
 0x384   : > { %v9317_v31 = vpop.f32.mrf.mxu0  ;;  %v2120_v11 = vmax.f32 %v9310_v28, %v2119_v3 }
 0x386   : > { %2121 = vmax.xlane.f32.xlu1 %v2120_v11  ;;  %v9320_v14 = vpop.f32.mrf.mxu0 }
 0x387   : > { %v2123_v59 = vsel %vm1601_vm3, %v9320_v14, -inf }
 0x388   : > { %v9324_v18 = vpop.f32.mrf.mxu0  ;;  %v2124_v43 = vmax.f32 %v9317_v31, %v2123_v59 }
 0x38a   : > { %2125 = vmax.xlane.f32.xlu1 %v2124_v43  ;;  %v9327_v0 = vpop.f32.mrf.mxu0 }
 0x38b   : > { %v2127_v9 = vsel %vm1601_vm3, %v9327_v0, -inf }
 0x38c   : > { %v9331_v4 = vpop.f32.mrf.mxu0  ;;  %v2128_v3 = vmax.f32 %v9324_v18, %v2127_v9 }
 0x38e   : > { %2129 = vmax.xlane.f32.xlu0 %v2128_v3  ;;  %v9334_v11 = vpop.f32.mrf.mxu0 }
 0x38f   : > { %v2131_v38 = vsel %vm1601_vm3, %v9334_v11, -inf }
 0x390   : > { %v9338_v61 = vpop.f32.mrf.mxu0  ;;  %v2132_v59 = vmax.f32 %v9331_v4, %v2131_v38 }
 0x392   : > { %2133 = vmax.xlane.f32.xlu1 %v2132_v59  ;;  %v9341_v43 = vpop.f32.mrf.mxu0 }
 0x393   : > { %v2135_v32 = vsel %vm1601_vm3, %v9341_v43, -inf }
 0x394   : > { %v9345_v63 = vpop.f32.mrf.mxu0  ;;  %v2136_v9 = vmax.f32 %v9338_v61, %v2135_v32 }
 0x396   : > { %2137 = vmax.xlane.f32.xlu0 %v2136_v9  ;;  %v9348_v3 = vpop.f32.mrf.mxu0 }
 0x397   : > { %v2139_v33 = vsel %vm1601_vm3, %v9348_v3, -inf }
 0x398   : > { %v9352_v62 = vpop.f32.mrf.mxu0  ;;  %v2140_v38 = vmax.f32 %v9345_v63, %v2139_v33 }
 0x39a   : > { %2141 = vmax.xlane.f32.xlu1 %v2140_v38  ;;  %v9355_v59 = vpop.f32.mrf.mxu0 }
 0x39b   : > { %v2143_v51 = vsel %vm1601_vm3, %v9355_v59, -inf }
 0x39c   : > { %v9359_v20 = vpop.f32.mrf.mxu0  ;;  %v2144_v32 = vmax.f32 %v9352_v62, %v2143_v51 }
 0x39e   : > { %2145 = vmax.xlane.f32.xlu0 %v2144_v32  ;;  %v9362_v9 = vpop.f32.mrf.mxu0 }
 0x39f   : > { %v2147_v2 = vsel %vm1601_vm3, %v9362_v9, -inf }
 0x3a0   : > { %v9366_v12 = vpop.f32.mrf.mxu0  ;;  %v2148_v33 = vmax.f32 %v9359_v20, %v2147_v2 }
 0x3a2   : > { %2149 = vmax.xlane.f32.xlu1 %v2148_v33  ;;  %v9369_v38 = vpop.f32.mrf.mxu0 }
 0x3a3   : > { %v2151_v35 = vsel %vm1601_vm3, %v9369_v38, -inf }
 0x3a4   : > { %v9373_v54 = vpop.f32.mrf.mxu0  ;;  %v2152_v51 = vmax.f32 %v9366_v12, %v2151_v35 }
 0x3a6   : > { %2153 = vmax.xlane.f32.xlu0 %v2152_v51  ;;  %v9376_v32 = vpop.f32.mrf.mxu0 }
 0x3a7   : > { %v2155_v49 = vsel %vm1601_vm3, %v9376_v32, -inf }
 0x3a8   : > { %v9380_v7 = vpop.f32.mrf.mxu0  ;;  %v2156_v2 = vmax.f32 %v9373_v54, %v2155_v49 }
 0x3aa   : > { %2157 = vmax.xlane.f32.xlu1 %v2156_v2  ;;  %v9383_v33 = vpop.f32.mrf.mxu0 }
 0x3ab   : > { %v2159_v29 = vsel %vm1601_vm3, %v9383_v33, -inf }
 0x3ac   : > { %v9387_v50 = vpop.f32.mrf.mxu0  ;;  %v2160_v35 = vmax.f32 %v9380_v7, %v2159_v29 }
 0x3ae   : > { %2161 = vmax.xlane.f32.xlu0 %v2160_v35  ;;  %v9390_v51 = vpop.f32.mrf.mxu0 }
 0x3af   : > { %v2163_v53 = vsel %vm1601_vm3, %v9390_v51, -inf }
 0x3b0   : > { %v9394_v21 = vpop.f32.mrf.mxu0  ;;  %v2164_v49 = vmax.f32 %v9387_v50, %v2163_v53 }
 0x3b2   : > { %2165 = vmax.xlane.f32.xlu1 %v2164_v49  ;;  %v9397_v2 = vpop.f32.mrf.mxu0 }
 0x3b3   : > { %v2167_v25 = vsel %vm1601_vm3, %v9397_v2, -inf }
 0x3b4   : > { %v9401_v36 = vpop.f32.mrf.mxu0  ;;  %v2168_v29 = vmax.f32 %v9394_v21, %v2167_v25 }
 0x3b6   : > { %2169 = vmax.xlane.f32.xlu0 %v2168_v29  ;;  %v9404_v35 = vpop.f32.mrf.mxu0 }
 0x3b7   : > { %v2171_v27 = vsel %vm1601_vm3, %v9404_v35, -inf }
 0x3b8   : > { %v9408_v17 = vpop.f32.mrf.mxu0  ;;  %v2172_v53 = vmax.f32 %v9401_v36, %v2171_v27 }
 0x3b9   : > { %v2175_v8 = vsel %vm1670_vm4, %v9408_v17, -inf }
 0x3ba   : > { %2173 = vmax.xlane.f32.xlu1 %v2172_v53  ;;  %v9411_v49 = vpop.f32.mrf.mxu0 }
 0x3bb   : > { %v2176_v25 = vsel %vm1672_vm5, %v9411_v49, -inf }
 0x3bc   : > { %v2177_v29 = vmax.f32 %v2175_v8, %v2176_v25 }
 0x3be   : > { %2178 = vmax.xlane.f32.xlu0 %v2177_v29 }
 0x3f8   : > { %v2110_v26 = vpop.xlane.xlu1 %2109 }
 0x3f9   : > { %v2180_v56 = vsub.f32 %v9290_v34, %v2110_v26  ;;  %v2181_v41 = vsub.f32 %v9292_v52, %v2110_v26 }
 0x3fb   : > { %v2216_v1 = vmul.f32 1.442695, %v2180_v56  ;;  %v2218_v27 = vmul.f32 1.442695, %v2181_v41 }
 0x3fc   : > { %v2114_v57 = vpop.xlane.xlu0 %2113 }
 0x3fd   : > { %7188 = vpow2.f32 %v2216_v1  ;;  %v2182_v53 = vsub.f32 %v9296_v6, %v2114_v57  ;;  %v2183_v19 = vsub.f32 %v9299_v60, %v2114_v57 }
 0x3fe   : > { %7190 = vpow2.f32 %v2218_v27 }
 0x3ff   : > { %v2220_v22 = vmul.f32 1.442695, %v2182_v53  ;;  %v2222_v10 = vmul.f32 1.442695, %v2183_v19 }
 0x401   : > { %7192 = vpow2.f32 %v2220_v22 }
 0x402   : > { %7194 = vpow2.f32 %v2222_v10 }
 0x40a   : > { %v9421_v8 = vpop.eup %7188 }
 0x40b   : > { %v9423_v25 = vpop.eup %7190  ;;  %v2118_v34 = vpop.xlane.xlu1 %2117 }
 0x40c   : > { %v2184_v26 = vsub.f32 %v9304_v30, %v2118_v34  ;;  %v2185_v41 = vsub.f32 %v9306_v5, %v2118_v34  ;;  %v2288_v1 = vsel %vm1601_vm3, %v9423_v25, 0.0 }
 0x40d   : > { %v2289_v56 = vadd.f32 %v9421_v8, %v2288_v1 }
 0x40e   : > { %v9430_v57 = vpop.eup %7192  ;;  %v2224_v52 = vmul.f32 1.442695, %v2184_v26  ;;  %v2226_v19 = vmul.f32 1.442695, %v2185_v41 }
 0x40f   : > { %v9432_v22 = vpop.eup %7194  ;;  %2290 = vadd.xlane.f32.xlu1 %v2289_v56  ;;  %v2122_v10 = vpop.xlane.xlu1 %2121 }
 0x410   : > { %7196 = vpow2.f32 %v2224_v52  ;;  %v2186_v6 = vsub.f32 %v9310_v28, %v2122_v10  ;;  %v2187_v30 = vsub.f32 %v9313_v45, %v2122_v10  ;;  %v2292_v5 = vsel %vm1601_vm3, %v9432_v22, 0.0 }
 0x411   : > { %7198 = vpow2.f32 %v2226_v19  ;;  %v2293_v60 = vadd.f32 %v9430_v57, %v2292_v5 }
 0x412   : > { %v2228_v29 = vmul.f32 1.442695, %v2186_v6  ;;  %v2230_v27 = vmul.f32 1.442695, %v2187_v30 }
 0x413   : > { %2294 = vadd.xlane.f32.xlu0 %v2293_v60  ;;  %v2126_v53 = vpop.xlane.xlu1 %2125 }
 0x414   : > { %7200 = vpow2.f32 %v2228_v29  ;;  %v2188_v34 = vsub.f32 %v9317_v31, %v2126_v53  ;;  %v2189_v26 = vsub.f32 %v9320_v14, %v2126_v53 }
 0x415   : > { %7202 = vpow2.f32 %v2230_v27 }
 0x416   : > { %v2232_v41 = vmul.f32 1.442695, %v2188_v34  ;;  %v2234_v28 = vmul.f32 1.442695, %v2189_v26 }
 0x417   : > { %v2130_v1 = vpop.xlane.xlu0 %2129 }
 0x418   : > { %7204 = vpow2.f32 %v2232_v41  ;;  %v2190_v45 = vsub.f32 %v9324_v18, %v2130_v1  ;;  %v2191_v56 = vsub.f32 %v9327_v0, %v2130_v1 }
 0x419   : > { %7206 = vpow2.f32 %v2234_v28 }
 0x41a   : > { %v2236_v52 = vmul.f32 1.442695, %v2190_v45  ;;  %v2238_v19 = vmul.f32 1.442695, %v2191_v56 }
 0x41b   : > { %v2134_v10 = vpop.xlane.xlu1 %2133 }
 0x41c   : > { %7208 = vpow2.f32 %v2236_v52  ;;  %v2192_v6 = vsub.f32 %v9331_v4, %v2134_v10  ;;  %v2193_v31 = vsub.f32 %v9334_v11, %v2134_v10 }
 0x41d   : > { %v9445_v30 = vpop.eup %7196  ;;  %7210 = vpow2.f32 %v2238_v19 }
 0x41e   : > { %v9447_v14 = vpop.eup %7198  ;;  %v2240_v5 = vmul.f32 1.442695, %v2192_v6  ;;  %v2242_v60 = vmul.f32 1.442695, %v2193_v31 }
 0x41f   : > { %v2138_v29 = vpop.xlane.xlu0 %2137  ;;  %v2296_v18 = vsel %vm1601_vm3, %v9447_v14, 0.0 }
 0x420   : > { %7212 = vpow2.f32 %v2240_v5  ;;  %v2194_v0 = vsub.f32 %v9338_v61, %v2138_v29  ;;  %v2195_v27 = vsub.f32 %v9341_v43, %v2138_v29  ;;  %v2297_v4 = vadd.f32 %v9445_v30, %v2296_v18 }
 0x421   : > { %v9454_v53 = vpop.eup %7200  ;;  %7214 = vpow2.f32 %v2242_v60 }
 0x422   : > { %v9456_v11 = vpop.eup %7202  ;;  %v2244_v34 = vmul.f32 1.442695, %v2194_v0  ;;  %v2246_v26 = vmul.f32 1.442695, %v2195_v27  ;;  %2298 = vadd.xlane.f32.xlu1 %v2297_v4 }
 0x423   : > { %v2142_v41 = vpop.xlane.xlu1 %2141  ;;  %v2300_v28 = vsel %vm1601_vm3, %v9456_v11, 0.0 }
 0x424   : > { %7216 = vpow2.f32 %v2244_v34  ;;  %v2196_v1 = vsub.f32 %v9345_v63, %v2142_v41  ;;  %v2197_v61 = vsub.f32 %v9348_v3, %v2142_v41  ;;  %v2301_v43 = vadd.f32 %v9454_v53, %v2300_v28 }
 0x425   : > { %v9463_v45 = vpop.eup %7204  ;;  %7218 = vpow2.f32 %v2246_v26 }
 0x426   : > { %v9465_v56 = vpop.eup %7206  ;;  %v2248_v52 = vmul.f32 1.442695, %v2196_v1  ;;  %v2250_v19 = vmul.f32 1.442695, %v2197_v61  ;;  %2302 = vadd.xlane.f32.xlu0 %v2301_v43 }
 0x427   : > { %v2146_v10 = vpop.xlane.xlu0 %2145  ;;  %v2304_v6 = vsel %vm1601_vm3, %v9465_v56, 0.0 }
 0x428   : > { %7220 = vpow2.f32 %v2248_v52  ;;  %v2198_v31 = vsub.f32 %v9352_v62, %v2146_v10  ;;  %v2199_v63 = vsub.f32 %v9355_v59, %v2146_v10  ;;  %v2305_v3 = vadd.f32 %v9463_v45, %v2304_v6 }
 0x429   : > { %v9472_v5 = vpop.eup %7208  ;;  %7222 = vpow2.f32 %v2250_v19 }
 0x42a   : > { %v9474_v60 = vpop.eup %7210  ;;  %v2252_v29 = vmul.f32 1.442695, %v2198_v31  ;;  %v2254_v18 = vmul.f32 1.442695, %v2199_v63  ;;  %2306 = vadd.xlane.f32.xlu1 %v2305_v3 }
 0x42b   : > { %v2150_v0 = vpop.xlane.xlu1 %2149  ;;  %v2308_v27 = vsel %vm1601_vm3, %v9474_v60, 0.0 }
 0x42c   : > { %7224 = vpow2.f32 %v2252_v29  ;;  %v2200_v4 = vsub.f32 %v9359_v20, %v2150_v0  ;;  %v2201_v62 = vsub.f32 %v9362_v9, %v2150_v0  ;;  %v2309_v59 = vadd.f32 %v9472_v5, %v2308_v27 }
 0x42d   : > { %v9481_v34 = vpop.eup %7212  ;;  %7226 = vpow2.f32 %v2254_v18 }
 0x42e   : > { %v9483_v26 = vpop.eup %7214  ;;  %v2256_v41 = vmul.f32 1.442695, %v2200_v4  ;;  %v2258_v28 = vmul.f32 1.442695, %v2201_v62  ;;  %2310 = vadd.xlane.f32.xlu0 %v2309_v59 }
 0x42f   : > { %v2154_v1 = vpop.xlane.xlu0 %2153  ;;  %v2312_v61 = vsel %vm1601_vm3, %v9483_v26, 0.0 }
 0x430   : > { %7228 = vpow2.f32 %v2256_v41  ;;  %v2202_v43 = vsub.f32 %v9366_v12, %v2154_v1  ;;  %v2203_v20 = vsub.f32 %v9369_v38, %v2154_v1  ;;  %v2313_v9 = vadd.f32 %v9481_v34, %v2312_v61 }
 0x431   : > { %v9490_v52 = vpop.eup %7216  ;;  %7230 = vpow2.f32 %v2258_v28 }
 0x432   : > { %v9492_v19 = vpop.eup %7218  ;;  %v2260_v10 = vmul.f32 1.442695, %v2202_v43  ;;  %v2262_v6 = vmul.f32 1.442695, %v2203_v20  ;;  %2314 = vadd.xlane.f32.xlu1 %v2313_v9 }
 0x433   : > { %v2158_v31 = vpop.xlane.xlu1 %2157  ;;  %v2316_v63 = vsel %vm1601_vm3, %v9492_v19, 0.0 }
 0x434   : > { %7232 = vpow2.f32 %v2260_v10  ;;  %v2204_v3 = vsub.f32 %v9373_v54, %v2158_v31  ;;  %v2205_v12 = vsub.f32 %v9376_v32, %v2158_v31  ;;  %v2317_v38 = vadd.f32 %v9490_v52, %v2316_v63  ;;  %v9521_v31 = vpop.f32.mrf.mxu1 }
 0x435   : > { %v9499_v29 = vpop.eup %7220  ;;  %7234 = vpow2.f32 %v2262_v6 }
 0x436   : > { %12511 = vst [vmem:[#allocation79_spill] sm:$0xff] %v9499_v29  ;;  %v9501_v18 = vpop.eup %7222  ;;  %v2264_v0 = vmul.f32 1.442695, %v2204_v3  ;;  %v2266_v27 = vmul.f32 1.442695, %v2205_v12  ;;  %2318 = vadd.xlane.f32.xlu0 %v2317_v38 }
 0x437   : > { %v2162_v4 = vpop.xlane.xlu0 %2161  ;;  %v2320_v62 = vsel %vm1601_vm3, %v9501_v18, 0.0 }
 0x438   : > { %7236 = vpow2.f32 %v2264_v0  ;;  %v2206_v59 = vsub.f32 %v9380_v7, %v2162_v4  ;;  %v2207_v54 = vsub.f32 %v9383_v33, %v2162_v4  ;;  %v2321_v32 = vadd.f32 %v9499_v29, %v2320_v62  ;;  %v9532_v62 = vpop.f32.mrf.mxu1 }
 0x439   : > { %v9508_v41 = vpop.eup %7224  ;;  %7238 = vpow2.f32 %v2266_v27  ;;  %v1602_v29 = vsel %vm1601_vm3, %v9532_v62, -inf }
 0x43a   : > { %12512 = vst [vmem:[#allocation80_spill] sm:$0xff] %v9508_v41  ;;  %v9510_v28 = vpop.eup %7226  ;;  %v2268_v1 = vmul.f32 1.442695, %v2206_v59  ;;  %v2270_v61 = vmul.f32 1.442695, %v2207_v54  ;;  %2322 = vadd.xlane.f32.xlu1 %v2321_v32 }
 0x43b   : > { %12513 = vst [vmem:[#allocation81_spill] sm:$0xff] %v9510_v28  ;;  %v2166_v43 = vpop.xlane.xlu1 %2165  ;;  %v2324_v20 = vsel %vm1601_vm3, %v9510_v28, 0.0 }
 0x43c   : > { %7240 = vpow2.f32 %v2268_v1  ;;  %v2208_v9 = vsub.f32 %v9387_v50, %v2166_v43  ;;  %v2209_v7 = vsub.f32 %v9390_v51, %v2166_v43  ;;  %v2325_v33 = vadd.f32 %v9508_v41, %v2324_v20 }
 0x43d   : > { %v9517_v10 = vpop.eup %7228  ;;  %7242 = vpow2.f32 %v2270_v61 }
 0x43e   : > { %12514 = vst [vmem:[#allocation82_spill] sm:$0xff] %v9517_v10  ;;  %v9519_v6 = vpop.eup %7230  ;;  %v2272_v63 = vmul.f32 1.442695, %v2208_v9  ;;  %v2274_v3 = vmul.f32 1.442695, %v2209_v7  ;;  %2326 = vadd.xlane.f32.xlu0 %v2325_v33  ;;  %v9543_v9 = vpop.f32.mrf.mxu1 }
 0x43f   : > { %12515 = vst [vmem:[#allocation83_spill] sm:$0xff] %v9519_v6  ;;  %v2170_v12 = vpop.xlane.xlu0 %2169  ;;  %v2328_v38 = vsel %vm1601_vm3, %v9519_v6, 0.0 }
 0x440   : > { %7244 = vpow2.f32 %v2272_v63  ;;  %v2210_v50 = vsub.f32 %v9394_v21, %v2170_v12  ;;  %v2211_v51 = vsub.f32 %v9397_v2, %v2170_v12  ;;  %v2329_v0 = vadd.f32 %v9517_v10, %v2328_v38 }
 0x441   : > { %v9528_v27 = vpop.eup %7232  ;;  %7246 = vpow2.f32 %v2274_v3 }
 0x442   : > { %12516 = vst [vmem:[#allocation84_spill] sm:$0xff] %v9528_v27  ;;  %v9530_v4 = vpop.eup %7234  ;;  %v2276_v59 = vmul.f32 1.442695, %v2210_v50  ;;  %v2278_v54 = vmul.f32 1.442695, %v2211_v51  ;;  %2330 = vadd.xlane.f32.xlu1 %v2329_v0  ;;  %v9554_v51 = vpop.f32.mrf.mxu1 }
 0x443   : > { %12517 = vst [vmem:[#allocation85_spill] sm:$0xff] %v9530_v4  ;;  %v2174_v32 = vpop.xlane.xlu1 %2173  ;;  %v2332_v1 = vsel %vm1601_vm3, %v9530_v4, 0.0  ;;  %12522 = vst [vmem:[#allocation90_spill] sm:$0xff] %v9554_v51 }
 0x444   : > { %7248 = vpow2.f32 %v2276_v59  ;;  %v2212_v21 = vsub.f32 %v9401_v36, %v2174_v32  ;;  %v2213_v2 = vsub.f32 %v9404_v35, %v2174_v32  ;;  %v2333_v61 = vadd.f32 %v9528_v27, %v2332_v1  ;;  %v9563_v1 = vpop.f32.mrf.mxu1 }
 0x445   : > { %v9539_v43 = vpop.eup %7236  ;;  %7250 = vpow2.f32 %v2278_v54 }
 0x446   : > { %12518 = vst [vmem:[#allocation86_spill] sm:$0xff] %v9539_v43  ;;  %v9541_v20 = vpop.eup %7238  ;;  %v2280_v7 = vmul.f32 1.442695, %v2212_v21  ;;  %v2282_v33 = vmul.f32 1.442695, %v2213_v2  ;;  %2334 = vadd.xlane.f32.xlu0 %v2333_v61 }
 0x447   : > { %12519 = vst [vmem:[#allocation87_spill] sm:$0xff] %v9541_v20  ;;  %v2179_v63 = vpop.xlane.xlu0 %2178  ;;  %v2336_v3 = vsel %vm1601_vm3, %v9541_v20, 0.0 }
 0x448   : > { %7252 = vpow2.f32 %v2280_v7  ;;  %v2214_v36 = vsub.f32 %v9408_v17, %v2179_v63  ;;  %v2215_v35 = vsub.f32 %v9411_v49, %v2179_v63  ;;  %v2337_v12 = vadd.f32 %v9539_v43, %v2336_v3 }
 0x449   : > { %v9550_v38 = vpop.eup %7240  ;;  %7254 = vpow2.f32 %v2282_v33  ;;  %v9572_v33 = vpop.f32.mrf.mxu1 }
 0x44a   : > { %12520 = vst [vmem:[#allocation88_spill] sm:$0xff] %v9550_v38  ;;  %v9552_v50 = vpop.eup %7242  ;;  %v2284_v0 = vmul.f32 1.442695, %v2214_v36  ;;  %v2286_v59 = vmul.f32 1.442695, %v2215_v35  ;;  %2338 = vadd.xlane.f32.xlu1 %v2337_v12 }
 0x44b   : > { %12521 = vst [vmem:[#allocation89_spill] sm:$0xff] %v9552_v50  ;;  %v2340_v54 = vsel %vm1601_vm3, %v9552_v50, 0.0  ;;  %v9581_v12 = vpop.f32.mrf.mxu1 }
 0x44c   : > { %7256 = vpow2.f32 %v2284_v0  ;;  %v2341_v17 = vadd.f32 %v9550_v38, %v2340_v54 }
 0x44d   : > { %v9559_v32 = vpop.eup %7244  ;;  %7258 = vpow2.f32 %v2286_v59 }
 0x44e   : > { %12523 = vst [vmem:[#allocation91_spill] sm:$0xff] %v9559_v32  ;;  %v9561_v49 = vpop.eup %7246  ;;  %2342 = vadd.xlane.f32.xlu0 %v2341_v17 }
 0x44f   : > { %12524 = vst [vmem:[#allocation92_spill] sm:$0xff] %v9561_v49  ;;  %v2344_v21 = vsel %vm1601_vm3, %v9561_v49, 0.0 }
 0x450   : > { %v2345_v2 = vadd.f32 %v9559_v32, %v2344_v21  ;;  %v9590_v21 = vpop.f32.mrf.mxu1 }
 0x451   : > { %v9568_v61 = vpop.eup %7248 }
 0x452   : > { %12525 = vst [vmem:[#allocation93_spill] sm:$0xff] %v9568_v61  ;;  %v9570_v7 = vpop.eup %7250  ;;  %2346 = vadd.xlane.f32.xlu1 %v2345_v2 }
 0x453   : > { %12526 = vst [vmem:[#allocation94_spill] sm:$0xff] %v9570_v7  ;;  %v2348_v63 = vsel %vm1601_vm3, %v9570_v7, 0.0 }
 0x454   : > { %v2349_v3 = vadd.f32 %v9568_v61, %v2348_v63 }
 0x455   : > { %v9577_v36 = vpop.eup %7252 }
 0x456   : > { %12527 = vst [vmem:[#allocation95_spill] sm:$0xff] %v9577_v36  ;;  %v9579_v35 = vpop.eup %7254  ;;  %2350 = vadd.xlane.f32.xlu0 %v2349_v3  ;;  %v9596_v3 = vpop.f32.mrf.mxu1 }
 0x457   : > { %12528 = vst [vmem:[#allocation96_spill] sm:$0xff] %v9579_v35  ;;  %v2352_v0 = vsel %vm1601_vm3, %v9579_v35, 0.0 }
 0x458   : > { %v2353_v59 = vadd.f32 %v9577_v36, %v2352_v0  ;;  %v9598_v35 = vpop.f32.mrf.mxu1 }
 0x459   : > { %v9586_v54 = vpop.eup %7256 }
 0x45a   : > { %12529 = vst [vmem:[#allocation97_spill] sm:$0xff] %v9586_v54  ;;  %v9588_v17 = vpop.eup %7258  ;;  %2354 = vadd.xlane.f32.xlu1 %v2353_v59  ;;  %v2356_v2 = vsel %vm1670_vm4, %v9586_v54, 0.0  ;;  %v9600_v0 = vpop.f32.mrf.mxu1 }
 0x45b   : > { %12530 = vst [vmem:[#allocation98_spill] sm:$0xff] %v9588_v17  ;;  %v2357_v63 = vsel %vm1672_vm5, %v9588_v17, 0.0 }
 0x45c   : > { %v2358_v61 = vadd.f32 %v2357_v63, %v2356_v2  ;;  %v9602_v36 = vpop.f32.mrf.mxu1 }
 0x45e   : > { %2359 = vadd.xlane.f32.xlu0 %v2358_v61  ;;  %v9605_v59 = vpop.f32.mrf.mxu1 }
 0x460   : > { %v9608_v54 = vpop.f32.mrf.mxu1 }
 0x462   : > { %v9612_v61 = vpop.f32.mrf.mxu1 }
 0x464   : > { %v9616_v2 = vpop.f32.mrf.mxu1 }
 0x466   : > { %v9620_v63 = vpop.f32.mrf.mxu1 }
 0x468   : > { %v9624_v17 = vpop.f32.mrf.mxu1 }
 0x46a   : > { %v9628_v32 = vpop.f32.mrf.mxu1 }
 0x46b   : > { %2707 = vrot.lane.b32.xlu1 %v8802_v23, %s8336_s4 }
 0x46c   : > { %v9632_v7 = vpop.f32.mrf.mxu1 }
 0x46e   : > { %v9636_v49 = vpop.f32.mrf.mxu1 }
 0x46f   : > { %2711 = vrot.lane.b32.xlu1 %v8838_v15, %s8336_s4 }
 0x473   : > { %2713 = vrot.lane.b32.xlu1 %v8855_v40, %s8336_s4 }
 0x474   : > { %2709 = vrot.lane.b32.xlu0 %v8821_v46, %s8336_s4 }
 0x477   : > { %2715 = vrot.lane.b32.xlu1 %v8804_v24, %s8336_s4 }
 0x478   : > { %2717 = vrot.lane.b32.xlu0 %v8823_v47, %s8336_s4 }
 0x47b   : > { %2719 = vrot.lane.b32.xlu1 %v8840_v16, %s8336_s4 }
 0x47c   : > { %2721 = vrot.lane.b32.xlu0 %v12497_v44, %s8336_s4 }
 0x47f   : > { %2723 = vrot.lane.b32.xlu1 %v12502_v48, %s8336_s4 }
 0x480   : > { %3354 = vrot.lane.b32.xlu0 %v8802_v23, %s8337_s21  ;;  %v9640_v23 = vpop.f32.mrf.mxu1 }
 0x483   : > { %3356 = vrot.lane.b32.xlu1 %v8821_v46, %s8337_s21  ;;  %v9642_v46 = vpop.f32.mrf.mxu1 }
 0x484   : > { %3358 = vrot.lane.b32.xlu0 %v8838_v15, %s8337_s21 }
 0x487   : > { %3360 = vrot.lane.b32.xlu1 %v8855_v40, %s8337_s21  ;;  %v9644_v40 = vpop.f32.mrf.mxu1 }
 0x488   : > { %3362 = vrot.lane.b32.xlu0 %v8804_v24, %s8337_s21 }
 0x489   : > { %v9646_v38 = vpop.f32.mrf.mxu1 }
 0x48b   : > { %3364 = vrot.lane.b32.xlu1 %v8823_v47, %s8337_s21  ;;  %v9648_v47 = vpop.f32.mrf.mxu1 }
 0x48c   : > { %3366 = vrot.lane.b32.xlu0 %v8840_v16, %s8337_s21 }
 0x48d   : > { %v9650_v16 = vpop.f32.mrf.mxu1 }
 0x48f   : > { %3368 = vrot.lane.b32.xlu1 %v12497_v44, %s8337_s21  ;;  %v9652_v50 = vpop.f32.mrf.mxu1 }
 0x490   : > { %3370 = vrot.lane.b32.xlu0 %v12502_v48, %s8337_s21  ;;  %v1606_v48 = vsel %vm1601_vm3, %v9554_v51, -inf  ;;  %v1610_v51 = vsel %vm1601_vm3, %v9572_v33, -inf }
 0x491   : > { %v1607_v4 = vmax.f32 %v9543_v9, %v1606_v48  ;;  %v9665_v28 = vpop.f32.mrf.mxu1 }
 0x498   : > { %v2291_v15 = vpop.xlane.xlu1 %2290 }
 0x499   : > { %7260 = vrcp.f32 %v2291_v15 }
 0x49c   : > { %v2295_v24 = vpop.xlane.xlu0 %2294 }
 0x49d   : > { %7262 = vrcp.f32 %v2295_v24 }
 0x4a6   : > { %v7261_v43 = vpop.eup %7260 }
 0x4a7   : > { %v2380_v27 = vmul.f32 %v7261_v43, %v9423_v25  ;;  %v2379_v24 = vmul.f32 %v7261_v43, %v9421_v8  ;;  %v939_v25 = vpack.c.bf16 %v9146_v39, %v9128_v58  ;;  %v1618_v43 = vsel %vm1601_vm3, %v9598_v35, -inf }
 0x4a8   : > { %v1614_v58 = vsel %vm1601_vm3, %v9590_v21, -inf  ;;  %v937_v39 = vpack.c.bf16 %v9096_v13, %v9059_v55  ;;  %v1622_v55 = vsel %vm1601_vm3, %v9602_v36, -inf }
 0x4a9   : > { %v1623_v48 = vmax.f32 %v9600_v0, %v1622_v55 }
 0x4aa   : > { %v7263_v44 = vpop.eup %7262 }
 0x4ab   : > { %v2299_v20 = vpop.xlane.xlu1 %2298  ;;  %v2382_v15 = vmul.f32 %v7263_v44, %v9432_v22  ;;  %v2381_v10 = vmul.f32 %v7263_v44, %v9430_v57  ;;  %v12531_v57 = vld [vmem:[#allocation37_spill] sm:$0xff] }
 0x4ac   : > { %7264 = vrcp.f32 %v2299_v20  ;;  %v938_v22 = vpack.c.bf16 %v9012_v42, %v12531_v57  ;;  %v9676_v20 = vpop.f32.mrf.mxu1 }
 0x4ad   : > { %v2416_v6 = vpack.c.bf16 %v2382_v15, %v2380_v27  ;;  %v2415_v41 = vpack.c.bf16 %v2381_v10, %v2379_v24  ;;  %v1603_v10 = vmax.f32 %v9521_v31, %v1602_v29  ;;  %v1611_v27 = vmax.f32 %v9563_v1, %v1610_v51  ;;  %v12532_v29 = vld [vmem:[#allocation51_spill] sm:$0xff] }
 0x4ae   : > { %v1626_v51 = vsel %vm1601_vm3, %v9608_v54, -inf  ;;  %v9688_v44 = vpop.f32.mrf.mxu1  ;;  %v1630_v15 = vsel %vm1601_vm3, %v9616_v2, -inf }
 0x4af   : > { %1608 = vmax.xlane.f32.xlu0 %v1607_v4  ;;  %6615 = vmatprep.mubr.msk.bf16.mxu1 %vm1601_vm3, %v2416_v6  ;;  %v2303_v8 = vpop.xlane.xlu0 %2302  ;;  %v1619_v6 = vmax.f32 %v9596_v3, %v1618_v43  ;;  %v1615_v4 = vmax.f32 %v9581_v12, %v1614_v58  ;;  %v1642_v43 = vsel %vm1601_vm3, %v9640_v23, -inf }
 0x4b0   : > { %7266 = vrcp.f32 %v2303_v8  ;;  %2500 = vmatmul.mubr.bf16.vlgmr.msra.gmra.mxu1 %v2415_v41  ;;  %v944_v41 = vpack.c.bf16 %v12532_v29, %v9120_v37  ;;  %v1627_v37 = vmax.f32 %v9605_v59, %v1626_v51  ;;  %v9698_v8 = vpop.f32.mrf.mxu1 }
 0x4b1   : > { %2765 = vmatpush1.bf16.msra.mxu1 %v939_v25  ;;  %v1634_v25 = vsel %vm1601_vm3, %v9624_v17, -inf }
 0x4b2   : > { %2766 = vmatprep.subr.bf16.mxu1 %v938_v22  ;;  %v1631_v22 = vmax.f32 %v9612_v61, %v1630_v15 }
 0x4b3   : > { %1604 = vmax.xlane.f32.xlu1 %v1603_v10  ;;  %v2307_v42 = vpop.xlane.xlu1 %2306  ;;  %1612 = vmax.xlane.f32.xlu0 %v1611_v27  ;;  %v1635_v27 = vmax.f32 %v9620_v63, %v1634_v25 }
 0x4b4   : > { %7268 = vrcp.f32 %v2307_v42  ;;  %v9707_v42 = vpop.f32.mrf.mxu1 }
 0x4b5   : > { %2767 = vmatpush1.bf16.msra.mxu1 %v937_v39  ;;  %v1638_v39 = vsel %vm1601_vm3, %v9632_v7, -inf }
 0x4b6   : > { %3411 = vmatprep.subr.bf16.mxu1 %v944_v41 }
 0x4b7   : > { %1620 = vmax.xlane.f32.xlu1 %v1619_v6  ;;  %1616 = vmax.xlane.f32.xlu0 %v1615_v4  ;;  %v2311_v13 = vpop.xlane.xlu0 %2310 }
 0x4b8   : > { %7270 = vrcp.f32 %v2311_v13  ;;  %v1646_v13 = vsel %vm1601_vm3, %v9644_v40, -inf }
 0x4b9   : > { %v7265_v24 = vpop.eup %7264  ;;  %v1647_v15 = vmax.f32 %v9642_v46, %v1646_v13 }
 0x4ba   : > { %v2384_v58 = vmul.f32 %v7265_v24, %v9447_v14  ;;  %v2383_v41 = vmul.f32 %v7265_v24, %v9445_v30  ;;  %v1643_v14 = vmax.f32 %v9636_v49, %v1642_v43  ;;  %v9718_v30 = vpop.f32.mrf.mxu1 }
 0x4bb   : > { %1628 = vmax.xlane.f32.xlu1 %v1627_v37  ;;  %v2315_v57 = vpop.xlane.xlu1 %2314  ;;  %1624 = vmax.xlane.f32.xlu0 %v1623_v48  ;;  %v1639_v37 = vmax.f32 %v9628_v32, %v1638_v39 }
 0x4bc   : > { %7272 = vrcp.f32 %v2315_v57  ;;  %v1654_v57 = vsel %vm1601_vm3, %v9652_v50, -inf }
 0x4bd   : > { %v7267_v10 = vpop.eup %7266 }
 0x4be   : > { %v2386_v29 = vmul.f32 %v7267_v10, %v9456_v11  ;;  %v2385_v6 = vmul.f32 %v7267_v10, %v9454_v53  ;;  %v1650_v11 = vsel %vm1601_vm3, %v9648_v47, -inf }
 0x4bf   : > { %1636 = vmax.xlane.f32.xlu1 %v1635_v27  ;;  %1632 = vmax.xlane.f32.xlu0 %v1631_v22  ;;  %v2319_v4 = vpop.xlane.xlu0 %2318  ;;  %v1651_v25 = vmax.f32 %v9646_v38, %v1650_v11  ;;  %v1658_v22 = vsel %vm1601_vm3, %v9676_v20, -inf  ;;  %v9728_v27 = vpop.f32.mrf.mxu1 }
 0x4c0   : > { %7274 = vrcp.f32 %v2319_v4  ;;  %v2418_v51 = vpack.c.bf16 %v2386_v29, %v2384_v58  ;;  %v2417_v55 = vpack.c.bf16 %v2385_v6, %v2383_v41  ;;  %v1659_v4 = vmax.f32 %v9665_v28, %v1658_v22 }
 0x4c1   : > { %v7269_v48 = vpop.eup %7268 }
 0x4c2   : > { %6616 = vmatprep.mubr.msk.bf16.mxu1 %vm1601_vm3, %v2418_v51  ;;  %v2388_v10 = vmul.f32 %v7269_v48, %v9465_v56  ;;  %v2387_v58 = vmul.f32 %v7269_v48, %v9463_v45  ;;  %v1655_v51 = vmax.f32 %v9650_v16, %v1654_v57  ;;  %v1662_v56 = vsel %vm1601_vm3, %v9698_v8, -inf }
 0x4c3   : > { %1644 = vmax.xlane.f32.xlu1 %v1643_v14  ;;  %v2323_v53 = vpop.xlane.xlu1 %2322  ;;  %1640 = vmax.xlane.f32.xlu0 %v1639_v37  ;;  %v1663_v48 = vmax.f32 %v9688_v44, %v1662_v56  ;;  %v1671_v57 = vsel %vm1670_vm4, %v9728_v27, -inf }
 0x4c4   : > { %2508 = vmatmul.mubr.bf16.gmra.mxu1 %v2417_v55  ;;  %7276 = vrcp.f32 %v2323_v53  ;;  %v9739_v55 = vpop.f32.mrf.mxu1 }
 0x4c5   : > { %v7271_v24 = vpop.eup %7270  ;;  %v1673_v37 = vsel %vm1672_vm5, %v9739_v55, -inf }
 0x4c6   : > { %v2390_v43 = vmul.f32 %v7271_v24, %v9474_v60  ;;  %v2389_v39 = vmul.f32 %v7271_v24, %v9472_v5  ;;  %v1666_v60 = vsel %vm1601_vm3, %v9718_v30, -inf }
 0x4c7   : > { %1652 = vmax.xlane.f32.xlu1 %v1651_v25  ;;  %1648 = vmax.xlane.f32.xlu0 %v1647_v15  ;;  %v2327_v29 = vpop.xlane.xlu0 %2326  ;;  %v1667_v13 = vmax.f32 %v9707_v42, %v1666_v60 }
 0x4c8   : > { %7278 = vrcp.f32 %v2327_v29  ;;  %v2420_v41 = vpack.c.bf16 %v2390_v43, %v2388_v10  ;;  %v2419_v6 = vpack.c.bf16 %v2389_v39, %v2387_v58  ;;  %v1674_v43 = vmax.f32 %v1671_v57, %v1673_v37  ;;  %v12534_v29 = vld [vmem:[#allocation79_spill] sm:$0xff] }
 0x4c9   : > { %v7273_v45 = vpop.eup %7272 }
 0x4ca   : > { %6617 = vmatprep.mubr.msk.bf16.mxu1 %vm1601_vm3, %v2420_v41  ;;  %v2392_v11 = vmul.f32 %v7273_v45, %v9483_v26  ;;  %v2391_v15 = vmul.f32 %v7273_v45, %v9481_v34 }
 0x4cb   : > { %1660 = vmax.xlane.f32.xlu1 %v1659_v4  ;;  %v2331_v5 = vpop.xlane.xlu1 %2330  ;;  %1656 = vmax.xlane.f32.xlu0 %v1655_v51 }
 0x4cc   : > { %2516 = vmatmul.mubr.bf16.gmra.mxu1 %v2419_v6  ;;  %7280 = vrcp.f32 %v2331_v5  ;;  %v12535_v6 = vld [vmem:[#allocation80_spill] sm:$0xff] }
 0x4cd   : > { %v7275_v14 = vpop.eup %7274 }
 0x4ce   : > { %v2394_v53 = vmul.f32 %v7275_v14, %v9492_v19  ;;  %v2393_v24 = vmul.f32 %v7275_v14, %v9490_v52  ;;  %v12533_v52 = vld [vmem:[#allocation81_spill] sm:$0xff] }
 0x4cf   : > { %1668 = vmax.xlane.f32.xlu1 %v1667_v13  ;;  %1664 = vmax.xlane.f32.xlu0 %v1663_v48  ;;  %v2335_v25 = vpop.xlane.xlu0 %2334  ;;  %v12536_v13 = vld [vmem:[#allocation83_spill] sm:$0xff] }
 0x4d0   : > { %7282 = vrcp.f32 %v2335_v25  ;;  %v2422_v22 = vpack.c.bf16 %v2394_v53, %v2392_v11  ;;  %v2421_v10 = vpack.c.bf16 %v2393_v24, %v2391_v15  ;;  %v12538_v11 = vld [vmem:[#allocation82_spill] sm:$0xff]  ;;  %v12539_v15 = vld [vmem:[#allocation84_spill] sm:$0xff] }
 0x4d1   : > { %v7277_v58 = vpop.eup %7276 }
 0x4d2   : > { %6618 = vmatprep.mubr.msk.bf16.mxu1 %vm1601_vm3, %v2422_v22  ;;  %v2396_v34 = vmul.f32 %v7277_v58, %v9501_v18  ;;  %v2395_v41 = vmul.f32 %v7277_v58, %v12534_v29  ;;  %v12537_v18 = vld [vmem:[#allocation85_spill] sm:$0xff] }
 0x4d3   : > { %v2339_v26 = vpop.xlane.xlu1 %2338  ;;  %1675 = vmax.xlane.f32.xlu0 %v1674_v43 }
 0x4d4   : > { %2524 = vmatmul.mubr.bf16.gmra.mxu1 %v2421_v10  ;;  %7284 = vrcp.f32 %v2339_v26  ;;  %v12540_v26 = vld [vmem:[#allocation87_spill] sm:$0xff] }
 0x4d5   : > { %v7279_v19 = vpop.eup %7278 }
 0x4d6   : > { %v2398_v39 = vmul.f32 %v7279_v19, %v12533_v52  ;;  %v2397_v4 = vmul.f32 %v7279_v19, %v12535_v6 }
 0x4d7   : > { %v2343_v51 = vpop.xlane.xlu0 %2342 }
 0x4d8   : > { %7286 = vrcp.f32 %v2343_v51  ;;  %v2424_v56 = vpack.c.bf16 %v2398_v39, %v2396_v34  ;;  %v2423_v60 = vpack.c.bf16 %v2397_v4, %v2395_v41  ;;  %v12541_v34 = vld [vmem:[#allocation89_spill] sm:$0xff]  ;;  %v12542_v39 = vld [vmem:[#allocation86_spill] sm:$0xff]  ;;  %v12543_v41 = vld [vmem:[#allocation88_spill] sm:$0xff] }
 0x4d9   : > { %v7281_v45 = vpop.eup %7280 }
 0x4da   : > { %6619 = vmatprep.mubr.msk.bf16.mxu1 %vm1601_vm3, %v2424_v56  ;;  %v2400_v37 = vmul.f32 %v7281_v45, %v12536_v13  ;;  %v2399_v53 = vmul.f32 %v7281_v45, %v12538_v11  ;;  %v12545_v13 = vld [vmem:[#allocation94_spill] sm:$0xff]  ;;  %v12547_v11 = vld [vmem:[#allocation93_spill] sm:$0xff] }
 0x4db   : > { %v2347_v5 = vpop.xlane.xlu1 %2346 }
 0x4dc   : > { %2532 = vmatmul.mubr.bf16.gmra.mxu1 %v2423_v60  ;;  %7288 = vrcp.f32 %v2347_v5  ;;  %v12544_v5 = vld [vmem:[#allocation92_spill] sm:$0xff] }
 0x4dd   : > { %v7283_v14 = vpop.eup %7282 }
 0x4de   : > { %v2402_v48 = vmul.f32 %v7283_v14, %v12537_v18  ;;  %v2401_v24 = vmul.f32 %v7283_v14, %v12539_v15  ;;  %v12546_v18 = vld [vmem:[#allocation91_spill] sm:$0xff] }
 0x4df   : > { %v2351_v25 = vpop.xlane.xlu0 %2350 }
 0x4e0   : > { %7290 = vrcp.f32 %v2351_v25  ;;  %v2426_v57 = vpack.c.bf16 %v2402_v48, %v2400_v37  ;;  %v2425_v22 = vpack.c.bf16 %v2401_v24, %v2399_v53 }
 0x4e1   : > { %v7285_v10 = vpop.eup %7284 }
 0x4e2   : > { %6620 = vmatprep.mubr.msk.bf16.mxu1 %vm1601_vm3, %v2426_v57  ;;  %v2404_v19 = vmul.f32 %v7285_v10, %v12540_v26  ;;  %v2403_v29 = vmul.f32 %v7285_v10, %v12542_v39  ;;  %v12550_v26 = vld [vmem:[#allocation95_spill] sm:$0xff] }
 0x4e3   : > { %v2355_v43 = vpop.xlane.xlu1 %2354 }
 0x4e4   : > { %2540 = vmatmul.mubr.bf16.gmra.mxu1 %v2425_v22  ;;  %7292 = vrcp.f32 %v2355_v43  ;;  %v12548_v22 = vld [vmem:[#allocation96_spill] sm:$0xff]  ;;  %v12549_v43 = vld [vmem:[#allocation98_spill] sm:$0xff] }
 0x4e5   : > { %v7287_v58 = vpop.eup %7286 }
 0x4e6   : > { %v2406_v52 = vmul.f32 %v7287_v58, %v12541_v34  ;;  %v2405_v6 = vmul.f32 %v7287_v58, %v12543_v41  ;;  %v12551_v34 = vld [vmem:[#allocation97_spill] sm:$0xff]  ;;  %v12552_v41 = vmov 0  }
 0x4e7   : > { %v2360_v4 = vpop.xlane.xlu0 %2359 }
 0x4e8   : > { %7294 = vrcp.f32 %v2360_v4  ;;  %v2428_v51 = vpack.c.bf16 %v2406_v52, %v2404_v19  ;;  %v2427_v56 = vpack.c.bf16 %v2405_v6, %v2403_v29  ;;  %v12553_v6 = vld [vmem:[#allocation64_spill] sm:$0xff]  ;;  %v12554_v4 = vld [vmem:[#allocation66_spill] sm:$0xff] }
 0x4e9   : > { %v7289_v60 = vpop.eup %7288 }
 0x4ea   : > { %6621 = vmatprep.mubr.msk.bf16.mxu1 %vm1601_vm3, %v2428_v51  ;;  %v2408_v14 = vmul.f32 %v7289_v60, %v12544_v5  ;;  %v2407_v48 = vmul.f32 %v7289_v60, %v12546_v18  ;;  %v943_v51 = vpack.c.bf16 %v12554_v4, %v12553_v6  ;;  %v12555_v60 = vld [vmem:[#allocation39_spill] sm:$0xff] }
 0x4eb   : > { %v2710_v18 = vpop.permute.xlu0 %2709 }
 0x4ec   : > { %2548 = vmatmul.mubr.bf16.gmra.mxu1 %v2427_v56  ;;  %v2708_v56 = vpop.permute.xlu1 %2707 }
 0x4ed   : > { %v7291_v45 = vpop.eup %7290 }
 0x4ee   : > { %v2410_v37 = vmul.f32 %v7291_v45, %v12545_v13  ;;  %v2409_v53 = vmul.f32 %v7291_v45, %v12547_v11  ;;  %v12556_v45 = vld [vmem:[#allocation43_spill] sm:$0xff] }
 0x4ef   : > { %v942_v5 = vpack.c.bf16 %v12556_v45, %v12555_v60  ;;  %v12558_v13 = vld [vmem:[#allocation59_spill] sm:$0xff] }
 0x4f0   : > { %v2430_v15 = vpack.c.bf16 %v2410_v37, %v2408_v14  ;;  %v2429_v24 = vpack.c.bf16 %v2409_v53, %v2407_v48  ;;  %v12557_v14 = vld [vmem:[#allocation55_spill] sm:$0xff]  ;;  %v2712_v48 = vpop.permute.xlu1 %2711 }
 0x4f1   : > { %v7293_v25 = vpop.eup %7292  ;;  %v941_v37 = vpack.c.bf16 %v12558_v13, %v12557_v14 }
 0x4f2   : > { %6622 = vmatprep.mubr.msk.bf16.mxu1 %vm1601_vm3, %v2430_v15  ;;  %v2412_v10 = vmul.f32 %v7293_v25, %v12548_v22  ;;  %v2411_v19 = vmul.f32 %v7293_v25, %v12550_v26  ;;  %v2718_v15 = vpop.permute.xlu0 %2717 }
 0x4f4   : > { %2556 = vmatmul.mubr.bf16.gmra.mxu1 %v2429_v24  ;;  %v2714_v11 = vpop.permute.xlu1 %2713 }
 0x4f5   : > { %v7295_v57 = vpop.eup %7294 }
 0x4f6   : > { %v2414_v58 = vmul.f32 %v7295_v57, %v12549_v43  ;;  %v2413_v52 = vmul.f32 %v7295_v57, %v12551_v34  ;;  %v2722_v25 = vpop.permute.xlu0 %2721 }
 0x4f8   : > { %v2432_v39 = vpack.c.bf16 %v2414_v58, %v2412_v10  ;;  %v2431_v29 = vpack.c.bf16 %v2413_v52, %v2411_v19  ;;  %v2716_v53 = vpop.permute.xlu1 %2715 }
 0x4fa   : > { %6623 = vmatprep.mubr.msk.bf16.mxu1 %vm1601_vm3, %v2432_v39  ;;  %v3355_v22 = vpop.permute.xlu0 %3354 }
 0x4fc   : > { %2564 = vmatmul.mubr.bf16.gmra.mxu1 %v2431_v29  ;;  %v2720_v24 = vpop.permute.xlu1 %2719 }
 0x4fd   : > { %2784 = vmatprep.mubr.bf16.mxu1 %v12552_v41 }
 0x4fe   : > { %v3359_v43 = vpop.permute.xlu0 %3358 }
 0x500   : > { %v2724_v57 = vpop.permute.xlu1 %2723 }
 0x502   : > { %v3363_v26 = vpop.permute.xlu0 %3362 }
 0x504   : > { %6633 = vmatmul.mubr.msk.bf16.vlgmr.msra.gmra.mxu1 %vm1450_vm0, %v2708_v56  ;;  %v3357_v10 = vpop.permute.xlu1 %3356 }
 0x505   : > { %3412 = vmatpush1.bf16.msra.mxu1 %v943_v51  ;;  %2794 = vmatprep.mubr.bf16.mxu1 %v12552_v41 }
 0x506   : > { %3413 = vmatprep.subr.bf16.mxu1 %v942_v5  ;;  %v3367_v6 = vpop.permute.xlu0 %3366 }
 0x508   : > { %v3361_v58 = vpop.permute.xlu1 %3360 }
 0x509   : > { %3414 = vmatpush1.bf16.msra.mxu1 %v941_v37 }
 0x50a   : > { %v3371_v5 = vpop.permute.xlu0 %3370 }
 0x50c   : > { %6634 = vmatmul.mubr.msk.bf16.gmra.mxu1 %vm1450_vm0, %v2710_v18  ;;  %v3365_v52 = vpop.permute.xlu1 %3364 }
 0x50d   : > { %2804 = vmatprep.mubr.bf16.mxu1 %v12552_v41 }
 0x510   : > { %v3369_v4 = vpop.permute.xlu1 %3368 }
 0x514   : > { %6635 = vmatmul.mubr.msk.bf16.gmra.mxu1 %vm1450_vm0, %v2712_v48 }
 0x515   : > { %2814 = vmatprep.mubr.bf16.mxu1 %v12552_v41 }
 0x51c   : > { %6636 = vmatmul.mubr.msk.bf16.gmra.mxu1 %vm1450_vm0, %v2714_v11 }
 0x51d   : > { %2824 = vmatprep.mubr.bf16.mxu1 %v12552_v41 }
 0x524   : > { %6637 = vmatmul.mubr.msk.bf16.gmra.mxu1 %vm1450_vm0, %v2716_v53 }
 0x525   : > { %2834 = vmatprep.mubr.bf16.mxu1 %v12552_v41 }
 0x52c   : > { %6638 = vmatmul.mubr.msk.bf16.gmra.mxu1 %vm1450_vm0, %v2718_v15 }
 0x52d   : > { %2844 = vmatprep.mubr.bf16.mxu1 %v12552_v41 }
 0x534   : > { %6639 = vmatmul.mubr.msk.bf16.gmra.mxu1 %vm1450_vm0, %v2720_v24 }
 0x535   : > { %2854 = vmatprep.mubr.bf16.mxu1 %v12552_v41 }
 0x53c   : > { %6640 = vmatmul.mubr.msk.bf16.gmra.mxu1 %vm1450_vm0, %v2722_v25 }
 0x53d   : > { %2864 = vmatprep.mubr.bf16.mxu1 %v12552_v41 }
 0x544   : > { %6641 = vmatmul.mubr.msk.bf16.gmra.mxu1 %vm1450_vm0, %v2724_v57 }
 0x545   : > { %3431 = vmatprep.mubr.bf16.mxu1 %v12552_v41 }
 0x54c   : > { %6651 = vmatmul.mubr.msk.bf16.vlgmr.msra.gmra.mxu1 %vm1450_vm0, %v3355_v22 }
 0x54d   : > { %3441 = vmatprep.mubr.bf16.mxu1 %v12552_v41 }
 0x554   : > { %6652 = vmatmul.mubr.msk.bf16.gmra.mxu1 %vm1450_vm0, %v3357_v10 }
 0x555   : > { %3451 = vmatprep.mubr.bf16.mxu1 %v12552_v41 }
 0x55c   : > { %6653 = vmatmul.mubr.msk.bf16.gmra.mxu1 %vm1450_vm0, %v3359_v43 }
 0x55d   : > { %3461 = vmatprep.mubr.bf16.mxu1 %v12552_v41 }
 0x564   : > { %6654 = vmatmul.mubr.msk.bf16.gmra.mxu1 %vm1450_vm0, %v3361_v58 }
 0x565   : > { %3471 = vmatprep.mubr.bf16.mxu1 %v12552_v41 }
 0x56c   : > { %6655 = vmatmul.mubr.msk.bf16.gmra.mxu1 %vm1450_vm0, %v3363_v26 }
 0x56d   : > { %3481 = vmatprep.mubr.bf16.mxu1 %v12552_v41 }
 0x570   : > { %v9813_v19 = vpop.f32.mrf.mxu1 }
 0x571   : > { %12559 = vst [vmem:[#allocation37_spill] sm:$0xff] %v9813_v19 }
 0x572   : > { %v2503_v34 = vpop.f32.mrf.mxu1 }
 0x574   : > { %6656 = vmatmul.mubr.msk.bf16.gmra.mxu1 %vm1450_vm0, %v3365_v52  ;;  %v9816_v39 = vpop.f32.mrf.mxu1 }
 0x575   : > { %12560 = vst [vmem:[#allocation51_spill] sm:$0xff] %v9816_v39  ;;  %3491 = vmatprep.mubr.bf16.mxu1 %v12552_v41 }
 0x576   : > { %v2506_v29 = vpop.f32.mrf.mxu1 }
 0x57c   : > { %6657 = vmatmul.mubr.msk.bf16.gmra.mxu1 %vm1450_vm0, %v3367_v6 }
 0x57d   : > { %3501 = vmatprep.mubr.bf16.mxu1 %v12552_v41 }
 0x584   : > { %v9821_v51 = vpop.f32.mrf.mxu1  ;;  %6658 = vmatmul.mubr.msk.bf16.gmra.mxu1 %vm1450_vm0, %v3369_v4 }
 0x585   : > { %12561 = vst [vmem:[#allocation81_spill] sm:$0xff] %v9821_v51  ;;  %3511 = vmatprep.mubr.bf16.mxu1 %v12552_v41 }
 0x586   : > { %v2511_v56 = vpop.f32.mrf.mxu1 }
 0x588   : > { %v9825_v60 = vpop.f32.mrf.mxu1 }
 0x589   : > { %12562 = vst [vmem:[#allocation79_spill] sm:$0xff] %v9825_v60 }
 0x58a   : > { %v2514_v45 = vpop.f32.mrf.mxu1 }
 0x58c   : > { %v9827_v14 = vpop.f32.mrf.mxu1  ;;  %6659 = vmatmul.mubr.msk.bf16.gmra.mxu1 %vm1450_vm0, %v3371_v5 }
 0x58d   : > { %12563 = vst [vmem:[#allocation80_spill] sm:$0xff] %v9827_v14 }
 0x58e   : > { %v2519_v13 = vpop.f32.mrf.mxu1 }
 0x590   : > { %v9830_v37 = vpop.f32.mrf.mxu1 }
 0x591   : > { %12564 = vst [vmem:[#allocation83_spill] sm:$0xff] %v9830_v37 }
 0x592   : > { %v2522_v18 = vpop.f32.mrf.mxu1 }
 0x593   : > { %v1609_v18 = vpop.xlane.xlu0 %1608 }
 0x594   : > { %v9832_v48 = vpop.f32.mrf.mxu1 }
 0x595   : > { %12565 = vst [vmem:[#allocation85_spill] sm:$0xff] %v9832_v48 }
 0x596   : > { %v2527_v11 = vpop.f32.mrf.mxu1 }
 0x597   : > { %v1605_v11 = vpop.xlane.xlu1 %1604 }
 0x598   : > { %v9834_v53 = vpop.f32.mrf.mxu1 }
 0x599   : > { %12566 = vst [vmem:[#allocation82_spill] sm:$0xff] %v9834_v53 }
 0x59a   : > { %v2530_v15 = vpop.f32.mrf.mxu1 }
 0x59c   : > { %v9836_v24 = vpop.f32.mrf.mxu1 }
 0x59d   : > { %12567 = vst [vmem:[#allocation84_spill] sm:$0xff] %v9836_v24 }
 0x59e   : > { %v2535_v25 = vpop.f32.mrf.mxu1 }
 0x5a0   : > { %v9838_v57 = vpop.f32.mrf.mxu1 }
 0x5a1   : > { %12568 = vst [vmem:[#allocation87_spill] sm:$0xff] %v9838_v57 }
 0x5a2   : > { %v2538_v22 = vpop.f32.mrf.mxu1 }
 0x5a3   : > { %v1678_v22 = vsub.f32 %v9532_v62, %v1605_v11 }
 0x5a4   : > { %v9840_v10 = vpop.f32.mrf.mxu1 }
 0x5a5   : > { %12569 = vst [vmem:[#allocation89_spill] sm:$0xff] %v9840_v10 }
 0x5a6   : > { %v2543_v43 = vpop.f32.mrf.mxu1 }
 0x5a8   : > { %v9842_v58 = vpop.f32.mrf.mxu1 }
 0x5a9   : > { %12570 = vst [vmem:[#allocation86_spill] sm:$0xff] %v9842_v58 }
 0x5aa   : > { %v2546_v26 = vpop.f32.mrf.mxu1 }
 0x5ab   : > { %v1677_v26 = vsub.f32 %v9521_v31, %v1605_v11 }
 0x5ac   : > { %v9844_v34 = vpop.f32.mrf.mxu1 }
 0x5ad   : > { %12571 = vst [vmem:[#allocation88_spill] sm:$0xff] %v9844_v34 }
 0x5ae   : > { %v2551_v52 = vpop.f32.mrf.mxu1 }
 0x5af   : > { %v1613_v52 = vpop.xlane.xlu0 %1612 }
 0x5b0   : > { %v9846_v29 = vpop.f32.mrf.mxu1  ;;  %v1682_v31 = vsub.f32 %v9572_v33, %v1613_v52  ;;  %v1621_v33 = vpop.xlane.xlu1 %1620 }
 0x5b1   : > { %12572 = vst [vmem:[#allocation92_spill] sm:$0xff] %v9846_v29  ;;  %v1715_v29 = vmul.f32 1.442695, %v1678_v22 }
 0x5b2   : > { %v2554_v6 = vpop.f32.mrf.mxu1 }
 0x5b3   : > { %7296 = vpow2.f32 %v1715_v29  ;;  %v1617_v11 = vpop.xlane.xlu0 %1616 }
 0x5b4   : > { %v9848_v4 = vpop.f32.mrf.mxu1  ;;  %v1684_v29 = vsub.f32 %v9590_v21, %v1617_v11 }
 0x5b5   : > { %12573 = vst [vmem:[#allocation94_spill] sm:$0xff] %v9848_v4  ;;  %v12577_v4 = vld [vmem:[#allocation90_spill] sm:$0xff] }
 0x5b6   : > { %v2559_v56 = vpop.f32.mrf.mxu1 }
 0x5b7   : > { %v1680_v56 = vsub.f32 %v12577_v4, %v1609_v18  ;;  %v1625_v21 = vpop.xlane.xlu0 %1624 }
 0x5b8   : > { %v9850_v45 = vpop.f32.mrf.mxu1 }
 0x5b9   : > { %12574 = vst [vmem:[#allocation91_spill] sm:$0xff] %v9850_v45 }
 0x5ba   : > { %v2562_v5 = vpop.f32.mrf.mxu1 }
 0x5bb   : > { %v1633_v10 = vpop.xlane.xlu0 %1632 }
 0x5bc   : > { %v9852_v13 = vpop.f32.mrf.mxu1 }
 0x5bd   : > { %12575 = vst [vmem:[#allocation93_spill] sm:$0xff] %v9852_v13  ;;  %v1713_v13 = vmul.f32 1.442695, %v1677_v26 }
 0x5be   : > { %v2567_v15 = vpop.f32.mrf.mxu1 }
 0x5bf   : > { %v1679_v15 = vsub.f32 %v9543_v9, %v1609_v18  ;;  %7298 = vpow2.f32 %v1713_v13  ;;  %v1681_v9 = vsub.f32 %v9563_v1, %v1613_v52  ;;  %v1683_v13 = vsub.f32 %v9581_v12, %v1617_v11 }
 0x5c0   : > { %v9854_v25 = vpop.f32.mrf.mxu1 }
 0x5c1   : > { %12576 = vst [vmem:[#allocation96_spill] sm:$0xff] %v9854_v25  ;;  %v1717_v34 = vmul.f32 1.442695, %v1679_v15  ;;  %v1721_v15 = vmul.f32 1.442695, %v1681_v9 }
 0x5c2   : > { %v2570_v43 = vpop.f32.mrf.mxu1  ;;  %v1725_v9 = vmul.f32 1.442695, %v1683_v13 }
 0x5c3   : > { %v1719_v43 = vmul.f32 1.442695, %v1680_v56  ;;  %v1723_v56 = vmul.f32 1.442695, %v1682_v31  ;;  %v1727_v31 = vmul.f32 1.442695, %v1684_v29  ;;  %v1629_v29 = vpop.xlane.xlu1 %1628 }
 0x5c4   : > { %v9858_v6 = vpop.f32.mrf.mxu1 }
 0x5c5   : > { %7300 = vpow2.f32 %v1719_v43  ;;  %v1686_v43 = vsub.f32 %v9598_v35, %v1621_v33  ;;  %v1688_v35 = vsub.f32 %v9602_v36, %v1625_v21  ;;  %v1690_v36 = vsub.f32 %v9608_v54, %v1629_v29 }
 0x5c6   : > { %v9861_v45 = vpop.f32.mrf.mxu1  ;;  %7302 = vpow2.f32 %v1717_v34  ;;  %v1685_v34 = vsub.f32 %v9596_v3, %v1621_v33  ;;  %v1687_v3 = vsub.f32 %v9600_v0, %v1625_v21  ;;  %v1689_v0 = vsub.f32 %v9605_v59, %v1629_v29 }
 0x5c7   : > { %v2875_v5 = vsel %vm1601_vm3, %v9861_v45, -inf  ;;  %7304 = vpow2.f32 %v1723_v56  ;;  %v9897_v56 = vpop.eup %7296  ;;  %v1739_v57 = vmul.f32 1.442695, %v1690_v36  ;;  %v1637_v24 = vpop.xlane.xlu1 %1636  ;;  %v1691_v36 = vsub.f32 %v9612_v61, %v1633_v10 }
 0x5c8   : > { %v2876_v25 = vmax.f32 %v9858_v6, %v2875_v5  ;;  %v9867_v62 = vpop.f32.mrf.mxu1  ;;  %7306 = vpow2.f32 %v1721_v15  ;;  %v1729_v58 = vmul.f32 1.442695, %v1685_v34 }
 0x5c9   : > { %7308 = vpow2.f32 %v1727_v31  ;;  %v1735_v31 = vmul.f32 1.442695, %v1688_v35 }
 0x5ca   : > { %2877 = vmax.xlane.f32.xlu1 %v2876_v25  ;;  %v9870_v4 = vpop.f32.mrf.mxu1  ;;  %7310 = vpow2.f32 %v1725_v9  ;;  %v1733_v9 = vmul.f32 1.442695, %v1687_v3  ;;  %v1737_v3 = vmul.f32 1.442695, %v1689_v0 }
 0x5cb   : > { %v2879_v22 = vsel %vm1601_vm3, %v9870_v4, -inf }
 0x5cc   : > { %v2880_v18 = vmax.f32 %v9867_v62, %v2879_v22  ;;  %v9876_v26 = vpop.f32.mrf.mxu1 }
 0x5ce   : > { %2881 = vmax.xlane.f32.xlu0 %v2880_v18  ;;  %v9879_v25 = vpop.f32.mrf.mxu1 }
 0x5cf   : > { %v2883_v5 = vsel %vm1601_vm3, %v9879_v25, -inf }
 0x5d0   : > { %v2884_v1 = vmax.f32 %v9876_v26, %v2883_v5  ;;  %v9885_v52 = vpop.f32.mrf.mxu1  ;;  %v1731_v5 = vmul.f32 1.442695, %v1686_v43  ;;  %v9907_v43 = vpop.eup %7298 }
 0x5d2   : > { %2885 = vmax.xlane.f32.xlu1 %v2884_v1  ;;  %v9888_v22 = vpop.f32.mrf.mxu1  ;;  %7312 = vpow2.f32 %v1731_v5 }
 0x5d3   : > { %v2887_v18 = vsel %vm1601_vm3, %v9888_v22, -inf  ;;  %7314 = vpow2.f32 %v1729_v58 }
 0x5d4   : > { %v2888_v12 = vmax.f32 %v9885_v52, %v2887_v18  ;;  %v9894_v11 = vpop.f32.mrf.mxu1  ;;  %v1785_v18 = vsel %vm1601_vm3, %v9897_v56, 0.0  ;;  %7316 = vpow2.f32 %v1735_v31 }
 0x5d5   : > { %v1786_v35 = vadd.f32 %v9907_v43, %v1785_v18  ;;  %7318 = vpow2.f32 %v1733_v9  ;;  %v1641_v9 = vpop.xlane.xlu0 %1640 }
 0x5d6   : > { %2889 = vmax.xlane.f32.xlu0 %v2888_v12  ;;  %v9899_v1 = vpop.f32.mrf.mxu1  ;;  %v9912_v12 = vpop.eup %7300  ;;  %7320 = vpow2.f32 %v1739_v57  ;;  %v1741_v57 = vmul.f32 1.442695, %v1691_v36 }
 0x5d7   : > { %v2891_v15 = vsel %vm1601_vm3, %v9899_v1, -inf  ;;  %v1789_v59 = vsel %vm1601_vm3, %v9912_v12, 0.0  ;;  %7322 = vpow2.f32 %v1737_v3 }
 0x5d8   : > { %v2892_v33 = vmax.f32 %v9894_v11, %v2891_v15  ;;  %v9905_v13 = vpop.f32.mrf.mxu1  ;;  %v9923_v15 = vpop.eup %7302 }
 0x5d9   : > { %v9928_v29 = vpop.eup %7304 }
 0x5da   : > { %2893 = vmax.xlane.f32.xlu1 %v2892_v33  ;;  %v9914_v34 = vpop.f32.mrf.mxu1  ;;  %v1692_v33 = vsub.f32 %v9616_v2, %v1633_v10  ;;  %v9939_v53 = vpop.eup %7306  ;;  %v1793_v0 = vsel %vm1601_vm3, %v9928_v29, 0.0  ;;  %v1693_v10 = vsub.f32 %v9620_v63, %v1637_v24 }
 0x5db   : > { %v2895_v21 = vsel %vm1601_vm3, %v9914_v34, -inf  ;;  %v9944_v48 = vpop.eup %7308 }
 0x5dc   : > { %v2896_v5 = vmax.f32 %v9905_v13, %v2895_v21  ;;  %v9920_v54 = vpop.f32.mrf.mxu1  ;;  %v1790_v21 = vadd.f32 %v9923_v15, %v1789_v59  ;;  %v9955_v37 = vpop.eup %7310  ;;  %v1797_v63 = vsel %vm1601_vm3, %v9944_v48, 0.0  ;;  %v1745_v36 = vmul.f32 1.442695, %v1693_v10 }
 0x5de   : > { %1787 = vadd.xlane.f32.xlu1 %v1786_v35  ;;  %2897 = vmax.xlane.f32.xlu0 %v2896_v5  ;;  %v9930_v58 = vpop.f32.mrf.mxu1  ;;  %v1694_v5 = vsub.f32 %v9624_v17, %v1637_v24  ;;  %v1743_v35 = vmul.f32 1.442695, %v1692_v33 }
 0x5df   : > { %v2899_v18 = vsel %vm1601_vm3, %v9930_v58, -inf  ;;  %v9960_v24 = vpop.eup %7312 }
 0x5e0   : > { %v2900_v31 = vmax.f32 %v9920_v54, %v2899_v18  ;;  %v9936_v2 = vpop.f32.mrf.mxu1  ;;  %v1794_v18 = vadd.f32 %v9939_v53, %v1793_v0  ;;  %v1747_v14 = vmul.f32 1.442695, %v1694_v5  ;;  %7324 = vpow2.f32 %v1743_v35  ;;  %12578 = vst [vmem:[#allocation98_spill] sm:$0xff] %v9960_v24  ;;  %v9971_v60 = vpop.eup %7314 }
 0x5e1   : > { %7326 = vpow2.f32 %v1741_v57  ;;  %v1695_v5 = vsub.f32 %v9628_v32, %v1641_v9  ;;  %12579 = vst [vmem:[#allocation95_spill] sm:$0xff] %v9971_v60  ;;  %v1801_v10 = vsel %vm1601_vm3, %v9960_v24, 0.0  ;;  %v1649_v57 = vpop.xlane.xlu0 %1648 }
 0x5e2   : > { %2901 = vmax.xlane.f32.xlu1 %v2900_v31  ;;  %v9946_v61 = vpop.f32.mrf.mxu1  ;;  %1791 = vadd.xlane.f32.xlu0 %v1790_v21  ;;  %v1696_v31 = vsub.f32 %v9632_v7, %v1641_v9  ;;  %v1645_v21 = vpop.xlane.xlu1 %1644  ;;  %7328 = vpow2.f32 %v1747_v14 }
 0x5e3   : > { %v2903_v59 = vsel %vm1601_vm3, %v9946_v61, -inf  ;;  %v1698_v51 = vsub.f32 %v9640_v23, %v1645_v21  ;;  %v1697_v32 = vsub.f32 %v9636_v49, %v1645_v21  ;;  %7330 = vpow2.f32 %v1745_v36 }
 0x5e4   : > { %v2904_v17 = vmax.f32 %v9936_v2, %v2903_v59  ;;  %v9952_v33 = vpop.f32.mrf.mxu1  ;;  %v1798_v59 = vadd.f32 %v9955_v37, %v1797_v63  ;;  %v1749_v14 = vmul.f32 1.442695, %v1695_v5  ;;  %v1802_v63 = vadd.f32 %v9971_v60, %v1801_v10 }
 0x5e5   : > { %v1755_v19 = vmul.f32 1.442695, %v1698_v51  ;;  %v1753_v5 = vmul.f32 1.442695, %v1697_v32  ;;  %v1699_v51 = vsub.f32 %v9642_v46, %v1649_v57 }
 0x5e6   : > { %v9962_v3 = vpop.f32.mrf.mxu1  ;;  %2905 = vmax.xlane.f32.xlu0 %v2904_v17  ;;  %1795 = vadd.xlane.f32.xlu1 %v1794_v18  ;;  %v1751_v17 = vmul.f32 1.442695, %v1696_v31  ;;  %v9976_v18 = vpop.eup %7316 }
 0x5e7   : > { %v2907_v0 = vsel %vm1601_vm3, %v9962_v3, -inf  ;;  %12580 = vst [vmem:[#allocation97_spill] sm:$0xff] %v9976_v18  ;;  %v1805_v49 = vsel %vm1601_vm3, %v9976_v18, 0.0 }
 0x5e8   : > { %v2908_v35 = vmax.f32 %v9952_v33, %v2907_v0  ;;  %v9968_v7 = vpop.f32.mrf.mxu1  ;;  %v9987_v0 = vpop.eup %7318  ;;  %7332 = vpow2.f32 %v1751_v17 }
 0x5e9   : > { %12581 = vst [vmem:[#allocation64_spill] sm:$0xff] %v9987_v0  ;;  %v9992_v21 = vpop.eup %7320  ;;  %7334 = vpow2.f32 %v1749_v14  ;;  %v1657_v14 = vpop.xlane.xlu0 %1656 }
 0x5ea   : > { %v9978_v39 = vpop.f32.mrf.mxu1  ;;  %2909 = vmax.xlane.f32.xlu1 %v2908_v35  ;;  %1799 = vadd.xlane.f32.xlu0 %v1798_v59  ;;  %v1700_v35 = vsub.f32 %v9644_v40, %v1649_v57  ;;  %12582 = vst [vmem:[#allocation66_spill] sm:$0xff] %v9992_v21  ;;  %v1653_v59 = vpop.xlane.xlu1 %1652  ;;  %7336 = vpow2.f32 %v1755_v19  ;;  %v1809_v32 = vsel %vm1601_vm3, %v9992_v21, 0.0  ;;  %v1757_v19 = vmul.f32 1.442695, %v1699_v51 }
 0x5eb   : > { %v2911_v9 = vsel %vm1601_vm3, %v9978_v39, -inf  ;;  %v10003_v60 = vpop.eup %7322  ;;  %v1702_v18 = vsub.f32 %v9648_v47, %v1653_v59  ;;  %v1701_v46 = vsub.f32 %v9646_v38, %v1653_v59  ;;  %7338 = vpow2.f32 %v1753_v5 }
 0x5ec   : > { %v2912_v23 = vmax.f32 %v9968_v7, %v2911_v9  ;;  %v9984_v31 = vpop.f32.mrf.mxu1  ;;  %v1806_v9 = vadd.f32 %v9987_v0, %v1805_v49  ;;  %12583 = vst [vmem:[#allocation39_spill] sm:$0xff] %v10003_v60  ;;  %v1810_v49 = vadd.f32 %v10003_v60, %v1809_v32 }
 0x5ed   : > { %v1763_v21 = vmul.f32 1.442695, %v1702_v18  ;;  %v1761_v51 = vmul.f32 1.442695, %v1701_v46  ;;  %v1703_v18 = vsub.f32 %v9650_v16, %v1657_v14 }
 0x5ee   : > { %v9994_v36 = vpop.f32.mrf.mxu1  ;;  %1803 = vadd.xlane.f32.xlu1 %v1802_v63  ;;  %2913 = vmax.xlane.f32.xlu0 %v2912_v23  ;;  %v1759_v63 = vmul.f32 1.442695, %v1700_v35  ;;  %v10008_v23 = vpop.eup %7324 }
 0x5ef   : > { %v2915_v10 = vsel %vm1601_vm3, %v9994_v36, -inf  ;;  %12584 = vst [vmem:[#allocation43_spill] sm:$0xff] %v10008_v23  ;;  %v1813_v38 = vsel %vm1601_vm3, %v10008_v23, 0.0 }
 0x5f0   : > { %v2916_v17 = vmax.f32 %v9984_v31, %v2915_v10  ;;  %v10000_v40 = vpop.f32.mrf.mxu1  ;;  %v10019_v10 = vpop.eup %7326  ;;  %7340 = vpow2.f32 %v1759_v63 }
 0x5f1   : > { %12585 = vst [vmem:[#allocation55_spill] sm:$0xff] %v10019_v10  ;;  %v10024_v59 = vpop.eup %7328  ;;  %7342 = vpow2.f32 %v1757_v19  ;;  %v1665_v19 = vpop.xlane.xlu0 %1664 }
 0x5f2   : > { %v10010_v24 = vpop.f32.mrf.mxu1  ;;  %2917 = vmax.xlane.f32.xlu1 %v2916_v17  ;;  %1807 = vadd.xlane.f32.xlu0 %v1806_v9  ;;  %v1704_v17 = vsub.f32 %v9652_v50, %v1657_v14  ;;  %12586 = vst [vmem:[#allocation59_spill] sm:$0xff] %v10024_v59  ;;  %v1661_v9 = vpop.xlane.xlu1 %1660  ;;  %7344 = vpow2.f32 %v1763_v21  ;;  %v1817_v46 = vsel %vm1601_vm3, %v10024_v59, 0.0  ;;  %v1765_v21 = vmul.f32 1.442695, %v1703_v18 }
 0x5f3   : > { %v2919_v57 = vsel %vm1601_vm3, %v10010_v24, -inf  ;;  %v10035_v60 = vpop.eup %7330  ;;  %v1706_v23 = vsub.f32 %v9676_v20, %v1661_v9  ;;  %v1705_v16 = vsub.f32 %v9665_v28, %v1661_v9  ;;  %7346 = vpow2.f32 %v1761_v51 }
 0x5f4   : > { %v2920_v47 = vmax.f32 %v10000_v40, %v2919_v57  ;;  %v10016_v35 = vpop.f32.mrf.mxu1  ;;  %v1814_v57 = vadd.f32 %v10019_v10, %v1813_v38  ;;  %12587 = vst [vmem:[#allocation90_spill] sm:$0xff] %v10035_v60  ;;  %v1818_v38 = vadd.f32 %v10035_v60, %v1817_v46 }
 0x5f5   : > { %v1771_v59 = vmul.f32 1.442695, %v1706_v23  ;;  %v1769_v18 = vmul.f32 1.442695, %v1705_v16  ;;  %v1707_v23 = vsub.f32 %v9688_v44, %v1665_v19 }
 0x5f6   : > { %v10026_v5 = vpop.f32.mrf.mxu1  ;;  %1811 = vadd.xlane.f32.xlu1 %v1810_v49  ;;  %2921 = vmax.xlane.f32.xlu0 %v2920_v47  ;;  %v1767_v49 = vmul.f32 1.442695, %v1704_v17  ;;  %v10040_v47 = vpop.eup %7332 }
 0x5f7   : > { %v2923_v32 = vsel %vm1601_vm3, %v10026_v5, -inf  ;;  %12588 = vst [vmem:[#allocation99_spill] sm:$0xff] %v10040_v47  ;;  %v1821_v28 = vsel %vm1601_vm3, %v10040_v47, 0.0 }
 0x5f8   : > { %v2924_v63 = vmax.f32 %v10016_v35, %v2923_v32  ;;  %v10032_v50 = vpop.f32.mrf.mxu1  ;;  %v10051_v32 = vpop.eup %7334  ;;  %7348 = vpow2.f32 %v1767_v49 }
 0x5f9   : > { %12589 = vst [vmem:[#allocation100_spill] sm:$0xff] %v10051_v32  ;;  %v10056_v9 = vpop.eup %7336  ;;  %7350 = vpow2.f32 %v1765_v21 }
 0x5fa   : > { %v10042_v0 = vpop.f32.mrf.mxu1  ;;  %2925 = vmax.xlane.f32.xlu1 %v2924_v63  ;;  %1815 = vadd.xlane.f32.xlu0 %v1814_v57  ;;  %v1708_v63 = vsub.f32 %v9698_v8, %v1665_v19  ;;  %12590 = vst [vmem:[#allocation101_spill] sm:$0xff] %v10056_v9  ;;  %v1669_v57 = vpop.xlane.xlu1 %1668  ;;  %7352 = vpow2.f32 %v1771_v59  ;;  %v1825_v16 = vsel %vm1601_vm3, %v10056_v9, 0.0  ;;  %v1773_v59 = vmul.f32 1.442695, %v1707_v23 }
 0x5fb   : > { %v2927_v14 = vsel %vm1601_vm3, %v10042_v0, -inf  ;;  %v10067_v60 = vpop.eup %7338  ;;  %v1710_v47 = vsub.f32 %v9718_v30, %v1669_v57  ;;  %7354 = vpow2.f32 %v1769_v18  ;;  %v1709_v44 = vsub.f32 %v9707_v42, %v1669_v57 }
 0x5fc   : > { %v2928_v20 = vmax.f32 %v10032_v50, %v2927_v14  ;;  %v10048_v17 = vpop.f32.mrf.mxu1  ;;  %v1822_v14 = vadd.f32 %v10051_v32, %v1821_v28  ;;  %12591 = vst [vmem:[#allocation102_spill] sm:$0xff] %v10067_v60 }
 0x5fd   : > { %v10072_v10 = vpop.eup %7340  ;;  %v1779_v32 = vmul.f32 1.442695, %v1710_v47 }
 0x5fe   : > { %v10058_v51 = vpop.f32.mrf.mxu1  ;;  %1819 = vadd.xlane.f32.xlu1 %v1818_v38  ;;  %2929 = vmax.xlane.f32.xlu0 %v2928_v20  ;;  %v1775_v38 = vmul.f32 1.442695, %v1708_v63  ;;  %v1676_v20 = vpop.xlane.xlu0 %1675  ;;  %12592 = vst [vmem:[#allocation103_spill] sm:$0xff] %v10072_v10  ;;  %v1829_v42 = vsel %vm1601_vm3, %v10072_v10, 0.0 }
 0x5ff   : > { %v2931_v46 = vsel %vm1601_vm3, %v10058_v51, -inf  ;;  %v1711_v30 = vsub.f32 %v9728_v27, %v1676_v20  ;;  %v10084_v9 = vpop.eup %7342  ;;  %v1712_v18 = vsub.f32 %v9739_v55, %v1676_v20  ;;  %v1777_v27 = vmul.f32 1.442695, %v1709_v44 }
 0x600   : > { %v2932_v49 = vmax.f32 %v10048_v17, %v2931_v46  ;;  %v10064_v8 = vpop.f32.mrf.mxu1  ;;  %v1826_v46 = vadd.f32 %v10067_v60, %v1825_v16  ;;  %12593 = vst [vmem:[#allocation104_spill] sm:$0xff] %v10084_v9  ;;  %7356 = vpow2.f32 %v1775_v38  ;;  %v10089_v57 = vpop.eup %7344  ;;  %v1830_v55 = vadd.f32 %v10084_v9, %v1829_v42 }
 0x601   : > { %12594 = vst [vmem:[#allocation105_spill] sm:$0xff] %v10089_v57  ;;  %7358 = vpow2.f32 %v1773_v59  ;;  %v10099_v20 = vpop.eup %7346  ;;  %v1783_v16 = vmul.f32 1.442695, %v1712_v18 }
 0x602   : > { %v10074_v21 = vpop.f32.mrf.mxu1  ;;  %2933 = vmax.xlane.f32.xlu1 %v2932_v49  ;;  %1823 = vadd.xlane.f32.xlu0 %v1822_v14  ;;  %v1781_v14 = vmul.f32 1.442695, %v1711_v30  ;;  %12596 = vst [vmem:[#allocation107_spill] sm:$0xff] %v10099_v20  ;;  %7360 = vpow2.f32 %v1779_v32 }
 0x603   : > { %v2935_v19 = vsel %vm1601_vm3, %v10074_v21, -inf  ;;  %7362 = vpow2.f32 %v1777_v27 }
 0x604   : > { %v2936_v63 = vmax.f32 %v10064_v8, %v2935_v19  ;;  %v10081_v28 = vpop.f32.mrf.mxu1  ;;  %v1833_v19 = vsel %vm1601_vm3, %v10089_v57, 0.0  ;;  %7364 = vpow2.f32 %v1781_v14 }
 0x605   : > { %v1834_v18 = vadd.f32 %v10099_v20, %v1833_v19  ;;  %7366 = vpow2.f32 %v1783_v16 }
 0x606   : > { %v10091_v23 = vpop.f32.mrf.mxu1  ;;  %1827 = vadd.xlane.f32.xlu1 %v1826_v46  ;;  %2937 = vmax.xlane.f32.xlu0 %v2936_v63  ;;  %v10103_v63 = vpop.eup %7348 }
 0x607   : > { %v2939_v49 = vsel %vm1601_vm3, %v10091_v23, -inf  ;;  %12597 = vst [vmem:[#allocation108_spill] sm:$0xff] %v10103_v63  ;;  %v10114_v42 = vpop.eup %7350 }
 0x608   : > { %v2940_v47 = vmax.f32 %v10081_v28, %v2939_v49  ;;  %v10096_v38 = vpop.f32.mrf.mxu1  ;;  %12600 = vst [vmem:[#allocation111_spill] sm:$0xff] %v10114_v42  ;;  %v1837_v49 = vsel %vm1601_vm3, %v10103_v63, 0.0 }
 0x609   : > { %12595 = vst [vmem:[#allocation106_spill] sm:$0xff] %v10096_v38  ;;  %v2943_v59 = vsel %vm1670_vm4, %v10096_v38, -inf  ;;  %v1838_v16 = vadd.f32 %v10114_v42, %v1837_v49 }
 0x60a   : > { %v10105_v44 = vpop.f32.mrf.mxu1  ;;  %2941 = vmax.xlane.f32.xlu1 %v2940_v47  ;;  %1831 = vadd.xlane.f32.xlu0 %v1830_v55  ;;  %v10118_v47 = vpop.eup %7352 }
 0x60b   : > { %12598 = vst [vmem:[#allocation109_spill] sm:$0xff] %v10105_v44  ;;  %v2944_v30 = vsel %vm1672_vm5, %v10105_v44, -inf  ;;  %12601 = vst [vmem:[#allocation112_spill] sm:$0xff] %v10118_v47  ;;  %v10124_v55 = vpop.eup %7354 }
 0x60c   : > { %v2945_v46 = vmax.f32 %v2943_v59, %v2944_v30  ;;  %v10111_v32 = vpop.f32.mrf.mxu1  ;;  %12603 = vst [vmem:[#allocation114_spill] sm:$0xff] %v10124_v55  ;;  %v1841_v30 = vsel %vm1601_vm3, %v10118_v47, 0.0 }
 0x60d   : > { %12599 = vst [vmem:[#allocation110_spill] sm:$0xff] %v10111_v32  ;;  %v10132_v20 = vpop.eup %7356 }
 0x60e   : > { %v10120_v27 = vpop.f32.mrf.mxu1  ;;  %1835 = vadd.xlane.f32.xlu1 %v1834_v18  ;;  %2946 = vmax.xlane.f32.xlu0 %v2945_v46  ;;  %12605 = vst [vmem:[#allocation116_spill] sm:$0xff] %v10132_v20  ;;  %v10142_v9 = vpop.eup %7358  ;;  %v1845_v49 = vsel %vm1601_vm3, %v10132_v20, 0.0 }
 0x60f   : > { %12602 = vst [vmem:[#allocation113_spill] sm:$0xff] %v10120_v27  ;;  %v3522_v14 = vsel %vm1601_vm3, %v10120_v27, -inf  ;;  %12608 = vst [vmem:[#allocation119_spill] sm:$0xff] %v10142_v9  ;;  %v10146_v47 = vpop.eup %7360 }
 0x610   : > { %v3523_v59 = vmax.f32 %v10111_v32, %v3522_v14  ;;  %v10127_v19 = vpop.f32.mrf.mxu1  ;;  %v1842_v14 = vadd.f32 %v10124_v55, %v1841_v30  ;;  %12609 = vst [vmem:[#allocation120_spill] sm:$0xff] %v10146_v47  ;;  %v1846_v30 = vadd.f32 %v10142_v9, %v1845_v49  ;;  %v1849_v20 = vsel %vm1601_vm3, %v10146_v47, 0.0 }
 0x611   : > { %12604 = vst [vmem:[#allocation115_spill] sm:$0xff] %v10127_v19 }
 0x612   : > { %v10134_v63 = vpop.f32.mrf.mxu1  ;;  %3524 = vmax.xlane.f32.xlu1 %v3523_v59  ;;  %1839 = vadd.xlane.f32.xlu0 %v1838_v16  ;;  %v10152_v16 = vpop.eup %7362 }
 0x613   : > { %12606 = vst [vmem:[#allocation117_spill] sm:$0xff] %v10134_v63  ;;  %v3526_v46 = vsel %vm1601_vm3, %v10134_v63, -inf  ;;  %12611 = vst [vmem:[#allocation122_spill] sm:$0xff] %v10152_v16  ;;  %v10158_v55 = vpop.eup %7364  ;;  %v1850_v49 = vadd.f32 %v10152_v16, %v1849_v20 }
 0x614   : > { %v3527_v18 = vmax.f32 %v10127_v19, %v3526_v46  ;;  %v10139_v57 = vpop.f32.mrf.mxu1  ;;  %12613 = vst [vmem:[#allocation124_spill] sm:$0xff] %v10158_v55  ;;  %v10162_v10 = vpop.eup %7366  ;;  %v1853_v9 = vsel %vm1670_vm4, %v10158_v55, 0.0 }
 0x615   : > { %12607 = vst [vmem:[#allocation118_spill] sm:$0xff] %v10139_v57  ;;  %12614 = vst [vmem:[#allocation125_spill] sm:$0xff] %v10162_v10  ;;  %v1854_v47 = vsel %vm1672_vm5, %v10162_v10, 0.0 }
 0x616   : > { %v10148_v42 = vpop.f32.mrf.mxu1  ;;  %1843 = vadd.xlane.f32.xlu1 %v1842_v14  ;;  %3528 = vmax.xlane.f32.xlu0 %v3527_v18 }
 0x617   : > { %12610 = vst [vmem:[#allocation121_spill] sm:$0xff] %v10148_v42  ;;  %v3530_v59 = vsel %vm1601_vm3, %v10148_v42, -inf }
 0x618   : > { %v3531_v46 = vmax.f32 %v10139_v57, %v3530_v59  ;;  %v10155_v60 = vpop.f32.mrf.mxu1 }
 0x619   : > { %12612 = vst [vmem:[#allocation123_spill] sm:$0xff] %v10155_v60 }
 0x61a   : > { %v10164_v14 = vpop.f32.mrf.mxu1  ;;  %3532 = vmax.xlane.f32.xlu1 %v3531_v46  ;;  %1847 = vadd.xlane.f32.xlu0 %v1846_v30 }
 0x61b   : > { %12615 = vst [vmem:[#allocation126_spill] sm:$0xff] %v10164_v14  ;;  %v3534_v18 = vsel %vm1601_vm3, %v10164_v14, -inf  ;;  %v1855_v14 = vadd.f32 %v1854_v47, %v1853_v9 }
 0x61c   : > { %v3535_v59 = vmax.f32 %v10155_v60, %v3534_v18  ;;  %v10169_v42 = vpop.f32.mrf.mxu1 }
 0x61d   : > { %12616 = vst [vmem:[#allocation127_spill] sm:$0xff] %v10169_v42 }
 0x61e   : > { %v10176_v57 = vpop.f32.mrf.mxu1  ;;  %1851 = vadd.xlane.f32.xlu1 %v1850_v49  ;;  %3536 = vmax.xlane.f32.xlu0 %v3535_v59 }
 0x61f   : > { %12617 = vst [vmem:[#allocation128_spill] sm:$0xff] %v10176_v57  ;;  %v3538_v46 = vsel %vm1601_vm3, %v10176_v57, -inf }
 0x620   : > { %v3539_v30 = vmax.f32 %v10169_v42, %v3538_v46  ;;  %v10181_v18 = vpop.f32.mrf.mxu1 }
 0x621   : > { %12618 = vst [vmem:[#allocation129_spill] sm:$0xff] %v10181_v18 }
 0x622   : > { %v10183_v60 = vpop.f32.mrf.mxu1  ;;  %3540 = vmax.xlane.f32.xlu1 %v3539_v30  ;;  %1856 = vadd.xlane.f32.xlu0 %v1855_v14 }
 0x623   : > { %12619 = vst [vmem:[#allocation130_spill] sm:$0xff] %v10183_v60  ;;  %v3542_v20 = vsel %vm1601_vm3, %v10183_v60, -inf }
 0x624   : > { %v3543_v55 = vmax.f32 %v10181_v18, %v3542_v20  ;;  %v10188_v49 = vpop.f32.mrf.mxu1 }
 0x626   : > { %3544 = vmax.xlane.f32.xlu0 %v3543_v55  ;;  %v10190_v59 = vpop.f32.mrf.mxu1 }
 0x628   : > { %v10192_v16 = vpop.f32.mrf.mxu1 }
 0x62a   : > { %v10194_v46 = vpop.f32.mrf.mxu1 }
 0x62c   : > { %v10196_v10 = vpop.f32.mrf.mxu1 }
 0x62e   : > { %v10198_v9 = vpop.f32.mrf.mxu1 }
 0x630   : > { %v10200_v47 = vpop.f32.mrf.mxu1 }
 0x632   : > { %v10202_v14 = vpop.f32.mrf.mxu1 }
 0x634   : > { %v10206_v60 = vpop.f32.mrf.mxu1 }
 0x636   : > { %v10210_v27 = vpop.f32.mrf.mxu1 }
 0x653   : > { %v2878_v30 = vpop.xlane.xlu1 %2877 }
 0x654   : > { %v2948_v20 = vsub.f32 %v9858_v6, %v2878_v30  ;;  %v2949_v55 = vsub.f32 %v9861_v45, %v2878_v30  ;;  %v10214_v30 = vpop.f32.mrf.mxu1 }
 0x656   : > { %v2984_v18 = vmul.f32 1.442695, %v2948_v20  ;;  %v2986_v57 = vmul.f32 1.442695, %v2949_v55 }
 0x657   : > { %v2882_v42 = vpop.xlane.xlu0 %2881 }
 0x658   : > { %7368 = vpow2.f32 %v2984_v18  ;;  %v2950_v63 = vsub.f32 %v9867_v62, %v2882_v42  ;;  %v2951_v19 = vsub.f32 %v9870_v4, %v2882_v42 }
 0x659   : > { %7370 = vpow2.f32 %v2986_v57  ;;  %v10218_v57 = vpop.f32.mrf.mxu1 }
 0x65a   : > { %v2988_v32 = vmul.f32 1.442695, %v2950_v63  ;;  %v2990_v44 = vmul.f32 1.442695, %v2951_v19 }
 0x65b   : > { %v2886_v38 = vpop.xlane.xlu1 %2885  ;;  %v10226_v19 = vpop.f32.mrf.mxu1 }
 0x65c   : > { %7372 = vpow2.f32 %v2988_v32  ;;  %v2952_v6 = vsub.f32 %v9876_v26, %v2886_v38  ;;  %v2953_v45 = vsub.f32 %v9879_v25, %v2886_v38 }
 0x65d   : > { %7374 = vpow2.f32 %v2990_v44 }
 0x65e   : > { %v2992_v20 = vmul.f32 1.442695, %v2952_v6  ;;  %v2994_v18 = vmul.f32 1.442695, %v2953_v45  ;;  %v3546_v6 = vsel %vm1601_vm3, %v10190_v59, -inf }
 0x65f   : > { %v2890_v55 = vpop.xlane.xlu0 %2889 }
 0x660   : > { %7376 = vpow2.f32 %v2992_v20  ;;  %v2954_v62 = vsub.f32 %v9885_v52, %v2890_v55  ;;  %v2955_v4 = vsub.f32 %v9888_v22, %v2890_v55 }
 0x661   : > { %7378 = vpow2.f32 %v2994_v18 }
 0x662   : > { %v2996_v63 = vmul.f32 1.442695, %v2954_v62  ;;  %v2998_v32 = vmul.f32 1.442695, %v2955_v4 }
 0x663   : > { %v2894_v42 = vpop.xlane.xlu1 %2893 }
 0x664   : > { %7380 = vpow2.f32 %v2996_v63  ;;  %v2956_v26 = vsub.f32 %v9894_v11, %v2894_v42  ;;  %v2957_v25 = vsub.f32 %v9899_v1, %v2894_v42  ;;  %v10239_v63 = vpop.f32.mrf.mxu1 }
 0x665   : > { %v10222_v38 = vpop.eup %7368  ;;  %7382 = vpow2.f32 %v2998_v32 }
 0x666   : > { %v10224_v44 = vpop.eup %7370  ;;  %v3000_v52 = vmul.f32 1.442695, %v2956_v26  ;;  %v3002_v22 = vmul.f32 1.442695, %v2957_v25  ;;  %v3547_v26 = vmax.f32 %v10188_v49, %v3546_v6  ;;  %v3550_v25 = vsel %vm1601_vm3, %v10194_v46, -inf }
 0x667   : > { %v1788_v45 = vpop.xlane.xlu1 %1787  ;;  %v2898_v20 = vpop.xlane.xlu0 %2897  ;;  %v3056_v18 = vsel %vm1601_vm3, %v10224_v44, 0.0 }
 0x668   : > { %7384 = vpow2.f32 %v3000_v52  ;;  %v2958_v11 = vsub.f32 %v9905_v13, %v2898_v20  ;;  %v2959_v1 = vsub.f32 %v9914_v34, %v2898_v20  ;;  %v3057_v55 = vadd.f32 %v10222_v38, %v3056_v18 }
 0x669   : > { %v10235_v62 = vpop.eup %7372  ;;  %7386 = vpow2.f32 %v3002_v22 }
 0x66a   : > { %v10237_v4 = vpop.eup %7374  ;;  %v3004_v32 = vmul.f32 1.442695, %v2958_v11  ;;  %v3006_v42 = vmul.f32 1.442695, %v2959_v1  ;;  %3058 = vadd.xlane.f32.xlu1 %v3057_v55  ;;  %7388 = vrcp.f32 %v1788_v45  ;;  %v10253_v1 = vpop.f32.mrf.mxu1 }
 0x66b   : > { %12620 = vst [vmem:[#allocation131_spill] sm:$0xff] %v10237_v4  ;;  %v2902_v13 = vpop.xlane.xlu1 %2901  ;;  %v1792_v34 = vpop.xlane.xlu0 %1791  ;;  %v3060_v52 = vsel %vm1601_vm3, %v10237_v4, 0.0 }
 0x66c   : > { %7390 = vpow2.f32 %v3004_v32  ;;  %v2960_v22 = vsub.f32 %v9920_v54, %v2902_v13  ;;  %v2961_v20 = vsub.f32 %v9930_v58, %v2902_v13  ;;  %v3061_v18 = vadd.f32 %v10235_v62, %v3060_v52 }
 0x66d   : > { %v10249_v11 = vpop.eup %7376  ;;  %7392 = vpow2.f32 %v3006_v42  ;;  %v3551_v32 = vmax.f32 %v10192_v16, %v3550_v25  ;;  %v3554_v54 = vsel %vm1601_vm3, %v10198_v9, -inf  ;;  %v10267_v25 = vpop.f32.mrf.mxu1 }
 0x66e   : > { %12621 = vst [vmem:[#allocation132_spill] sm:$0xff] %v10249_v11  ;;  %v10251_v6 = vpop.eup %7378  ;;  %v3008_v45 = vmul.f32 1.442695, %v2960_v22  ;;  %v3010_v55 = vmul.f32 1.442695, %v2961_v20  ;;  %7394 = vrcp.f32 %v1792_v34  ;;  %3548 = vmax.xlane.f32.xlu1 %v3547_v26  ;;  %3062 = vadd.xlane.f32.xlu0 %v3061_v18 }
 0x66f   : > { %12622 = vst [vmem:[#allocation133_spill] sm:$0xff] %v10251_v6  ;;  %v1796_v58 = vpop.xlane.xlu1 %1795  ;;  %v2906_v13 = vpop.xlane.xlu0 %2905  ;;  %v3064_v52 = vsel %vm1601_vm3, %v10251_v6, 0.0  ;;  %v3555_v6 = vmax.f32 %v10196_v10, %v3554_v54 }
 0x670   : > { %7396 = vpow2.f32 %v3008_v45  ;;  %v2962_v42 = vsub.f32 %v9936_v2, %v2906_v13  ;;  %v2963_v4 = vsub.f32 %v9946_v61, %v2906_v13  ;;  %v3065_v22 = vadd.f32 %v10249_v11, %v3064_v52  ;;  %v10281_v54 = vpop.f32.mrf.mxu1 }
 0x671   : > { %v10263_v34 = vpop.eup %7380  ;;  %7398 = vpow2.f32 %v3010_v55  ;;  %v3558_v2 = vsel %vm1601_vm3, %v10202_v14, -inf }
 0x672   : > { %12623 = vst [vmem:[#allocation134_spill] sm:$0xff] %v10263_v34  ;;  %v10265_v26 = vpop.eup %7382  ;;  %v3012_v20 = vmul.f32 1.442695, %v2962_v42  ;;  %v3014_v18 = vmul.f32 1.442695, %v2963_v4  ;;  %3066 = vadd.xlane.f32.xlu1 %v3065_v22  ;;  %3552 = vmax.xlane.f32.xlu0 %v3551_v32  ;;  %7400 = vrcp.f32 %v1796_v58 }
 0x673   : > { %12624 = vst [vmem:[#allocation135_spill] sm:$0xff] %v10265_v26  ;;  %v2910_v61 = vpop.xlane.xlu1 %2909  ;;  %v1800_v45 = vpop.xlane.xlu0 %1799  ;;  %v3068_v13 = vsel %vm1601_vm3, %v10265_v26, 0.0 }
 0x674   : > { %7402 = vpow2.f32 %v3012_v20  ;;  %v2964_v55 = vsub.f32 %v9952_v33, %v2910_v61  ;;  %v2965_v52 = vsub.f32 %v9962_v3, %v2910_v61  ;;  %v3069_v4 = vadd.f32 %v10263_v34, %v3068_v13 }
 0x675   : > { %v10277_v42 = vpop.eup %7384  ;;  %7404 = vpow2.f32 %v3014_v18  ;;  %v3559_v20 = vmax.f32 %v10200_v47, %v3558_v2  ;;  %v3562_v33 = vsel %vm1601_vm3, %v10210_v27, -inf }
 0x676   : > { %v10279_v32 = vpop.eup %7386  ;;  %v3016_v58 = vmul.f32 1.442695, %v2964_v55  ;;  %v3018_v22 = vmul.f32 1.442695, %v2965_v52  ;;  %7406 = vrcp.f32 %v1800_v45  ;;  %3556 = vmax.xlane.f32.xlu1 %v3555_v6  ;;  %3070 = vadd.xlane.f32.xlu0 %v3069_v4  ;;  %v10295_v52 = vpop.f32.mrf.mxu1 }
 0x677   : > { %12625 = vst [vmem:[#allocation136_spill] sm:$0xff] %v10279_v32  ;;  %v1804_v3 = vpop.xlane.xlu1 %1803  ;;  %v2914_v61 = vpop.xlane.xlu0 %2913  ;;  %v3072_v13 = vsel %vm1601_vm3, %v10279_v32, 0.0 }
 0x678   : > { %v7389_v18 = vpop.eup %7388  ;;  %7408 = vpow2.f32 %v3016_v58  ;;  %v2966_v34 = vsub.f32 %v9968_v7, %v2914_v61  ;;  %v2967_v55 = vsub.f32 %v9978_v39, %v2914_v61  ;;  %v3073_v45 = vadd.f32 %v10277_v42, %v3072_v13 }
 0x679   : > { %v10291_v6 = vpop.eup %7390  ;;  %7410 = vpow2.f32 %v3018_v22  ;;  %v3563_v58 = vmax.f32 %v10206_v60, %v3562_v33  ;;  %v1877_v61 = vmul.f32 %v7389_v18, %v9897_v56  ;;  %v1876_v33 = vmul.f32 %v7389_v18, %v9907_v43 }
 0x67a   : > { %v10293_v2 = vpop.eup %7392  ;;  %v3020_v4 = vmul.f32 1.442695, %v2966_v34  ;;  %v3022_v11 = vmul.f32 1.442695, %v2967_v55  ;;  %3074 = vadd.xlane.f32.xlu1 %v3073_v45  ;;  %3560 = vmax.xlane.f32.xlu0 %v3559_v20  ;;  %7412 = vrcp.f32 %v1804_v3  ;;  %v3566_v56 = vsel %vm1601_vm3, %v10218_v57, -inf }
 0x67b   : > { %v7395_v32 = vpop.eup %7394  ;;  %v2918_v7 = vpop.xlane.xlu1 %2917  ;;  %v3076_v39 = vsel %vm1601_vm3, %v10293_v2, 0.0 }
 0x67c   : > { %v1808_v26 = vpop.xlane.xlu0 %1807  ;;  %7414 = vpow2.f32 %v3020_v4  ;;  %v2968_v22 = vsub.f32 %v9984_v31, %v2918_v7  ;;  %v2969_v13 = vsub.f32 %v9994_v36, %v2918_v7  ;;  %v3077_v34 = vadd.f32 %v10291_v6, %v3076_v39  ;;  %v10313_v4 = vpop.f32.mrf.mxu1 }
 0x67d   : > { %v10304_v55 = vpop.eup %7396  ;;  %7416 = vpow2.f32 %v3022_v11  ;;  %v1879_v20 = vmul.f32 %v7395_v32, %v9912_v12  ;;  %v1878_v3 = vmul.f32 %v7395_v32, %v9923_v15  ;;  %v3570_v11 = vsel %vm1601_vm3, %v10239_v63, -inf }
 0x67e   : > { %v10309_v45 = vpop.eup %7398  ;;  %v3024_v31 = vmul.f32 1.442695, %v2968_v22  ;;  %v3026_v36 = vmul.f32 1.442695, %v2969_v13  ;;  %7418 = vrcp.f32 %v1808_v26  ;;  %3564 = vmax.xlane.f32.xlu1 %v3563_v58  ;;  %3078 = vadd.xlane.f32.xlu0 %v3077_v34  ;;  %v3567_v13 = vmax.f32 %v10214_v30, %v3566_v56  ;;  %v10328_v34 = vpop.f32.mrf.mxu1 }
 0x67f   : > { %v1913_v12 = vpack.c.bf16 %v1879_v20, %v1877_v61  ;;  %v1812_v7 = vpop.xlane.xlu1 %1811  ;;  %v1912_v43 = vpack.c.bf16 %v1878_v3, %v1876_v33  ;;  %v3080_v15 = vsel %vm1601_vm3, %v10309_v45, 0.0  ;;  %v7401_v32 = vpop.eup %7400  ;;  %v12626_v3 = vld [vmem:[#allocation73_spill] sm:$0xff] }
 0x680   : > { %v2922_v18 = vpop.xlane.xlu0 %2921  ;;  %7420 = vpow2.f32 %v3024_v31  ;;  %v3081_v26 = vadd.f32 %v10304_v55, %v3080_v15  ;;  %v12627_v31 = vld [vmem:[#allocation72_spill] sm:$0xff]  ;;  %v1881_v15 = vmul.f32 %v7401_v32, %v9928_v29  ;;  %v3574_v29 = vsel %vm1601_vm3, %v10267_v25, -inf }
 0x681   : > { %v2970_v39 = vsub.f32 %v10000_v40, %v2922_v18  ;;  %v2971_v22 = vsub.f32 %v10010_v24, %v2922_v18  ;;  %v10322_v58 = vpop.eup %7402  ;;  %7422 = vpow2.f32 %v3026_v36  ;;  %6624 = vmatprep.mubr.msk.bf16.mxu0 %vm1601_vm3, %v1913_v12  ;;  %v3571_v24 = vmax.f32 %v10226_v19, %v3570_v11 }
 0x682   : > { %v10326_v61 = vpop.eup %7404  ;;  %2635 = vmatmul.mubr.bf16.vlgmr.msra.gmra.mxu0 %v1912_v43  ;;  %3082 = vadd.xlane.f32.xlu1 %v3081_v26  ;;  %7424 = vrcp.f32 %v1812_v7  ;;  %v12628_v18 = vpack.c.bf16 %v12626_v3, %v12627_v31  ;;  %v1880_v26 = vmul.f32 %v7401_v32, %v9939_v53  ;;  %v12629_v31 = vld [vmem:[#allocation70_spill] sm:$0xff] }
 0x683   : > { %v3028_v20 = vmul.f32 1.442695, %v2970_v39  ;;  %v3030_v33 = vmul.f32 1.442695, %v2971_v22  ;;  %v7407_v40 = vpop.eup %7406  ;;  %3568 = vmax.xlane.f32.xlu0 %v3567_v13  ;;  %v2926_v56 = vpop.xlane.xlu1 %2925  ;;  %v3084_v12 = vsel %vm1601_vm3, %v10326_v61, 0.0 }
 0x684   : > { %3232 = vmatpush1.bf16.msra.mxu0 %v12628_v18  ;;  %v1816_v36 = vpop.xlane.xlu0 %1815  ;;  %v2972_v43 = vsub.f32 %v10016_v35, %v2926_v56  ;;  %v2973_v11 = vsub.f32 %v10026_v5, %v2926_v56  ;;  %v3085_v7 = vadd.f32 %v10322_v58, %v3084_v12  ;;  %v1883_v22 = vmul.f32 %v7407_v40, %v9944_v48  ;;  %v12630_v48 = vld [vmem:[#allocation69_spill] sm:$0xff] }
 0x685   : > { %7426 = vpow2.f32 %v3028_v20  ;;  %3233 = vmatprep.subr.bf16.mxu0 %v12552_v41  ;;  %v10341_v39 = vpop.eup %7408  ;;  %v1882_v13 = vmul.f32 %v7407_v40, %v9955_v37  ;;  %v10350_v20 = vpop.f32.mrf.mxu1  ;;  %v12631_v18 = vpack.c.bf16 %v12629_v31, %v12630_v48  ;;  %v12635_v31 = vld [vmem:[#allocation65_spill] sm:$0xff] }
 0x686   : > { %7428 = vpow2.f32 %v3030_v33  ;;  %v10346_v3 = vpop.eup %7410  ;;  %v3032_v35 = vmul.f32 1.442695, %v2972_v43  ;;  %v3034_v5 = vmul.f32 1.442695, %v2973_v11  ;;  %3572 = vmax.xlane.f32.xlu1 %v3571_v24  ;;  %v3578_v33 = vsel %vm1601_vm3, %v10295_v52, -inf }
 0x687   : > { %7430 = vrcp.f32 %v1816_v36  ;;  %3086 = vadd.xlane.f32.xlu0 %v3085_v7  ;;  %v1915_v37 = vpack.c.bf16 %v1883_v22, %v1881_v15  ;;  %v1820_v53 = vpop.xlane.xlu1 %1819  ;;  %v1914_v32 = vpack.c.bf16 %v1882_v13, %v1880_v26  ;;  %v3088_v56 = vsel %vm1601_vm3, %v10346_v3, 0.0  ;;  %v7413_v12 = vpop.eup %7412 }
 0x688   : > { %3234 = vmatpush1.bf16.msra.mxu0 %v12631_v18  ;;  %v2930_v40 = vpop.xlane.xlu0 %2929  ;;  %7432 = vpow2.f32 %v3032_v35  ;;  %v3089_v43 = vadd.f32 %v10341_v39, %v3088_v56  ;;  %v3575_v15 = vmax.f32 %v10253_v1, %v3574_v29  ;;  %v10369_v22 = vpop.f32.mrf.mxu1  ;;  %v12634_v35 = vld [vmem:[#allocation67_spill] sm:$0xff] }
 0x689   : > { %3235 = vmatprep.subr.bf16.mxu0 %v12552_v41  ;;  %v2974_v24 = vsub.f32 %v10032_v50, %v2930_v40  ;;  %v2975_v36 = vsub.f32 %v10042_v0, %v2930_v40  ;;  %v10363_v11 = vpop.eup %7414  ;;  %7434 = vpow2.f32 %v3034_v5  ;;  %6625 = vmatprep.mubr.msk.bf16.mxu0 %vm1601_vm3, %v1915_v37  ;;  %v3579_v0 = vmax.f32 %v10281_v54, %v3578_v33  ;;  %v12637_v37 = vld [vmem:[#allocation98_spill] sm:$0xff] }
 0x68a   : > { %12632 = vst [vmem:[#allocation73_spill] sm:$0xff] %v10363_v11  ;;  %v10367_v7 = vpop.eup %7416  ;;  %2643 = vmatmul.mubr.bf16.gmra.mxu0 %v1914_v32  ;;  %3090 = vadd.xlane.f32.xlu1 %v3089_v43  ;;  %7436 = vrcp.f32 %v1820_v53  ;;  %v12636_v48 = vpack.c.bf16 %v12634_v35, %v12635_v31  ;;  %v1885_v40 = vmul.f32 %v7413_v12, %v12637_v37  ;;  %v12640_v43 = vld [vmem:[#allocation95_spill] sm:$0xff]  ;;  %v12641_v35 = vld [vmem:[#allocation64_spill] sm:$0xff]  ;;  %v10391_v37 = vpop.f32.mrf.mxu1 }
 0x68b   : > { %12633 = vst [vmem:[#allocation72_spill] sm:$0xff] %v10367_v7  ;;  %v3036_v26 = vmul.f32 1.442695, %v2974_v24  ;;  %v3038_v13 = vmul.f32 1.442695, %v2975_v36  ;;  %v7419_v50 = vpop.eup %7418  ;;  %3576 = vmax.xlane.f32.xlu0 %v3575_v15  ;;  %v2934_v29 = vpop.xlane.xlu1 %2933  ;;  %v3092_v18 = vsel %vm1601_vm3, %v10367_v7, 0.0  ;;  %v1884_v15 = vmul.f32 %v7413_v12, %v12640_v43 }
 0x68c   : > { %3236 = vmatpush1.bf16.msra.mxu0 %v12636_v48  ;;  %v1824_v5 = vpop.xlane.xlu0 %1823  ;;  %v2976_v32 = vsub.f32 %v10048_v17, %v2934_v29  ;;  %v2977_v33 = vsub.f32 %v10058_v51, %v2934_v29  ;;  %v3093_v53 = vadd.f32 %v10363_v11, %v3092_v18  ;;  %v12639_v24 = vld [vmem:[#allocation97_spill] sm:$0xff]  ;;  %v1886_v31 = vmul.f32 %v7419_v50, %v12641_v35  ;;  %v12642_v29 = vld [vmem:[#allocation62_spill] sm:$0xff] }
 0x68d   : > { %7438 = vpow2.f32 %v3036_v26  ;;  %3237 = vmatprep.subr.bf16.mxu0 %v12552_v41  ;;  %v10382_v56 = vpop.eup %7420  ;;  %v1887_v36 = vmul.f32 %v7419_v50, %v12639_v24  ;;  %v3582_v26 = vsel %vm1601_vm3, %v10328_v34, -inf  ;;  %v12643_v18 = vld [vmem:[#allocation61_spill] sm:$0xff] }
 0x68e   : > { %12638 = vst [vmem:[#allocation70_spill] sm:$0xff] %v10382_v56  ;;  %7440 = vpow2.f32 %v3038_v13  ;;  %v10387_v48 = vpop.eup %7422  ;;  %v3040_v17 = vmul.f32 1.442695, %v2976_v32  ;;  %v3042_v51 = vmul.f32 1.442695, %v2977_v33  ;;  %3580 = vmax.xlane.f32.xlu1 %v3579_v0  ;;  %v3586_v13 = vsel %vm1601_vm3, %v10369_v22, -inf }
 0x68f   : > { %7442 = vrcp.f32 %v1824_v5  ;;  %v12644_v24 = vpack.c.bf16 %v12642_v29, %v12643_v18  ;;  %3094 = vadd.xlane.f32.xlu0 %v3093_v53  ;;  %v1917_v12 = vpack.c.bf16 %v1887_v36, %v1885_v40  ;;  %v1828_v50 = vpop.xlane.xlu1 %1827  ;;  %v1916_v43 = vpack.c.bf16 %v1886_v31, %v1884_v15  ;;  %v7425_v7 = vpop.eup %7424 }
 0x690   : > { %v2938_v35 = vpop.xlane.xlu0 %2937  ;;  %v3096_v11 = vsel %vm1601_vm3, %v10387_v48, 0.0  ;;  %7444 = vpow2.f32 %v3040_v17  ;;  %v3583_v40 = vmax.f32 %v10313_v4, %v3582_v26  ;;  %v10410_v36 = vpop.f32.mrf.mxu1  ;;  %v12648_v17 = vld [vmem:[#allocation56_spill] sm:$0xff] }
 0x691   : > { %3238 = vmatpush1.bf16.msra.mxu0 %v12644_v24  ;;  %v2978_v0 = vsub.f32 %v10064_v8, %v2938_v35  ;;  %v2979_v5 = vsub.f32 %v10074_v21, %v2938_v35  ;;  %v3097_v32 = vadd.f32 %v10382_v56, %v3096_v11  ;;  %7446 = vpow2.f32 %v3042_v51  ;;  %6626 = vmatprep.mubr.msk.bf16.mxu0 %vm1601_vm3, %v1917_v12  ;;  %v12647_v11 = vld [vmem:[#allocation57_spill] sm:$0xff]  ;;  %v12650_v24 = vld [vmem:[#allocation66_spill] sm:$0xff] }
 0x692   : > { %3239 = vmatprep.subr.bf16.mxu0 %v12552_v41  ;;  %v10404_v33 = vpop.eup %7426  ;;  %2651 = vmatmul.mubr.bf16.gmra.mxu0 %v1916_v43  ;;  %v3587_v21 = vmax.f32 %v10350_v20, %v3586_v13  ;;  %7448 = vrcp.f32 %v1828_v50  ;;  %v12649_v29 = vpack.c.bf16 %v12647_v11, %v12648_v17  ;;  %v1889_v12 = vmul.f32 %v7425_v7, %v12650_v24  ;;  %v12654_v11 = vld [vmem:[#allocation55_spill] sm:$0xff] }
 0x693   : > { %12645 = vst [vmem:[#allocation69_spill] sm:$0xff] %v10404_v33  ;;  %v10408_v53 = vpop.eup %7428  ;;  %v3044_v15 = vmul.f32 1.442695, %v2978_v0  ;;  %v3046_v31 = vmul.f32 1.442695, %v2979_v5  ;;  %3098 = vadd.xlane.f32.xlu1 %v3097_v32  ;;  %3584 = vmax.xlane.f32.xlu0 %v3583_v40  ;;  %v2942_v26 = vpop.xlane.xlu1 %2941  ;;  %v12652_v0 = vld [vmem:[#allocation43_spill] sm:$0xff] }
 0x694   : > { %12646 = vst [vmem:[#allocation67_spill] sm:$0xff] %v10408_v53  ;;  %v7431_v8 = vpop.eup %7430  ;;  %v1832_v51 = vpop.xlane.xlu0 %1831  ;;  %v3100_v18 = vsel %vm1601_vm3, %v10408_v53, 0.0  ;;  %v2980_v43 = vsub.f32 %v10081_v28, %v2942_v26  ;;  %v2981_v13 = vsub.f32 %v10091_v23, %v2942_v26  ;;  %v12653_v32 = vld [vmem:[#allocation39_spill] sm:$0xff]  ;;  %v3590_v23 = vsel %vm1670_vm4, %v10391_v37, -inf  ;;  %v12656_v26 = vld [vmem:[#allocation52_spill] sm:$0xff] }
 0x695   : > { %3240 = vmatpush1.bf16.msra.mxu0 %v12649_v29  ;;  %7450 = vpow2.f32 %v3044_v15  ;;  %v3101_v50 = vadd.f32 %v10404_v33, %v3100_v18  ;;  %v10423_v35 = vpop.eup %7432  ;;  %v1891_v5 = vmul.f32 %v7431_v8, %v12652_v0  ;;  %v1888_v40 = vmul.f32 %v7425_v7, %v12653_v32 }
 0x696   : > { %3241 = vmatprep.subr.bf16.mxu0 %v12552_v41  ;;  %12651 = vst [vmem:[#allocation65_spill] sm:$0xff] %v10423_v35  ;;  %7452 = vpow2.f32 %v3046_v31  ;;  %v1890_v17 = vmul.f32 %v7431_v8, %v12654_v11  ;;  %v10428_v29 = vpop.eup %7434  ;;  %v3591_v15 = vsel %vm1672_vm5, %v10410_v36, -inf  ;;  %v3048_v24 = vmul.f32 1.442695, %v2980_v43  ;;  %v12657_v31 = vld [vmem:[#allocation50_spill] sm:$0xff]  ;;  %v12660_v43 = vld [vmem:[#allocation109_spill] sm:$0xff] }
 0x697   : > { %12655 = vst [vmem:[#allocation98_spill] sm:$0xff] %v10428_v29  ;;  %v3050_v28 = vmul.f32 1.442695, %v2981_v13  ;;  %7454 = vrcp.f32 %v1832_v51  ;;  %3588 = vmax.xlane.f32.xlu1 %v3587_v21  ;;  %v12658_v18 = vpack.c.bf16 %v12656_v26, %v12657_v31  ;;  %3102 = vadd.xlane.f32.xlu0 %v3101_v50  ;;  %v1919_v7 = vpack.c.bf16 %v1891_v5, %v1889_v12  ;;  %v1836_v0 = vpop.xlane.xlu1 %1835  ;;  %v7437_v33 = vpop.eup %7436  ;;  %v12659_v21 = vld [vmem:[#allocation106_spill] sm:$0xff]  ;;  %v12664_v31 = vld [vmem:[#allocation45_spill] sm:$0xff] }
 0x698   : > { %v1918_v8 = vpack.c.bf16 %v1890_v17, %v1888_v40  ;;  %v2947_v32 = vpop.xlane.xlu0 %2946  ;;  %v3104_v11 = vsel %vm1601_vm3, %v10428_v29, 0.0  ;;  %7456 = vpow2.f32 %v3048_v24  ;;  %v3592_v50 = vmax.f32 %v3590_v23, %v3591_v15  ;;  %v12663_v24 = vld [vmem:[#allocation46_spill] sm:$0xff] }
 0x699   : > { %3242 = vmatpush1.bf16.msra.mxu0 %v12658_v18  ;;  %v2982_v51 = vsub.f32 %v12659_v21, %v2947_v32  ;;  %v2983_v13 = vsub.f32 %v12660_v43, %v2947_v32  ;;  %v3105_v56 = vadd.f32 %v10423_v35, %v3104_v11  ;;  %7458 = vpow2.f32 %v3050_v28  ;;  %6627 = vmatprep.mubr.msk.bf16.mxu0 %vm1601_vm3, %v1919_v7  ;;  %v12666_v28 = vld [vmem:[#allocation59_spill] sm:$0xff]  ;;  %v12667_v7 = vld [vmem:[#allocation110_spill] sm:$0xff] }
 0x69a   : > { %3243 = vmatprep.subr.bf16.mxu0 %v12552_v41  ;;  %v10443_v26 = vpop.eup %7438  ;;  %2659 = vmatmul.mubr.bf16.gmra.mxu0 %v1918_v8  ;;  %7460 = vrcp.f32 %v1836_v0  ;;  %v12665_v18 = vpack.c.bf16 %v12663_v24, %v12664_v31  ;;  %v1893_v23 = vmul.f32 %v7437_v33, %v12666_v28  ;;  %v12670_v43 = vld [vmem:[#allocation99_spill] sm:$0xff]  ;;  %v12672_v31 = vld [vmem:[#allocation100_spill] sm:$0xff] }
 0x69b   : > { %12661 = vst [vmem:[#allocation97_spill] sm:$0xff] %v10443_v26  ;;  %v10446_v12 = vpop.eup %7440  ;;  %v3052_v5 = vmul.f32 1.442695, %v2982_v51  ;;  %v3054_v40 = vmul.f32 1.442695, %v2983_v13  ;;  %3106 = vadd.xlane.f32.xlu1 %v3105_v56  ;;  %3593 = vmax.xlane.f32.xlu0 %v3592_v50  ;;  %v3525_v32 = vpop.xlane.xlu1 %3524  ;;  %v12668_v56 = vld [vmem:[#allocation113_spill] sm:$0xff] }
 0x69c   : > { %12662 = vst [vmem:[#allocation95_spill] sm:$0xff] %v10446_v12  ;;  %v7443_v17 = vpop.eup %7442  ;;  %v1840_v11 = vpop.xlane.xlu0 %1839  ;;  %v3108_v15 = vsel %vm1601_vm3, %v10446_v12, 0.0  ;;  %v3595_v8 = vsub.f32 %v12667_v7, %v3525_v32  ;;  %v3596_v21 = vsub.f32 %v12668_v56, %v3525_v32  ;;  %v12671_v50 = vld [vmem:[#allocation90_spill] sm:$0xff]  ;;  %v12674_v12 = vld [vmem:[#allocation41_spill] sm:$0xff]  ;;  %v12675_v7 = vld [vmem:[#allocation40_spill] sm:$0xff] }
 0x69d   : > { %3244 = vmatpush1.bf16.msra.mxu0 %v12665_v18  ;;  %7462 = vpow2.f32 %v3052_v5  ;;  %v3109_v0 = vadd.f32 %v10443_v26, %v3108_v15  ;;  %v10458_v51 = vpop.eup %7444  ;;  %v1895_v13 = vmul.f32 %v7443_v17, %v12670_v43  ;;  %v1892_v24 = vmul.f32 %v7437_v33, %v12671_v50 }
 0x69e   : > { %3245 = vmatprep.subr.bf16.mxu0 %v12552_v41  ;;  %12669 = vst [vmem:[#allocation64_spill] sm:$0xff] %v10458_v51  ;;  %7464 = vpow2.f32 %v3054_v40  ;;  %v1894_v18 = vmul.f32 %v7443_v17, %v12672_v31  ;;  %v10463_v35 = vpop.eup %7446  ;;  %v3631_v5 = vmul.f32 1.442695, %v3595_v8  ;;  %v3633_v28 = vmul.f32 1.442695, %v3596_v21  ;;  %v12677_v17 = vld [vmem:[#allocation115_spill] sm:$0xff] }
 0x69f   : > { %12673 = vst [vmem:[#allocation62_spill] sm:$0xff] %v10463_v35  ;;  %7466 = vrcp.f32 %v1840_v11  ;;  %v12676_v29 = vpack.c.bf16 %v12674_v12, %v12675_v7  ;;  %3110 = vadd.xlane.f32.xlu0 %v3109_v0  ;;  %v1921_v32 = vpack.c.bf16 %v1895_v13, %v1893_v23  ;;  %v1844_v15 = vpop.xlane.xlu1 %1843  ;;  %v3112_v43 = vsel %vm1601_vm3, %v10463_v35, 0.0  ;;  %v7449_v33 = vpop.eup %7448  ;;  %v12678_v21 = vld [vmem:[#allocation117_spill] sm:$0xff]  ;;  %v12681_v23 = vld [vmem:[#allocation76_spill] sm:$0xff] }
 0x6a0   : > { %v1920_v56 = vpack.c.bf16 %v1894_v18, %v1892_v24  ;;  %v3529_v40 = vpop.xlane.xlu0 %3528  ;;  %7468 = vpow2.f32 %v3631_v5  ;;  %v3113_v50 = vadd.f32 %v10458_v51, %v3112_v43  ;;  %v12683_v13 = vld [vmem:[#allocation49_spill] sm:$0xff]  ;;  %v12691_v51 = vld [vmem:[#allocation104_spill] sm:$0xff] }
 0x6a1   : > { %3246 = vmatpush1.bf16.msra.mxu0 %v12676_v29  ;;  %v3597_v8 = vsub.f32 %v12677_v17, %v3529_v40  ;;  %v3598_v11 = vsub.f32 %v12678_v21, %v3529_v40  ;;  %v12680_v29 = vld [vmem:[#allocation77_spill] sm:$0xff]  ;;  %7470 = vpow2.f32 %v3633_v28  ;;  %6628 = vmatprep.mubr.msk.bf16.mxu0 %vm1601_vm3, %v1921_v32  ;;  %v12686_v28 = vld [vmem:[#allocation118_spill] sm:$0xff] }
 0x6a2   : > { %3261 = vmatprep.subr.bf16.mxu0 %v12552_v41  ;;  %v10474_v12 = vpop.eup %7450  ;;  %v12682_v0 = vpack.c.bf16 %v12680_v29, %v12681_v23  ;;  %2667 = vmatmul.mubr.bf16.gmra.mxu0 %v1920_v56  ;;  %7472 = vrcp.f32 %v1844_v15  ;;  %v12685_v21 = vld [vmem:[#allocation101_spill] sm:$0xff]  ;;  %v12689_v15 = vld [vmem:[#allocation103_spill] sm:$0xff] }
 0x6a3   : > { %12679 = vst [vmem:[#allocation61_spill] sm:$0xff] %v10474_v12  ;;  %v10481_v31 = vpop.eup %7452  ;;  %v3635_v18 = vmul.f32 1.442695, %v3597_v8  ;;  %v3637_v5 = vmul.f32 1.442695, %v3598_v11  ;;  %3114 = vadd.xlane.f32.xlu1 %v3113_v50  ;;  %v3533_v40 = vpop.xlane.xlu1 %3532  ;;  %v1897_v29 = vmul.f32 %v7449_v33, %v12685_v21  ;;  %v12687_v32 = vld [vmem:[#allocation121_spill] sm:$0xff] }
 0x6a4   : > { %v3229_v24 = vand.u32 %v12683_v13, %v12682_v0  ;;  %12684 = vst [vmem:[#allocation57_spill] sm:$0xff] %v10481_v31  ;;  %v7455_v7 = vpop.eup %7454  ;;  %v1848_v43 = vpop.xlane.xlu0 %1847  ;;  %v3116_v17 = vsel %vm1601_vm3, %v10481_v31, 0.0  ;;  %v3599_v23 = vsub.f32 %v12686_v28, %v3533_v40  ;;  %v3600_v0 = vsub.f32 %v12687_v32, %v3533_v40  ;;  %v12690_v50 = vld [vmem:[#allocation102_spill] sm:$0xff] }
 0x6a5   : > { %7474 = vpow2.f32 %v3635_v18  ;;  %v3117_v56 = vadd.f32 %v10474_v12, %v3116_v17  ;;  %v10490_v8 = vpop.eup %7456  ;;  %v1899_v11 = vmul.f32 %v7455_v7, %v12689_v15  ;;  %v1898_v31 = vmul.f32 %v7455_v7, %v12691_v51  ;;  %v12693_v15 = vld [vmem:[#allocation123_spill] sm:$0xff] }
 0x6a6   : > { %3262 = vmatpush2.bf16.msra.mxu0 %v3229_v24  ;;  %12688 = vst [vmem:[#allocation56_spill] sm:$0xff] %v10490_v8  ;;  %7476 = vpow2.f32 %v3637_v5  ;;  %v1896_v24 = vmul.f32 %v7449_v33, %v12690_v50  ;;  %v10495_v35 = vpop.eup %7458  ;;  %v3639_v18 = vmul.f32 1.442695, %v3599_v23  ;;  %v3641_v21 = vmul.f32 1.442695, %v3600_v0  ;;  %v12694_v33 = vld [vmem:[#allocation126_spill] sm:$0xff] }
 0x6a7   : > { %3878 = vmatprep.subr.bf16.mxu0 %v12552_v41  ;;  %12692 = vst [vmem:[#allocation66_spill] sm:$0xff] %v10495_v35  ;;  %7478 = vrcp.f32 %v1848_v43  ;;  %3118 = vadd.xlane.f32.xlu0 %v3117_v56  ;;  %v1923_v40 = vpack.c.bf16 %v1899_v11, %v1897_v29  ;;  %v1852_v28 = vpop.xlane.xlu1 %1851  ;;  %v3120_v12 = vsel %vm1601_vm3, %v10495_v35, 0.0  ;;  %v7461_v5 = vpop.eup %7460 }
 0x6a8   : > { %v1922_v17 = vpack.c.bf16 %v1898_v31, %v1896_v24  ;;  %v3537_v32 = vpop.xlane.xlu0 %3536  ;;  %7480 = vpow2.f32 %v3639_v18  ;;  %v3121_v51 = vadd.f32 %v10490_v8, %v3120_v12  ;;  %v12697_v24 = vld [vmem:[#allocation105_spill] sm:$0xff]  ;;  %v12702_v8 = vld [vmem:[#allocation111_spill] sm:$0xff] }
 0x6a9   : > { %v3601_v26 = vsub.f32 %v12693_v15, %v3537_v32  ;;  %v3602_v50 = vsub.f32 %v12694_v33, %v3537_v32  ;;  %7482 = vpow2.f32 %v3641_v21  ;;  %6629 = vmatprep.mubr.msk.bf16.mxu0 %vm1601_vm3, %v1923_v40  ;;  %v1901_v18 = vmul.f32 %v7461_v5, %v12697_v24  ;;  %v12698_v21 = vld [vmem:[#allocation127_spill] sm:$0xff]  ;;  %v12699_v32 = vld [vmem:[#allocation128_spill] sm:$0xff] }
 0x6aa   : > { %v10502_v7 = vpop.eup %7462  ;;  %2675 = vmatmul.mubr.bf16.gmra.mxu0 %v1922_v17  ;;  %3122 = vadd.xlane.f32.xlu1 %v3121_v51  ;;  %7484 = vrcp.f32 %v1852_v28  ;;  %v12700_v33 = vld [vmem:[#allocation108_spill] sm:$0xff]  ;;  %v12701_v51 = vld [vmem:[#allocation107_spill] sm:$0xff] }
 0x6ab   : > { %12695 = vst [vmem:[#allocation43_spill] sm:$0xff] %v10502_v7  ;;  %v10505_v43 = vpop.eup %7464  ;;  %v3643_v31 = vmul.f32 1.442695, %v3601_v26  ;;  %v3645_v29 = vmul.f32 1.442695, %v3602_v50  ;;  %v3124_v23 = vsel %vm1670_vm4, %v10502_v7, 0.0  ;;  %v3541_v56 = vpop.xlane.xlu1 %3540  ;;  %v1900_v28 = vmul.f32 %v7461_v5, %v12701_v51 }
 0x6ac   : > { %12696 = vst [vmem:[#allocation39_spill] sm:$0xff] %v10505_v43  ;;  %v7467_v0 = vpop.eup %7466  ;;  %v1857_v11 = vpop.xlane.xlu0 %1856  ;;  %v3125_v12 = vsel %vm1672_vm5, %v10505_v43, 0.0  ;;  %v3603_v40 = vsub.f32 %v12698_v21, %v3541_v56  ;;  %v3604_v17 = vsub.f32 %v12699_v32, %v3541_v56  ;;  %v12704_v32 = vld [vmem:[#allocation130_spill] sm:$0xff] }
 0x6ad   : > { %7486 = vpow2.f32 %v3643_v31  ;;  %v3126_v26 = vadd.f32 %v3125_v12, %v3124_v23  ;;  %v10514_v15 = vpop.eup %7468  ;;  %v1903_v50 = vmul.f32 %v7467_v0, %v12700_v33  ;;  %v1902_v7 = vmul.f32 %v7467_v0, %v12702_v8  ;;  %v12706_v33 = vld [vmem:[#allocation114_spill] sm:$0xff] }
 0x6ae   : > { %7488 = vpow2.f32 %v3645_v29  ;;  %v10519_v35 = vpop.eup %7470  ;;  %v3647_v43 = vmul.f32 1.442695, %v3603_v40  ;;  %v3649_v53 = vmul.f32 1.442695, %v3604_v17  ;;  %v12703_v29 = vld [vmem:[#allocation129_spill] sm:$0xff]  ;;  %v12705_v17 = vld [vmem:[#allocation112_spill] sm:$0xff] }
 0x6af   : > { %7490 = vrcp.f32 %v1857_v11  ;;  %3127 = vadd.xlane.f32.xlu0 %v3126_v26  ;;  %v1925_v31 = vpack.c.bf16 %v1903_v50, %v1901_v18  ;;  %v1924_v24 = vpack.c.bf16 %v1902_v7, %v1900_v28  ;;  %v3703_v23 = vsel %vm1601_vm3, %v10519_v35, 0.0  ;;  %v7473_v56 = vpop.eup %7472 }
 0x6b0   : > { %v3545_v21 = vpop.xlane.xlu0 %3544  ;;  %7492 = vpow2.f32 %v3647_v43  ;;  %v3704_v8 = vadd.f32 %v10514_v15, %v3703_v23  ;;  %v1905_v26 = vmul.f32 %v7473_v56, %v12705_v17  ;;  %v1904_v50 = vmul.f32 %v7473_v56, %v12706_v33  ;;  %v12710_v33 = vld [vmem:[#allocation125_spill] sm:$0xff] }
 0x6b1   : > { %v3605_v12 = vsub.f32 %v12703_v29, %v3545_v21  ;;  %v3606_v5 = vsub.f32 %v12704_v32, %v3545_v21  ;;  %7494 = vpow2.f32 %v3649_v53  ;;  %6630 = vmatprep.mubr.msk.bf16.mxu0 %vm1601_vm3, %v1925_v31  ;;  %v12707_v53 = vld [vmem:[#allocation116_spill] sm:$0xff]  ;;  %v12708_v31 = vld [vmem:[#allocation119_spill] sm:$0xff] }
 0x6b2   : > { %v10526_v0 = vpop.eup %7474  ;;  %2683 = vmatmul.mubr.bf16.gmra.mxu0 %v1924_v24  ;;  %3705 = vadd.xlane.f32.xlu1 %v3704_v8 }
 0x6b3   : > { %v10529_v11 = vpop.eup %7476  ;;  %v3651_v7 = vmul.f32 1.442695, %v3605_v12  ;;  %v3653_v18 = vmul.f32 1.442695, %v3606_v5 }
 0x6b4   : > { %v7479_v40 = vpop.eup %7478  ;;  %v3707_v43 = vsel %vm1601_vm3, %v10529_v11, 0.0 }
 0x6b5   : > { %7496 = vpow2.f32 %v3651_v7  ;;  %v3708_v51 = vadd.f32 %v10526_v0, %v3707_v43  ;;  %v1907_v28 = vmul.f32 %v7479_v40, %v12707_v53  ;;  %v1906_v21 = vmul.f32 %v7479_v40, %v12708_v31  ;;  %v10538_v23 = vpop.eup %7480  ;;  %v12709_v43 = vld [vmem:[#allocation120_spill] sm:$0xff] }
 0x6b6   : > { %7498 = vpow2.f32 %v3653_v18  ;;  %v10540_v24 = vpop.eup %7482 }
 0x6b7   : > { %3709 = vadd.xlane.f32.xlu0 %v3708_v51  ;;  %v1927_v29 = vpack.c.bf16 %v1907_v28, %v1905_v26  ;;  %v1926_v12 = vpack.c.bf16 %v1906_v21, %v1904_v50  ;;  %v3711_v32 = vsel %vm1601_vm3, %v10540_v24, 0.0  ;;  %v7485_v5 = vpop.eup %7484  ;;  %v12711_v51 = vld [vmem:[#allocation122_spill] sm:$0xff]  ;;  %v12712_v28 = vld [vmem:[#allocation124_spill] sm:$0xff] }
 0x6b8   : > { %v3712_v56 = vadd.f32 %v10538_v23, %v3711_v32  ;;  %v1909_v17 = vmul.f32 %v7485_v5, %v12709_v43  ;;  %v1908_v53 = vmul.f32 %v7485_v5, %v12711_v51 }
 0x6b9   : > { %6631 = vmatprep.mubr.msk.bf16.mxu0 %vm1601_vm3, %v1927_v29 }
 0x6ba   : > { %v10546_v8 = vpop.eup %7486  ;;  %2691 = vmatmul.mubr.bf16.gmra.mxu0 %v1926_v12  ;;  %3713 = vadd.xlane.f32.xlu1 %v3712_v56 }
 0x6bb   : > { %v10548_v7 = vpop.eup %7488 }
 0x6bc   : > { %v7491_v18 = vpop.eup %7490  ;;  %v3715_v40 = vsel %vm1601_vm3, %v10548_v7, 0.0 }
 0x6bd   : > { %v3716_v26 = vadd.f32 %v10546_v8, %v3715_v40  ;;  %v1911_v50 = vmul.f32 %v7491_v18, %v12710_v33  ;;  %v1910_v31 = vmul.f32 %v7491_v18, %v12712_v28  ;;  %v10557_v21 = vpop.eup %7492 }
 0x6be   : > { %12713 = vst [vmem:[#allocation55_spill] sm:$0xff] %v10557_v21  ;;  %v10559_v29 = vpop.eup %7494 }
 0x6bf   : > { %3717 = vadd.xlane.f32.xlu0 %v3716_v26  ;;  %v1929_v12 = vpack.c.bf16 %v1911_v50, %v1909_v17  ;;  %v1928_v32 = vpack.c.bf16 %v1910_v31, %v1908_v53  ;;  %v3719_v56 = vsel %vm1601_vm3, %v10559_v29, 0.0 }
 0x6c0   : > { %v3720_v40 = vadd.f32 %v10557_v21, %v3719_v56 }
 0x6c1   : > { %6632 = vmatprep.mubr.msk.bf16.mxu0 %vm1601_vm3, %v1929_v12 }
 0x6c2   : > { %v10565_v43 = vpop.eup %7496  ;;  %2699 = vmatmul.mubr.bf16.gmra.mxu0 %v1928_v32  ;;  %3721 = vadd.xlane.f32.xlu1 %v3720_v40 }
 0x6c3   : > { %v10567_v33 = vpop.eup %7498 }
 0x6c4   : > { %v3723_v5 = vsel %vm1601_vm3, %v10567_v33, 0.0 }
 0x6c5   : > { %v3724_v18 = vadd.f32 %v10565_v43, %v3723_v5 }
 0x6c7   : > { %3725 = vadd.xlane.f32.xlu0 %v3724_v18 }
 0x6f3   : > { %v3059_v17 = vpop.xlane.xlu1 %3058 }
 0x6f4   : > { %7500 = vrcp.f32 %v3059_v17 }
 0x6f7   : > { %v3549_v26 = vpop.xlane.xlu1 %3548  ;;  %v3063_v50 = vpop.xlane.xlu0 %3062 }
 0x6f8   : > { %v3607_v51 = vsub.f32 %v10188_v49, %v3549_v26  ;;  %v3608_v53 = vsub.f32 %v10190_v59, %v3549_v26  ;;  %7502 = vrcp.f32 %v3063_v50  ;;  %v12714_v26 = vld [vmem:[#allocation33_spill] sm:$0xff] }
 0x6f9   : > { %v993_v50 = vsub.s32 3, %v12714_v26 }
 0x6fa   : > { %v3655_v28 = vmul.f32 1.442695, %v3607_v51  ;;  %v3657_v31 = vmul.f32 1.442695, %v3608_v53 }
 0x6fb   : > { %v3067_v12 = vpop.xlane.xlu1 %3066  ;;  %v3553_v32 = vpop.xlane.xlu0 %3552 }
 0x6fc   : > { %7504 = vpow2.f32 %v3655_v28  ;;  %v3609_v56 = vsub.f32 %v10192_v16, %v3553_v32  ;;  %v3610_v40 = vsub.f32 %v10194_v46, %v3553_v32 }
 0x6fd   : > { %7506 = vpow2.f32 %v3657_v31 }
 0x6fe   : > { %7508 = vrcp.f32 %v3067_v12  ;;  %v3659_v5 = vmul.f32 1.442695, %v3609_v56  ;;  %v3661_v18 = vmul.f32 1.442695, %v3610_v40 }
 0x6ff   : > { %v3557_v17 = vpop.xlane.xlu1 %3556  ;;  %v3071_v21 = vpop.xlane.xlu0 %3070  ;;  %v7656_v56 = vld [vmem:[#allocation17] ss:$4 sm:$0xf] }
 0x700   : > { %7510 = vpow2.f32 %v3659_v5  ;;  %v3611_v49 = vsub.f32 %v10196_v10, %v3557_v17  ;;  %v3612_v59 = vsub.f32 %v10198_v9, %v3557_v17  ;;  %v10581_v40 = vrot.slane %v7656_v56, %v993_v50  ;;  %v12717_v50 = vld [vmem:[#allocation131_spill] sm:$0xff] }
 0x701   : > { %7512 = vpow2.f32 %v3661_v18  ;;  %v7501_v51 = vpop.eup %7500 }
 0x702   : > { %v3663_v53 = vmul.f32 1.442695, %v3611_v49  ;;  %v3665_v28 = vmul.f32 1.442695, %v3612_v59  ;;  %7514 = vrcp.f32 %v3071_v21  ;;  %v3147_v10 = vmul.f32 %v7501_v51, %v10222_v38  ;;  %v12715_v21 = vld [vmem:[#allocation35_spill] sm:$0xff]  ;;  %v12716_v49 = vld [vmem:[#allocation74_spill] sm:$0xff] }
 0x703   : > { %v3075_v16 = vpop.xlane.xlu1 %3074  ;;  %v3561_v46 = vpop.xlane.xlu0 %3560  ;;  %v1389_v17 = vadd.f32 %v12715_v21, %v10581_v40  ;;  %v3148_v26 = vmul.f32 %v7501_v51, %v10224_v44  ;;  %v12720_v21 = vld [vmem:[#allocation71_spill] sm:$0xff] }
 0x704   : > { %7516 = vpow2.f32 %v3663_v53  ;;  %v3613_v31 = vsub.f32 %v10200_v47, %v3561_v46  ;;  %v3614_v12 = vsub.f32 %v10202_v14, %v3561_v46  ;;  %v1393_v47 = vadd.f32 %v12716_v49, %v10581_v40 }
 0x705   : > { %v7503_v32 = vpop.eup %7502  ;;  %7518 = vpow2.f32 %v3665_v28  ;;  %v1383_v44 = vadd.f32 %v12720_v21, %v10581_v40 }
 0x706   : > { %v3149_v9 = vmul.f32 %v7503_v32, %v10235_v62  ;;  %7520 = vrcp.f32 %v3075_v16  ;;  %v3667_v5 = vmul.f32 1.442695, %v3613_v31  ;;  %v3669_v18 = vmul.f32 1.442695, %v3614_v12  ;;  %v12719_v16 = vld [vmem:[#allocation34_spill] sm:$0xff] }
 0x707   : > { %v3565_v59 = vpop.xlane.xlu1 %3564  ;;  %v3079_v14 = vpop.xlane.xlu0 %3078  ;;  %v3150_v53 = vmul.f32 %v7503_v32, %v12717_v50  ;;  %v1379_v31 = vadd.f32 %v12719_v16, %v10581_v40  ;;  %v12725_v16 = vld [vmem:[#allocation133_spill] sm:$0xff] }
 0x708   : > { %v3183_v46 = vpack.c.bf16 %v3149_v9, %v3147_v10  ;;  %7522 = vpow2.f32 %v3667_v5  ;;  %v3615_v38 = vsub.f32 %v10206_v60, %v3565_v59  ;;  %v3616_v62 = vsub.f32 %v10210_v27, %v3565_v59  ;;  %v12721_v5 = vld [vmem:[#allocation60_spill] sm:$0xff] }
 0x709   : > { %v10593_v28 = vpop.eup %7504  ;;  %7524 = vpow2.f32 %v3669_v18  ;;  %v3184_v12 = vpack.c.bf16 %v3150_v53, %v3148_v26  ;;  %v1436_v9 = vpack.c.bf16 %v1393_v47, %v1389_v17  ;;  %v10606_v18 = vadd.f32 %v12721_v5, %v10581_v40 }
 0x70a   : > { %12718 = vst [vmem:[#allocation52_spill] sm:$0xff] %v10593_v28  ;;  %v10597_v56 = vpop.eup %7506  ;;  %v3671_v51 = vmul.f32 1.442695, %v3615_v38  ;;  %v3673_v32 = vmul.f32 1.442695, %v3616_v62  ;;  %7526 = vrcp.f32 %v3079_v14  ;;  %v12723_v14 = vld [vmem:[#allocation36_spill] sm:$0xff] }
 0x70b   : > { %v7509_v10 = vpop.eup %7508  ;;  %6642 = vmatprep.mubr.msk.bf16.mxu0 %vm1601_vm3, %v3184_v12  ;;  %v3083_v60 = vpop.xlane.xlu1 %3082  ;;  %v3727_v27 = vsel %vm1601_vm3, %v10597_v56, 0.0  ;;  %v1369_v17 = vadd.f32 %v12723_v14, %v10581_v40  ;;  %v12724_v38 = vld [vmem:[#allocation68_spill] sm:$0xff]  ;;  %v12727_v14 = vld [vmem:[#allocation63_spill] sm:$0xff] }
 0x70c   : > { %7528 = vpow2.f32 %v3671_v51  ;;  %3264 = vmatmul.mubr.bf16.vlgmr.msra.gmra.mxu0 %v3183_v46  ;;  %v3569_v49 = vpop.xlane.xlu0 %3568  ;;  %v3728_v59 = vadd.f32 %v10593_v28, %v3727_v27  ;;  %v1373_v62 = vadd.f32 %v12724_v38, %v10581_v40  ;;  %v1432_v46 = vpack.c.bf16 %v1383_v44, %v1379_v31  ;;  %v12726_v44 = vld [vmem:[#allocation135_spill] sm:$0xff]  ;;  %v12729_v38 = vld [vmem:[#allocation134_spill] sm:$0xff] }
 0x70d   : > { %v10609_v26 = vpop.eup %7510  ;;  %7530 = vpow2.f32 %v3673_v32  ;;  %3879 = vmatpush1.bf16.msra.mxu0 %v1436_v9  ;;  %v3617_v47 = vsub.f32 %v10214_v30, %v3569_v49  ;;  %v3618_v50 = vsub.f32 %v10218_v57, %v3569_v49  ;;  %v3152_v12 = vmul.f32 %v7509_v10, %v12725_v16 }
 0x70e   : > { %12722 = vst [vmem:[#allocation50_spill] sm:$0xff] %v10609_v26  ;;  %v10615_v53 = vpop.eup %7512  ;;  %3729 = vadd.xlane.f32.xlu1 %v3728_v59  ;;  %3880 = vmatprep.subr.bf16.mxu0 %v12552_v41  ;;  %7532 = vrcp.f32 %v3083_v60  ;;  %v1363_v60 = vadd.f32 %v12727_v14, %v10581_v40 }
 0x70f   : > { %v7515_v21 = vpop.eup %7514  ;;  %v3675_v51 = vmul.f32 1.442695, %v3617_v47  ;;  %v3677_v32 = vmul.f32 1.442695, %v3618_v50  ;;  %v3573_v9 = vpop.xlane.xlu1 %3572  ;;  %v3731_v30 = vsel %vm1601_vm3, %v10615_v53, 0.0  ;;  %v12728_v47 = vld [vmem:[#allocation132_spill] sm:$0xff] }
 0x710   : > { %v3619_v57 = vsub.f32 %v10226_v19, %v3573_v9  ;;  %v3620_v27 = vsub.f32 %v10239_v63, %v3573_v9  ;;  %v3087_v5 = vpop.xlane.xlu0 %3086  ;;  %v3732_v31 = vadd.f32 %v10609_v26, %v3731_v30  ;;  %v3154_v49 = vmul.f32 %v7515_v21, %v12726_v44 }
 0x711   : > { %v10627_v59 = vpop.eup %7516  ;;  %7534 = vpow2.f32 %v3675_v51  ;;  %3881 = vmatpush1.bf16.msra.mxu0 %v1432_v46  ;;  %v3151_v50 = vmul.f32 %v7509_v10, %v12728_v47  ;;  %v3153_v16 = vmul.f32 %v7515_v21, %v12729_v38  ;;  %v12730_v10 = vld [vmem:[#allocation48_spill] sm:$0xff]  ;;  %v1428_v21 = vpack.c.bf16 %v1373_v62, %v1369_v17  ;;  %v12732_v17 = vld [vmem:[#allocation58_spill] sm:$0xff] }
 0x712   : > { %v10633_v28 = vpop.eup %7518  ;;  %7536 = vpow2.f32 %v3677_v32  ;;  %v3679_v19 = vmul.f32 1.442695, %v3619_v57  ;;  %v3681_v63 = vmul.f32 1.442695, %v3620_v27  ;;  %3733 = vadd.xlane.f32.xlu0 %v3732_v31  ;;  %v3186_v9 = vpack.c.bf16 %v3154_v49, %v3152_v12  ;;  %3882 = vmatprep.subr.bf16.mxu0 %v12552_v41  ;;  %v12731_v27 = vld [vmem:[#allocation54_spill] sm:$0xff] }
 0x713   : > { %v7521_v30 = vpop.eup %7520  ;;  %7538 = vrcp.f32 %v3087_v5  ;;  %v3091_v44 = vpop.xlane.xlu1 %3090  ;;  %v3185_v26 = vpack.c.bf16 %v3153_v16, %v3151_v50  ;;  %v3735_v46 = vsel %vm1601_vm3, %v10633_v28, 0.0  ;;  %v10640_v51 = vadd.f32 %v12730_v10, %v10581_v40  ;;  %v12733_v50 = vld [vmem:[#allocation136_spill] sm:$0xff] }
 0x714   : > { %7540 = vpow2.f32 %v3679_v19  ;;  %6643 = vmatprep.mubr.msk.bf16.mxu0 %vm1601_vm3, %v3186_v9  ;;  %v3577_v32 = vpop.xlane.xlu0 %3576  ;;  %v3736_v12 = vadd.f32 %v10627_v59, %v3735_v46  ;;  %v1349_v5 = vadd.f32 %v12731_v27, %v10581_v40  ;;  %v1353_v62 = vadd.f32 %v12732_v17, %v10581_v40 }
 0x715   : > { %v10644_v57 = vpop.eup %7522  ;;  %7542 = vpow2.f32 %v3681_v63  ;;  %3272 = vmatmul.mubr.bf16.gmra.mxu0 %v3185_v26  ;;  %v3621_v31 = vsub.f32 %v10253_v1, %v3577_v32  ;;  %v3622_v49 = vsub.f32 %v10267_v25, %v3577_v32  ;;  %v1424_v47 = vpack.c.bf16 %v1363_v60, %v10606_v18 }
 0x716   : > { %v10650_v14 = vpop.eup %7524  ;;  %3883 = vmatpush1.bf16.msra.mxu0 %v1428_v21  ;;  %3737 = vadd.xlane.f32.xlu1 %v3736_v12  ;;  %v3156_v38 = vmul.f32 %v7521_v30, %v12733_v50  ;;  %7544 = vrcp.f32 %v3091_v44  ;;  %v12734_v44 = vld [vmem:[#allocation53_spill] sm:$0xff]  ;;  %v3155_v32 = vmul.f32 %v7521_v30, %v10277_v42  ;;  %v12736_v30 = vld [vmem:[#allocation42_spill] sm:$0xff] }
 0x717   : > { %v7527_v16 = vpop.eup %7526  ;;  %v3683_v19 = vmul.f32 1.442695, %v3621_v31  ;;  %v3685_v63 = vmul.f32 1.442695, %v3622_v49  ;;  %3884 = vmatprep.subr.bf16.mxu0 %v12552_v41  ;;  %v3581_v1 = vpop.xlane.xlu1 %3580  ;;  %v3739_v25 = vsel %vm1601_vm3, %v10650_v14, 0.0  ;;  %v1343_v21 = vadd.f32 %v12734_v44, %v10581_v40 }
 0x718   : > { %v3623_v26 = vsub.f32 %v10281_v54, %v3581_v1  ;;  %v3624_v9 = vsub.f32 %v10295_v52, %v3581_v1  ;;  %v3095_v46 = vpop.xlane.xlu0 %3094  ;;  %v3740_v18 = vadd.f32 %v10644_v57, %v3739_v25  ;;  %v3158_v60 = vmul.f32 %v7527_v16, %v10293_v2  ;;  %v12735_v2 = vld [vmem:[#allocation38_spill] sm:$0xff] }
 0x719   : > { %v10663_v10 = vpop.eup %7528  ;;  %7546 = vpow2.f32 %v3683_v19  ;;  %v3157_v12 = vmul.f32 %v7527_v16, %v10291_v6  ;;  %v10673_v49 = vadd.f32 %v12735_v2, %v10581_v40  ;;  %v10680_v16 = vadd.f32 %v12736_v30, %v10581_v40 }
 0x71a   : > { %v10669_v27 = vpop.eup %7530  ;;  %7548 = vpow2.f32 %v3685_v63  ;;  %v3687_v54 = vmul.f32 1.442695, %v3623_v26  ;;  %v3689_v52 = vmul.f32 1.442695, %v3624_v9  ;;  %3885 = vmatpush1.bf16.msra.mxu0 %v1424_v47  ;;  %3741 = vadd.xlane.f32.xlu0 %v3740_v18  ;;  %v3188_v31 = vpack.c.bf16 %v3158_v60, %v3156_v38  ;;  %v12737_v63 = vld [vmem:[#allocation44_spill] sm:$0xff]  ;;  %v12739_v18 = vld [vmem:[#allocation75_spill] sm:$0xff] }
 0x71b   : > { %7550 = vrcp.f32 %v3095_v46  ;;  %3886 = vmatprep.subr.bf16.mxu0 %v12552_v41  ;;  %v3187_v50 = vpack.c.bf16 %v3157_v12, %v3155_v32  ;;  %v3743_v42 = vsel %vm1601_vm3, %v10669_v27, 0.0  ;;  %v7533_v6 = vpop.eup %7532  ;;  %v1420_v47 = vpack.c.bf16 %v1353_v62, %v1349_v5  ;;  %v12738_v46 = vld [vmem:[#allocation47_spill] sm:$0xff] }
 0x71c   : > { %v3099_v17 = vpop.xlane.xlu1 %3098  ;;  %7552 = vpow2.f32 %v3687_v54  ;;  %6644 = vmatprep.mubr.msk.bf16.mxu0 %vm1601_vm3, %v3188_v31  ;;  %v3585_v38 = vpop.xlane.xlu0 %3584  ;;  %v3744_v19 = vadd.f32 %v10663_v10, %v3743_v42  ;;  %v1329_v1 = vadd.f32 %v12737_v63, %v10581_v40  ;;  %v1333_v5 = vadd.f32 %v12738_v46, %v10581_v40 }
 0x71d   : > { %7554 = vpow2.f32 %v3689_v52  ;;  %3280 = vmatmul.mubr.bf16.gmra.mxu0 %v3187_v50  ;;  %v3625_v25 = vsub.f32 %v10313_v4, %v3585_v38  ;;  %v3626_v26 = vsub.f32 %v10328_v34, %v3585_v38  ;;  %v1416_v62 = vpack.c.bf16 %v1343_v21, %v10640_v51 }
 0x71e   : > { %v10688_v9 = vpop.eup %7534  ;;  %v10695_v60 = vadd.f32 %v12739_v18, %v10581_v40  ;;  %3887 = vmatpush1.bf16.msra.mxu0 %v1420_v47  ;;  %3745 = vadd.xlane.f32.xlu1 %v3744_v19  ;;  %v3160_v34 = vmul.f32 %v7533_v6, %v10309_v45  ;;  %v3159_v54 = vmul.f32 %v7533_v6, %v10304_v55  ;;  %7556 = vrcp.f32 %v3099_v17  ;;  %v12740_v17 = vld [vmem:[#allocation78_spill] sm:$0xff] }
 0x71f   : > { %v10697_v44 = vpop.eup %7536  ;;  %v3691_v32 = vmul.f32 1.442695, %v3625_v25  ;;  %v3693_v12 = vmul.f32 1.442695, %v3626_v26  ;;  %3888 = vmatprep.subr.bf16.mxu0 %v12552_v41  ;;  %v1412_v25 = vpack.c.bf16 %v1333_v5, %v1329_v1 }
 0x720   : > { %v3589_v4 = vpop.xlane.xlu1 %3588  ;;  %v7539_v52 = vpop.eup %7538  ;;  %v3747_v2 = vsel %vm1601_vm3, %v10697_v44, 0.0 }
 0x721   : > { %v3627_v51 = vsub.f32 %v10350_v20, %v3589_v4  ;;  %v3628_v21 = vsub.f32 %v10369_v22, %v3589_v4  ;;  %v3103_v31 = vpop.xlane.xlu0 %3102  ;;  %v10706_v50 = vpop.eup %7540  ;;  %7558 = vpow2.f32 %v3691_v32  ;;  %v3748_v42 = vadd.f32 %v10688_v9, %v3747_v2 }
 0x722   : > { %v3162_v30 = vmul.f32 %v7539_v52, %v10326_v61  ;;  %v3161_v45 = vmul.f32 %v7539_v52, %v10322_v58  ;;  %v10711_v55 = vpop.eup %7542  ;;  %v1403_v20 = vadd.f32 %v12740_v17, %v10581_v40  ;;  %7560 = vpow2.f32 %v3693_v12  ;;  %3889 = vmatpush1.bf16.msra.mxu0 %v1416_v62 }
 0x723   : > { %v3695_v22 = vmul.f32 1.442695, %v3627_v51  ;;  %v3697_v6 = vmul.f32 1.442695, %v3628_v21  ;;  %7562 = vrcp.f32 %v3103_v31  ;;  %3749 = vadd.xlane.f32.xlu0 %v3748_v42  ;;  %3890 = vmatprep.subr.bf16.mxu0 %v12552_v41  ;;  %v3751_v61 = vsel %vm1601_vm3, %v10711_v55, 0.0  ;;  %v7545_v19 = vpop.eup %7544  ;;  %v12742_v51 = vld [vmem:[#allocation73_spill] sm:$0xff] }
 0x724   : > { %v3190_v47 = vpack.c.bf16 %v3162_v30, %v3160_v34  ;;  %v3189_v38 = vpack.c.bf16 %v3161_v45, %v3159_v54  ;;  %v3752_v63 = vadd.f32 %v10706_v50, %v3751_v61  ;;  %v3107_v40 = vpop.xlane.xlu1 %3106  ;;  %v1408_v32 = vpack.c.bf16 %v10680_v16, %v10673_v49  ;;  %v12741_v16 = vld [vmem:[#allocation72_spill] sm:$0xff] }
 0x725   : > { %7564 = vpow2.f32 %v3695_v22  ;;  %v3594_v58 = vpop.xlane.xlu0 %3593  ;;  %v1440_v12 = vpack.c.bf16 %v1403_v20, %v10695_v60  ;;  %v3164_v34 = vmul.f32 %v7545_v19, %v10346_v3  ;;  %v3163_v54 = vmul.f32 %v7545_v19, %v10341_v39  ;;  %v12743_v19 = vld [vmem:[#allocation67_spill] sm:$0xff] }
 0x726   : > { %7566 = vpow2.f32 %v3697_v6  ;;  %6645 = vmatprep.mubr.msk.bf16.mxu0 %vm1601_vm3, %v3190_v47  ;;  %v3629_v26 = vsub.f32 %v10391_v37, %v3594_v58  ;;  %v3630_v46 = vsub.f32 %v10410_v36, %v3594_v58  ;;  %v10722_v62 = vpop.eup %7546  ;;  %3753 = vadd.xlane.f32.xlu1 %v3752_v63  ;;  %v12744_v63 = vld [vmem:[#allocation70_spill] sm:$0xff] }
 0x727   : > { %3288 = vmatmul.mubr.bf16.gmra.mxu0 %v3189_v38  ;;  %v10724_v18 = vpop.eup %7548  ;;  %7568 = vrcp.f32 %v3107_v40  ;;  %v3876_v17 = vand.u32 %v12683_v13, %v1440_v12  ;;  %v12745_v40 = vld [vmem:[#allocation69_spill] sm:$0xff] }
 0x728   : > { %3891 = vmatpush1.bf16.msra.mxu0 %v1412_v25  ;;  %v3699_v1 = vmul.f32 1.442695, %v3629_v26  ;;  %v3701_v5 = vmul.f32 1.442695, %v3630_v46  ;;  %v7551_v4 = vpop.eup %7550  ;;  %v3755_v36 = vsel %vm1601_vm3, %v10724_v18, 0.0 }
 0x729   : > { %3892 = vmatprep.subr.bf16.mxu0 %v12552_v41  ;;  %v3111_v37 = vpop.xlane.xlu0 %3110  ;;  %v10734_v52 = vpop.eup %7552  ;;  %v3756_v49 = vadd.f32 %v10722_v62, %v3755_v36  ;;  %v3166_v60 = vmul.f32 %v7551_v4, %v12741_v16  ;;  %v3165_v21 = vmul.f32 %v7551_v4, %v12742_v51 }
 0x72a   : > { %7570 = vpow2.f32 %v3699_v1  ;;  %v10739_v31 = vpop.eup %7554 }
 0x72b   : > { %7572 = vpow2.f32 %v3701_v5  ;;  %3757 = vadd.xlane.f32.xlu0 %v3756_v49  ;;  %v3192_v2 = vpack.c.bf16 %v3166_v60, %v3164_v34  ;;  %v3191_v3 = vpack.c.bf16 %v3165_v21, %v3163_v54  ;;  %v3759_v39 = vsel %vm1601_vm3, %v10739_v31, 0.0  ;;  %v7557_v45 = vpop.eup %7556  ;;  %v12746_v60 = vld [vmem:[#allocation98_spill] sm:$0xff] }
 0x72c   : > { %3893 = vmatpush1.bf16.msra.mxu0 %v1408_v32  ;;  %7574 = vrcp.f32 %v3111_v37  ;;  %v3115_v42 = vpop.xlane.xlu1 %3114  ;;  %v3760_v30 = vadd.f32 %v10734_v52, %v3759_v39  ;;  %v3168_v38 = vmul.f32 %v7557_v45, %v10387_v48  ;;  %v3167_v25 = vmul.f32 %v7557_v45, %v12744_v63 }
 0x72d   : > { %3908 = vmatprep.subr.bf16.mxu0 %v12552_v41  ;;  %6646 = vmatprep.mubr.msk.bf16.mxu0 %vm1601_vm3, %v3192_v2  ;;  %7576 = vrcp.f32 %v3115_v42  ;;  %v12747_v2 = vld [vmem:[#allocation95_spill] sm:$0xff] }
 0x72e   : > { %v10747_v20 = vpop.eup %7558  ;;  %3761 = vadd.xlane.f32.xlu1 %v3760_v30  ;;  %v12749_v30 = vld [vmem:[#allocation97_spill] sm:$0xff] }
 0x72f   : > { %3296 = vmatmul.mubr.bf16.gmra.mxu0 %v3191_v3  ;;  %v10749_v22 = vpop.eup %7560  ;;  %v12748_v3 = vld [vmem:[#allocation65_spill] sm:$0xff] }
 0x730   : > { %3909 = vmatpush2.bf16.msra.mxu0 %v3876_v17  ;;  %v3119_v6 = vpop.xlane.xlu0 %3118  ;;  %v7563_v47 = vpop.eup %7562  ;;  %v3763_v41 = vsel %vm1601_vm3, %v10749_v22, 0.0 }
 0x731   : > { %7578 = vrcp.f32 %v3119_v6  ;;  %v3764_v13 = vadd.f32 %v10747_v20, %v3763_v41  ;;  %v3170_v58 = vmul.f32 %v7563_v47, %v12743_v19  ;;  %v3169_v26 = vmul.f32 %v7563_v47, %v12745_v40 }
 0x732   : > { %v10754_v61 = vpop.eup %7564 }
 0x733   : > { %v10760_v46 = vpop.eup %7566  ;;  %3765 = vadd.xlane.f32.xlu0 %v3764_v13  ;;  %v3194_v32 = vpack.c.bf16 %v3170_v58, %v3168_v38  ;;  %v3123_v12 = vpop.xlane.xlu1 %3122  ;;  %v3193_v1 = vpack.c.bf16 %v3169_v26, %v3167_v25  ;;  %v12750_v13 = vld [vmem:[#allocation62_spill] sm:$0xff]  ;;  %v12751_v58 = vld [vmem:[#allocation57_spill] sm:$0xff] }
 0x734   : > { %v3767_v5 = vsel %vm1601_vm3, %v10760_v46, 0.0  ;;  %v7569_v4 = vpop.eup %7568  ;;  %7580 = vrcp.f32 %v3123_v12  ;;  %v12752_v25 = vld [vmem:[#allocation61_spill] sm:$0xff]  ;;  %v12753_v12 = vld [vmem:[#allocation64_spill] sm:$0xff] }
 0x735   : > { %v3768_v48 = vadd.f32 %v10754_v61, %v3767_v5  ;;  %6647 = vmatprep.mubr.msk.bf16.mxu0 %vm1601_vm3, %v3194_v32  ;;  %v3172_v51 = vmul.f32 %v7569_v4, %v12746_v60  ;;  %v3171_v39 = vmul.f32 %v7569_v4, %v12748_v3  ;;  %v12754_v60 = vld [vmem:[#allocation66_spill] sm:$0xff] }
 0x737   : > { %v10766_v37 = vpop.eup %7570  ;;  %3304 = vmatmul.mubr.bf16.gmra.mxu0 %v3193_v1  ;;  %3769 = vadd.xlane.f32.xlu1 %v3768_v48 }
 0x738   : > { %v10768_v36 = vpop.eup %7572  ;;  %v3128_v34 = vpop.xlane.xlu0 %3127  ;;  %v3771_v54 = vsel %vm1670_vm4, %v10766_v37, 0.0 }
 0x739   : > { %v7575_v49 = vpop.eup %7574  ;;  %7582 = vrcp.f32 %v3128_v34  ;;  %v3772_v16 = vsel %vm1672_vm5, %v10768_v36, 0.0 }
 0x73a   : > { %v3773_v21 = vadd.f32 %v3772_v16, %v3771_v54  ;;  %v3174_v42 = vmul.f32 %v7575_v49, %v12747_v2  ;;  %v3173_v45 = vmul.f32 %v7575_v49, %v12749_v30  ;;  %v7577_v17 = vpop.eup %7576 }
 0x73b   : > { %v3706_v47 = vpop.xlane.xlu1 %3705  ;;  %v3176_v19 = vmul.f32 %v7577_v17, %v12750_v13  ;;  %v3175_v1 = vmul.f32 %v7577_v17, %v12753_v12  ;;  %v12757_v17 = vld [vmem:[#allocation56_spill] sm:$0xff] }
 0x73c   : > { %3774 = vadd.xlane.f32.xlu0 %v3773_v21  ;;  %v3196_v6 = vpack.c.bf16 %v3174_v42, %v3172_v51  ;;  %v3195_v41 = vpack.c.bf16 %v3173_v45, %v3171_v39  ;;  %7584 = vrcp.f32 %v3706_v47  ;;  %v12755_v21 = vld [vmem:[#allocation39_spill] sm:$0xff] }
 0x73d   : > { %v12756_v42 = vld [vmem:[#allocation43_spill] sm:$0xff] }
 0x73e   : > { %v7579_v38 = vpop.eup %7578  ;;  %6648 = vmatprep.mubr.msk.bf16.mxu0 %vm1601_vm3, %v3196_v6 }
 0x73f   : > { %3312 = vmatmul.mubr.bf16.gmra.mxu0 %v3195_v41  ;;  %v3178_v63 = vmul.f32 %v7579_v38, %v12751_v58  ;;  %v3177_v40 = vmul.f32 %v7579_v38, %v12752_v25 }
 0x740   : > { %v3710_v26 = vpop.xlane.xlu0 %3709 }
 0x741   : > { %7586 = vrcp.f32 %v3710_v26  ;;  %v3198_v32 = vpack.c.bf16 %v3178_v63, %v3176_v19  ;;  %v3197_v48 = vpack.c.bf16 %v3177_v40, %v3175_v1  ;;  %v7581_v4 = vpop.eup %7580 }
 0x742   : > { %v10783_v5 = vpop.f32.mrf.mxu0  ;;  %v3180_v51 = vmul.f32 %v7581_v4, %v12754_v60  ;;  %v3179_v6 = vmul.f32 %v7581_v4, %v12757_v17 }
 0x743   : > { %6649 = vmatprep.mubr.msk.bf16.mxu0 %vm1601_vm3, %v3198_v32  ;;  %v3714_v34 = vpop.xlane.xlu1 %3713 }
 0x744   : > { %v2638_v54 = vpop.f32.mrf.mxu0  ;;  %7588 = vrcp.f32 %v3714_v34 }
 0x746   : > { %v7583_v49 = vpop.eup %7582  ;;  %v10786_v16 = vpop.f32.mrf.mxu0 }
 0x747   : > { %3320 = vmatmul.mubr.bf16.gmra.mxu0 %v3197_v48  ;;  %v3182_v2 = vmul.f32 %v7583_v49, %v12755_v21  ;;  %v3181_v3 = vmul.f32 %v7583_v49, %v12756_v42 }
 0x748   : > { %v3718_v39 = vpop.xlane.xlu0 %3717  ;;  %v2641_v30 = vpop.f32.mrf.mxu0 }
 0x749   : > { %7590 = vrcp.f32 %v3718_v39  ;;  %v3200_v45 = vpack.c.bf16 %v3182_v2, %v3180_v51  ;;  %v3199_v41 = vpack.c.bf16 %v3181_v3, %v3179_v6  ;;  %v7585_v38 = vpop.eup %7584 }
 0x74a   : > { %v10792_v47 = vpop.f32.mrf.mxu0  ;;  %v3795_v40 = vmul.f32 %v7585_v38, %v10519_v35  ;;  %v3794_v12 = vmul.f32 %v7585_v38, %v10514_v15 }
 0x74b   : > { %6650 = vmatprep.mubr.msk.bf16.mxu0 %vm1601_vm3, %v3200_v45  ;;  %v3722_v13 = vpop.xlane.xlu1 %3721 }
 0x74c   : > { %v2646_v19 = vpop.f32.mrf.mxu0  ;;  %7592 = vrcp.f32 %v3722_v13 }
 0x74e   : > { %v7587_v58 = vpop.eup %7586  ;;  %v10796_v25 = vpop.f32.mrf.mxu0 }
 0x74f   : > { %v3796_v63 = vmul.f32 %v7587_v58, %v10526_v0  ;;  %3328 = vmatmul.mubr.bf16.gmra.mxu0 %v3199_v41  ;;  %v3797_v26 = vmul.f32 %v7587_v58, %v10529_v11 }
 0x750   : > { %v3726_v32 = vpop.xlane.xlu0 %3725  ;;  %v2649_v1 = vpop.f32.mrf.mxu0 }
 0x751   : > { %7594 = vrcp.f32 %v3726_v32  ;;  %v3831_v48 = vpack.c.bf16 %v3797_v26, %v3795_v40  ;;  %v3830_v4 = vpack.c.bf16 %v3796_v63, %v3794_v12  ;;  %v7589_v0 = vpop.eup %7588 }
 0x752   : > { %v10801_v34 = vpop.f32.mrf.mxu0  ;;  %v3799_v35 = vmul.f32 %v7589_v0, %v10540_v24  ;;  %v3798_v2 = vmul.f32 %v7589_v0, %v10538_v23  ;;  %v12758_v23 = vld [vmem:[#allocation55_spill] sm:$0xff] }
 0x753   : > { %6660 = vmatprep.mubr.msk.bf16.mxu0 %vm1601_vm3, %v3831_v48 }
 0x754   : > { %v2654_v54 = vpop.f32.mrf.mxu0 }
 0x756   : > { %v7591_v49 = vpop.eup %7590  ;;  %v10804_v60 = vpop.f32.mrf.mxu0 }
 0x757   : > { %3911 = vmatmul.mubr.bf16.vlgmr.msra.gmra.mxu0 %v3830_v4  ;;  %v3801_v11 = vmul.f32 %v7591_v49, %v10548_v7  ;;  %v3800_v15 = vmul.f32 %v7591_v49, %v10546_v8 }
 0x758   : > { %v2657_v51 = vpop.f32.mrf.mxu0 }
 0x759   : > { %v3833_v21 = vpack.c.bf16 %v3801_v11, %v3799_v35  ;;  %v3832_v3 = vpack.c.bf16 %v3800_v15, %v3798_v2  ;;  %v7593_v39 = vpop.eup %7592 }
 0x75a   : > { %v10810_v42 = vpop.f32.mrf.mxu0  ;;  %v3803_v24 = vmul.f32 %v7593_v39, %v10559_v29  ;;  %v3802_v38 = vmul.f32 %v7593_v39, %v12758_v23  ;;  %v12760_v23 = vld [vmem:[#allocation50_spill] sm:$0xff] }
 0x75b   : > { %6661 = vmatprep.mubr.msk.bf16.mxu0 %vm1601_vm3, %v3833_v21 }
 0x75c   : > { %v2662_v30 = vpop.f32.mrf.mxu0 }
 0x75e   : > { %v7595_v45 = vpop.eup %7594  ;;  %v10813_v17 = vpop.f32.mrf.mxu0 }
 0x75f   : > { %3919 = vmatmul.mubr.bf16.gmra.mxu0 %v3832_v3  ;;  %v3805_v7 = vmul.f32 %v7595_v45, %v10567_v33  ;;  %v3804_v8 = vmul.f32 %v7595_v45, %v10565_v43 }
 0x760   : > { %v2665_v6 = vpop.f32.mrf.mxu0 }
 0x761   : > { %v3835_v41 = vpack.c.bf16 %v3805_v7, %v3803_v24  ;;  %v3834_v19 = vpack.c.bf16 %v3804_v8, %v3802_v38  ;;  %v12759_v6 = vld [vmem:[#allocation52_spill] sm:$0xff] }
 0x762   : > { %v10819_v13 = vpop.f32.mrf.mxu0 }
 0x763   : > { %6662 = vmatprep.mubr.msk.bf16.mxu0 %vm1601_vm3, %v3835_v41 }
 0x764   : > { %v2670_v58 = vpop.f32.mrf.mxu0 }
 0x766   : > { %v10822_v63 = vpop.f32.mrf.mxu0 }
 0x767   : > { %3927 = vmatmul.mubr.bf16.gmra.mxu0 %v3834_v19 }
 0x768   : > { %v2673_v40 = vpop.f32.mrf.mxu0 }
 0x76a   : > { %v10824_v26 = vpop.f32.mrf.mxu0 }
 0x76c   : > { %v2678_v29 = vpop.f32.mrf.mxu0 }
 0x76e   : > { %v10826_v33 = vpop.f32.mrf.mxu0 }
 0x770   : > { %v2681_v43 = vpop.f32.mrf.mxu0 }
 0x772   : > { %v10828_v32 = vpop.f32.mrf.mxu0 }
 0x774   : > { %v2686_v12 = vpop.f32.mrf.mxu0 }
 0x776   : > { %v10830_v1 = vpop.f32.mrf.mxu0 }
 0x778   : > { %v2689_v48 = vpop.f32.mrf.mxu0 }
 0x77a   : > { %v10832_v4 = vpop.f32.mrf.mxu0 }
 0x77c   : > { %v2694_v0 = vpop.f32.mrf.mxu0 }
 0x77e   : > { %v10834_v54 = vpop.f32.mrf.mxu0 }
 0x780   : > { %v2697_v49 = vpop.f32.mrf.mxu0 }
 0x782   : > { %v10836_v35 = vpop.f32.mrf.mxu0 }
 0x784   : > { %v2702_v11 = vpop.f32.mrf.mxu0 }
 0x786   : > { %v10838_v15 = vpop.f32.mrf.mxu0 }
 0x788   : > { %v2705_v51 = vpop.f32.mrf.mxu0 }
 0x797   : > { %v3730_v21 = vpop.xlane.xlu1 %3729 }
 0x798   : > { %7596 = vrcp.f32 %v3730_v21 }
 0x79b   : > { %v3734_v2 = vpop.xlane.xlu0 %3733 }
 0x79c   : > { %7598 = vrcp.f32 %v3734_v2 }
 0x79f   : > { %v3738_v3 = vpop.xlane.xlu1 %3737 }
 0x7a0   : > { %7600 = vrcp.f32 %v3738_v3 }
 0x7a3   : > { %v3742_v39 = vpop.xlane.xlu0 %3741 }
 0x7a4   : > { %7602 = vrcp.f32 %v3742_v39 }
 0x7a5   : > { %v7597_v30 = vpop.eup %7596 }
 0x7a6   : > { %v3807_v7 = vmul.f32 %v7597_v30, %v10597_v56  ;;  %v3806_v41 = vmul.f32 %v7597_v30, %v12759_v6 }
 0x7a7   : > { %v3746_v45 = vpop.xlane.xlu1 %3745 }
 0x7a8   : > { %7604 = vrcp.f32 %v3746_v45 }
 0x7a9   : > { %v7599_v24 = vpop.eup %7598 }
 0x7aa   : > { %v3809_v8 = vmul.f32 %v7599_v24, %v10615_v53  ;;  %v3808_v38 = vmul.f32 %v7599_v24, %v12760_v23 }
 0x7ac   : > { %v3750_v19 = vpop.xlane.xlu0 %3749  ;;  %v3837_v58 = vpack.c.bf16 %v3809_v8, %v3807_v7  ;;  %v3836_v40 = vpack.c.bf16 %v3808_v38, %v3806_v41 }
 0x7ad   : > { %7606 = vrcp.f32 %v3750_v19  ;;  %v7601_v29 = vpop.eup %7600 }
 0x7ae   : > { %6663 = vmatprep.mubr.msk.bf16.mxu0 %vm1601_vm3, %v3837_v58  ;;  %v3811_v48 = vmul.f32 %v7601_v29, %v10633_v28  ;;  %v3810_v53 = vmul.f32 %v7601_v29, %v10627_v59  ;;  %v12761_v58 = vld [vmem:[#allocation37_spill] sm:$0xff] }
 0x7af   : > { %v3754_v43 = vpop.xlane.xlu1 %3753  ;;  %3935 = vmatmul.mubr.bf16.gmra.mxu0 %v3836_v40  ;;  %v2637_v40 = vadd.f32 %v10783_v5, %v12761_v58 }
 0x7b0   : > { %7608 = vrcp.f32 %v3754_v43 }
 0x7b1   : > { %v7603_v12 = vpop.eup %7602 }
 0x7b2   : > { %v3813_v56 = vmul.f32 %v7603_v12, %v10650_v14  ;;  %v3812_v0 = vmul.f32 %v7603_v12, %v10644_v57 }
 0x7b4   : > { %v3758_v49 = vpop.xlane.xlu0 %3757  ;;  %v3839_v11 = vpack.c.bf16 %v3813_v56, %v3811_v48  ;;  %v3838_v51 = vpack.c.bf16 %v3812_v0, %v3810_v53  ;;  %v12762_v53 = vld [vmem:[#allocation51_spill] sm:$0xff] }
 0x7b5   : > { %7610 = vrcp.f32 %v3758_v49  ;;  %v7605_v21 = vpop.eup %7604  ;;  %v2640_v0 = vadd.f32 %v10786_v16, %v12762_v53 }
 0x7b6   : > { %6664 = vmatprep.mubr.msk.bf16.mxu0 %vm1601_vm3, %v3839_v11  ;;  %v3815_v39 = vmul.f32 %v7605_v21, %v10669_v27  ;;  %v3814_v14 = vmul.f32 %v7605_v21, %v10663_v10 }
 0x7b7   : > { %3943 = vmatmul.mubr.bf16.gmra.mxu0 %v3838_v51  ;;  %v3762_v2 = vpop.xlane.xlu1 %3761 }
 0x7b8   : > { %7612 = vrcp.f32 %v3762_v2  ;;  %v12763_v2 = vld [vmem:[#allocation81_spill] sm:$0xff] }
 0x7b9   : > { %v2645_v16 = vadd.f32 %v10792_v47, %v12763_v2 }
 0x7ba   : > { %v7607_v3 = vpop.eup %7606 }
 0x7bb   : > { %v3817_v28 = vmul.f32 %v7607_v3, %v10697_v44  ;;  %v3816_v59 = vmul.f32 %v7607_v3, %v10688_v9 }
 0x7bc   : > { %v3766_v57 = vpop.xlane.xlu0 %3765 }
 0x7bd   : > { %7614 = vrcp.f32 %v3766_v57  ;;  %v3841_v30 = vpack.c.bf16 %v3817_v28, %v3815_v39  ;;  %v3840_v45 = vpack.c.bf16 %v3816_v59, %v3814_v14  ;;  %v7609_v24 = vpop.eup %7608  ;;  %v12764_v57 = vld [vmem:[#allocation79_spill] sm:$0xff] }
 0x7be   : > { %v3819_v6 = vmul.f32 %v7609_v24, %v10711_v55  ;;  %v3818_v44 = vmul.f32 %v7609_v24, %v10706_v50 }
 0x7bf   : > { %6665 = vmatprep.mubr.msk.bf16.mxu0 %vm1601_vm3, %v3841_v30 }
 0x7c0   : > { %v3770_v7 = vpop.xlane.xlu1 %3769  ;;  %3951 = vmatmul.mubr.bf16.gmra.mxu0 %v3840_v45 }
 0x7c1   : > { %7616 = vrcp.f32 %v3770_v7 }
 0x7c2   : > { %v7611_v8 = vpop.eup %7610 }
 0x7c3   : > { %v3821_v27 = vmul.f32 %v7611_v8, %v10724_v18  ;;  %v3820_v10 = vmul.f32 %v7611_v8, %v10722_v62  ;;  %v12766_v8 = vld [vmem:[#allocation83_spill] sm:$0xff] }
 0x7c5   : > { %v3775_v9 = vpop.xlane.xlu0 %3774  ;;  %v3843_v41 = vpack.c.bf16 %v3821_v27, %v3819_v6  ;;  %v3842_v23 = vpack.c.bf16 %v3820_v10, %v3818_v44  ;;  %v7613_v38 = vpop.eup %7612  ;;  %v2656_v6 = vadd.f32 %v10804_v60, %v12766_v8 }
 0x7c6   : > { %7618 = vrcp.f32 %v3775_v9  ;;  %v3823_v55 = vmul.f32 %v7613_v38, %v10739_v31  ;;  %v3822_v50 = vmul.f32 %v7613_v38, %v10734_v52 }
 0x7c7   : > { %6666 = vmatprep.mubr.msk.bf16.mxu0 %vm1601_vm3, %v3843_v41 }
 0x7c8   : > { %3959 = vmatmul.mubr.bf16.gmra.mxu0 %v3842_v23 }
 0x7ca   : > { %v7615_v19 = vpop.eup %7614 }
 0x7cb   : > { %v3825_v18 = vmul.f32 %v7615_v19, %v10749_v22  ;;  %v3824_v62 = vmul.f32 %v7615_v19, %v10747_v20  ;;  %v12768_v19 = vld [vmem:[#allocation82_spill] sm:$0xff] }
 0x7cc   : > { %v3265_v29 = vpop.f32.mrf.mxu0 }
 0x7cd   : > { %v10866_v43 = vadd.f32 %v3265_v29, %v2637_v40  ;;  %v3845_v12 = vpack.c.bf16 %v3825_v18, %v3823_v55  ;;  %v3844_v48 = vpack.c.bf16 %v3824_v62, %v3822_v50  ;;  %v12769_v18 = vld [vmem:[#allocation84_spill] sm:$0xff] }
 0x7ce   : > { %v3267_v56 = vpop.f32.mrf.mxu0  ;;  %v7617_v5 = vpop.eup %7616  ;;  %v2669_v60 = vadd.f32 %v10819_v13, %v12769_v18 }
 0x7cf   : > { %6667 = vmatprep.mubr.msk.bf16.mxu0 %vm1601_vm3, %v3845_v12  ;;  %v3827_v20 = vmul.f32 %v7617_v5, %v10760_v46  ;;  %v3826_v51 = vmul.f32 %v7617_v5, %v10754_v61  ;;  %v2648_v46 = vadd.f32 %v10796_v25, %v12764_v57  ;;  %v12767_v25 = vld [vmem:[#allocation85_spill] sm:$0xff]  ;;  %v12770_v12 = vld [vmem:[#allocation87_spill] sm:$0xff] }
 0x7d0   : > { %3967 = vmatmul.mubr.bf16.gmra.mxu0 %v3844_v48  ;;  %v3268_v31 = vpop.f32.mrf.mxu0  ;;  %v2661_v9 = vadd.f32 %v10810_v42, %v12767_v25  ;;  %v2672_v42 = vadd.f32 %v10822_v63, %v12770_v12 }
 0x7d1   : > { %v10871_v49 = vadd.f32 %v3268_v31, %v2640_v0  ;;  %v12771_v0 = vld [vmem:[#allocation89_spill] sm:$0xff] }
 0x7d2   : > { %v3270_v52 = vpop.f32.mrf.mxu0 }
 0x7d3   : > { %v7619_v22 = vpop.eup %7618  ;;  %v12772_v52 = vld [vmem:[#allocation86_spill] sm:$0xff] }
 0x7d4   : > { %v3829_v11 = vmul.f32 %v7619_v22, %v10768_v36  ;;  %v3828_v21 = vmul.f32 %v7619_v22, %v10766_v37  ;;  %v12765_v37 = vld [vmem:[#allocation80_spill] sm:$0xff]  ;;  %v2680_v13 = vadd.f32 %v10826_v33, %v12772_v52 }
 0x7d5   : > { %v3273_v3 = vpop.f32.mrf.mxu0  ;;  %v2653_v45 = vadd.f32 %v10801_v34, %v12765_v37  ;;  %v2664_v34 = vadd.f32 %v10813_v17, %v12768_v19  ;;  %v2677_v17 = vadd.f32 %v10824_v26, %v12771_v0 }
 0x7d6   : > { %v3847_v39 = vpack.c.bf16 %v3829_v11, %v3827_v20  ;;  %v3846_v28 = vpack.c.bf16 %v3828_v21, %v3826_v51  ;;  %v10879_v14 = vadd.f32 %v3273_v3, %v2645_v16  ;;  %v12773_v21 = vld [vmem:[#allocation88_spill] sm:$0xff] }
 0x7d7   : > { %v3275_v59 = vpop.f32.mrf.mxu0  ;;  %v2685_v63 = vadd.f32 %v10828_v32, %v12773_v21  ;;  %v7660_v21 = vld [vmem:[#allocation2 + $0x58] sm:$0xff] }
 0x7d8   : > { %6668 = vmatprep.mubr.msk.bf16.mxu0 %vm1601_vm3, %v3847_v39  ;;  %v12774_v39 = vld [vmem:[#allocation92_spill] sm:$0xff] }
 0x7d9   : > { %3975 = vmatmul.mubr.bf16.gmra.mxu0 %v3846_v28  ;;  %v3276_v36 = vpop.f32.mrf.mxu0  ;;  %v2688_v26 = vadd.f32 %v10830_v1, %v12774_v39 }
 0x7da   : > { %v10884_v30 = vadd.f32 %v3276_v36, %v2648_v46  ;;  %v12775_v46 = vld [vmem:[#allocation94_spill] sm:$0xff] }
 0x7db   : > { %v3278_v61 = vpop.f32.mrf.mxu0  ;;  %v2693_v33 = vadd.f32 %v10832_v4, %v12775_v46 }
 0x7dd   : > { %v3281_v47 = vpop.f32.mrf.mxu0 }
 0x7de   : > { %v10888_v24 = vadd.f32 %v3281_v47, %v2653_v45  ;;  %v12776_v45 = vld [vmem:[#allocation91_spill] sm:$0xff] }
 0x7df   : > { %v3283_v7 = vpop.f32.mrf.mxu0  ;;  %v2696_v32 = vadd.f32 %v10834_v54, %v12776_v45  ;;  %v10945_v54 = vld [vmem:[%s12216_s8 + $0x5] ss:$0 sm:$0xff] }
 0x7e1   : > { %v3284_v27 = vpop.f32.mrf.mxu0 }
 0x7e2   : > { %v10892_v44 = vadd.f32 %v3284_v27, %v2656_v6  ;;  %v12777_v6 = vld [vmem:[#allocation93_spill] sm:$0xff] }
 0x7e3   : > { %v3286_v10 = vpop.f32.mrf.mxu0  ;;  %v2701_v1 = vadd.f32 %v10836_v35, %v12777_v6 }
 0x7e7   : > { %v3289_v41 = vpop.f32.mrf.mxu0 }
 0x7e8   : > { %v10896_v23 = vadd.f32 %v3289_v41, %v2661_v9  ;;  %v12778_v9 = vld [vmem:[#allocation96_spill] sm:$0xff] }
 0x7e9   : > { %v3291_v38 = vpop.f32.mrf.mxu0  ;;  %v2704_v4 = vadd.f32 %v10838_v15, %v12778_v9 }
 0x7eb   : > { %v3292_v58 = vpop.f32.mrf.mxu0 }
 0x7ec   : > { %v10900_v40 = vadd.f32 %v3292_v58, %v2664_v34 }
 0x7ed   : > { %v3294_v55 = vpop.f32.mrf.mxu0 }
 0x7ef   : > { %v3297_v50 = vpop.f32.mrf.mxu0 }
 0x7f0   : > { %v10904_v62 = vadd.f32 %v3297_v50, %v2669_v60  ;;  %v7657_v50 = vld [vmem:[#allocation2] sm:$0xff] }
 0x7f1   : > { %v3299_v29 = vpop.f32.mrf.mxu0 }
 0x7f3   : > { %v3300_v48 = vpop.f32.mrf.mxu0 }
 0x7f4   : > { %v10908_v56 = vadd.f32 %v3300_v48, %v2672_v42 }
 0x7f5   : > { %v3302_v53 = vpop.f32.mrf.mxu0 }
 0x7f6   : > { %v7658_v53 = vld [vmem:[#allocation2 + $0x38] sm:$0xff] }
 0x7f7   : > { %v3305_v5 = vpop.f32.mrf.mxu0 }
 0x7f8   : > { %v10912_v31 = vadd.f32 %v3305_v5, %v2677_v17 }
 0x7f9   : > { %v3307_v22 = vpop.f32.mrf.mxu0 }
 0x7fa   : > { %v7659_v22 = vld [vmem:[#allocation2 + $0x78] sm:$0xff] }
 0x7fb   : > { %v3308_v20 = vpop.f32.mrf.mxu0 }
 0x7fc   : > { %v10916_v11 = vadd.f32 %v3308_v20, %v2680_v13 }
 0x7fd   : > { %v3310_v51 = vpop.f32.mrf.mxu0 }
 0x7ff   : > { %v3313_v2 = vpop.f32.mrf.mxu0 }
 0x800   : > { %v10920_v16 = vadd.f32 %v3313_v2, %v2685_v63 }
 0x801   : > { %v3315_v3 = vpop.f32.mrf.mxu0 }
 0x803   : > { %v3316_v28 = vpop.f32.mrf.mxu0 }
 0x804   : > { %v10924_v59 = vadd.f32 %v3316_v28, %v2688_v26  ;;  %v7661_v26 = vld [vmem:[#allocation2 + $0x20] sm:$0xff] }
 0x805   : > { %v3318_v57 = vpop.f32.mrf.mxu0 }
 0x807   : > { %v3321_v36 = vpop.f32.mrf.mxu0 }
 0x808   : > { %v10928_v61 = vadd.f32 %v3321_v36, %v2693_v33 }
 0x809   : > { %v3323_v37 = vpop.f32.mrf.mxu0 }
 0x80b   : > { %v3324_v47 = vpop.f32.mrf.mxu0 }
 0x80c   : > { %v10932_v7 = vadd.f32 %v3324_v47, %v2696_v32 }
 0x80d   : > { %v3326_v8 = vpop.f32.mrf.mxu0 }
 0x80e   : > { %v7663_v8 = vld [vmem:[#allocation2 + $0x70] sm:$0xff] }
 0x80f   : > { %v3329_v27 = vpop.f32.mrf.mxu0 }
 0x810   : > { %v10936_v10 = vadd.f32 %v3329_v27, %v2701_v1 }
 0x811   : > { %v3331_v25 = vpop.f32.mrf.mxu0 }
 0x813   : > { %v3332_v41 = vpop.f32.mrf.mxu0 }
 0x814   : > { %v10940_v38 = vadd.f32 %v3332_v41, %v2704_v4  ;;  %v7664_v4 = vld [vmem:[#allocation2 + $0x80] sm:$0xff] }
 0x815   : > { %v3334_v19 = vpop.f32.mrf.mxu0 }
 0x817   : > { %v3912_v34 = vpop.f32.mrf.mxu0 }
 0x818   : > { %v3983_v58 = vadd.f32 %v3912_v34, %v10866_v43 }
 0x819   : > { %v3914_v35 = vpop.f32.mrf.mxu0 }
 0x81a   : > { %v4006_v55 = vadd.f32 %v10945_v54, %v3983_v58  ;;  %v7665_v58 = vld [vmem:[#allocation2 + $0x88] sm:$0xff] }
 0x81b   : > { %v3915_v18 = vpop.f32.mrf.mxu0 }
 0x81c   : > { %v3984_v60 = vadd.f32 %v3915_v18, %v10871_v49  ;;  %v10950_v15 = vadd.f32 %v7657_v50, %v4006_v55 }
 0x81d   : > { %v3917_v29 = vpop.f32.mrf.mxu0 }
 0x81e   : > { %v4007_v12 = vadd.f32 %v10945_v54, %v3984_v60  ;;  %4044 = vadd.xlane.f32.xlu0 %v10950_v15  ;;  %v7666_v60 = vld [vmem:[#allocation2 + $0x40] sm:$0xff] }
 0x81f   : > { %v3920_v42 = vpop.f32.mrf.mxu0 }
 0x820   : > { %v3985_v48 = vadd.f32 %v3920_v42, %v10879_v14  ;;  %v10955_v0 = vadd.f32 %v7658_v53, %v4007_v12  ;;  %v7667_v53 = vld [vmem:[#allocation2 + $0x50] sm:$0xff] }
 0x821   : > { %v3922_v43 = vpop.f32.mrf.mxu0 }
 0x822   : > { %v4008_v17 = vadd.f32 %v10945_v54, %v3985_v48  ;;  %4046 = vadd.xlane.f32.xlu1 %v10955_v0 }
 0x823   : > { %v3923_v49 = vpop.f32.mrf.mxu0 }
 0x824   : > { %v3986_v5 = vadd.f32 %v3923_v49, %v10884_v30  ;;  %v10960_v52 = vadd.f32 %v7659_v22, %v4008_v17 }
 0x825   : > { %v3925_v13 = vpop.f32.mrf.mxu0 }
 0x826   : > { %v4009_v20 = vadd.f32 %v10945_v54, %v3986_v5  ;;  %4048 = vadd.xlane.f32.xlu0 %v10960_v52 }
 0x827   : > { %v3928_v14 = vpop.f32.mrf.mxu0 }
 0x828   : > { %v3987_v51 = vadd.f32 %v3928_v14, %v10888_v24  ;;  %v10965_v63 = vadd.f32 %v7660_v21, %v4009_v20  ;;  %v7662_v24 = vld [vmem:[#allocation2 + $0x8] sm:$0xff]  ;;  %v7669_v21 = vld [vmem:[#allocation2 + $0x10] sm:$0xff] }
 0x829   : > { %v3930_v2 = vpop.f32.mrf.mxu0 }
 0x82a   : > { %v4010_v3 = vadd.f32 %v10945_v54, %v3987_v51  ;;  %4050 = vadd.xlane.f32.xlu1 %v10965_v63 }
 0x82b   : > { %v3931_v30 = vpop.f32.mrf.mxu0 }
 0x82c   : > { %v3988_v39 = vadd.f32 %v3931_v30, %v10892_v44  ;;  %v10970_v28 = vadd.f32 %v7661_v26, %v4010_v3  ;;  %v7670_v26 = vld [vmem:[#allocation2 + $0x48] sm:$0xff] }
 0x82d   : > { %v3933_v57 = vpop.f32.mrf.mxu0 }
 0x82e   : > { %v4011_v46 = vadd.f32 %v10945_v54, %v3988_v39  ;;  %4052 = vadd.xlane.f32.xlu0 %v10970_v28 }
 0x830   : > { %v10974_v33 = vadd.f32 %v7662_v24, %v4011_v46 }
 0x832   : > { %4054 = vadd.xlane.f32.xlu1 %v10974_v33 }
 0x86f   : > { %v3936_v36 = vpop.f32.mrf.mxu0 }
 0x870   : > { %v3989_v37 = vadd.f32 %v3936_v36, %v10896_v23  ;;  %v7671_v36 = vld [vmem:[#allocation2 + $0x30] sm:$0xff] }
 0x871   : > { %v3938_v45 = vpop.f32.mrf.mxu0 }
 0x872   : > { %v4012_v32 = vadd.f32 %v10945_v54, %v3989_v37 }
 0x873   : > { %v3939_v44 = vpop.f32.mrf.mxu0 }
 0x874   : > { %v3990_v47 = vadd.f32 %v3939_v44, %v10900_v40  ;;  %v10980_v6 = vadd.f32 %v7663_v8, %v4012_v32 }
 0x875   : > { %v3941_v1 = vpop.f32.mrf.mxu0 }
 0x876   : > { %v4013_v27 = vadd.f32 %v10945_v54, %v3990_v47  ;;  %4056 = vadd.xlane.f32.xlu0 %v10980_v6 }
 0x877   : > { %v3944_v25 = vpop.f32.mrf.mxu0 }
 0x878   : > { %v3991_v9 = vadd.f32 %v3944_v25, %v10904_v62  ;;  %v10985_v41 = vadd.f32 %v7664_v4, %v4013_v27  ;;  %v7672_v27 = vld [vmem:[#allocation2 + $0x68] sm:$0xff] }
 0x879   : > { %v3946_v23 = vpop.f32.mrf.mxu0 }
 0x87a   : > { %v4014_v19 = vadd.f32 %v10945_v54, %v3991_v9  ;;  %4058 = vadd.xlane.f32.xlu1 %v10985_v41 }
 0x87b   : > { %v3947_v40 = vpop.f32.mrf.mxu0 }
 0x87c   : > { %v3992_v34 = vadd.f32 %v3947_v40, %v10908_v56  ;;  %v10990_v35 = vadd.f32 %v7665_v58, %v4014_v19  ;;  %v7673_v19 = vld [vmem:[#allocation2 + $0x60] sm:$0x1]  ;;  %v7674_v58 = vld [vmem:[#allocation2 + $0x18] sm:$0xff] }
 0x87d   : > { %v3949_v55 = vpop.f32.mrf.mxu0 }
 0x87e   : > { %v4015_v18 = vadd.f32 %v10945_v54, %v3992_v34  ;;  %4060 = vadd.xlane.f32.xlu0 %v10990_v35 }
 0x880   : > { %v3952_v62 = vpop.f32.mrf.mxu0  ;;  %v10994_v50 = vadd.f32 %v7666_v60, %v4015_v18 }
 0x881   : > { %v3993_v29 = vadd.f32 %v3952_v62, %v10912_v31  ;;  %v7668_v31 = vld [vmem:[#allocation2 + $0x28] sm:$0xff] }
 0x882   : > { %v3954_v12 = vpop.f32.mrf.mxu0  ;;  %4062 = vadd.xlane.f32.xlu1 %v10994_v50 }
 0x883   : > { %v4016_v42 = vadd.f32 %v10945_v54, %v3993_v29 }
 0x884   : > { %v3955_v56 = vpop.f32.mrf.mxu0 }
 0x885   : > { %v3994_v48 = vadd.f32 %v3955_v56, %v10916_v11  ;;  %v11000_v43 = vadd.f32 %v7667_v53, %v4016_v42 }
 0x886   : > { %v3957_v17 = vpop.f32.mrf.mxu0 }
 0x887   : > { %v4017_v49 = vadd.f32 %v10945_v54, %v3994_v48  ;;  %4064 = vadd.xlane.f32.xlu0 %v11000_v43 }
 0x888   : > { %v3960_v5 = vpop.f32.mrf.mxu0 }
 0x889   : > { %v3995_v22 = vadd.f32 %v3960_v5, %v10920_v16  ;;  %v11005_v13 = vadd.f32 %v7668_v31, %v4017_v49 }
 0x88a   : > { %v3962_v20 = vpop.f32.mrf.mxu0 }
 0x88b   : > { %v4018_v14 = vadd.f32 %v10945_v54, %v3995_v22  ;;  %4066 = vadd.xlane.f32.xlu1 %v11005_v13 }
 0x88c   : > { %v3963_v11 = vpop.f32.mrf.mxu0 }
 0x88d   : > { %v3996_v51 = vadd.f32 %v3963_v11, %v10924_v59  ;;  %v11010_v2 = vadd.f32 %v7669_v21, %v4018_v14 }
 0x88e   : > { %v3965_v3 = vpop.f32.mrf.mxu0 }
 0x88f   : > { %v4019_v30 = vadd.f32 %v10945_v54, %v3996_v51  ;;  %4068 = vadd.xlane.f32.xlu0 %v11010_v2 }
 0x890   : > { %v3968_v16 = vpop.f32.mrf.mxu0 }
 0x891   : > { %v3997_v39 = vadd.f32 %v3968_v16, %v10928_v61  ;;  %v11015_v57 = vadd.f32 %v7670_v26, %v4019_v30 }
 0x892   : > { %v3970_v46 = vpop.f32.mrf.mxu0 }
 0x893   : > { %v4020_v24 = vadd.f32 %v10945_v54, %v3997_v39  ;;  %4070 = vadd.xlane.f32.xlu1 %v11015_v57 }
 0x894   : > { %v3971_v59 = vpop.f32.mrf.mxu0 }
 0x895   : > { %v11019_v37 = vadd.f32 %v7671_v36, %v4020_v24  ;;  %v3998_v9 = vadd.f32 %v3971_v59, %v10932_v7 }
 0x896   : > { %v3973_v45 = vpop.f32.mrf.mxu0 }
 0x897   : > { %4072 = vadd.xlane.f32.xlu0 %v11019_v37 }
 0x899   : > { %v3976_v32 = vpop.f32.mrf.mxu0 }
 0x89a   : > { %v3999_v44 = vadd.f32 %v3976_v32, %v10936_v10  ;;  %v4021_v10 = vadd.f32 %v10945_v54, %v3998_v9 }
 0x89b   : > { %v3978_v47 = vpop.f32.mrf.mxu0 }
 0x89c   : > { %v4022_v61 = vadd.f32 %v10945_v54, %v3999_v44  ;;  %v11035_v55 = vadd.f32 %v7674_v58, %v4021_v10 }
 0x89d   : > { %v3979_v8 = vpop.f32.mrf.mxu0 }
 0x89e   : > { %v4000_v1 = vadd.f32 %v3979_v8, %v10940_v38  ;;  %v11025_v25 = vadd.f32 %v7672_v27, %v4022_v61 }
 0x89f   : > { %v3981_v4 = vpop.f32.mrf.mxu0 }
 0x8a0   : > { %v4023_v23 = vadd.f32 %v10945_v54, %v4000_v1  ;;  %4076 = vadd.xlane.f32.xlu0 %v11025_v25 }
 0x8a2   : > { %v11030_v40 = vadd.f32 %v7673_v19, %v4023_v23 }
 0x8a4   : > { %v4078_v34 = vsel %vm1670_vm4, %v11030_v40, 0.0 }
 0x8a5   : > { %4079 = vadd.xlane.f32.xlu1 %v4078_v34 }
 0x8a7   : > { %v4045_v38 = vpop.xlane.xlu0 %4044 }
 0x8a8   : > { %v4082_v18 = vmul.f32 0.0078125, %v4045_v38 }
 0x8a9   : > { %4074 = vadd.xlane.f32.xlu1 %v11035_v55 }
 0x8aa   : > { %v11039_v7 = vsub.f32 %v10950_v15, %v4082_v18 }
 0x8ab   : > { %v4047_v62 = vpop.xlane.xlu1 %4046 }
 0x8ac   : > { %v4083_v60 = vmul.f32 0.0078125, %v4047_v62  ;;  %v4118_v29 = vmul.f32 %v11039_v7, %v11039_v7 }
 0x8ae   : > { %v11044_v54 = vsub.f32 %v10955_v0, %v4083_v60  ;;  %4136 = vadd.xlane.f32.xlu1 %v4118_v29 }
 0x8af   : > { %v4049_v12 = vpop.xlane.xlu0 %4048 }
 0x8b0   : > { %v4084_v42 = vmul.f32 0.0078125, %v4049_v12  ;;  %v4119_v56 = vmul.f32 %v11044_v54, %v11044_v54 }
 0x8b2   : > { %v11049_v48 = vsub.f32 %v10960_v52, %v4084_v42  ;;  %4138 = vadd.xlane.f32.xlu0 %v4119_v56 }
 0x8b3   : > { %v4051_v15 = vpop.xlane.xlu1 %4050 }
 0x8b4   : > { %v4085_v53 = vmul.f32 0.0078125, %v4051_v15  ;;  %v4120_v17 = vmul.f32 %v11049_v48, %v11049_v48 }
 0x8b6   : > { %v11054_v49 = vsub.f32 %v10965_v63, %v4085_v53  ;;  %4140 = vadd.xlane.f32.xlu1 %v4120_v17 }
 0x8b7   : > { %v4053_v0 = vpop.xlane.xlu0 %4052 }
 0x8b8   : > { %v4086_v5 = vmul.f32 0.0078125, %v4053_v0  ;;  %v4121_v22 = vmul.f32 %v11054_v49, %v11054_v49 }
 0x8ba   : > { %v11059_v31 = vsub.f32 %v10970_v28, %v4086_v5  ;;  %4142 = vadd.xlane.f32.xlu0 %v4121_v22 }
 0x8bb   : > { %v4055_v52 = vpop.xlane.xlu1 %4054 }
 0x8bc   : > { %v4087_v20 = vmul.f32 0.0078125, %v4055_v52  ;;  %v4122_v14 = vmul.f32 %v11059_v31, %v11059_v31 }
 0x8be   : > { %v11064_v11 = vsub.f32 %v10974_v33, %v4087_v20  ;;  %4144 = vadd.xlane.f32.xlu1 %v4122_v14 }
 0x8c0   : > { %v4123_v63 = vmul.f32 %v11064_v11, %v11064_v11 }
 0x8c2   : > { %4146 = vadd.xlane.f32.xlu0 %v4123_v63 }
 0x8ff   : > { %v4057_v51 = vpop.xlane.xlu0 %4056 }
 0x900   : > { %v4088_v21 = vmul.f32 0.0078125, %v4057_v51 }
 0x902   : > { %v11069_v3 = vsub.f32 %v10980_v6, %v4088_v21 }
 0x903   : > { %v4059_v28 = vpop.xlane.xlu1 %4058 }
 0x904   : > { %v4089_v30 = vmul.f32 0.0078125, %v4059_v28  ;;  %v4124_v16 = vmul.f32 %v11069_v3, %v11069_v3 }
 0x906   : > { %v11074_v39 = vsub.f32 %v10985_v41, %v4089_v30  ;;  %4148 = vadd.xlane.f32.xlu1 %v4124_v16 }
 0x907   : > { %v4061_v33 = vpop.xlane.xlu0 %4060 }
 0x908   : > { %v4090_v26 = vmul.f32 0.0078125, %v4061_v33  ;;  %v4125_v46 = vmul.f32 %v11074_v39, %v11074_v39 }
 0x90a   : > { %v11079_v24 = vsub.f32 %v10990_v35, %v4090_v26  ;;  %4150 = vadd.xlane.f32.xlu0 %v4125_v46  ;;  %v11132_v26 = vld [vmem:[%s12216_s8] ss:$0 sm:$0xff] }
 0x90b   : > { %v4063_v6 = vpop.xlane.xlu1 %4062 }
 0x90c   : > { %v4091_v59 = vmul.f32 0.0078125, %v4063_v6  ;;  %v4126_v36 = vmul.f32 %v11079_v24, %v11079_v24 }
 0x90e   : > { %v11084_v45 = vsub.f32 %v10994_v50, %v4091_v59  ;;  %4152 = vadd.xlane.f32.xlu1 %v4126_v36  ;;  %v11138_v59 = vld [vmem:[%s12216_s8 + $0x1] ss:$0 sm:$0xff] }
 0x910   : > { %v4065_v41 = vpop.xlane.xlu0 %4064  ;;  %v4127_v32 = vmul.f32 %v11084_v45, %v11084_v45 }
 0x911   : > { %v4092_v44 = vmul.f32 0.0078125, %v4065_v41 }
 0x912   : > { %4154 = vadd.xlane.f32.xlu0 %v4127_v32 }
 0x913   : > { %v11089_v47 = vsub.f32 %v11000_v43, %v4092_v44 }
 0x914   : > { %v4067_v35 = vpop.xlane.xlu1 %4066 }
 0x915   : > { %v4093_v61 = vmul.f32 0.0078125, %v4067_v35  ;;  %v4128_v8 = vmul.f32 %v11089_v47, %v11089_v47 }
 0x917   : > { %v11094_v1 = vsub.f32 %v11005_v13, %v4093_v61  ;;  %4156 = vadd.xlane.f32.xlu1 %v4128_v8 }
 0x918   : > { %v4069_v50 = vpop.xlane.xlu0 %4068 }
 0x919   : > { %v4094_v27 = vmul.f32 0.0078125, %v4069_v50  ;;  %v4129_v9 = vmul.f32 %v11094_v1, %v11094_v1 }
 0x91b   : > { %v11099_v4 = vsub.f32 %v11010_v2, %v4094_v27  ;;  %4158 = vadd.xlane.f32.xlu0 %v4129_v9 }
 0x91c   : > { %v4071_v43 = vpop.xlane.xlu1 %4070 }
 0x91d   : > { %v4095_v23 = vmul.f32 0.0078125, %v4071_v43  ;;  %v4130_v19 = vmul.f32 %v11099_v4, %v11099_v4 }
 0x91f   : > { %v11104_v10 = vsub.f32 %v11015_v57, %v4095_v23  ;;  %4160 = vadd.xlane.f32.xlu1 %v4130_v19 }
 0x920   : > { %v4073_v13 = vpop.xlane.xlu0 %4072 }
 0x921   : > { %v4096_v34 = vmul.f32 0.0078125, %v4073_v13  ;;  %v4131_v38 = vmul.f32 %v11104_v10, %v11104_v10 }
 0x923   : > { %v11109_v58 = vsub.f32 %v11019_v37, %v4096_v34  ;;  %4162 = vadd.xlane.f32.xlu0 %v4131_v38 }
 0x925   : > { %v4132_v2 = vmul.f32 %v11109_v58, %v11109_v58 }
 0x927   : > { %4164 = vadd.xlane.f32.xlu1 %v4132_v2 }
 0x929   : > { %v4077_v18 = vpop.xlane.xlu0 %4076 }
 0x92a   : > { %v4098_v62 = vmul.f32 0.0078125, %v4077_v18 }
 0x92c   : > { %v11114_v60 = vsub.f32 %v11025_v25, %v4098_v62 }
 0x92e   : > { %v4080_v57 = vpop.xlane.xlu1 %4079  ;;  %v4134_v29 = vmul.f32 %v11114_v60, %v11114_v60 }
 0x92f   : > { %v4099_v12 = vmul.f32 0.0078125, %v4080_v57 }
 0x930   : > { %4168 = vadd.xlane.f32.xlu1 %v4134_v29 }
 0x931   : > { %v11119_v37 = vsub.f32 %v11030_v40, %v4099_v12 }
 0x932   : > { %v4075_v42 = vpop.xlane.xlu1 %4074 }
 0x933   : > { %v4097_v56 = vmul.f32 0.0078125, %v4075_v42  ;;  %v4135_v0 = vmul.f32 %v11119_v37, %v11119_v37 }
 0x935   : > { %v11122_v15 = vsub.f32 %v11035_v55, %v4097_v56  ;;  %v4170_v20 = vsel %vm1670_vm4, %v4135_v0, 0.0 }
 0x937   : > { %v4137_v53 = vpop.xlane.xlu1 %4136  ;;  %v4133_v17 = vmul.f32 %v11122_v15, %v11122_v15 }
 0x938   : > { %v4173_v25 = vmul.f32 0.0078125, %v4137_v53 }
 0x939   : > { %4166 = vadd.xlane.f32.xlu0 %v4133_v17 }
 0x93a   : > { %v4191_v5 = vadd.f32 1e-05, %v4173_v25 }
 0x93b   : > { %v4139_v22 = vpop.xlane.xlu0 %4138 }
 0x93c   : > { %7620 = vrsqrt.f32 %v4191_v5  ;;  %v4174_v52 = vmul.f32 0.0078125, %v4139_v22 }
 0x93d   : > { %4171 = vadd.xlane.f32.xlu0 %v4170_v20 }
 0x93e   : > { %v4192_v40 = vadd.f32 1e-05, %v4174_v52 }
 0x93f   : > { %v4141_v14 = vpop.xlane.xlu1 %4140 }
 0x940   : > { %7622 = vrsqrt.f32 %v4192_v40  ;;  %v4175_v55 = vmul.f32 0.0078125, %v4141_v14 }
 0x942   : > { %v4193_v63 = vadd.f32 1e-05, %v4175_v55 }
 0x943   : > { %v4143_v51 = vpop.xlane.xlu0 %4142 }
 0x944   : > { %7624 = vrsqrt.f32 %v4193_v63  ;;  %v4176_v21 = vmul.f32 0.0078125, %v4143_v51 }
 0x946   : > { %v4194_v28 = vadd.f32 1e-05, %v4176_v21 }
 0x947   : > { %v4145_v30 = vpop.xlane.xlu1 %4144 }
 0x948   : > { %7626 = vrsqrt.f32 %v4194_v28  ;;  %v4177_v16 = vmul.f32 0.0078125, %v4145_v30 }
 0x949   : > { %v7621_v33 = vpop.eup %7620 }
 0x94a   : > { %v4227_v46 = vmul.f32 %v7621_v33, %v11039_v7  ;;  %v4195_v6 = vadd.f32 1e-05, %v4177_v16 }
 0x94b   : > { %v4147_v36 = vpop.xlane.xlu0 %4146 }
 0x94c   : > { %v4249_v41 = vmul.f32 %v11132_v26, %v4227_v46  ;;  %7628 = vrsqrt.f32 %v4195_v6  ;;  %v4178_v32 = vmul.f32 0.0078125, %v4147_v36 }
 0x94d   : > { %v7623_v44 = vpop.eup %7622 }
 0x94e   : > { %v4271_v35 = vadd.f32 %v11138_v59, %v4249_v41  ;;  %v4228_v61 = vmul.f32 %v7623_v44, %v11044_v54  ;;  %v4196_v8 = vadd.f32 1e-05, %v4178_v32 }
 0x950   : > { %4289 = vst [vmem:[#allocation3 + $0x88] sm:$0xff] %v4271_v35  ;;  %v4250_v7 = vmul.f32 %v11132_v26, %v4228_v61  ;;  %7630 = vrsqrt.f32 %v4196_v8 }
 0x951   : > { %v7625_v50 = vpop.eup %7624 }
 0x952   : > { %v4272_v27 = vadd.f32 %v11138_v59, %v4250_v7  ;;  %v4229_v9 = vmul.f32 %v7625_v50, %v11049_v48 }
 0x954   : > { %4290 = vst [vmem:[#allocation3 + $0x48] sm:$0xff] %v4272_v27  ;;  %v4251_v43 = vmul.f32 %v11132_v26, %v4229_v9 }
 0x955   : > { %v7627_v23 = vpop.eup %7626 }
 0x956   : > { %v4273_v19 = vadd.f32 %v11138_v59, %v4251_v43  ;;  %v4230_v13 = vmul.f32 %v7627_v23, %v11054_v49 }
 0x958   : > { %4291 = vst [vmem:[#allocation3 + $0x10] sm:$0xff] %v4273_v19  ;;  %v4252_v54 = vmul.f32 %v11132_v26, %v4230_v13 }
 0x959   : > { %v7629_v34 = vpop.eup %7628 }
 0x95a   : > { %v4274_v38 = vadd.f32 %v11138_v59, %v4252_v54  ;;  %v4231_v2 = vmul.f32 %v7629_v34, %v11059_v31 }
 0x95c   : > { %4292 = vst [vmem:[#allocation3 + $0x20] sm:$0xff] %v4274_v38  ;;  %v4253_v18 = vmul.f32 %v11132_v26, %v4231_v2 }
 0x95d   : > { %v7631_v48 = vpop.eup %7630 }
 0x95e   : > { %v4275_v62 = vadd.f32 %v11138_v59, %v4253_v18  ;;  %v4232_v57 = vmul.f32 %v7631_v48, %v11064_v11 }
 0x960   : > { %4293 = vst [vmem:[#allocation3 + $0x50] sm:$0xff] %v4275_v62  ;;  %v4254_v29 = vmul.f32 %v11132_v26, %v4232_v57 }
 0x962   : > { %v4276_v49 = vadd.f32 %v11138_v59, %v4254_v29 }
 0x964   : > { %4294 = vst [vmem:[#allocation3 + $0x18] sm:$0xff] %v4276_v49 }
 0x98f   : > { %v4149_v12 = vpop.xlane.xlu1 %4148 }
 0x990   : > { %v4179_v42 = vmul.f32 0.0078125, %v4149_v12 }
 0x992   : > { %v4197_v56 = vadd.f32 1e-05, %v4179_v42 }
 0x993   : > { %v4151_v53 = vpop.xlane.xlu0 %4150 }
 0x994   : > { %7632 = vrsqrt.f32 %v4197_v56  ;;  %v4180_v31 = vmul.f32 0.0078125, %v4151_v53 }
 0x996   : > { %v4198_v17 = vadd.f32 1e-05, %v4180_v31 }
 0x997   : > { %v4153_v25 = vpop.xlane.xlu1 %4152 }
 0x998   : > { %7634 = vrsqrt.f32 %v4198_v17  ;;  %v4181_v0 = vmul.f32 0.0078125, %v4153_v25 }
 0x99a   : > { %v4199_v5 = vadd.f32 1e-05, %v4181_v0 }
 0x99b   : > { %v4155_v22 = vpop.xlane.xlu0 %4154 }
 0x99c   : > { %7636 = vrsqrt.f32 %v4199_v5  ;;  %v4182_v11 = vmul.f32 0.0078125, %v4155_v22 }
 0x99e   : > { %v4200_v52 = vadd.f32 1e-05, %v4182_v11 }
 0x9a0   : > { %7638 = vrsqrt.f32 %v4200_v52  ;;  %v4157_v20 = vpop.xlane.xlu1 %4156 }
 0x9a1   : > { %v7633_v40 = vpop.eup %7632  ;;  %v4183_v14 = vmul.f32 0.0078125, %v4157_v20 }
 0x9a2   : > { %v4233_v55 = vmul.f32 %v7633_v40, %v11069_v3 }
 0x9a3   : > { %v4201_v63 = vadd.f32 1e-05, %v4183_v14 }
 0x9a4   : > { %v4255_v51 = vmul.f32 %v11132_v26, %v4233_v55  ;;  %v4159_v21 = vpop.xlane.xlu0 %4158 }
 0x9a5   : > { %v7635_v28 = vpop.eup %7634  ;;  %7640 = vrsqrt.f32 %v4201_v63  ;;  %v4184_v30 = vmul.f32 0.0078125, %v4159_v21 }
 0x9a6   : > { %v4277_v16 = vadd.f32 %v11138_v59, %v4255_v51  ;;  %v4234_v33 = vmul.f32 %v7635_v28, %v11074_v39 }
 0x9a7   : > { %v4202_v46 = vadd.f32 1e-05, %v4184_v30 }
 0x9a8   : > { %4295 = vst [vmem:[#allocation3 + $0x60] sm:$0xff] %v4277_v16  ;;  %v4256_v6 = vmul.f32 %v11132_v26, %v4234_v33  ;;  %v4161_v36 = vpop.xlane.xlu1 %4160 }
 0x9a9   : > { %v7637_v41 = vpop.eup %7636  ;;  %7642 = vrsqrt.f32 %v4202_v46  ;;  %v4185_v32 = vmul.f32 0.0078125, %v4161_v36 }
 0x9aa   : > { %v4278_v3 = vadd.f32 %v11138_v59, %v4256_v6  ;;  %v4235_v44 = vmul.f32 %v7637_v41, %v11079_v24 }
 0x9ab   : > { %v4203_v35 = vadd.f32 1e-05, %v4185_v32 }
 0x9ac   : > { %4296 = vst [vmem:[#allocation3 + $0x78] sm:$0xff] %v4278_v3  ;;  %v4257_v61 = vmul.f32 %v11132_v26, %v4235_v44  ;;  %v4163_v8 = vpop.xlane.xlu0 %4162 }
 0x9ad   : > { %v7639_v7 = vpop.eup %7638  ;;  %7644 = vrsqrt.f32 %v4203_v35  ;;  %v4186_v39 = vmul.f32 0.0078125, %v4163_v8 }
 0x9ae   : > { %v4279_v50 = vadd.f32 %v11138_v59, %v4257_v61  ;;  %v4236_v27 = vmul.f32 %v7639_v7, %v11084_v45 }
 0x9af   : > { %v4204_v9 = vadd.f32 1e-05, %v4186_v39 }
 0x9b0   : > { %4297 = vst [vmem:[#allocation3 + $0x28] sm:$0xff] %v4279_v50  ;;  %v4258_v43 = vmul.f32 %v11132_v26, %v4236_v27  ;;  %v4165_v23 = vpop.xlane.xlu1 %4164 }
 0x9b1   : > { %7646 = vrsqrt.f32 %v4204_v9  ;;  %v4187_v19 = vmul.f32 0.0078125, %v4165_v23 }
 0x9b2   : > { %v7641_v24 = vpop.eup %7640  ;;  %v4280_v13 = vadd.f32 %v11138_v59, %v4258_v43 }
 0x9b3   : > { %v4237_v54 = vmul.f32 %v7641_v24, %v11089_v47  ;;  %v4205_v34 = vadd.f32 1e-05, %v4187_v19 }
 0x9b4   : > { %4298 = vst [vmem:[#allocation3 + $0x8] sm:$0xff] %v4280_v13 }
 0x9b5   : > { %v4259_v38 = vmul.f32 %v11132_v26, %v4237_v54  ;;  %7648 = vrsqrt.f32 %v4205_v34 }
 0x9b6   : > { %v7643_v2 = vpop.eup %7642 }
 0x9b7   : > { %v4281_v45 = vadd.f32 %v11138_v59, %v4259_v38  ;;  %v4238_v18 = vmul.f32 %v7643_v2, %v11094_v1 }
 0x9b9   : > { %v4169_v48 = vpop.xlane.xlu1 %4168  ;;  %4299 = vst [vmem:[#allocation3 + $0x30] sm:$0xff] %v4281_v45  ;;  %v4260_v62 = vmul.f32 %v11132_v26, %v4238_v18 }
 0x9ba   : > { %v4189_v57 = vmul.f32 0.0078125, %v4169_v48  ;;  %v7645_v29 = vpop.eup %7644 }
 0x9bb   : > { %v4282_v49 = vadd.f32 %v11138_v59, %v4260_v62  ;;  %v4239_v47 = vmul.f32 %v7645_v29, %v11099_v4 }
 0x9bc   : > { %v4207_v12 = vadd.f32 1e-05, %v4189_v57 }
 0x9bd   : > { %4300 = vst [vmem:[#allocation3 + $0x40] sm:$0xff] %v4282_v49  ;;  %v4261_v42 = vmul.f32 %v11132_v26, %v4239_v47 }
 0x9be   : > { %7650 = vrsqrt.f32 %v4207_v12  ;;  %v7647_v56 = vpop.eup %7646 }
 0x9bf   : > { %v4283_v53 = vadd.f32 %v11138_v59, %v4261_v42  ;;  %v4240_v1 = vmul.f32 %v7647_v56, %v11104_v10 }
 0x9c1   : > { %4301 = vst [vmem:[#allocation3 + $0x58] sm:$0xff] %v4283_v53  ;;  %v4262_v31 = vmul.f32 %v11132_v26, %v4240_v1 }
 0x9c2   : > { %v4167_v17 = vpop.xlane.xlu0 %4166  ;;  %v7649_v25 = vpop.eup %7648 }
 0x9c3   : > { %v4188_v0 = vmul.f32 0.0078125, %v4167_v17  ;;  %v4284_v5 = vadd.f32 %v11138_v59, %v4262_v31  ;;  %v4241_v4 = vmul.f32 %v7649_v25, %v11109_v58 }
 0x9c5   : > { %v4206_v22 = vadd.f32 1e-05, %v4188_v0  ;;  %4302 = vst [vmem:[#allocation3 + $0x70] sm:$0xff] %v4284_v5  ;;  %v4263_v11 = vmul.f32 %v11132_v26, %v4241_v4 }
 0x9c6   : > { %v4172_v52 = vpop.xlane.xlu0 %4171 }
 0x9c7   : > { %7652 = vrsqrt.f32 %v4206_v22  ;;  %v4190_v20 = vmul.f32 0.0078125, %v4172_v52  ;;  %v4285_v40 = vadd.f32 %v11138_v59, %v4263_v11 }
 0x9c9   : > { %v4208_v10 = vadd.f32 1e-05, %v4190_v20  ;;  %4303 = vst [vmem:[#allocation3 + $0x38] sm:$0xff] %v4285_v40 }
 0x9cb   : > { %v7651_v14 = vpop.eup %7650  ;;  %7654 = vrsqrt.f32 %v4208_v10 }
 0x9cc   : > { %v4243_v55 = vmul.f32 %v7651_v14, %v11114_v60 }
 0x9ce   : > { %v4265_v63 = vmul.f32 %v11132_v26, %v4243_v55 }
 0x9d0   : > { %v4287_v51 = vadd.f32 %v11138_v59, %v4265_v63 }
 0x9d2   : > { %4305 = vst [vmem:[#allocation3 + $0x80] sm:$0xff] %v4287_v51 }
 0x9d4   : > { %v7653_v58 = vpop.eup %7652 }
 0x9d5   : > { %v4242_v21 = vmul.f32 %v7653_v58, %v11122_v15 }
 0x9d7   : > { %v4264_v28 = vmul.f32 %v11132_v26, %v4242_v21 }
 0x9d8   : > { %v7655_v30 = vpop.eup %7654 }
 0x9d9   : > { %v4286_v16 = vadd.f32 %v11138_v59, %v4264_v28  ;;  %v4244_v33 = vmul.f32 %v7655_v30, %v11119_v37 }
 0x9db   : > { %4304 = vst [vmem:[#allocation3 + $0x68] sm:$0xff] %v4286_v16  ;;  %v4266_v46 = vmul.f32 %v11132_v26, %v4244_v33 }
 0x9dd   : > { %v4288_v60 = vadd.f32 %v11138_v59, %v4266_v46 }
 0x9df   : > { %4306 = vst [vmem:[#allocation3] sm:$0x1] %v4288_v60 }
 0x9e0 PF: > { %v7675_v15 = vld [vmem:[%s8644_s29 + $0xe4] ss:$16 sps:$4 sm:$0xff]   ;;  %v7677_v6 = vld [vmem:[%s8644_s29 + $0xec] ss:$16 sps:$4 sm:$0xff]   ;;  %v8338_v36 = vmov 0   ;;  %s4384_s9 = sshra.s32 %s8430_s27, 2 }
 0x9e1   : > { %4606 = vmatprep.mubr.bf16.mxu0 %v8338_v36  ;;  %4729 = vmatprep.mubr.bf16.mxu1 %v8338_v36  ;;  %v7679_v37 = vld [vmem:[%s8644_s29 + $0xe0] ss:$16 sps:$4 sm:$0xff]   ;;  %v7680_v26 = vld [vmem:[%s8644_s29 + $0xe8] ss:$16 sps:$4 sm:$0xff]   ;;  %v7681_v59 = vld [vmem:[%s8644_s29 + $0xc4] ss:$16 sps:$4 sm:$0xff]  }
 0x9e2   : > { %4574 = vmatprep.subr.bf16.mxu0 %v7675_v15  ;;  %4697 = vmatprep.subr.bf16.mxu1 %v7677_v6  ;;  %v7683_v41 = vld [vmem:[%s8644_s29 + $0xcc] ss:$16 sps:$4 sm:$0xff]   ;;  %v7685_v32 = vld [vmem:[%s8644_s29 + $0xc0] ss:$16 sps:$4 sm:$0xff]   ;;  %v7686_v3 = vld [vmem:[%s8644_s29 + $0xc8] ss:$16 sps:$4 sm:$0xff]  }
 0x9e3   : > { %4575 = vmatpush1.bf16.msra.mxu0 %v7679_v37  ;;  %4698 = vmatpush1.bf16.msra.mxu1 %v7680_v26  ;;  %v7687_v44 = vld [vmem:[%s8644_s29 + $0xa4] ss:$16 sps:$4 sm:$0xff]   ;;  %v7689_v35 = vld [vmem:[%s8644_s29 + $0xac] ss:$16 sps:$4 sm:$0xff]   ;;  %v7691_v61 = vld [vmem:[%s8644_s29 + $0xa0] ss:$16 sps:$4 sm:$0xff]  }
 0x9e4   : > { %4576 = vmatprep.subr.bf16.mxu0 %v7681_v59  ;;  %4699 = vmatprep.subr.bf16.mxu1 %v7683_v41  ;;  %v7692_v8 = vld [vmem:[%s8644_s29 + $0xa8] ss:$16 sps:$4 sm:$0xff]   ;;  %v7693_v7 = vld [vmem:[%s8644_s29 + $0x84] ss:$16 sps:$4 sm:$0xff]   ;;  %v7695_v39 = vld [vmem:[%s8644_s29 + $0x8c] ss:$16 sps:$4 sm:$0xff]  }
 0x9e5   : > { %v7697_v50 = vld [vmem:[%s8644_s29 + $0x80] ss:$16 sps:$4 sm:$0xff]   ;;  %v7698_v27 = vld [vmem:[%s8644_s29 + $0x88] ss:$16 sps:$4 sm:$0xff]   ;;  %v7699_v9 = vld [vmem:[%s8644_s29 + $0x64] ss:$16 sps:$4 sm:$0xff]  }
 0x9e6   : > { %v7701_v43 = vld [vmem:[%s8644_s29 + $0x6c] ss:$16 sps:$4 sm:$0xff]   ;;  %v7703_v23 = vld [vmem:[%s8644_s29 + $0x60] ss:$16 sps:$4 sm:$0xff]   ;;  %v7704_v19 = vld [vmem:[%s8644_s29 + $0x68] ss:$16 sps:$4 sm:$0xff]  }
 0x9e7   : > { %4577 = vmatpush1.bf16.msra.mxu0 %v7685_v32  ;;  %4700 = vmatpush1.bf16.msra.mxu1 %v7686_v3  ;;  %v7705_v24 = vld [vmem:[%s8644_s29 + $0x44] ss:$16 sps:$4 sm:$0xff]   ;;  %v7707_v13 = vld [vmem:[%s8644_s29 + $0x4c] ss:$16 sps:$4 sm:$0xff]   ;;  %v7709_v54 = vld [vmem:[%s8644_s29 + $0x40] ss:$16 sps:$4 sm:$0xff]  }
 0x9e8   : > { %4578 = vmatprep.subr.bf16.mxu0 %v7687_v44  ;;  %4701 = vmatprep.subr.bf16.mxu1 %v7689_v35  ;;  %v7710_v34 = vld [vmem:[%s8644_s29 + $0x48] ss:$16 sps:$4 sm:$0xff]   ;;  %v7711_v38 = vld [vmem:[%s8644_s29 + $0x24] ss:$16 sps:$4 sm:$0xff]   ;;  %v7713_v2 = vld [vmem:[%s8644_s29 + $0x2c] ss:$16 sps:$4 sm:$0xff]  }
 0x9e9   : > { %v7715_v45 = vld [vmem:[%s8644_s29 + $0x20] ss:$16 sps:$4 sm:$0xff]   ;;  %v7716_v18 = vld [vmem:[%s8644_s29 + $0x28] ss:$16 sps:$4 sm:$0xff]   ;;  %v7717_v48 = vld [vmem:[%s8644_s29 + $0x4] ss:$16 sps:$4 sm:$0xff]  }
 0x9ea   : > { %v7719_v62 = vld [vmem:[%s8644_s29 + $0xc] ss:$16 sps:$4 sm:$0xff]   ;;  %v7721_v57 = vld [vmem:[%s8644_s29] ss:$16 sps:$4 sm:$0xff]   ;;  %v7722_v29 = vld [vmem:[%s8644_s29 + $0x8] ss:$16 sps:$4 sm:$0xff]  }
 0x9eb   : > { %4579 = vmatpush1.bf16.msra.mxu0 %v7691_v61  ;;  %4702 = vmatpush1.bf16.msra.mxu1 %v7692_v8  ;;  %v4325_v49 = vld [vmem:[#allocation3 + $0x88] sm:$0xff]  ;;  %v7723_v12 = vld [vmem:[%s8650_s24 + $0x78] sm:$0xff]   ;;  %v7727_v31 = vld [vmem:[%s8650_s24 + $0x70] sm:$0xff]   ;;  %s4387_s19 = sand.u32 3, %s8430_s27  ;;  %s6774_s15 = sshll.u32 %s4384_s9, 4 }
 0x9ec   : > { %4580 = vmatprep.subr.bf16.mxu0 %v7693_v7  ;;  %4703 = vmatprep.subr.bf16.mxu1 %v7695_v39  ;;  %v4326_v47 = vld [vmem:[#allocation3 + $0x48] sm:$0xff]  ;;  %v7724_v42 = vld [vmem:[%s8650_s24 + $0xf8] sm:$0xff]   ;;  %v4327_v17 = vld [vmem:[#allocation3 + $0x10] sm:$0xff]  ;;  %s4390_s1 = sadd.s32 %s6774_s15, %s4387_s19  ;;  %p6738_p4 = scmp.ne.s32.totalorder %s8430_s27, 3 }
 0x9ed   : > { %v4343_v56 = vpack.c.bf16 %v4326_v47, %v4325_v49  ;;  %v7725_v53 = vld [vmem:[%s8650_s24 + $0x38] sm:$0xff]   ;;  %v7728_v0 = vld [vmem:[%s8650_s24 + $0xf0] sm:$0xff]   ;;  %v7731_v22 = vld [vmem:[%s8650_s24 + $0x68] sm:$0xff]   ;;  %s4391_s28 = scalar_lea.vmem [#allocation19], %s4390_s1 }
 0x9ee   : > { %v7726_v1 = vld [vmem:[%s8650_s24 + $0xb8] sm:$0xff]   ;;  %v7729_v5 = vld [vmem:[%s8650_s24 + $0x30] sm:$0xff]   ;;  %v7732_v11 = vld [vmem:[%s8650_s24 + $0xe8] sm:$0xff]  }
 0x9ef   : > { %4581 = vmatpush1.bf16.msra.mxu0 %v7697_v50  ;;  %4704 = vmatpush1.bf16.msra.mxu1 %v7698_v27  ;;  %v4328_v25 = vld [vmem:[#allocation3 + $0x20] sm:$0xff]  ;;  %v7730_v4 = vld [vmem:[%s8650_s24 + $0xb0] sm:$0xff]   ;;  %v7733_v20 = vld [vmem:[%s8650_s24 + $0x28] sm:$0xff]  }
 0x9f0   : > { %4582 = vmatprep.subr.bf16.mxu0 %v7699_v9  ;;  %4705 = vmatprep.subr.bf16.mxu1 %v7701_v43  ;;  %v4344_v52 = vpack.c.bf16 %v4328_v25, %v4327_v17  ;;  %v7734_v40 = vld [vmem:[%s8650_s24 + $0xa8] sm:$0xff]   ;;  %v7735_v10 = vld [vmem:[%s8650_s24 + $0x60] sm:$0xff]   ;;  %v4330_v55 = vld [vmem:[#allocation3 + $0x18] sm:$0xff] }
 0x9f1   : > { %v4329_v14 = vld [vmem:[#allocation3 + $0x50] sm:$0xff]  ;;  %v7736_v63 = vld [vmem:[%s8650_s24 + $0xe0] sm:$0xff]   ;;  %v4331_v28 = vld [vmem:[#allocation3 + $0x60] sm:$0xff] }
 0x9f2   : > { %v7737_v51 = vld [vmem:[%s8650_s24 + $0x20] sm:$0xff]   ;;  %v4345_v21 = vpack.c.bf16 %v4330_v55, %v4329_v14  ;;  %v4332_v30 = vld [vmem:[#allocation3 + $0x78] sm:$0xff]  ;;  %v4335_v15 = vld [vmem:[#allocation3 + $0x30] sm:$0xff] }
 0x9f3   : > { %4583 = vmatpush1.bf16.msra.mxu0 %v7703_v23  ;;  %4706 = vmatpush1.bf16.msra.mxu1 %v7704_v19  ;;  %v7738_v58 = vld [vmem:[%s8650_s24 + $0xa0] sm:$0xff]   ;;  %v4346_v16 = vpack.c.bf16 %v4332_v30, %v4331_v28  ;;  %v4336_v6 = vld [vmem:[#allocation3 + $0x40] sm:$0xff]  ;;  %v4337_v26 = vld [vmem:[#allocation3 + $0x58] sm:$0xff] }
 0x9f4   : > { %4584 = vmatprep.subr.bf16.mxu0 %v7705_v24  ;;  %4707 = vmatprep.subr.bf16.mxu1 %v7707_v13  ;;  %v4333_v33 = vld [vmem:[#allocation3 + $0x28] sm:$0xff]  ;;  %v4348_v37 = vpack.c.bf16 %v4336_v6, %v4335_v15  ;;  %v4338_v59 = vld [vmem:[#allocation3 + $0x70] sm:$0xff]  ;;  %v4339_v32 = vld [vmem:[#allocation3 + $0x38] sm:$0xff] }
 0x9f5   : > { %v4334_v46 = vld [vmem:[#allocation3 + $0x8] sm:$0xff]  ;;  %v4349_v41 = vpack.c.bf16 %v4338_v59, %v4337_v26  ;;  %v4341_v35 = vld [vmem:[#allocation3 + $0x80] sm:$0xff]  ;;  %v7744_v9 = vld [vmem:[%s8650_s24 + $0xd0] sm:$0xff]  }
 0x9f6   : > { %v4347_v60 = vpack.c.bf16 %v4334_v46, %v4333_v33  ;;  %v4340_v3 = vld [vmem:[#allocation3 + $0x68] sm:$0xff]  ;;  %v4342_v61 = vld [vmem:[#allocation3] sm:$0x1]  ;;  %v7745_v43 = vld [vmem:[%s8650_s24 + $0x10] sm:$0xff]  }
 0x9f7   : > { %4585 = vmatpush1.bf16.msra.mxu0 %v7709_v54  ;;  %4708 = vmatpush1.bf16.msra.mxu1 %v7710_v34  ;;  %v4350_v44 = vpack.c.bf16 %v4340_v3, %v4339_v32  ;;  %v4351_v8 = vpack.c.bf16 %v4342_v61, %v4341_v35  ;;  %v7739_v7 = vld [vmem:[%s8650_s24 + $0x58] sm:$0xff]   ;;  %v7746_v23 = vld [vmem:[%s8650_s24 + $0x90] sm:$0xff]   ;;  %v7747_v19 = vld [vmem:[%s8650_s24 + $0x48] sm:$0xff]  }
 0x9f8   : > { %4586 = vmatprep.subr.bf16.mxu0 %v7711_v38  ;;  %4709 = vmatprep.subr.bf16.mxu1 %v7713_v2  ;;  %v7740_v39 = vld [vmem:[%s8650_s24 + $0xd8] sm:$0xff]   ;;  %v7748_v24 = vld [vmem:[%s8650_s24 + $0xc8] sm:$0xff]   ;;  %v7751_v34 = vld [vmem:[%s8650_s24 + $0x40] sm:$0xff]  }
 0x9f9   : > { %v7741_v50 = vld [vmem:[%s8650_s24 + $0x18] sm:$0xff]   ;;  %v7749_v13 = vld [vmem:[%s8650_s24 + $0x8] sm:$0xff]   ;;  %v7752_v38 = vld [vmem:[%s8650_s24 + $0xc0] sm:$0xff]  }
 0x9fa   : > { %v7742_v27 = vld [vmem:[%s8650_s24 + $0x98] sm:$0xff]   ;;  %v7750_v54 = vld [vmem:[%s8650_s24 + $0x88] sm:$0xff]   ;;  %v7753_v2 = vld [vmem:[%s8650_s24] sm:$0xff]  }
 0x9fb   : > { %4587 = vmatpush1.bf16.msra.mxu0 %v7715_v45  ;;  %4710 = vmatpush1.bf16.msra.mxu1 %v7716_v18  ;;  %v7754_v45 = vld [vmem:[%s8650_s24 + $0x80] sm:$0xff]   ;;  %v4394_v18 = vlaneseq }
 0x9fc   : > { %4588 = vmatprep.subr.bf16.mxu0 %v7717_v48  ;;  %4711 = vmatprep.subr.bf16.mxu1 %v7719_v62 }
 0x9fd   : > { %v11277_v48 = vshrl.u32 %v4394_v18, 7 }
 0x9ff   : > { %4589 = vmatpush1.bf16.msra.mxu0 %v7721_v57  ;;  %4712 = vmatpush1.bf16.msra.mxu1 %v7722_v29  ;;  %12779 = vst [vmem:[#allocation137_spill] sm:$0xff] %v11277_v48  ;;  %v12347_v62 = vsub.s32 0, %v11277_v48  ;;  %v4404_v57 = vsub.s32 2, %v11277_v48  ;;  %v4392_v29 = vld [vmem:[%s4391_s28] ss:$4 sm:$0xf] }
 0xa00   : > { %6775 = vmatprep.subr.bf16.mxu0 %v7723_v12  ;;  %6845 = vmatprep.subr.bf16.mxu1 %v7724_v42  ;;  %v12346_v49 = vsub.s32 1, %v11277_v48  ;;  %v4408_v47 = vsub.s32 3, %v11277_v48 }
 0xa01   : > { %v11285_v12 = vrot.slane %v4392_v29, %v12347_v62  ;;  %v11287_v42 = vrot.slane %v4392_v29, %v4404_v57 }
 0xa02   : > { %4607 = vmatmul.mubr.bf16.vlgmr.msra.gmra.mxu0 %v4343_v56  ;;  %4730 = vmatmul.mubr.bf16.vlgmr.msra.gmra.mxu1 %v4343_v56 }
 0xa03   : > { %4616 = vmatprep.mubr.bf16.mxu0 %v8338_v36  ;;  %4739 = vmatprep.mubr.bf16.mxu1 %v8338_v36 }
 0xa04   : > { %6776 = vmatpush3.bf16.msra.mxu0 %v7725_v53  ;;  %6846 = vmatpush3.bf16.msra.mxu1 %v7726_v1  ;;  %v11291_v1 = vrot.slane %v4392_v29, %v12346_v49 }
 0xa05   : > { %6777 = vmatprep.subr.bf16.mxu0 %v7727_v31  ;;  %6847 = vmatprep.subr.bf16.mxu1 %v7728_v0  ;;  %v11293_v31 = vrot.slane %v4392_v29, %v4408_v47 }
 0xa08   : > { %6778 = vmatpush3.bf16.msra.mxu0 %v7729_v5  ;;  %6848 = vmatpush3.bf16.msra.mxu1 %v7730_v4 }
 0xa09   : > { %6779 = vmatprep.subr.bf16.mxu0 %v7731_v22  ;;  %6849 = vmatprep.subr.bf16.mxu1 %v7732_v11 }
 0xa0a   : > { %4617 = vmatmul.mubr.bf16.gmra.mxu0 %v4344_v52  ;;  %4740 = vmatmul.mubr.bf16.gmra.mxu1 %v4344_v52 }
 0xa0b   : > { %4626 = vmatprep.mubr.bf16.mxu0 %v8338_v36  ;;  %4749 = vmatprep.mubr.bf16.mxu1 %v8338_v36 }
 0xa0c   : > { %6780 = vmatpush3.bf16.msra.mxu0 %v7733_v20  ;;  %6850 = vmatpush3.bf16.msra.mxu1 %v7734_v40 }
 0xa0d   : > { %6781 = vmatprep.subr.bf16.mxu0 %v7735_v10  ;;  %6851 = vmatprep.subr.bf16.mxu1 %v7736_v63 }
 0xa10   : > { %6782 = vmatpush3.bf16.msra.mxu0 %v7737_v51  ;;  %6852 = vmatpush3.bf16.msra.mxu1 %v7738_v58 }
 0xa11   : > { %6783 = vmatprep.subr.bf16.mxu0 %v7739_v7  ;;  %6853 = vmatprep.subr.bf16.mxu1 %v7740_v39 }
 0xa12   : > { %4627 = vmatmul.mubr.bf16.gmra.mxu0 %v4345_v21  ;;  %4750 = vmatmul.mubr.bf16.gmra.mxu1 %v4345_v21 }
 0xa13   : > { %4636 = vmatprep.mubr.bf16.mxu0 %v8338_v36  ;;  %4759 = vmatprep.mubr.bf16.mxu1 %v8338_v36 }
 0xa14   : > { %6784 = vmatpush3.bf16.msra.mxu0 %v7741_v50  ;;  %6854 = vmatpush3.bf16.msra.mxu1 %v7742_v27 }
 0xa15   : > { %6855 = vmatprep.subr.bf16.mxu1 %v7744_v9 }
 0xa18   : > { %6856 = vmatpush3.bf16.msra.mxu1 %v7746_v23 }
 0xa19   : > { %6857 = vmatprep.subr.bf16.mxu1 %v7748_v24 }
 0xa1a   : > { %4637 = vmatmul.mubr.bf16.gmra.mxu0 %v4346_v16  ;;  %4760 = vmatmul.mubr.bf16.gmra.mxu1 %v4346_v16 }
 0xa1b   : > { %4646 = vmatprep.mubr.bf16.mxu0 %v8338_v36  ;;  %4769 = vmatprep.mubr.bf16.mxu1 %v8338_v36 }
 0xa1c   : > { %6858 = vmatpush3.bf16.msra.mxu1 %v7750_v54 }
 0xa1d   : > { %6859 = vmatprep.subr.bf16.mxu1 %v7752_v38 }
 0xa20   : > { %6860 = vmatpush3.bf16.msra.mxu1 %v7754_v45 }
 0xa22   : > { %4647 = vmatmul.mubr.bf16.gmra.mxu0 %v4347_v60  ;;  %4770 = vmatmul.mubr.bf16.gmra.mxu1 %v4347_v60 }
 0xa23   : > { %4656 = vmatprep.mubr.bf16.mxu0 %v8338_v36  ;;  %4779 = vmatprep.mubr.bf16.mxu1 %v8338_v36 }
 0xa2a   : > { %4657 = vmatmul.mubr.bf16.gmra.mxu0 %v4348_v37  ;;  %4780 = vmatmul.mubr.bf16.gmra.mxu1 %v4348_v37 }
 0xa2b   : > { %4666 = vmatprep.mubr.bf16.mxu0 %v8338_v36  ;;  %4789 = vmatprep.mubr.bf16.mxu1 %v8338_v36 }
 0xa32   : > { %4667 = vmatmul.mubr.bf16.gmra.mxu0 %v4349_v41  ;;  %4790 = vmatmul.mubr.bf16.gmra.mxu1 %v4349_v41 }
 0xa33   : > { %4676 = vmatprep.mubr.bf16.mxu0 %v8338_v36  ;;  %4799 = vmatprep.mubr.bf16.mxu1 %v8338_v36 }
 0xa3a   : > { %4677 = vmatmul.mubr.bf16.gmra.mxu0 %v4350_v44  ;;  %4800 = vmatmul.mubr.bf16.gmra.mxu1 %v4350_v44 }
 0xa3b   : > { %4686 = vmatprep.mubr.bf16.mxu0 %v8338_v36  ;;  %4809 = vmatprep.mubr.bf16.mxu1 %v8338_v36  ;;  %v7743_v36 = vld [vmem:[%s8650_s24 + $0x50] sm:$0xff]  }
 0xa3c   : > { %6785 = vmatprep.subr.bf16.mxu0 %v7743_v36 }
 0xa3d   : > { %6786 = vmatpush3.bf16.msra.mxu0 %v7745_v43 }
 0xa3e   : > { %6787 = vmatprep.subr.bf16.mxu0 %v7747_v19 }
 0xa41   : > { %6788 = vmatpush3.bf16.msra.mxu0 %v7749_v13 }
 0xa42   : > { %4687 = vmatmul.mubr.bf16.gmra.mxu0 %v4351_v8  ;;  %4810 = vmatmul.mubr.bf16.gmra.mxu1 %v4351_v8 }
 0xa43   : > { %6789 = vmatprep.subr.bf16.mxu0 %v7751_v34 }
 0xa45   : > { %6790 = vmatpush3.bf16.msra.mxu0 %v7753_v2 }
 0xac2   : > { %v4608_v56 = vpop.f32.mrf.mxu0  ;;  %v4731_v53 = vpop.f32.mrf.mxu1 }
 0xac3   : > { %v4609_v17 = vadd.f32 %v4608_v56, %v11285_v12  ;;  %v4732_v25 = vadd.f32 %v4731_v53, %v11287_v42 }
 0xac4   : > { %v4610_v0 = vpop.f32.mrf.mxu0  ;;  %v4733_v5 = vpop.f32.mrf.mxu1 }
 0xac5   : > { %v4892_v4 = vmul.f32 0.044715, %v4609_v17  ;;  %v4894_v22 = vmul.f32 0.044715, %v4732_v25  ;;  %v11298_v11 = vadd.f32 %v4610_v0, %v11291_v1  ;;  %v11301_v52 = vadd.f32 %v4733_v5, %v11293_v31 }
 0xac6   : > { %v4612_v20 = vpop.f32.mrf.mxu0  ;;  %v4735_v40 = vpop.f32.mrf.mxu1  ;;  %v11313_v44 = vmul.f32 0.5, %v4609_v17  ;;  %v11315_v8 = vmul.f32 0.5, %v4732_v25 }
 0xac7   : > { %v4964_v10 = vmul.f32 %v4892_v4, %v4609_v17  ;;  %v4966_v14 = vmul.f32 %v4894_v22, %v4732_v25  ;;  %v4613_v55 = vadd.f32 %v4612_v20, %v11285_v12  ;;  %v4736_v63 = vadd.f32 %v4735_v40, %v11287_v42 }
 0xac8   : > { %v4614_v51 = vpop.f32.mrf.mxu0  ;;  %v4737_v58 = vpop.f32.mrf.mxu1  ;;  %v4893_v16 = vmul.f32 0.044715, %v11298_v11  ;;  %v4895_v6 = vmul.f32 0.044715, %v11301_v52  ;;  %v11324_v19 = vmul.f32 0.5, %v11298_v11  ;;  %v11334_v2 = vmul.f32 0.5, %v11301_v52 }
 0xac9   : > { %v5036_v21 = vmul.f32 %v4964_v10, %v4609_v17  ;;  %v5038_v28 = vmul.f32 %v4966_v14, %v4732_v25  ;;  %v4896_v30 = vmul.f32 0.044715, %v4613_v55  ;;  %v4898_v33 = vmul.f32 0.044715, %v4736_v63 }
 0xaca   : > { %v4618_v46 = vpop.f32.mrf.mxu0  ;;  %v4741_v60 = vpop.f32.mrf.mxu1  ;;  %v11308_v26 = vadd.f32 %v4614_v51, %v11291_v1  ;;  %v11311_v41 = vadd.f32 %v4737_v58, %v11293_v31  ;;  %v4965_v7 = vmul.f32 %v4893_v16, %v11298_v11  ;;  %v4967_v43 = vmul.f32 %v4895_v6, %v11301_v52  ;;  %12781 = vst [vmem:[#allocation139_spill] sm:$0xff] %v11324_v19 }
 0xacb   : > { %v5108_v15 = vadd.f32 %v5036_v21, %v4609_v17  ;;  %v4968_v37 = vmul.f32 %v4896_v30, %v4613_v55  ;;  %v4970_v59 = vmul.f32 %v4898_v33, %v4736_v63  ;;  %v5110_v35 = vadd.f32 %v5038_v28, %v4732_v25  ;;  %12783 = vst [vmem:[#allocation141_spill] sm:$0xff] %v11334_v2 }
 0xacc   : > { %v4620_v32 = vpop.f32.mrf.mxu0  ;;  %v4743_v3 = vpop.f32.mrf.mxu1  ;;  %v4897_v50 = vmul.f32 0.044715, %v11308_v26  ;;  %v11321_v23 = vadd.f32 %v4618_v46, %v11285_v12  ;;  %v4899_v24 = vmul.f32 0.044715, %v11311_v41  ;;  %v11328_v13 = vadd.f32 %v4741_v60, %v11287_v42 }
 0xacd   : > { %v5040_v61 = vmul.f32 %v4968_v37, %v4613_v55  ;;  %v5042_v39 = vmul.f32 %v4970_v59, %v4736_v63  ;;  %v5180_v9 = vmul.f32 0.7978846, %v5108_v15  ;;  %v11331_v54 = vadd.f32 %v4620_v32, %v11291_v1 }
 0xace   : > { %v4622_v27 = vpop.f32.mrf.mxu0  ;;  %v4745_v36 = vpop.f32.mrf.mxu1  ;;  %12780 = vst [vmem:[#allocation138_spill] sm:$0xff] %v11321_v23  ;;  %12782 = vst [vmem:[#allocation140_spill] sm:$0xff] %v11328_v13  ;;  %v5182_v45 = vmul.f32 0.7978846, %v5110_v35  ;;  %v11336_v18 = vmul.f32 0.5, %v4613_v55  ;;  %v11338_v29 = vmul.f32 0.5, %v4736_v63  ;;  %v11341_v47 = vmul.f32 %v4965_v7, %v11298_v11 }
 0xacf   : > { %v5112_v57 = vadd.f32 %v5040_v61, %v4613_v55  ;;  %v5114_v56 = vadd.f32 %v5042_v39, %v4736_v63  ;;  %v4969_v53 = vmul.f32 %v4897_v50, %v11308_v26  ;;  %v11345_v17 = vadd.f32 %v4743_v3, %v11293_v31 }
 0xad0   : > { %v4624_v34 = vpop.f32.mrf.mxu0  ;;  %v4747_v38 = vpop.f32.mrf.mxu1  ;;  %7755 = vtanh.f32 %v5180_v9  ;;  %v11348_v5 = vmul.f32 %v4967_v43, %v11301_v52  ;;  %v4900_v4 = vmul.f32 0.044715, %v11321_v23  ;;  %v11352_v22 = vadd.f32 %v4622_v27, %v11285_v12 }
 0xad1   : > { %12784 = vst [vmem:[#allocation142_spill] sm:$0xff] %v11345_v17  ;;  %v4971_v20 = vmul.f32 %v4899_v24, %v11311_v41  ;;  %v4902_v40 = vmul.f32 0.044715, %v11328_v13  ;;  %v4901_v10 = vmul.f32 0.044715, %v11331_v54  ;;  %v11358_v14 = vadd.f32 %v4745_v36, %v11287_v42 }
 0xad2   : > { %v4628_v25 = vpop.f32.mrf.mxu0  ;;  %v4751_v0 = vpop.f32.mrf.mxu1  ;;  %12785 = vst [vmem:[#allocation143_spill] sm:$0xff] %v11352_v22  ;;  %7757 = vtanh.f32 %v5182_v45  ;;  %v5184_v51 = vmul.f32 0.7978846, %v5112_v57  ;;  %v4903_v58 = vmul.f32 0.044715, %v11345_v17  ;;  %v11362_v21 = vadd.f32 %v4624_v34, %v11291_v1 }
 0xad3   : > { %12786 = vst [vmem:[#allocation144_spill] sm:$0xff] %v11358_v14  ;;  %v5186_v28 = vmul.f32 0.7978846, %v5114_v56  ;;  %v11365_v30 = vmul.f32 %v4969_v53, %v11308_v26  ;;  %v11368_v16 = vadd.f32 %v4747_v38, %v11293_v31  ;;  %v11371_v33 = vadd.f32 %v4628_v25, %v11285_v12 }
 0xad4   : > { %v4630_v55 = vpop.f32.mrf.mxu0  ;;  %v4753_v63 = vpop.f32.mrf.mxu1  ;;  %v4972_v15 = vmul.f32 %v4900_v4, %v11321_v23  ;;  %v4904_v6 = vmul.f32 0.044715, %v11352_v22  ;;  %v11376_v37 = vadd.f32 %v4751_v0, %v11287_v42  ;;  %v11382_v32 = vmul.f32 %v4971_v20, %v11311_v41 }
 0xad5   : > { %12787 = vst [vmem:[#allocation145_spill] sm:$0xff] %v11368_v16  ;;  %12788 = vst [vmem:[#allocation146_spill] sm:$0xff] %v11371_v33  ;;  %v11379_v59 = vadd.f32 %v4630_v55, %v11291_v1  ;;  %v4974_v3 = vmul.f32 %v4902_v40, %v11328_v13  ;;  %v4973_v35 = vmul.f32 %v4901_v10, %v11331_v54  ;;  %v4906_v61 = vmul.f32 0.044715, %v11358_v14 }
 0xad6   : > { %v4632_v46 = vpop.f32.mrf.mxu0  ;;  %v4755_v60 = vpop.f32.mrf.mxu1  ;;  %12789 = vst [vmem:[#allocation147_spill] sm:$0xff] %v11376_v37  ;;  %7759 = vtanh.f32 %v5184_v51  ;;  %v4975_v50 = vmul.f32 %v4903_v58, %v11345_v17  ;;  %v4905_v27 = vmul.f32 0.044715, %v11362_v21  ;;  %v4907_v36 = vmul.f32 0.044715, %v11368_v16 }
 0xad7   : > { %12790 = vst [vmem:[#allocation148_spill] sm:$0xff] %v11379_v59  ;;  %7761 = vtanh.f32 %v5186_v28  ;;  %v4908_v9 = vmul.f32 0.044715, %v11371_v33  ;;  %v4910_v43 = vmul.f32 0.044715, %v11376_v37  ;;  %v11394_v45 = vmul.f32 %v4972_v15, %v11321_v23 }
 0xad8   : > { %v4634_v7 = vpop.f32.mrf.mxu0  ;;  %v4757_v39 = vpop.f32.mrf.mxu1  ;;  %v4909_v24 = vmul.f32 0.044715, %v11379_v59  ;;  %v4976_v57 = vmul.f32 %v4904_v6, %v11352_v22  ;;  %v11398_v56 = vadd.f32 %v4753_v63, %v11293_v31  ;;  %v11401_v53 = vadd.f32 %v4632_v46, %v11285_v12 }
 0xad9   : > { %12791 = vst [vmem:[#allocation149_spill] sm:$0xff] %v11394_v45  ;;  %v11404_v25 = vmul.f32 %v4974_v3, %v11328_v13  ;;  %v11407_v0 = vmul.f32 %v4973_v35, %v11331_v54  ;;  %v4978_v4 = vmul.f32 %v4906_v61, %v11358_v14  ;;  %v11411_v20 = vadd.f32 %v4755_v60, %v11287_v42 }
 0xada   : > { %v4638_v34 = vpop.f32.mrf.mxu0  ;;  %v4761_v38 = vpop.f32.mrf.mxu1  ;;  %12792 = vst [vmem:[#allocation150_spill] sm:$0xff] %v11398_v56  ;;  %v11414_v55 = vmul.f32 %v4975_v50, %v11345_v17  ;;  %v4977_v63 = vmul.f32 %v4905_v27, %v11362_v21  ;;  %v4979_v51 = vmul.f32 %v4907_v36, %v11368_v16  ;;  %v11419_v58 = vadd.f32 %v4634_v7, %v11291_v1 }
 0xadb   : > { %12793 = vst [vmem:[#allocation151_spill] sm:$0xff] %v11404_v25  ;;  %v4980_v28 = vmul.f32 %v4908_v9, %v11371_v33  ;;  %v4982_v46 = vmul.f32 %v4910_v43, %v11376_v37  ;;  %v4981_v15 = vmul.f32 %v4909_v24, %v11379_v59  ;;  %v11425_v60 = vadd.f32 %v4757_v39, %v11293_v31 }
 0xadc   : > { %v4640_v40 = vpop.f32.mrf.mxu0  ;;  %v4763_v10 = vpop.f32.mrf.mxu1  ;;  %12794 = vst [vmem:[#allocation152_spill] sm:$0xff] %v11414_v55  ;;  %v11428_v35 = vmul.f32 %v4976_v57, %v11352_v22  ;;  %v4911_v61 = vmul.f32 0.044715, %v11398_v56  ;;  %v4912_v50 = vmul.f32 0.044715, %v11401_v53  ;;  %v11433_v7 = vadd.f32 %v4638_v34, %v11285_v12 }
 0xadd   : > { %v11435_v27 = vpop.eup %7755  ;;  %v11438_v36 = vmul.f32 %v4978_v4, %v11358_v14  ;;  %v4914_v39 = vmul.f32 0.044715, %v11411_v20  ;;  %v4913_v9 = vmul.f32 0.044715, %v11419_v58  ;;  %v11443_v43 = vadd.f32 %v4761_v38, %v11287_v42 }
 0xade   : > { %v4642_v6 = vpop.f32.mrf.mxu0  ;;  %v4765_v3 = vpop.f32.mrf.mxu1  ;;  %12795 = vst [vmem:[#allocation153_spill] sm:$0xff] %v11428_v35  ;;  %v11446_v49 = vmul.f32 %v4977_v63, %v11362_v21  ;;  %v11449_v34 = vmul.f32 %v4979_v51, %v11368_v16  ;;  %v4915_v62 = vmul.f32 0.044715, %v11425_v60  ;;  %v11453_v4 = vadd.f32 %v4640_v40, %v11291_v1 }
 0xadf   : > { %12796 = vst [vmem:[#allocation154_spill] sm:$0xff] %v11438_v36  ;;  %v11455_v48 = vpop.eup %7757  ;;  %v11458_v36 = vmul.f32 %v4980_v28, %v11371_v33  ;;  %v11461_v38 = vmul.f32 %v4982_v46, %v11376_v37  ;;  %v11464_v14 = vmul.f32 %v4981_v15, %v11379_v59  ;;  %v11467_v63 = vadd.f32 %v4763_v10, %v11293_v31 }
 0xae0   : > { %v4644_v24 = vpop.f32.mrf.mxu0  ;;  %v4767_v57 = vpop.f32.mrf.mxu1  ;;  %12797 = vst [vmem:[#allocation155_spill] sm:$0xff] %v11446_v49  ;;  %12798 = vst [vmem:[#allocation156_spill] sm:$0xff] %v11449_v34  ;;  %v4983_v13 = vmul.f32 %v4911_v61, %v11398_v56  ;;  %v4984_v40 = vmul.f32 %v4912_v50, %v11401_v53  ;;  %v4916_v35 = vmul.f32 0.044715, %v11433_v7  ;;  %v11473_v28 = vadd.f32 %v4642_v6, %v11285_v12 }
 0xae1   : > { %12799 = vst [vmem:[#allocation157_spill] sm:$0xff] %v11458_v36  ;;  %12800 = vst [vmem:[#allocation158_spill] sm:$0xff] %v11461_v38  ;;  %v4986_v46 = vmul.f32 %v4914_v39, %v11411_v20  ;;  %v4985_v38 = vmul.f32 %v4913_v9, %v11419_v58  ;;  %v4918_v15 = vmul.f32 0.044715, %v11443_v43  ;;  %v11479_v10 = vadd.f32 %v4765_v3, %v11287_v42 }
 0xae2   : > { %12801 = vst [vmem:[#allocation159_spill] sm:$0xff] %v11464_v14  ;;  %v4648_v51 = vpop.f32.mrf.mxu0  ;;  %v4771_v25 = vpop.f32.mrf.mxu1  ;;  %v4987_v61 = vmul.f32 %v4915_v62, %v11425_v60  ;;  %v4917_v50 = vmul.f32 0.044715, %v11453_v4  ;;  %v4919_v33 = vmul.f32 0.044715, %v11467_v63  ;;  %v11485_v6 = vadd.f32 %v4644_v24, %v11291_v1 }
 0xae3   : > { %12802 = vst [vmem:[#allocation160_spill] sm:$0xff] %v11479_v10  ;;  %v11487_v14 = vpop.eup %7759  ;;  %v4920_v39 = vmul.f32 0.044715, %v11473_v28  ;;  %v4922_v9 = vmul.f32 0.044715, %v11479_v10  ;;  %v11492_v3 = vadd.f32 %v4767_v57, %v11293_v31  ;;  %v11495_v59 = vadd.f32 %v4648_v51, %v11285_v12 }
 0xae4   : > { %v4650_v37 = vpop.f32.mrf.mxu0  ;;  %v4773_v36 = vpop.f32.mrf.mxu1  ;;  %v4988_v45 = vmul.f32 %v4916_v35, %v11433_v7  ;;  %v4921_v24 = vmul.f32 0.044715, %v11485_v6  ;;  %v11502_v23 = vadd.f32 %v4771_v25, %v11287_v42  ;;  %v11508_v19 = vmul.f32 %v4983_v13, %v11398_v56 }
 0xae5   : > { %12803 = vst [vmem:[#allocation161_spill] sm:$0xff] %v11495_v59  ;;  %v11497_v22 = vpop.eup %7761  ;;  %v11505_v2 = vadd.f32 %v4650_v37, %v11291_v1  ;;  %v4990_v57 = vmul.f32 %v4918_v15, %v11443_v43  ;;  %v4923_v51 = vmul.f32 0.044715, %v11492_v3  ;;  %v4924_v34 = vmul.f32 0.044715, %v11495_v59 }
 0xae6   : > { %v4652_v62 = vpop.f32.mrf.mxu0  ;;  %12804 = vst [vmem:[#allocation162_spill] sm:$0xff] %v11502_v23  ;;  %12806 = vst [vmem:[#allocation164_spill] sm:$0xff] %v11508_v19  ;;  %v4775_v16 = vpop.f32.mrf.mxu1  ;;  %v4989_v35 = vmul.f32 %v4917_v50, %v11453_v4  ;;  %v4991_v55 = vmul.f32 %v4919_v33, %v11467_v63  ;;  %v4926_v25 = vmul.f32 0.044715, %v11502_v23  ;;  %v11518_v37 = vmul.f32 %v4984_v40, %v11401_v53 }
 0xae7   : > { %12805 = vst [vmem:[#allocation163_spill] sm:$0xff] %v11505_v2  ;;  %v4925_v17 = vmul.f32 0.044715, %v11505_v2  ;;  %v11521_v13 = vmul.f32 %v4986_v46, %v11411_v20  ;;  %v4992_v15 = vmul.f32 %v4920_v39, %v11473_v28  ;;  %v4994_v19 = vmul.f32 %v4922_v9, %v11479_v10 }
 0xae8   : > { %12807 = vst [vmem:[#allocation165_spill] sm:$0xff] %v11518_v37  ;;  %v4654_v56 = vpop.f32.mrf.mxu0  ;;  %v11526_v49 = vmul.f32 %v4985_v38, %v11419_v58  ;;  %v11529_v33 = vmul.f32 %v4987_v61, %v11425_v60  ;;  %v11532_v50 = vmul.f32 %v4988_v45, %v11433_v7  ;;  %v4993_v40 = vmul.f32 %v4921_v24, %v11485_v6  ;;  %v4777_v38 = vpop.f32.mrf.mxu1 }
 0xae9   : > { %12808 = vst [vmem:[#allocation166_spill] sm:$0xff] %v11521_v13  ;;  %v11536_v37 = vmul.f32 %v4990_v57, %v11443_v43  ;;  %v4995_v46 = vmul.f32 %v4923_v51, %v11492_v3  ;;  %v4996_v39 = vmul.f32 %v4924_v34, %v11495_v59  ;;  %v11541_v9 = vadd.f32 %v4773_v36, %v11293_v31 }
 0xaea   : > { %v11544_v13 = vmul.f32 %v4989_v35, %v11453_v4  ;;  %v11547_v61 = vmul.f32 %v4991_v55, %v11467_v63  ;;  %v4998_v45 = vmul.f32 %v4926_v25, %v11502_v23  ;;  %v4997_v24 = vmul.f32 %v4925_v17, %v11505_v2  ;;  %v4658_v35 = vpop.f32.mrf.mxu0 }
 0xaeb   : > { %12809 = vst [vmem:[#allocation167_spill] sm:$0xff] %v11536_v37  ;;  %12810 = vst [vmem:[#allocation168_spill] sm:$0xff] %v11541_v9  ;;  %v11552_v57 = vmul.f32 %v4992_v15, %v11473_v28  ;;  %v11555_v51 = vmul.f32 %v4994_v19, %v11479_v10  ;;  %v11558_v36 = vadd.f32 %v4652_v62, %v11285_v12 }
 0xaec   : > { %v11561_v34 = vadd.f32 %v4775_v16, %v11287_v42  ;;  %v11564_v55 = vmul.f32 %v4993_v40, %v11485_v6  ;;  %v11567_v25 = vadd.f32 %v4654_v56, %v11291_v1  ;;  %v5109_v17 = vadd.f32 %v11341_v47, %v11298_v11 }
 0xaed   : > { %12811 = vst [vmem:[#allocation169_spill] sm:$0xff] %v11555_v51  ;;  %12812 = vst [vmem:[#allocation170_spill] sm:$0xff] %v11558_v36  ;;  %v5113_v19 = vadd.f32 %v11365_v30, %v11308_v26  ;;  %v11574_v15 = vmul.f32 %v4995_v46, %v11492_v3  ;;  %v11577_v62 = vmul.f32 %v4996_v39, %v11495_v59  ;;  %v4927_v16 = vmul.f32 0.044715, %v11541_v9  ;;  %v4781_v51 = vpop.f32.mrf.mxu1 }
 0xaee   : > { %12813 = vst [vmem:[#allocation171_spill] sm:$0xff] %v11561_v34  ;;  %v11581_v40 = vadd.f32 %v4777_v38, %v11293_v31  ;;  %v11584_v56 = vmul.f32 %v4998_v45, %v11502_v23  ;;  %v11587_v11 = vmul.f32 %v4997_v24, %v11505_v2  ;;  %v5181_v47 = vmul.f32 0.7978846, %v5109_v17 }
 0xaef   : > { %12814 = vst [vmem:[#allocation172_spill] sm:$0xff] %v11577_v62  ;;  %v5185_v30 = vmul.f32 0.7978846, %v5113_v19  ;;  %v4928_v46 = vmul.f32 0.044715, %v11558_v36  ;;  %v5111_v39 = vadd.f32 %v11348_v5, %v11301_v52  ;;  %v5115_v38 = vadd.f32 %v11382_v32, %v11311_v41  ;;  %v4660_v62 = vpop.f32.mrf.mxu0  ;;  %v4783_v23 = vpop.f32.mrf.mxu1 }
 0xaf0   : > { %12815 = vst [vmem:[#allocation173_spill] sm:$0xff] %v11581_v40  ;;  %12816 = vst [vmem:[#allocation174_spill] sm:$0xff] %v11584_v56  ;;  %v4930_v10 = vmul.f32 0.044715, %v11561_v34  ;;  %v4929_v59 = vmul.f32 0.044715, %v11567_v25  ;;  %7763 = vtanh.f32 %v5181_v47  ;;  %v11597_v45 = vadd.f32 %v4658_v35, %v11285_v12 }
 0xaf1   : > { %12817 = vst [vmem:[#allocation175_spill] sm:$0xff] %v11587_v11  ;;  %v11600_v24 = vadd.f32 %v4781_v51, %v11287_v42  ;;  %v4931_v17 = vmul.f32 0.044715, %v11581_v40  ;;  %7765 = vtanh.f32 %v5185_v30  ;;  %v5183_v19 = vmul.f32 0.7978846, %v5111_v39  ;;  %v4662_v30 = vpop.f32.mrf.mxu0 }
 0xaf2   : > { %12818 = vst [vmem:[#allocation176_spill] sm:$0xff] %v11597_v45  ;;  %v5187_v56 = vmul.f32 0.7978846, %v5115_v38  ;;  %v4999_v52 = vmul.f32 %v4927_v16, %v11541_v9  ;;  %v11605_v5 = vmul.f32 0.5, %v11308_v26  ;;  %v4932_v32 = vmul.f32 0.044715, %v11597_v45 }
 0xaf3   : > { %12819 = vst [vmem:[#allocation177_spill] sm:$0xff] %v11600_v24  ;;  %v4934_v47 = vmul.f32 0.044715, %v11600_v24  ;;  %v5000_v35 = vmul.f32 %v4928_v46, %v11558_v36  ;;  %7767 = vtanh.f32 %v5183_v19  ;;  %v5328_v51 = vadd.f32 1.0, %v11487_v14  ;;  %v4785_v14 = vpop.f32.mrf.mxu1 }
 0xaf4   : > { %v11612_v11 = vadd.f32 %v4660_v62, %v11291_v1  ;;  %v5002_v39 = vmul.f32 %v4930_v10, %v11561_v34  ;;  %v5001_v16 = vmul.f32 %v4929_v59, %v11567_v25  ;;  %7769 = vtanh.f32 %v5187_v56 }
 0xaf5   : > { %v5330_v26 = vadd.f32 1.0, %v11497_v22  ;;  %v5003_v38 = vmul.f32 %v4931_v17, %v11581_v40  ;;  %v5324_v2 = vadd.f32 1.0, %v11435_v27  ;;  %v5326_v46 = vadd.f32 1.0, %v11455_v48 }
 0xaf6   : > { %12820 = vst [vmem:[#allocation178_spill] sm:$0xff] %v11612_v11  ;;  %v4933_v19 = vmul.f32 0.044715, %v11612_v11  ;;  %v5004_v62 = vmul.f32 %v4932_v32, %v11597_v45  ;;  %v5006_v37 = vmul.f32 %v4934_v47, %v11600_v24  ;;  %v11624_v10 = vadd.f32 %v4783_v23, %v11293_v31 }
 0xaf7   : > { %v11627_v59 = vadd.f32 %v4662_v30, %v11285_v12  ;;  %v11630_v22 = vmul.f32 %v4999_v52, %v11541_v9  ;;  %v11633_v27 = vmul.f32 %v5000_v35, %v11558_v36  ;;  %v4827_v48 = vmul.f32 0.5, %v11311_v41  ;;  %v4664_v52 = vpop.f32.mrf.mxu0  ;;  %v4787_v30 = vpop.f32.mrf.mxu1  ;;  %v12837_v36 = vld [vmem:[#allocation139_spill] sm:$0xff] }
 0xaf8   : > { %v11637_v56 = vmul.f32 %v5328_v51, %v11336_v18  ;;  %v11640_v17 = vmul.f32 %v5002_v39, %v11561_v34  ;;  %v11643_v23 = vmul.f32 %v5330_v26, %v11338_v29  ;;  %v5005_v32 = vmul.f32 %v4933_v19, %v11612_v11  ;;  %v12834_v34 = vld [vmem:[#allocation145_spill] sm:$0xff] }
 0xaf9   : > { %12821 = vst [vmem:[#allocation179_spill] sm:$0xff] %v11627_v59  ;;  %12822 = vst [vmem:[#allocation180_spill] sm:$0xff] %v11630_v22  ;;  %v11647_v47 = vadd.f32 %v4785_v14, %v11287_v42  ;;  %v11650_v35 = vmul.f32 %v5001_v16, %v11567_v25  ;;  %v11653_v41 = vmul.f32 %v5003_v38, %v11581_v40  ;;  %v4935_v26 = vmul.f32 0.044715, %v11624_v10 }
 0xafa   : > { %12823 = vst [vmem:[#allocation181_spill] sm:$0xff] %v11633_v27  ;;  %12824 = vst [vmem:[#allocation182_spill] sm:$0xff] %v11640_v17  ;;  %v5396_v18 = vmul.f32 %v5324_v2, %v11313_v44  ;;  %v11657_v51 = vmul.f32 %v5326_v46, %v11315_v8  ;;  %v11660_v29 = vmul.f32 %v5004_v62, %v11597_v45  ;;  %v4936_v16 = vmul.f32 0.044715, %v11627_v59  ;;  %v12830_v8 = vld [vmem:[#allocation155_spill] sm:$0xff]  ;;  %v12832_v45 = vld [vmem:[#allocation142_spill] sm:$0xff] }
 0xafb   : > { %12825 = vst [vmem:[#allocation183_spill] sm:$0xff] %v11647_v47  ;;  %12826 = vst [vmem:[#allocation184_spill] sm:$0xff] %v11650_v35  ;;  %v11663_v39 = vmul.f32 %v5006_v37, %v11600_v24  ;;  %v11669_v38 = vadd.f32 %v4664_v52, %v11291_v1  ;;  %v5117_v44 = vadd.f32 %v11407_v0, %v11331_v54  ;;  %v4938_v14 = vmul.f32 0.044715, %v11647_v47 }
 0xafc   : > { %12827 = vst [vmem:[#allocation185_spill] sm:$0xff] %v11653_v41  ;;  %12828 = vst [vmem:[#allocation186_spill] sm:$0xff] %v11660_v29  ;;  %v5486_v19 = vpack.c.bf16 %v11637_v56, %v5396_v18  ;;  %v5121_v2 = vadd.f32 %v12830_v8, %v11362_v21  ;;  %v11678_v37 = vmul.f32 %v5005_v32, %v11612_v11  ;;  %v11685_v52 = vmul.f32 0.5, %v11331_v54  ;;  %v4791_v11 = vpop.f32.mrf.mxu1 }
 0xafd   : > { %12829 = vst [vmem:[#allocation187_spill] sm:$0xff] %v11663_v39  ;;  %v11682_v62 = vadd.f32 %v4787_v30, %v11293_v31  ;;  %v7764_v56 = vpop.eup %7763  ;;  %v11688_v0 = vmul.f32 0.5, %v11362_v21  ;;  %v5189_v18 = vmul.f32 0.7978846, %v5117_v44  ;;  %v4668_v39 = vpop.f32.mrf.mxu0  ;;  %v5007_v32 = vmul.f32 %v4935_v26, %v11624_v10  ;;  %v12835_v21 = vld [vmem:[#allocation156_spill] sm:$0xff] }
 0xafe   : > { %12831 = vst [vmem:[#allocation155_spill] sm:$0xff] %v11678_v37  ;;  %v5193_v8 = vmul.f32 0.7978846, %v5121_v2  ;;  %v7766_v24 = vpop.eup %7765  ;;  %v5325_v46 = vadd.f32 1.0, %v7764_v56  ;;  %v5008_v29 = vmul.f32 %v4936_v16, %v11627_v59  ;;  %v12833_v37 = vld [vmem:[#allocation152_spill] sm:$0xff]  ;;  %v5123_v27 = vadd.f32 %v12835_v21, %v12834_v34 }
 0xaff   : > { %v5119_v30 = vadd.f32 %v12833_v37, %v12832_v45  ;;  %v5329_v17 = vadd.f32 1.0, %v7766_v24  ;;  %v4937_v54 = vmul.f32 0.044715, %v11669_v38  ;;  %7771 = vtanh.f32 %v5189_v18  ;;  %v4670_v22 = vpop.f32.mrf.mxu0 }
 0xb00   : > { %v7768_v44 = vpop.eup %7767  ;;  %v4939_v2 = vmul.f32 0.044715, %v11682_v62  ;;  %7773 = vtanh.f32 %v5193_v8  ;;  %v11699_v26 = vadd.f32 %v4668_v39, %v11285_v12  ;;  %v5397_v41 = vmul.f32 %v5325_v46, %v12837_v36  ;;  %v4793_v8 = vpop.f32.mrf.mxu1  ;;  %v12840_v36 = vld [vmem:[#allocation141_spill] sm:$0xff]  ;;  %v12841_v46 = vld [vmem:[#allocation138_spill] sm:$0xff] }
 0xb01   : > { %v5191_v56 = vmul.f32 0.7978846, %v5119_v30  ;;  %v7770_v16 = vpop.eup %7769  ;;  %v5401_v37 = vmul.f32 %v5329_v17, %v11605_v5  ;;  %v5327_v24 = vadd.f32 1.0, %v7768_v44  ;;  %v5195_v40 = vmul.f32 0.7978846, %v5123_v27 }
 0xb02   : > { %12836 = vst [vmem:[#allocation142_spill] sm:$0xff] %v11699_v26  ;;  %v5331_v18 = vadd.f32 1.0, %v7770_v16  ;;  %v5010_v9 = vmul.f32 %v4938_v14, %v11647_v47  ;;  %v11705_v21 = vadd.f32 %v4791_v11, %v11287_v42  ;;  %v11708_v39 = vmul.f32 %v5007_v32, %v11624_v10  ;;  %v12842_v14 = vld [vmem:[#allocation149_spill] sm:$0xff] }
 0xb03   : > { %7775 = vtanh.f32 %v5191_v56  ;;  %v5487_v30 = vpack.c.bf16 %v5401_v37, %v5397_v41  ;;  %v11711_v35 = vmul.f32 0.5, %v12832_v45  ;;  %v5399_v5 = vmul.f32 %v5327_v24, %v12840_v36  ;;  %v12844_v56 = vld [vmem:[#allocation143_spill] sm:$0xff]  ;;  %v12845_v45 = vld [vmem:[#allocation153_spill] sm:$0xff] }
 0xb04   : > { %12838 = vst [vmem:[#allocation152_spill] sm:$0xff] %v11705_v21  ;;  %12839 = vst [vmem:[#allocation145_spill] sm:$0xff] %v11708_v39  ;;  %7777 = vtanh.f32 %v5195_v40  ;;  %v5403_v27 = vmul.f32 %v5331_v18, %v4827_v48  ;;  %v4940_v17 = vmul.f32 0.044715, %v11699_v26  ;;  %v5116_v44 = vadd.f32 %v12842_v14, %v12841_v46  ;;  %v4672_v40 = vpop.f32.mrf.mxu0  ;;  %v12846_v18 = vld [vmem:[#allocation140_spill] sm:$0xff]  ;;  %v12847_v36 = vld [vmem:[#allocation151_spill] sm:$0xff] }
 0xb05   : > { %5810 = vmatprep.mubr.bf16.mxu0 %v5487_v30  ;;  %v11718_v11 = vmul.f32 %v5008_v29, %v11627_v59  ;;  %v5009_v41 = vmul.f32 %v4937_v54, %v11669_v38  ;;  %v5011_v32 = vmul.f32 %v4939_v2, %v11682_v62  ;;  %v5120_v16 = vadd.f32 %v12845_v45, %v12844_v56  ;;  %v4795_v30 = vpop.f32.mrf.mxu1  ;;  %v12848_v29 = vld [vmem:[#allocation144_spill] sm:$0xff] }
 0xb06   : > { %v5489_v37 = vpack.c.bf16 %v5403_v27, %v5399_v5  ;;  %5811 = vmatmul.mubr.bf16.vlgmr.msra.gmra.mxu0 %v5486_v19  ;;  %v4942_v48 = vmul.f32 0.044715, %v11705_v21  ;;  %v5188_v24 = vmul.f32 0.7978846, %v5116_v44  ;;  %v5118_v14 = vadd.f32 %v12847_v36, %v12846_v18 }
 0xb07   : > { %12843 = vst [vmem:[#allocation156_spill] sm:$0xff] %v11718_v11  ;;  %v5192_v39 = vmul.f32 0.7978846, %v5120_v16  ;;  %v12849_v11 = vld [vmem:[#allocation154_spill] sm:$0xff]  ;;  %v11730_v54 = vadd.f32 %v4670_v22, %v11291_v1  ;;  %v11733_v2 = vadd.f32 %v4793_v8, %v11293_v31  ;;  %v5012_v19 = vmul.f32 %v4940_v17, %v11699_v26 }
 0xb08   : > { %v5122_v59 = vadd.f32 %v12849_v11, %v12848_v29  ;;  %5915 = vmatprep.mubr.bf16.mxu1 %v5489_v37  ;;  %7779 = vtanh.f32 %v5188_v24  ;;  %v5190_v5 = vmul.f32 0.7978846, %v5118_v14  ;;  %v11737_v27 = vadd.f32 %v4672_v40, %v11285_v12  ;;  %v4674_v40 = vpop.f32.mrf.mxu0 }
 0xb09   : > { %12850 = vst [vmem:[#allocation139_spill] sm:$0xff] %v11733_v2  ;;  %v12852_v44 = vpack.c.bf16 %v11643_v23, %v11657_v51  ;;  %v11743_v11 = vmul.f32 %v5010_v9, %v11647_v47  ;;  %7781 = vtanh.f32 %v5192_v39  ;;  %v11746_v8 = vadd.f32 %v4795_v30, %v11287_v42 }
 0xb0a   : > { %12851 = vst [vmem:[#allocation141_spill] sm:$0xff] %v11737_v27  ;;  %v5194_v22 = vmul.f32 0.7978846, %v5122_v59  ;;  %v4835_v45 = vmul.f32 0.5, %v12834_v34  ;;  %v5014_v17 = vmul.f32 %v4942_v48, %v11705_v21  ;;  %7783 = vtanh.f32 %v5190_v5 }
 0xb0b   : > { %5916 = vmatmul.mubr.bf16.vlgmr.msra.gmra.mxu1 %v12852_v44  ;;  %12853 = vst [vmem:[#allocation138_spill] sm:$0xff] %v11743_v11  ;;  %v4941_v16 = vmul.f32 0.044715, %v11730_v54  ;;  %v11752_v37 = vmul.f32 %v5009_v41, %v11669_v38  ;;  %v4943_v9 = vmul.f32 0.044715, %v11733_v2  ;;  %v11757_v51 = vmul.f32 %v5011_v32, %v11682_v62  ;;  %v4797_v41 = vpop.f32.mrf.mxu1 }
 0xb0c   : > { %7785 = vtanh.f32 %v5194_v22  ;;  %v4944_v23 = vmul.f32 0.044715, %v11737_v27  ;;  %v7772_v59 = vpop.eup %7771  ;;  %v11760_v34 = vmul.f32 %v5012_v19, %v11699_v26  ;;  %v11763_v39 = vmul.f32 0.5, %v12841_v46 }
 0xb0d   : > { %12854 = vst [vmem:[#allocation149_spill] sm:$0xff] %v11757_v51  ;;  %v11766_v48 = vmul.f32 0.5, %v12844_v56  ;;  %v7774_v24 = vpop.eup %7773  ;;  %v5333_v36 = vadd.f32 1.0, %v7772_v59  ;;  %v11769_v14 = vmul.f32 0.5, %v12846_v18  ;;  %v4946_v30 = vmul.f32 0.044715, %v11746_v8 }
 0xb0e   : > { %12855 = vst [vmem:[#allocation143_spill] sm:$0xff] %v11760_v34  ;;  %v11773_v32 = vadd.f32 %v4674_v40, %v11291_v1  ;;  %v5337_v5 = vadd.f32 1.0, %v7774_v24  ;;  %v11776_v19 = vmul.f32 %v5014_v17, %v11705_v21  ;;  %v11779_v46 = vmul.f32 0.5, %v12848_v29  ;;  %v12857_v34 = vld [vmem:[#allocation148_spill] sm:$0xff]  ;;  %v12858_v40 = vld [vmem:[#allocation159_spill] sm:$0xff] }
 0xb0f   : > { %v5013_v56 = vmul.f32 %v4941_v16, %v11730_v54  ;;  %v5015_v22 = vmul.f32 %v4943_v9, %v11733_v2  ;;  %v5016_v18 = vmul.f32 %v4944_v23, %v11737_v27  ;;  %v11785_v59 = vadd.f32 %v4797_v41, %v11293_v31  ;;  %v4678_v41 = vpop.f32.mrf.mxu0 }
 0xb10   : > { %12856 = vst [vmem:[#allocation153_spill] sm:$0xff] %v11776_v19  ;;  %v7776_v44 = vpop.eup %7775  ;;  %v5125_v26 = vadd.f32 %v12858_v40, %v12857_v34  ;;  %v5405_v17 = vmul.f32 %v5333_v36, %v11685_v52  ;;  %v5409_v19 = vmul.f32 %v5337_v5, %v11688_v0  ;;  %v5129_v16 = vadd.f32 %v11526_v49, %v11419_v58  ;;  %v12859_v0 = vld [vmem:[#allocation150_spill] sm:$0xff]  ;;  %v12860_v5 = vld [vmem:[#allocation164_spill] sm:$0xff] }
 0xb11   : > { %v7778_v24 = vpop.eup %7777  ;;  %v5335_v29 = vadd.f32 1.0, %v7776_v44  ;;  %v5018_v9 = vmul.f32 %v4946_v30, %v11746_v8  ;;  %v4945_v23 = vmul.f32 0.044715, %v11773_v32  ;;  %v11797_v40 = vmul.f32 0.5, %v12857_v34  ;;  %v4801_v30 = vpop.f32.mrf.mxu1 }
 0xb12   : > { %v5339_v21 = vadd.f32 1.0, %v7778_v24  ;;  %v5197_v11 = vmul.f32 0.7978846, %v5125_v26  ;;  %v5491_v47 = vpack.c.bf16 %v5409_v19, %v5405_v17  ;;  %v5201_v52 = vmul.f32 0.7978846, %v5129_v16  ;;  %v4680_v17 = vpop.f32.mrf.mxu0  ;;  %v12865_v16 = vld [vmem:[#allocation146_spill] sm:$0xff] }
 0xb13   : > { %v5407_v51 = vmul.f32 %v5335_v29, %v11711_v35  ;;  %v5127_v44 = vadd.f32 %v12860_v5, %v12859_v0  ;;  %v5131_v49 = vadd.f32 %v11529_v33, %v11425_v60  ;;  %v11804_v26 = vmul.f32 %v5013_v56, %v11730_v54 }
 0xb14   : > { %v5411_v36 = vmul.f32 %v5339_v21, %v4835_v45  ;;  %7787 = vtanh.f32 %v5197_v11  ;;  %5818 = vmatprep.mubr.bf16.mxu0 %v5491_v47  ;;  %v4947_v19 = vmul.f32 0.044715, %v11785_v59  ;;  %v11808_v35 = vadd.f32 %v4678_v41, %v11285_v12 }
 0xb15   : > { %7789 = vtanh.f32 %v5201_v52  ;;  %v7780_v34 = vpop.eup %7779  ;;  %v11811_v11 = vmul.f32 %v5015_v22, %v11733_v2  ;;  %v5199_v45 = vmul.f32 0.7978846, %v5127_v44  ;;  %v5203_v24 = vmul.f32 0.7978846, %v5131_v49  ;;  %v12866_v52 = vld [vmem:[#allocation157_spill] sm:$0xff] }
 0xb16   : > { %12861 = vst [vmem:[#allocation140_spill] sm:$0xff] %v11808_v35  ;;  %v5493_v21 = vpack.c.bf16 %v5411_v36, %v5407_v51  ;;  %v7782_v33 = vpop.eup %7781  ;;  %v5332_v29 = vadd.f32 1.0, %v7780_v34  ;;  %v11814_v47 = vmul.f32 %v5016_v18, %v11737_v27  ;;  %v11817_v56 = vadd.f32 %v4801_v30, %v11287_v42  ;;  %v12867_v36 = vld [vmem:[#allocation165_spill] sm:$0xff] }
 0xb17   : > { %12862 = vst [vmem:[#allocation151_spill] sm:$0xff] %v11811_v11  ;;  %v5124_v41 = vadd.f32 %v12866_v52, %v12865_v16  ;;  %v7784_v5 = vpop.eup %7783  ;;  %v5336_v51 = vadd.f32 1.0, %v7782_v33  ;;  %v5017_v22 = vmul.f32 %v4945_v23, %v11773_v32  ;;  %7791 = vtanh.f32 %v5199_v45  ;;  %v4682_v11 = vpop.f32.mrf.mxu0 }
 0xb18   : > { %12863 = vst [vmem:[#allocation144_spill] sm:$0xff] %v11814_v47  ;;  %12864 = vst [vmem:[#allocation154_spill] sm:$0xff] %v11817_v56  ;;  %5923 = vmatprep.mubr.bf16.mxu1 %v5493_v21  ;;  %v5128_v44 = vadd.f32 %v12867_v36, %v11401_v53  ;;  %v5334_v34 = vadd.f32 1.0, %v7784_v5  ;;  %v5019_v18 = vmul.f32 %v4947_v19, %v11785_v59  ;;  %7793 = vtanh.f32 %v5203_v24  ;;  %v4803_v47 = vpop.f32.mrf.mxu1 }
 0xb19   : > { %v7786_v49 = vpop.eup %7785  ;;  %v4948_v30 = vmul.f32 0.044715, %v11808_v35  ;;  %v5404_v27 = vmul.f32 %v5332_v29, %v11763_v39  ;;  %v5408_v52 = vmul.f32 %v5336_v51, %v11766_v48  ;;  %v5196_v33 = vmul.f32 0.7978846, %v5124_v41  ;;  %v12868_v39 = vld [vmem:[#allocation147_spill] sm:$0xff]  ;;  %v12869_v48 = vld [vmem:[#allocation158_spill] sm:$0xff] }
 0xb1a   : > { %v5338_v21 = vadd.f32 1.0, %v7786_v49  ;;  %v11829_v23 = vmul.f32 %v5018_v9, %v11746_v8  ;;  %v4841_v45 = vmul.f32 0.5, %v11419_v58  ;;  %v4950_v5 = vmul.f32 0.044715, %v11817_v56  ;;  %v12870_v41 = vld [vmem:[#allocation166_spill] sm:$0xff]  ;;  %v4805_v58 = vpop.f32.mrf.mxu1 }
 0xb1b   : > { %v5200_v36 = vmul.f32 0.7978846, %v5128_v44  ;;  %v5490_v19 = vpack.c.bf16 %v5408_v52, %v5404_v27  ;;  %v5406_v24 = vmul.f32 %v5334_v34, %v11769_v14  ;;  %7795 = vtanh.f32 %v5196_v33  ;;  %v4684_v44 = vpop.f32.mrf.mxu0 }
 0xb1c   : > { %v5410_v2 = vmul.f32 %v5338_v21, %v11779_v46  ;;  %v5126_v29 = vadd.f32 %v12869_v48, %v12868_v39  ;;  %v5130_v51 = vadd.f32 %v12870_v41, %v11411_v20  ;;  %v11840_v9 = vadd.f32 %v4680_v17, %v11291_v1  ;;  %v4807_v48 = vpop.f32.mrf.mxu1 }
 0xb1d   : > { %7797 = vtanh.f32 %v5200_v36  ;;  %5819 = vmatmul.mubr.bf16.gmra.mxu0 %v5490_v19  ;;  %v11843_v27 = vmul.f32 %v5017_v22, %v11773_v32  ;;  %v11846_v14 = vmul.f32 %v5019_v18, %v11785_v59  ;;  %v5020_v46 = vmul.f32 %v4948_v30, %v11808_v35 }
 0xb1e   : > { %v5492_v49 = vpack.c.bf16 %v5410_v2, %v5406_v24  ;;  %v5198_v34 = vmul.f32 0.7978846, %v5126_v29  ;;  %v5202_v52 = vmul.f32 0.7978846, %v5130_v51  ;;  %v11850_v21 = vadd.f32 %v4803_v47, %v11293_v31 }
 0xb1f   : > { %v11853_v17 = vadd.f32 %v4682_v11, %v11285_v12  ;;  %v4839_v2 = vmul.f32 0.5, %v12859_v0  ;;  %v5022_v22 = vmul.f32 %v4950_v5, %v11817_v56  ;;  %v4949_v33 = vmul.f32 0.044715, %v11840_v9 }
 0xb20   : > { %5924 = vmatmul.mubr.bf16.gmra.mxu1 %v5492_v49  ;;  %v11859_v18 = vadd.f32 %v4805_v58, %v11287_v42  ;;  %v4843_v36 = vmul.f32 0.5, %v11425_v60  ;;  %v4836_v19 = vmul.f32 0.5, %v12865_v16  ;;  %7799 = vtanh.f32 %v5198_v34 }
 0xb21   : > { %v7788_v30 = vpop.eup %7787  ;;  %v11864_v47 = vadd.f32 %v4684_v44, %v11291_v1  ;;  %v4840_v0 = vmul.f32 0.5, %v11401_v53  ;;  %v11868_v5 = vmul.f32 0.5, %v12868_v39  ;;  %7801 = vtanh.f32 %v5202_v52 }
 0xb22   : > { %12871 = vst [vmem:[#allocation148_spill] sm:$0xff] %v11859_v18  ;;  %v7790_v11 = vpop.eup %7789  ;;  %v5341_v24 = vadd.f32 1.0, %v7788_v30  ;;  %v11871_v41 = vmul.f32 %v5020_v46, %v11808_v35  ;;  %v4951_v60 = vmul.f32 0.044715, %v11850_v21  ;;  %v4952_v16 = vmul.f32 0.044715, %v11853_v17 }
 0xb23   : > { %v5345_v29 = vadd.f32 1.0, %v7790_v11  ;;  %v11876_v51 = vmul.f32 %v5022_v22, %v11817_v56  ;;  %v11879_v58 = vmul.f32 0.5, %v11411_v20  ;;  %v5021_v53 = vmul.f32 %v4949_v33, %v11840_v9 }
 0xb24   : > { %12872 = vst [vmem:[#allocation159_spill] sm:$0xff] %v11871_v41  ;;  %v4954_v39 = vmul.f32 0.044715, %v11859_v18  ;;  %v7792_v49 = vpop.eup %7791  ;;  %v5413_v44 = vmul.f32 %v5341_v24, %v11797_v40  ;;  %v4953_v46 = vmul.f32 0.044715, %v11864_v47  ;;  %v11886_v52 = vadd.f32 %v4807_v48, %v11293_v31  ;;  %v4688_v24 = vpop.f32.mrf.mxu0 }
 0xb25   : > { %12873 = vst [vmem:[#allocation150_spill] sm:$0xff] %v11876_v51  ;;  %v5417_v34 = vmul.f32 %v5345_v29, %v4841_v45  ;;  %v7794_v30 = vpop.eup %7793  ;;  %v5343_v11 = vadd.f32 1.0, %v7792_v49  ;;  %v11889_v22 = vmul.f32 0.5, %v11453_v4  ;;  %v5133_v20 = vadd.f32 %v11544_v13, %v11453_v4 }
 0xb26   : > { %v5137_v33 = vadd.f32 %v11564_v55, %v11485_v6  ;;  %v5347_v56 = vadd.f32 1.0, %v7794_v30  ;;  %v5023_v40 = vmul.f32 %v4951_v60, %v11850_v21  ;;  %v5024_v45 = vmul.f32 %v4952_v16, %v11853_v17 }
 0xb27   : > { %v5495_v51 = vpack.c.bf16 %v5417_v34, %v5413_v44  ;;  %v11898_v48 = vmul.f32 %v5021_v53, %v11840_v9  ;;  %v5026_v29 = vmul.f32 %v4954_v39, %v11859_v18  ;;  %v5205_v49 = vmul.f32 0.7978846, %v5133_v20  ;;  %v4811_v44 = vpop.f32.mrf.mxu1 }
 0xb28   : > { %v5209_v41 = vmul.f32 0.7978846, %v5137_v33  ;;  %v7796_v35 = vpop.eup %7795  ;;  %v5415_v4 = vmul.f32 %v5343_v11, %v4839_v2  ;;  %v5419_v13 = vmul.f32 %v5347_v56, %v4843_v36  ;;  %v5135_v55 = vadd.f32 %v11547_v61, %v11467_v63  ;;  %v4690_v56 = vpop.f32.mrf.mxu0 }
 0xb29   : > { %5826 = vmatprep.mubr.bf16.mxu0 %v5495_v51  ;;  %v5139_v60 = vadd.f32 %v11574_v15, %v11492_v3  ;;  %v5340_v34 = vadd.f32 1.0, %v7796_v35  ;;  %v5025_v53 = vmul.f32 %v4953_v46, %v11864_v47  ;;  %7803 = vtanh.f32 %v5205_v49 }
 0xb2a   : > { %v7798_v16 = vpop.eup %7797  ;;  %v11907_v39 = vadd.f32 %v4688_v24, %v11285_v12  ;;  %v5497_v30 = vpack.c.bf16 %v5419_v13, %v5415_v4  ;;  %7805 = vtanh.f32 %v5209_v41  ;;  %v5207_v2 = vmul.f32 0.7978846, %v5135_v55  ;;  %v4813_v41 = vpop.f32.mrf.mxu1 }
 0xb2b   : > { %v5344_v20 = vadd.f32 1.0, %v7798_v16  ;;  %v11910_v36 = vmul.f32 %v5023_v40, %v11850_v21  ;;  %v11913_v61 = vmul.f32 %v5024_v45, %v11853_v17  ;;  %v5211_v15 = vmul.f32 0.7978846, %v5139_v60  ;;  %v4692_v55 = vpop.f32.mrf.mxu0 }
 0xb2c   : > { %12874 = vst [vmem:[#allocation164_spill] sm:$0xff] %v11907_v39  ;;  %v11916_v35 = vadd.f32 %v4811_v44, %v11287_v42  ;;  %5931 = vmatprep.mubr.bf16.mxu1 %v5497_v30  ;;  %v5412_v51 = vmul.f32 %v5340_v34, %v4836_v19  ;;  %7807 = vtanh.f32 %v5207_v2  ;;  %v5132_v11 = vadd.f32 %v11532_v50, %v11433_v7 }
 0xb2d   : > { %v5416_v46 = vmul.f32 %v5344_v20, %v4840_v0  ;;  %v7800_v33 = vpop.eup %7799  ;;  %v11921_v24 = vmul.f32 %v5026_v29, %v11859_v18  ;;  %v4955_v40 = vmul.f32 0.044715, %v11886_v52  ;;  %7809 = vtanh.f32 %v5211_v15  ;;  %v4815_v20 = vpop.f32.mrf.mxu1  ;;  %v12878_v15 = vld [vmem:[#allocation160_spill] sm:$0xff] }
 0xb2e   : > { %12875 = vst [vmem:[#allocation146_spill] sm:$0xff] %v11916_v35  ;;  %v5136_v45 = vadd.f32 %v11552_v57, %v11473_v28  ;;  %v7802_v49 = vpop.eup %7801  ;;  %v5342_v13 = vadd.f32 1.0, %v7800_v33  ;;  %v4956_v19 = vmul.f32 0.044715, %v11907_v39  ;;  %v5204_v0 = vmul.f32 0.7978846, %v5132_v11 }
 0xb2f   : > { %12876 = vst [vmem:[#allocation157_spill] sm:$0xff] %v11921_v24  ;;  %v5494_v4 = vpack.c.bf16 %v5416_v46, %v5412_v51  ;;  %v5346_v60 = vadd.f32 1.0, %v7802_v49  ;;  %v11928_v50 = vmul.f32 %v5025_v53, %v11864_v47  ;;  %v4849_v29 = vmul.f32 0.5, %v11485_v6  ;;  %v12877_v57 = vld [vmem:[#allocation167_spill] sm:$0xff]  ;;  %v12879_v51 = vld [vmem:[#allocation169_spill] sm:$0xff] }
 0xb30   : > { %v5208_v44 = vmul.f32 0.7978846, %v5136_v45  ;;  %v5414_v16 = vmul.f32 %v5342_v13, %v11868_v5  ;;  %v4958_v34 = vmul.f32 0.044715, %v11916_v35  ;;  %7811 = vtanh.f32 %v5204_v0  ;;  %v4694_v45 = vpop.f32.mrf.mxu0 }
 0xb31   : > { %5827 = vmatmul.mubr.bf16.gmra.mxu0 %v5494_v4  ;;  %v5134_v30 = vadd.f32 %v12877_v57, %v11443_v43  ;;  %v5418_v2 = vmul.f32 %v5346_v60, %v11879_v58  ;;  %v5138_v53 = vadd.f32 %v12879_v51, %v12878_v15  ;;  %v11939_v46 = vadd.f32 %v4690_v56, %v11291_v1 }
 0xb32   : > { %7813 = vtanh.f32 %v5208_v44  ;;  %v5027_v6 = vmul.f32 %v4955_v40, %v11886_v52  ;;  %v5028_v5 = vmul.f32 %v4956_v19, %v11907_v39  ;;  %v11944_v33 = vadd.f32 %v4813_v41, %v11293_v31 }
 0xb33   : > { %12880 = vst [vmem:[#allocation165_spill] sm:$0xff] %v11939_v46  ;;  %v5206_v11 = vmul.f32 0.7978846, %v5134_v30  ;;  %v5496_v49 = vpack.c.bf16 %v5418_v2, %v5414_v16  ;;  %v5210_v4 = vmul.f32 0.7978846, %v5138_v53  ;;  %v11947_v58 = vadd.f32 %v4692_v55, %v11285_v12  ;;  %v4817_v16 = vpop.f32.mrf.mxu1 }
 0xb34   : > { %v11950_v13 = vadd.f32 %v4815_v20, %v11287_v42  ;;  %v4847_v56 = vmul.f32 0.5, %v11467_v63  ;;  %v5030_v0 = vmul.f32 %v4958_v34, %v11916_v35  ;;  %v4957_v40 = vmul.f32 0.044715, %v11939_v46 }
 0xb35   : > { %7815 = vtanh.f32 %v5206_v11  ;;  %5932 = vmatmul.mubr.bf16.gmra.mxu1 %v5496_v49  ;;  %v4851_v41 = vmul.f32 0.5, %v11492_v3  ;;  %v4959_v19 = vmul.f32 0.044715, %v11944_v33  ;;  %v11958_v60 = vadd.f32 %v4694_v45, %v11291_v1 }
 0xb36   : > { %7817 = vtanh.f32 %v5210_v4  ;;  %v7804_v12 = vpop.eup %7803  ;;  %v11961_v42 = vmul.f32 %v5027_v6, %v11886_v52  ;;  %v4844_v63 = vmul.f32 0.5, %v11433_v7  ;;  %v4848_v55 = vmul.f32 0.5, %v11473_v28  ;;  %v12883_v4 = vld [vmem:[#allocation163_spill] sm:$0xff] }
 0xb37   : > { %v11966_v44 = vmul.f32 0.5, %v11443_v43  ;;  %v7806_v34 = vpop.eup %7805  ;;  %v5349_v3 = vadd.f32 1.0, %v7804_v12  ;;  %v11969_v57 = vmul.f32 %v5028_v5, %v11907_v39  ;;  %v4960_v1 = vmul.f32 0.044715, %v11947_v58  ;;  %v12890_v39 = vld [vmem:[#allocation185_spill] sm:$0xff] }
 0xb38   : > { %v4962_v30 = vmul.f32 0.044715, %v11950_v13  ;;  %v5353_v20 = vadd.f32 1.0, %v7806_v34  ;;  %v11974_v2 = vmul.f32 %v5030_v0, %v11916_v35  ;;  %v4850_v7 = vmul.f32 0.5, %v12878_v15  ;;  %v12884_v0 = vld [vmem:[#allocation175_spill] sm:$0xff]  ;;  %v12885_v15 = vld [vmem:[#allocation184_spill] sm:$0xff] }
 0xb39   : > { %12881 = vst [vmem:[#allocation147_spill] sm:$0xff] %v11969_v57  ;;  %v5029_v28 = vmul.f32 %v4957_v40, %v11939_v46  ;;  %v7808_v43 = vpop.eup %7807  ;;  %v5421_v51 = vmul.f32 %v5349_v3, %v11889_v22  ;;  %v5031_v53 = vmul.f32 %v4959_v19, %v11944_v33  ;;  %v4961_v6 = vmul.f32 0.044715, %v11958_v60  ;;  %v12887_v35 = vld [vmem:[#allocation168_spill] sm:$0xff] }
 0xb3a   : > { %12882 = vst [vmem:[#allocation158_spill] sm:$0xff] %v11974_v2  ;;  %v11982_v5 = vadd.f32 %v4817_v16, %v11293_v31  ;;  %v7810_v11 = vpop.eup %7809  ;;  %v5425_v45 = vmul.f32 %v5353_v20, %v4849_v29  ;;  %v5351_v49 = vadd.f32 1.0, %v7808_v43  ;;  %v5141_v12 = vadd.f32 %v12884_v0, %v12883_v4  ;;  %v12888_v57 = vld [vmem:[#allocation180_spill] sm:$0xff] }
 0xb3b   : > { %v5145_v34 = vadd.f32 %v12885_v15, %v11567_v25  ;;  %v5355_v40 = vadd.f32 1.0, %v7810_v11  ;;  %v5032_v2 = vmul.f32 %v4960_v1, %v11947_v58  ;;  %v5034_v22 = vmul.f32 %v4962_v30, %v11950_v13  ;;  %v12889_v11 = vld [vmem:[#allocation173_spill] sm:$0xff] }
 0xb3c   : > { %v11991_v19 = vmul.f32 0.5, %v12883_v4  ;;  %v5499_v3 = vpack.c.bf16 %v5425_v45, %v5421_v51  ;;  %v11994_v31 = vmul.f32 %v5029_v28, %v11939_v46  ;;  %v5213_v29 = vmul.f32 0.7978846, %v5141_v12  ;;  %v12891_v28 = vld [vmem:[#allocation161_spill] sm:$0xff]  ;;  %v12892_v51 = vld [vmem:[#allocation172_spill] sm:$0xff] }
 0xb3d   : > { %v5217_v16 = vmul.f32 0.7978846, %v5145_v34  ;;  %v7812_v20 = vpop.eup %7811  ;;  %v5423_v43 = vmul.f32 %v5351_v49, %v4847_v56  ;;  %v5427_v0 = vmul.f32 %v5355_v40, %v4851_v41  ;;  %v5143_v15 = vadd.f32 %v12888_v57, %v12887_v35  ;;  %v12893_v49 = vld [vmem:[#allocation170_spill] sm:$0xff] }
 0xb3e   : > { %12886 = vst [vmem:[#allocation166_spill] sm:$0xff] %v11994_v31  ;;  %v5147_v1 = vadd.f32 %v12890_v39, %v12889_v11  ;;  %5834 = vmatprep.mubr.bf16.mxu0 %v5499_v3  ;;  %v5348_v30 = vadd.f32 1.0, %v7812_v20  ;;  %v12001_v4 = vmul.f32 %v4961_v6, %v11958_v60  ;;  %7819 = vtanh.f32 %v5213_v29  ;;  %v12894_v39 = vld [vmem:[#allocation181_spill] sm:$0xff] }
 0xb3f   : > { %v7814_v24 = vpop.eup %7813  ;;  %v5140_v45 = vadd.f32 %v12892_v51, %v12891_v28  ;;  %v5501_v12 = vpack.c.bf16 %v5427_v0, %v5423_v43  ;;  %7821 = vtanh.f32 %v5217_v16  ;;  %v5215_v56 = vmul.f32 0.7978846, %v5143_v15  ;;  %v12895_v0 = vld [vmem:[#allocation162_spill] sm:$0xff] }
 0xb40   : > { %v5352_v34 = vadd.f32 1.0, %v7814_v24  ;;  %v12006_v41 = vmul.f32 0.044715, %v11982_v5  ;;  %v5219_v57 = vmul.f32 0.7978846, %v5147_v1  ;;  %v5144_v40 = vadd.f32 %v12894_v39, %v12893_v49  ;;  %v12896_v15 = vld [vmem:[#allocation174_spill] sm:$0xff] }
 0xb41   : > { %v5212_v3 = vmul.f32 0.7978846, %v5140_v45  ;;  %5939 = vmatprep.mubr.bf16.mxu1 %v5501_v12  ;;  %v5420_v6 = vmul.f32 %v5348_v30, %v4844_v63  ;;  %v12011_v29 = vmul.f32 %v5031_v53, %v11944_v33  ;;  %7823 = vtanh.f32 %v5215_v56  ;;  %v12897_v39 = vld [vmem:[#allocation171_spill] sm:$0xff]  ;;  %v12898_v45 = vld [vmem:[#allocation182_spill] sm:$0xff] }
 0xb42   : > { %v7816_v20 = vpop.eup %7815  ;;  %v5424_v31 = vmul.f32 %v5352_v34, %v4848_v55  ;;  %7825 = vtanh.f32 %v5219_v57  ;;  %v5216_v16 = vmul.f32 0.7978846, %v5144_v40  ;;  %v5142_v51 = vadd.f32 %v12896_v15, %v12895_v0  ;;  %v12899_v56 = vld [vmem:[#allocation178_spill] sm:$0xff]  ;;  %v12905_v15 = vld [vmem:[#allocation179_spill] sm:$0xff] }
 0xb43   : > { %v7818_v43 = vpop.eup %7817  ;;  %v5350_v24 = vadd.f32 1.0, %v7816_v20  ;;  %7827 = vtanh.f32 %v5212_v3  ;;  %v5146_v18 = vadd.f32 %v12898_v45, %v12897_v39  ;;  %v12018_v63 = vmul.f32 %v5032_v2, %v11947_v58 }
 0xb44   : > { %v5498_v1 = vpack.c.bf16 %v5424_v31, %v5420_v6  ;;  %v5354_v46 = vadd.f32 1.0, %v7818_v43  ;;  %v12021_v55 = vmul.f32 %v5034_v22, %v11950_v13  ;;  %7829 = vtanh.f32 %v5216_v16  ;;  %v12900_v31 = vld [vmem:[#allocation155_spill] sm:$0xff]  ;;  %v12901_v6 = vld [vmem:[#allocation145_spill] sm:$0xff]  ;;  %v12904_v16 = vld [vmem:[#allocation186_spill] sm:$0xff] }
 0xb45   : > { %v5214_v53 = vmul.f32 0.7978846, %v5142_v51  ;;  %v5422_v30 = vmul.f32 %v5350_v24, %v11966_v44  ;;  %v5218_v34 = vmul.f32 0.7978846, %v5146_v18  ;;  %v5149_v57 = vadd.f32 %v12900_v31, %v12899_v56  ;;  %v12903_v24 = vld [vmem:[#allocation176_spill] sm:$0xff]  ;;  %v12908_v31 = vld [vmem:[#allocation187_spill] sm:$0xff] }
 0xb46   : > { %5835 = vmatmul.mubr.bf16.gmra.mxu0 %v5498_v1  ;;  %v5426_v12 = vmul.f32 %v5354_v46, %v4850_v7  ;;  %v4857_v40 = vmul.f32 0.5, %v11567_v25  ;;  %v4855_v3 = vmul.f32 0.5, %v12887_v35  ;;  %v5153_v2 = vadd.f32 %v11752_v37, %v11669_v38  ;;  %v12902_v7 = vld [vmem:[#allocation149_spill] sm:$0xff]  ;;  %v12906_v51 = vld [vmem:[#allocation156_spill] sm:$0xff] }
 0xb47   : > { %7831 = vtanh.f32 %v5214_v53  ;;  %v5221_v20 = vmul.f32 0.7978846, %v5149_v57  ;;  %v5151_v43 = vadd.f32 %v12901_v6, %v11624_v10  ;;  %v4859_v46 = vmul.f32 0.5, %v12889_v11  ;;  %v12909_v6 = vld [vmem:[#allocation183_spill] sm:$0xff] }
 0xb48   : > { %v5500_v22 = vpack.c.bf16 %v5426_v12, %v5422_v30  ;;  %7833 = vtanh.f32 %v5218_v34  ;;  %v4852_v18 = vmul.f32 0.5, %v12891_v28  ;;  %v5225_v44 = vmul.f32 0.7978846, %v5153_v2  ;;  %v12907_v34 = vld [vmem:[#allocation177_spill] sm:$0xff] }
 0xb49   : > { %v5155_v25 = vadd.f32 %v12902_v7, %v11682_v62  ;;  %7835 = vtanh.f32 %v5221_v20  ;;  %v5223_v35 = vmul.f32 0.7978846, %v5151_v43  ;;  %v5148_v37 = vadd.f32 %v12904_v16, %v12903_v24  ;;  %v12910_v43 = vld [vmem:[#allocation138_spill] sm:$0xff] }
 0xb4a   : > { %5940 = vmatmul.mubr.bf16.gmra.mxu1 %v5500_v22  ;;  %v5152_v1 = vadd.f32 %v12906_v51, %v12905_v15  ;;  %v4856_v45 = vmul.f32 0.5, %v12893_v49  ;;  %v12042_v53 = vmul.f32 0.5, %v12895_v0  ;;  %7837 = vtanh.f32 %v5225_v44 }
 0xb4b   : > { %v5227_v11 = vmul.f32 0.7978846, %v5155_v25  ;;  %v7820_v28 = vpop.eup %7819  ;;  %7839 = vtanh.f32 %v5223_v35  ;;  %v5220_v30 = vmul.f32 0.7978846, %v5148_v37  ;;  %v5150_v57 = vadd.f32 %v12908_v31, %v12907_v34 }
 0xb4c   : > { %v5224_v12 = vmul.f32 0.7978846, %v5152_v1  ;;  %v7822_v2 = vpop.eup %7821  ;;  %v5357_v22 = vadd.f32 1.0, %v7820_v28  ;;  %v4858_v20 = vmul.f32 0.5, %v12897_v39  ;;  %v5154_v49 = vadd.f32 %v12910_v43, %v12909_v6 }
 0xb4d   : > { %7841 = vtanh.f32 %v5227_v11  ;;  %v5361_v7 = vadd.f32 1.0, %v7822_v2  ;;  %v4861_v0 = vmul.f32 0.5, %v12899_v56  ;;  %v5222_v44 = vmul.f32 0.7978846, %v5150_v57 }
 0xb4e   : > { %7843 = vtanh.f32 %v5220_v30  ;;  %v7824_v25 = vpop.eup %7823  ;;  %v5429_v35 = vmul.f32 %v5357_v22, %v11991_v19  ;;  %v5226_v16 = vmul.f32 0.7978846, %v5154_v49  ;;  %v5157_v37 = vadd.f32 %v11804_v26, %v11730_v54 }
 0xb4f   : > { %7845 = vtanh.f32 %v5224_v12  ;;  %v7826_v51 = vpop.eup %7825  ;;  %v5433_v1 = vmul.f32 %v5361_v7, %v4857_v40  ;;  %v5359_v39 = vadd.f32 1.0, %v7824_v25  ;;  %v5161_v11 = vadd.f32 %v11843_v27, %v11773_v32  ;;  %v12911_v7 = vld [vmem:[#allocation139_spill] sm:$0xff] }
 0xb50   : > { %7847 = vtanh.f32 %v5222_v44  ;;  %v7828_v28 = vpop.eup %7827  ;;  %v5363_v31 = vadd.f32 1.0, %v7826_v51  ;;  %v4865_v56 = vmul.f32 0.5, %v11669_v38  ;;  %v5229_v30 = vmul.f32 0.7978846, %v5157_v37  ;;  %v12912_v44 = vld [vmem:[#allocation151_spill] sm:$0xff] }
 0xb51   : > { %7849 = vtanh.f32 %v5226_v16  ;;  %v7830_v57 = vpop.eup %7829  ;;  %v5503_v19 = vpack.c.bf16 %v5433_v1, %v5429_v35  ;;  %v5356_v12 = vadd.f32 1.0, %v7828_v28  ;;  %v4863_v2 = vmul.f32 0.5, %v11624_v10 }
 0xb52   : > { %v5233_v22 = vmul.f32 0.7978846, %v5161_v11  ;;  %v5431_v26 = vmul.f32 %v5359_v39, %v4855_v3  ;;  %v5435_v43 = vmul.f32 %v5363_v31, %v4859_v46  ;;  %v5360_v40 = vadd.f32 1.0, %v7830_v57  ;;  %v12913_v31 = vld [vmem:[#allocation142_spill] sm:$0xff] }
 0xb53   : > { %7851 = vtanh.f32 %v5229_v30  ;;  %5842 = vmatprep.mubr.bf16.mxu0 %v5503_v19  ;;  %v4867_v27 = vmul.f32 0.5, %v11682_v62  ;;  %v5159_v38 = vadd.f32 %v12912_v44, %v12911_v7  ;;  %v5163_v25 = vadd.f32 %v11846_v14, %v11785_v59  ;;  %v12914_v30 = vld [vmem:[#allocation143_spill] sm:$0xff]  ;;  %v12915_v19 = vld [vmem:[#allocation141_spill] sm:$0xff]  ;;  %v12916_v14 = vld [vmem:[#allocation144_spill] sm:$0xff] }
 0xb54   : > { %v7832_v49 = vpop.eup %7831  ;;  %7853 = vtanh.f32 %v5233_v22  ;;  %v5505_v16 = vpack.c.bf16 %v5435_v43, %v5431_v26  ;;  %v5428_v37 = vmul.f32 %v5356_v12, %v4852_v18  ;;  %v5432_v10 = vmul.f32 %v5360_v40, %v4856_v45 }
 0xb55   : > { %v7834_v35 = vpop.eup %7833  ;;  %v5358_v51 = vadd.f32 1.0, %v7832_v49  ;;  %v4860_v46 = vmul.f32 0.5, %v12903_v24  ;;  %v5231_v1 = vmul.f32 0.7978846, %v5159_v38  ;;  %v5235_v39 = vmul.f32 0.7978846, %v5163_v25 }
 0xb56   : > { %v5362_v3 = vadd.f32 1.0, %v7834_v35  ;;  %v7836_v11 = vpop.eup %7835  ;;  %5947 = vmatprep.mubr.bf16.mxu1 %v5505_v16  ;;  %v5502_v62 = vpack.c.bf16 %v5432_v10, %v5428_v37  ;;  %v4864_v28 = vmul.f32 0.5, %v12905_v15  ;;  %v5156_v57 = vadd.f32 %v12914_v30, %v12913_v31 }
 0xb57   : > { %v5160_v22 = vadd.f32 %v12916_v14, %v12915_v19  ;;  %v7838_v26 = vpop.eup %7837  ;;  %v5430_v18 = vmul.f32 %v5358_v51, %v12042_v53  ;;  %v5365_v12 = vadd.f32 1.0, %v7836_v11  ;;  %7855 = vtanh.f32 %v5231_v1  ;;  %v12917_v53 = vld [vmem:[#allocation152_spill] sm:$0xff] }
 0xb58   : > { %v5434_v45 = vmul.f32 %v5362_v3, %v4858_v20  ;;  %v7840_v24 = vpop.eup %7839  ;;  %5843 = vmatmul.mubr.bf16.gmra.mxu0 %v5502_v62  ;;  %v5369_v43 = vadd.f32 1.0, %v7838_v26  ;;  %7857 = vtanh.f32 %v5235_v39  ;;  %v5228_v40 = vmul.f32 0.7978846, %v5156_v57  ;;  %v12918_v20 = vld [vmem:[#allocation153_spill] sm:$0xff] }
 0xb59   : > { %v5232_v49 = vmul.f32 0.7978846, %v5160_v22  ;;  %v5437_v38 = vmul.f32 %v5365_v12, %v4861_v0  ;;  %v5367_v25 = vadd.f32 1.0, %v7840_v24  ;;  %v4862_v35 = vmul.f32 0.5, %v12907_v34 }
 0xb5a   : > { %v7842_v44 = vpop.eup %7841  ;;  %v5504_v15 = vpack.c.bf16 %v5434_v45, %v5430_v18  ;;  %v5441_v37 = vmul.f32 %v5369_v43, %v4865_v56  ;;  %7859 = vtanh.f32 %v5228_v40  ;;  %v5158_v51 = vadd.f32 %v12918_v20, %v12917_v53 }
 0xb5b   : > { %v7844_v16 = vpop.eup %7843  ;;  %v5371_v10 = vadd.f32 1.0, %v7842_v44  ;;  %v5439_v1 = vmul.f32 %v5367_v25, %v4863_v2  ;;  %7861 = vtanh.f32 %v5232_v49  ;;  %v5162_v39 = vadd.f32 %v11829_v23, %v11746_v8 }
 0xb5c   : > { %v7846_v3 = vpop.eup %7845  ;;  %5948 = vmatmul.mubr.bf16.gmra.mxu1 %v5504_v15  ;;  %v5364_v11 = vadd.f32 1.0, %v7844_v16  ;;  %v5507_v0 = vpack.c.bf16 %v5441_v37, %v5437_v38  ;;  %v5230_v34 = vmul.f32 0.7978846, %v5158_v51  ;;  %v4866_v22 = vmul.f32 0.5, %v12909_v6  ;;  %v12919_v51 = vld [vmem:[#allocation140_spill] sm:$0xff] }
 0xb5d   : > { %v7848_v62 = vpop.eup %7847  ;;  %v5443_v30 = vmul.f32 %v5371_v10, %v4867_v27  ;;  %v5368_v57 = vadd.f32 1.0, %v7846_v3  ;;  %v5234_v18 = vmul.f32 0.7978846, %v5162_v39  ;;  %v5105_v23 = vmul.f32 %v12001_v4, %v11958_v60 }
 0xb5e   : > { %v7850_v14 = vpop.eup %7849  ;;  %v5436_v56 = vmul.f32 %v5364_v11, %v4860_v46  ;;  %v5366_v26 = vadd.f32 1.0, %v7848_v62  ;;  %5850 = vmatprep.mubr.bf16.mxu0 %v5507_v0  ;;  %7863 = vtanh.f32 %v5230_v34  ;;  %v5165_v27 = vadd.f32 %v11898_v48, %v11840_v9 }
 0xb5f   : > { %v5509_v45 = vpack.c.bf16 %v5443_v30, %v5439_v1  ;;  %v5440_v12 = vmul.f32 %v5368_v57, %v4864_v28  ;;  %v5370_v2 = vadd.f32 1.0, %v7850_v14  ;;  %7865 = vtanh.f32 %v5234_v18  ;;  %v12921_v18 = vld [vmem:[#allocation154_spill] sm:$0xff] }
 0xb60   : > { %v7852_v24 = vpop.eup %7851  ;;  %v5438_v43 = vmul.f32 %v5366_v26, %v4862_v35  ;;  %v5169_v44 = vadd.f32 %v11928_v50, %v11864_v47  ;;  %v4869_v28 = vmul.f32 0.5, %v11730_v54  ;;  %v4873_v15 = vmul.f32 0.5, %v11773_v32 }
 0xb61   : > { %v7854_v40 = vpop.eup %7853  ;;  %5955 = vmatprep.mubr.bf16.mxu1 %v5509_v45  ;;  %v5506_v46 = vpack.c.bf16 %v5440_v12, %v5436_v56  ;;  %v5442_v6 = vmul.f32 %v5370_v2, %v4866_v22  ;;  %v5373_v49 = vadd.f32 1.0, %v7852_v24  ;;  %v5237_v25 = vmul.f32 0.7978846, %v5165_v27  ;;  %v12922_v45 = vld [vmem:[#allocation150_spill] sm:$0xff]  ;;  %v12923_v2 = vld [vmem:[#allocation148_spill] sm:$0xff]  ;;  %v12924_v24 = vld [vmem:[#allocation157_spill] sm:$0xff] }
 0xb62   : > { %v5377_v38 = vadd.f32 1.0, %v7854_v40  ;;  %v5035_v4 = vmul.f32 %v12006_v41, %v11982_v5  ;;  %v5241_v48 = vmul.f32 0.7978846, %v5169_v44  ;;  %v5167_v16 = vadd.f32 %v11910_v36, %v11850_v21  ;;  %v12920_v41 = vld [vmem:[#allocation159_spill] sm:$0xff] }
 0xb63   : > { %5851 = vmatmul.mubr.bf16.gmra.mxu0 %v5506_v46  ;;  %v5508_v35 = vpack.c.bf16 %v5442_v6, %v5438_v43  ;;  %v5445_v37 = vmul.f32 %v5373_v49, %v4869_v28  ;;  %7867 = vtanh.f32 %v5237_v25  ;;  %v5171_v50 = vadd.f32 %v11961_v42, %v11886_v52  ;;  %v12925_v28 = vld [vmem:[#allocation165_spill] sm:$0xff] }
 0xb64   : > { %v5449_v10 = vmul.f32 %v5377_v38, %v4873_v15  ;;  %v7856_v54 = vpop.eup %7855  ;;  %v4871_v32 = vmul.f32 0.5, %v12911_v7  ;;  %7869 = vtanh.f32 %v5241_v48  ;;  %v5239_v20 = vmul.f32 0.7978846, %v5167_v16  ;;  %v12926_v15 = vld [vmem:[#allocation166_spill] sm:$0xff] }
 0xb65   : > { %5956 = vmatmul.mubr.bf16.gmra.mxu1 %v5508_v35  ;;  %v5164_v3 = vadd.f32 %v12920_v41, %v12919_v51  ;;  %v7858_v1 = vpop.eup %7857  ;;  %v5375_v39 = vadd.f32 1.0, %v7856_v54  ;;  %v5243_v62 = vmul.f32 0.7978846, %v5171_v50  ;;  %v5168_v36 = vadd.f32 %v11913_v61, %v11853_v17 }
 0xb66   : > { %v5511_v11 = vpack.c.bf16 %v5449_v10, %v5445_v37  ;;  %v4875_v0 = vmul.f32 0.5, %v11785_v59  ;;  %v5379_v30 = vadd.f32 1.0, %v7858_v1  ;;  %7871 = vtanh.f32 %v5239_v20 }
 0xb67   : > { %v5236_v42 = vmul.f32 0.7978846, %v5164_v3  ;;  %v7860_v57 = vpop.eup %7859  ;;  %v5447_v7 = vmul.f32 %v5375_v39, %v4871_v32  ;;  %v4868_v34 = vmul.f32 0.5, %v12913_v31  ;;  %7873 = vtanh.f32 %v5243_v62  ;;  %v12928_v39 = vld [vmem:[#allocation147_spill] sm:$0xff] }
 0xb68   : > { %5858 = vmatprep.mubr.bf16.mxu0 %v5511_v11  ;;  %v5240_v14 = vmul.f32 0.7978846, %v5168_v36  ;;  %v7862_v56 = vpop.eup %7861  ;;  %v5451_v22 = vmul.f32 %v5379_v30, %v4875_v0  ;;  %v5372_v26 = vadd.f32 1.0, %v7860_v57  ;;  %v5166_v12 = vadd.f32 %v12922_v45, %v12921_v18  ;;  %v12927_v11 = vld [vmem:[#allocation164_spill] sm:$0xff] }
 0xb69   : > { %7875 = vtanh.f32 %v5236_v42  ;;  %v4872_v61 = vmul.f32 0.5, %v12915_v19  ;;  %v5376_v59 = vadd.f32 1.0, %v7862_v56  ;;  %v5170_v43 = vadd.f32 %v12924_v24, %v12923_v2  ;;  %v12929_v56 = vld [vmem:[#allocation146_spill] sm:$0xff] }
 0xb6a   : > { %7877 = vtanh.f32 %v5240_v14  ;;  %v5107_v27 = vmul.f32 %v5035_v4, %v11982_v5  ;;  %v5513_v40 = vpack.c.bf16 %v5451_v22, %v5447_v7  ;;  %v5444_v31 = vmul.f32 %v5372_v26, %v4868_v34  ;;  %v12930_v22 = vld [vmem:[#allocation158_spill] sm:$0xff] }
 0xb6b   : > { %v5238_v46 = vmul.f32 0.7978846, %v5166_v12  ;;  %v7864_v6 = vpop.eup %7863  ;;  %v5448_v49 = vmul.f32 %v5376_v59, %v4872_v61  ;;  %v5242_v44 = vmul.f32 0.7978846, %v5170_v43  ;;  %v5173_v38 = vadd.f32 %v12926_v15, %v12925_v28 }
 0xb6c   : > { %v5177_v25 = vadd.f32 %v5105_v23, %v11958_v60  ;;  %v7866_v35 = vpop.eup %7865  ;;  %5963 = vmatprep.mubr.bf16.mxu1 %v5513_v40  ;;  %v4870_v19 = vmul.f32 0.5, %v12917_v53  ;;  %v4874_v48 = vmul.f32 0.5, %v11746_v8  ;;  %v5374_v16 = vadd.f32 1.0, %v7864_v6 }
 0xb6d   : > { %7879 = vtanh.f32 %v5238_v46  ;;  %v5510_v4 = vpack.c.bf16 %v5448_v49, %v5444_v31  ;;  %v5378_v37 = vadd.f32 1.0, %v7866_v35  ;;  %v5245_v10 = vmul.f32 0.7978846, %v5173_v38 }
 0xb6e   : > { %7881 = vtanh.f32 %v5242_v44  ;;  %v4877_v50 = vmul.f32 0.5, %v11840_v9  ;;  %v5249_v54 = vmul.f32 0.7978846, %v5177_v25  ;;  %v5175_v32 = vadd.f32 %v12011_v29, %v11944_v33 }
 0xb6f   : > { %v5179_v23 = vadd.f32 %v5107_v27, %v11982_v5  ;;  %5859 = vmatmul.mubr.bf16.gmra.mxu0 %v5510_v4  ;;  %v5446_v20 = vmul.f32 %v5374_v16, %v4870_v19  ;;  %v5450_v41 = vmul.f32 %v5378_v37, %v4874_v48  ;;  %v4881_v53 = vmul.f32 0.5, %v11864_v47 }
 0xb70   : > { %7883 = vtanh.f32 %v5245_v10  ;;  %v7868_v8 = vpop.eup %7867  ;;  %v5247_v3 = vmul.f32 0.7978846, %v5175_v32  ;;  %v5172_v62 = vadd.f32 %v12928_v39, %v12927_v11  ;;  %v4879_v29 = vmul.f32 0.5, %v11850_v21 }
 0xb71   : > { %7885 = vtanh.f32 %v5249_v54  ;;  %v5251_v1 = vmul.f32 0.7978846, %v5179_v23  ;;  %v7870_v9 = vpop.eup %7869  ;;  %v5512_v36 = vpack.c.bf16 %v5450_v41, %v5446_v20  ;;  %v5381_v0 = vadd.f32 1.0, %v7868_v8 }
 0xb72   : > { %v5176_v30 = vadd.f32 %v12018_v63, %v11947_v58  ;;  %v5385_v42 = vadd.f32 1.0, %v7870_v9  ;;  %v4883_v57 = vmul.f32 0.5, %v11886_v52  ;;  %7887 = vtanh.f32 %v5247_v3 }
 0xb73   : > { %v5244_v47 = vmul.f32 0.7978846, %v5172_v62  ;;  %v7872_v7 = vpop.eup %7871  ;;  %5964 = vmatmul.mubr.bf16.gmra.mxu1 %v5512_v36  ;;  %v5453_v34 = vmul.f32 %v5381_v0, %v4877_v50  ;;  %7889 = vtanh.f32 %v5251_v1  ;;  %v5174_v26 = vadd.f32 %v12930_v22, %v12929_v56 }
 0xb74   : > { %v5248_v14 = vmul.f32 0.7978846, %v5176_v30  ;;  %v7874_v45 = vpop.eup %7873  ;;  %v5457_v12 = vmul.f32 %v5385_v42, %v4881_v53  ;;  %v5383_v61 = vadd.f32 1.0, %v7872_v7  ;;  %v5178_v21 = vadd.f32 %v12021_v55, %v11950_v13 }
 0xb75   : > { %7891 = vtanh.f32 %v5244_v47  ;;  %v5387_v59 = vadd.f32 1.0, %v7874_v45  ;;  %v4876_v52 = vmul.f32 0.5, %v12919_v51  ;;  %v5246_v24 = vmul.f32 0.7978846, %v5174_v26 }
 0xb76   : > { %v7876_v63 = vpop.eup %7875  ;;  %7893 = vtanh.f32 %v5248_v14  ;;  %v5515_v27 = vpack.c.bf16 %v5457_v12, %v5453_v34  ;;  %v4880_v40 = vmul.f32 0.5, %v11853_v17  ;;  %v5250_v46 = vmul.f32 0.7978846, %v5178_v21 }
 0xb77   : > { %v7878_v43 = vpop.eup %7877  ;;  %v5380_v31 = vadd.f32 1.0, %v7876_v63  ;;  %v5455_v6 = vmul.f32 %v5383_v61, %v4879_v29  ;;  %v5459_v49 = vmul.f32 %v5387_v59, %v4883_v57  ;;  %7895 = vtanh.f32 %v5246_v24 }
 0xb78   : > { %v5384_v44 = vadd.f32 1.0, %v7878_v43  ;;  %5866 = vmatprep.mubr.bf16.mxu0 %v5515_v27  ;;  %7897 = vtanh.f32 %v5250_v46  ;;  %v4878_v48 = vmul.f32 0.5, %v12921_v18  ;;  %v4882_v17 = vmul.f32 0.5, %v12923_v2 }
 0xb79   : > { %v5517_v55 = vpack.c.bf16 %v5459_v49, %v5455_v6  ;;  %v5452_v38 = vmul.f32 %v5380_v31, %v4876_v52  ;;  %v4885_v32 = vmul.f32 0.5, %v12925_v28  ;;  %v4889_v23 = vmul.f32 0.5, %v11958_v60  ;;  %v5468_v31 = vld [vmem:[#allocation4 + $0x80] sm:$0xff] }
 0xb7a   : > { %v7880_v15 = vpop.eup %7879  ;;  %v5456_v25 = vmul.f32 %v5384_v44, %v4880_v40  ;;  %v4887_v2 = vmul.f32 0.5, %v11944_v33  ;;  %v4891_v62 = vmul.f32 0.5, %v11982_v5  ;;  %v4884_v28 = vmul.f32 0.5, %v12927_v11 }
 0xb7b   : > { %v7882_v35 = vpop.eup %7881  ;;  %v5382_v51 = vadd.f32 1.0, %v7880_v15  ;;  %5971 = vmatprep.mubr.bf16.mxu1 %v5517_v55  ;;  %v4888_v42 = vmul.f32 0.5, %v11947_v58  ;;  %v4886_v5 = vmul.f32 0.5, %v12929_v56  ;;  %v4890_v26 = vmul.f32 0.5, %v11950_v13  ;;  %v5469_v15 = vld [vmem:[#allocation4 + $0x68] sm:$0xff] }
 0xb7c   : > { %v5514_v19 = vpack.c.bf16 %v5456_v25, %v5452_v38  ;;  %v5386_v16 = vadd.f32 1.0, %v7882_v35 }
 0xb7d   : > { %v7884_v4 = vpop.eup %7883  ;;  %v5454_v10 = vmul.f32 %v5382_v51, %v4878_v48 }
 0xb7e   : > { %v7886_v37 = vpop.eup %7885  ;;  %5867 = vmatmul.mubr.bf16.gmra.mxu0 %v5514_v19  ;;  %v5458_v50 = vmul.f32 %v5386_v16, %v4882_v17  ;;  %v5389_v54 = vadd.f32 1.0, %v7884_v4  ;;  %v5470_v4 = vld [vmem:[#allocation4 + $0x38] sm:$0xff] }
 0xb7f   : > { %v5393_v20 = vadd.f32 1.0, %v7886_v37  ;;  %v7888_v41 = vpop.eup %7887 }
 0xb80   : > { %v5516_v53 = vpack.c.bf16 %v5458_v50, %v5454_v10  ;;  %v7890_v8 = vpop.eup %7889  ;;  %v5461_v3 = vmul.f32 %v5389_v54, %v4885_v32  ;;  %v5391_v18 = vadd.f32 1.0, %v7888_v41  ;;  %v5471_v41 = vld [vmem:[#allocation4] sm:$0xff] }
 0xb81   : > { %v5465_v1 = vmul.f32 %v5393_v20, %v4889_v23  ;;  %v5395_v9 = vadd.f32 1.0, %v7890_v8 }
 0xb82   : > { %v7892_v39 = vpop.eup %7891  ;;  %5972 = vmatmul.mubr.bf16.gmra.mxu1 %v5516_v53  ;;  %v5463_v60 = vmul.f32 %v5391_v18, %v4887_v2 }
 0xb83   : > { %v7894_v36 = vpop.eup %7893  ;;  %v5519_v0 = vpack.c.bf16 %v5465_v1, %v5461_v3  ;;  %v5388_v29 = vadd.f32 1.0, %v7892_v39  ;;  %v5467_v30 = vmul.f32 %v5395_v9, %v4891_v62 }
 0xb84   : > { %v5392_v57 = vadd.f32 1.0, %v7894_v36  ;;  %v7896_v47 = vpop.eup %7895 }
 0xb85   : > { %5874 = vmatprep.mubr.bf16.mxu0 %v5519_v0  ;;  %v7898_v7 = vpop.eup %7897  ;;  %v5521_v34 = vpack.c.bf16 %v5467_v30, %v5463_v60  ;;  %v5460_v14 = vmul.f32 %v5388_v29, %v4884_v28  ;;  %v5390_v33 = vadd.f32 1.0, %v7896_v47  ;;  %v5472_v0 = vld [vmem:[#allocation4 + $0x48] sm:$0xff]  ;;  %v5473_v47 = vld [vmem:[#allocation4 + $0x10] sm:$0xff] }
 0xb86   : > { %v5464_v22 = vmul.f32 %v5392_v57, %v4888_v42  ;;  %v5394_v45 = vadd.f32 1.0, %v7898_v7 }
 0xb87   : > { %5979 = vmatprep.mubr.bf16.mxu1 %v5521_v34  ;;  %v5462_v12 = vmul.f32 %v5390_v33, %v4886_v5 }
 0xb88   : > { %v5518_v11 = vpack.c.bf16 %v5464_v22, %v5460_v14  ;;  %v5466_v61 = vmul.f32 %v5394_v45, %v4890_v26 }
 0xb8a   : > { %5875 = vmatmul.mubr.bf16.gmra.mxu0 %v5518_v11  ;;  %v5520_v21 = vpack.c.bf16 %v5466_v61, %v5462_v12  ;;  %v5474_v61 = vld [vmem:[#allocation4 + $0x88] sm:$0xff] }
 0xb8c   : > { %5980 = vmatmul.mubr.bf16.gmra.mxu1 %v5520_v21 }
 0xbc6   : > { %v6791_v58 = vpop.f32.mrf.mxu0 }
 0xbc8   : > { %v6792_v63 = vpop.f32.mrf.mxu0 }
 0xbc9   : > { %v6793_v52 = vadd.f32 %v6792_v63, %v6791_v58 }
 0xbca   : > { %v6794_v24 = vpop.f32.mrf.mxu0 }
 0xbcb   : > { %v6861_v59 = vpop.f32.mrf.mxu1 }
 0xbcc   : > { %v6795_v40 = vpop.f32.mrf.mxu0 }
 0xbcd   : > { %v6862_v43 = vpop.f32.mrf.mxu1  ;;  %v6796_v13 = vadd.f32 %v6795_v40, %v6794_v24 }
 0xbce   : > { %v6863_v27 = vadd.f32 %v6862_v43, %v6861_v59  ;;  %v5475_v43 = vld [vmem:[#allocation4 + $0x28] sm:$0xff] }
 0xbcf   : > { %v6864_v56 = vpop.f32.mrf.mxu1 }
 0xbd0   : > { %v5918_v46 = vadd.f32 %v6863_v27, %v6793_v52 }
 0xbd1   : > { %v6865_v6 = vpop.f32.mrf.mxu1 }
 0xbd2   : > { %v5988_v49 = vadd.f32 %v5918_v46, %v5468_v31  ;;  %v6866_v44 = vadd.f32 %v6865_v6, %v6864_v56 }
 0xbd4   : > { %6006 = vst [vmem:[#allocation4 + $0x80] sm:$0xff] %v5988_v49  ;;  %v5921_v55 = vadd.f32 %v6866_v44, %v6796_v13 }
 0xbd6   : > { %v5989_v38 = vadd.f32 %v5921_v55, %v5469_v15  ;;  %v5476_v55 = vld [vmem:[#allocation4 + $0x58] sm:$0xff] }
 0xbd8   : > { %6007 = vst [vmem:[#allocation4 + $0x68] sm:$0xff] %v5989_v38 }
 0xbdd   : > { %v6797_v25 = vpop.f32.mrf.mxu0 }
 0xbdf   : > { %v6798_v51 = vpop.f32.mrf.mxu0 }
 0xbe0   : > { %v6867_v35 = vpop.f32.mrf.mxu1  ;;  %v6799_v19 = vadd.f32 %v6798_v51, %v6797_v25 }
 0xbe1   : > { %v6800_v17 = vpop.f32.mrf.mxu0 }
 0xbe2   : > { %v6868_v48 = vpop.f32.mrf.mxu1 }
 0xbe3   : > { %v6869_v16 = vadd.f32 %v6868_v48, %v6867_v35  ;;  %v6801_v10 = vpop.f32.mrf.mxu0 }
 0xbe4   : > { %v6870_v37 = vpop.f32.mrf.mxu1  ;;  %v6802_v54 = vadd.f32 %v6801_v10, %v6800_v17 }
 0xbe5   : > { %v5926_v50 = vadd.f32 %v6869_v16, %v6799_v19  ;;  %v5477_v16 = vld [vmem:[#allocation4 + $0x78] sm:$0xff] }
 0xbe6   : > { %v6871_v32 = vpop.f32.mrf.mxu1 }
 0xbe7   : > { %v5990_v23 = vadd.f32 %v5926_v50, %v5470_v4  ;;  %v6872_v20 = vadd.f32 %v6871_v32, %v6870_v37 }
 0xbe9   : > { %6008 = vst [vmem:[#allocation4 + $0x38] sm:$0xff] %v5990_v23  ;;  %v5929_v53 = vadd.f32 %v6872_v20, %v6802_v54 }
 0xbeb   : > { %v5991_v8 = vadd.f32 %v5929_v53, %v5471_v41  ;;  %v5478_v41 = vld [vmem:[#allocation4 + $0x30] sm:$0xff] }
 0xbed   : > { %6009 = vst [vmem:[#allocation4] sm:$0xff] %v5991_v8 }
 0xbf1   : > { %v6803_v3 = vpop.f32.mrf.mxu0 }
 0xbf3   : > { %v6804_v1 = vpop.f32.mrf.mxu0 }
 0xbf4   : > { %v6805_v2 = vadd.f32 %v6804_v1, %v6803_v3 }
 0xbf5   : > { %v6806_v18 = vpop.f32.mrf.mxu0  ;;  %v6873_v39 = vpop.f32.mrf.mxu1 }
 0xbf7   : > { %v6874_v62 = vpop.f32.mrf.mxu1  ;;  %v6807_v9 = vpop.f32.mrf.mxu0 }
 0xbf8   : > { %v6875_v36 = vadd.f32 %v6874_v62, %v6873_v39  ;;  %v6808_v60 = vadd.f32 %v6807_v9, %v6806_v18  ;;  %v5479_v62 = vld [vmem:[#allocation4 + $0x18] sm:$0xff] }
 0xbf9   : > { %v6876_v28 = vpop.f32.mrf.mxu1 }
 0xbfa   : > { %v5934_v29 = vadd.f32 %v6875_v36, %v6805_v2 }
 0xbfb   : > { %v6877_v30 = vpop.f32.mrf.mxu1 }
 0xbfc   : > { %v5992_v42 = vadd.f32 %v5934_v29, %v5472_v0  ;;  %v6878_v57 = vadd.f32 %v6877_v30, %v6876_v28 }
 0xbfe   : > { %6010 = vst [vmem:[#allocation4 + $0x48] sm:$0xff] %v5992_v42  ;;  %v5937_v7 = vadd.f32 %v6878_v57, %v6808_v60 }
 0xc00   : > { %v5993_v34 = vadd.f32 %v5937_v7, %v5473_v47  ;;  %v5480_v7 = vld [vmem:[#allocation4 + $0x50] sm:$0xff] }
 0xc02   : > { %6011 = vst [vmem:[#allocation4 + $0x10] sm:$0xff] %v5993_v34 }
 0xc06   : > { %v6809_v14 = vpop.f32.mrf.mxu0 }
 0xc08   : > { %v6810_v22 = vpop.f32.mrf.mxu0 }
 0xc09   : > { %v6811_v26 = vadd.f32 %v6810_v22, %v6809_v14 }
 0xc0a   : > { %v6879_v33 = vpop.f32.mrf.mxu1  ;;  %v6812_v5 = vpop.f32.mrf.mxu0 }
 0xc0c   : > { %v6880_v45 = vpop.f32.mrf.mxu1  ;;  %v6813_v11 = vpop.f32.mrf.mxu0 }
 0xc0d   : > { %v6881_v12 = vadd.f32 %v6880_v45, %v6879_v33  ;;  %v6814_v63 = vadd.f32 %v6813_v11, %v6812_v5  ;;  %v5481_v45 = vld [vmem:[#allocation4 + $0x70] sm:$0xff] }
 0xc0e   : > { %v6882_v21 = vpop.f32.mrf.mxu1 }
 0xc0f   : > { %v5942_v58 = vadd.f32 %v6881_v12, %v6811_v26 }
 0xc10   : > { %v6883_v59 = vpop.f32.mrf.mxu1 }
 0xc11   : > { %v5994_v52 = vadd.f32 %v5942_v58, %v5474_v61  ;;  %v6884_v24 = vadd.f32 %v6883_v59, %v6882_v21 }
 0xc13   : > { %6012 = vst [vmem:[#allocation4 + $0x88] sm:$0xff] %v5994_v52  ;;  %v5945_v27 = vadd.f32 %v6884_v24, %v6814_v63 }
 0xc15   : > { %v5995_v40 = vadd.f32 %v5945_v27, %v5475_v43  ;;  %v5482_v27 = vld [vmem:[#allocation4 + $0x20] sm:$0xff] }
 0xc17   : > { %6013 = vst [vmem:[#allocation4 + $0x28] sm:$0xff] %v5995_v40 }
 0xc18   : > { %v6815_v31 = vpop.f32.mrf.mxu0 }
 0xc1a   : > { %v6816_v56 = vpop.f32.mrf.mxu0 }
 0xc1b   : > { %v6817_v13 = vadd.f32 %v6816_v56, %v6815_v31 }
 0xc1c   : > { %v6885_v46 = vpop.f32.mrf.mxu1  ;;  %v6818_v6 = vpop.f32.mrf.mxu0 }
 0xc1e   : > { %v6886_v49 = vpop.f32.mrf.mxu1  ;;  %v6819_v15 = vpop.f32.mrf.mxu0 }
 0xc1f   : > { %v6887_v44 = vadd.f32 %v6886_v49, %v6885_v46  ;;  %v6820_v35 = vadd.f32 %v6819_v15, %v6818_v6  ;;  %v5483_v49 = vld [vmem:[#allocation4 + $0x40] sm:$0xff] }
 0xc20   : > { %v6888_v38 = vpop.f32.mrf.mxu1 }
 0xc21   : > { %v5950_v25 = vadd.f32 %v6887_v44, %v6817_v13 }
 0xc22   : > { %v6889_v51 = vpop.f32.mrf.mxu1 }
 0xc23   : > { %v5996_v19 = vadd.f32 %v5950_v25, %v5476_v55  ;;  %v6890_v48 = vadd.f32 %v6889_v51, %v6888_v38  ;;  %v6821_v17 = vpop.f32.mrf.mxu0 }
 0xc25   : > { %6014 = vst [vmem:[#allocation4 + $0x58] sm:$0xff] %v5996_v19  ;;  %v5953_v4 = vadd.f32 %v6890_v48, %v6820_v35  ;;  %v6891_v37 = vpop.f32.mrf.mxu1  ;;  %v6822_v10 = vpop.f32.mrf.mxu0 }
 0xc26   : > { %v6823_v50 = vadd.f32 %v6822_v10, %v6821_v17 }
 0xc27   : > { %v5997_v54 = vadd.f32 %v5953_v4, %v5477_v16  ;;  %v6892_v32 = vpop.f32.mrf.mxu1  ;;  %v6824_v23 = vpop.f32.mrf.mxu0  ;;  %v5484_v16 = vld [vmem:[#allocation4 + $0x60] sm:$0xff] }
 0xc28   : > { %v6893_v20 = vadd.f32 %v6892_v32, %v6891_v37 }
 0xc29   : > { %6015 = vst [vmem:[#allocation4 + $0x78] sm:$0xff] %v5997_v54  ;;  %v6894_v53 = vpop.f32.mrf.mxu1  ;;  %v6825_v8 = vpop.f32.mrf.mxu0 }
 0xc2a   : > { %v5958_v3 = vadd.f32 %v6893_v20, %v6823_v50  ;;  %v6826_v1 = vadd.f32 %v6825_v8, %v6824_v23  ;;  %v5485_v23 = vld [vmem:[#allocation4 + $0x8] sm:$0x1] }
 0xc2b   : > { %v6895_v18 = vpop.f32.mrf.mxu1 }
 0xc2c   : > { %v5998_v39 = vadd.f32 %v5958_v3, %v5478_v41  ;;  %v6896_v2 = vadd.f32 %v6895_v18, %v6894_v53 }
 0xc2e   : > { %6016 = vst [vmem:[#allocation4 + $0x30] sm:$0xff] %v5998_v39  ;;  %v5961_v9 = vadd.f32 %v6896_v2, %v6826_v1 }
 0xc2f   : > { %v6827_v0 = vpop.f32.mrf.mxu0 }
 0xc30   : > { %v5999_v36 = vadd.f32 %v5961_v9, %v5479_v62 }
 0xc31   : > { %v6828_v28 = vpop.f32.mrf.mxu0 }
 0xc32   : > { %6017 = vst [vmem:[#allocation4 + $0x18] sm:$0xff] %v5999_v36  ;;  %v6829_v30 = vadd.f32 %v6828_v28, %v6827_v0 }
 0xc33   : > { %v6897_v29 = vpop.f32.mrf.mxu1  ;;  %v6830_v60 = vpop.f32.mrf.mxu0 }
 0xc35   : > { %v6898_v42 = vpop.f32.mrf.mxu1  ;;  %v6831_v57 = vpop.f32.mrf.mxu0 }
 0xc36   : > { %v6899_v47 = vadd.f32 %v6898_v42, %v6897_v29  ;;  %v6832_v22 = vadd.f32 %v6831_v57, %v6830_v60 }
 0xc37   : > { %v6900_v34 = vpop.f32.mrf.mxu1 }
 0xc38   : > { %v5966_v14 = vadd.f32 %v6899_v47, %v6829_v30 }
 0xc39   : > { %v6901_v33 = vpop.f32.mrf.mxu1 }
 0xc3a   : > { %v6000_v5 = vadd.f32 %v5966_v14, %v5480_v7  ;;  %v6902_v26 = vadd.f32 %v6901_v33, %v6900_v34 }
 0xc3c   : > { %6018 = vst [vmem:[#allocation4 + $0x50] sm:$0xff] %v6000_v5  ;;  %v5969_v11 = vadd.f32 %v6902_v26, %v6832_v22 }
 0xc3e   : > { %v6833_v12 = vpop.f32.mrf.mxu0  ;;  %v6001_v61 = vadd.f32 %v5969_v11, %v5481_v45 }
 0xc40   : > { %v6834_v21 = vpop.f32.mrf.mxu0  ;;  %6019 = vst [vmem:[#allocation4 + $0x70] sm:$0xff] %v6001_v61 }
 0xc41   : > { %v6835_v59 = vadd.f32 %v6834_v21, %v6833_v12 }
 0xc42   : > { %v6903_v58 = vpop.f32.mrf.mxu1  ;;  %v6836_v63 = vpop.f32.mrf.mxu0 }
 0xc44   : > { %v6904_v52 = vpop.f32.mrf.mxu1  ;;  %v6837_v24 = vpop.f32.mrf.mxu0 }
 0xc45   : > { %v6905_v43 = vadd.f32 %v6904_v52, %v6903_v58  ;;  %v6838_v56 = vadd.f32 %v6837_v24, %v6836_v63 }
 0xc46   : > { %v6906_v40 = vpop.f32.mrf.mxu1 }
 0xc47   : > { %v5974_v31 = vadd.f32 %v6905_v43, %v6835_v59 }
 0xc48   : > { %v6907_v46 = vpop.f32.mrf.mxu1 }
 0xc49   : > { %v6002_v13 = vadd.f32 %v5974_v31, %v5482_v27  ;;  %v6908_v6 = vadd.f32 %v6907_v46, %v6906_v40 }
 0xc4a   : > { %v6839_v44 = vpop.f32.mrf.mxu0 }
 0xc4b   : > { %6020 = vst [vmem:[#allocation4 + $0x20] sm:$0xff] %v6002_v13  ;;  %v5977_v15 = vadd.f32 %v6908_v6, %v6838_v56 }
 0xc4c   : > { %v6840_v55 = vpop.f32.mrf.mxu0  ;;  %v6909_v25 = vpop.f32.mrf.mxu1 }
 0xc4d   : > { %v6003_v38 = vadd.f32 %v5977_v15, %v5483_v49  ;;  %v6841_v35 = vadd.f32 %v6840_v55, %v6839_v44 }
 0xc4e   : > { %v6842_v51 = vpop.f32.mrf.mxu0  ;;  %v6910_v19 = vpop.f32.mrf.mxu1 }
 0xc4f   : > { %6021 = vst [vmem:[#allocation4 + $0x40] sm:$0xff] %v6003_v38  ;;  %v6911_v48 = vadd.f32 %v6910_v19, %v6909_v25 }
 0xc50   : > { %v6843_v17 = vpop.f32.mrf.mxu0  ;;  %v6912_v4 = vpop.f32.mrf.mxu1 }
 0xc51   : > { %v5982_v37 = vadd.f32 %v6911_v48, %v6841_v35  ;;  %v6844_v10 = vadd.f32 %v6843_v17, %v6842_v51 }
 0xc52   : > { %v6913_v50 = vpop.f32.mrf.mxu1 }
 0xc53   : > { %v6004_v54 = vadd.f32 %v5982_v37, %v5484_v16  ;;  %v6914_v32 = vadd.f32 %v6913_v50, %v6912_v4 }
 0xc55   : > { %6022 = vst [vmem:[#allocation4 + $0x60] sm:$0xff] %v6004_v54  ;;  %v5985_v20 = vadd.f32 %v6914_v32, %v6844_v10  ;;  %6027 = sbr.rel (%p6738_p4) target bundleno = 3682 (0xe62), region = 112 }
 0xc57   : > { %v6005_v41 = vadd.f32 %v5985_v20, %v5485_v23 }
 0xc59   : > { %6023 = vst [vmem:[#allocation4 + $0x8] sm:$0x1] %v6005_v41 }
 0xc5a   : > { %v6028_v53 = vld [vmem:[#allocation3 + $0x80] sm:$0xff]  ;;  %v6739_v3 = vld [vmem:[%s12216_s8 + $0x4] ss:$0 sm:$0xff]  ;;  %vm6045_vm6 = vcmask 1040384   ;;  %v8339_v29 = vmov 0.0   ;;  %v7908_v11 = vld [vmem:[#allocation16 + $0x30] sm:$0xff]  }
 0xc5b   : > { %v6029_v18 = vld [vmem:[#allocation3] sm:$0x1]  ;;  %v7899_v0 = vld [vmem:[#allocation15 + $0x74] ss:$8 sps:$4 sm:$0xff]   ;;  %6924 = vmatprep.subr.bf16.mxu1 %v8339_v29  ;;  %v7902_v33 = vld [vmem:[#allocation15 + $0x64] ss:$8 sps:$4 sm:$0xff]  }
 0xc5c   : > { %v6030_v8 = vld [vmem:[#allocation4 + $0x60] sm:$0xff]  ;;  %v7901_v28 = vld [vmem:[#allocation15 + $0x70] ss:$8 sps:$4 sm:$0xff]   ;;  %6193 = vmatprep.subr.bf16.mxu0 %v7899_v0  ;;  %v7906_v45 = vld [vmem:[#allocation15 + $0x54] ss:$8 sps:$4 sm:$0xff]   ;;  %v8340_v43 = vmov 0  }
 0xc5d   : > { %v6037_v1 = vadd.f32 %v6739_v3, %v6030_v8  ;;  %6194 = vmatpush1.bf16.msra.mxu0 %v7901_v28  ;;  %v7904_v5 = vld [vmem:[#allocation16 + $0x38] sm:$0xff]   ;;  %v7905_v26 = vld [vmem:[#allocation15 + $0x60] ss:$8 sps:$4 sm:$0xff]   ;;  %v7910_v61 = vld [vmem:[#allocation15 + $0x44] ss:$8 sps:$4 sm:$0xff]   ;;  %6225 = vmatprep.mubr.bf16.mxu0 %v8340_v43  ;;  %vm8341_vm7 = vmmov 0  }
 0xc5e   : > { %6195 = vmatprep.subr.bf16.mxu0 %v7902_v33  ;;  %6925 = vmatpush3.bf16.msra.mxu1 %v7904_v5  ;;  %v7909_v12 = vld [vmem:[#allocation15 + $0x50] ss:$8 sps:$4 sm:$0xff]   ;;  %v7912_v21 = vld [vmem:[#allocation16 + $0x28] sm:$0xff]   ;;  %v7914_v63 = vld [vmem:[#allocation15 + $0x34] ss:$8 sps:$4 sm:$0xff]  }
 0xc5f   : > { %v6039_v62 = vadd.f32 %v6037_v1, %v6028_v53  ;;  %6926 = vmatprep.subr.bf16.mxu1 %v8339_v29  ;;  %v7913_v58 = vld [vmem:[#allocation15 + $0x40] ss:$8 sps:$4 sm:$0xff]   ;;  %v7917_v52 = vld [vmem:[#allocation15 + $0x30] ss:$8 sps:$4 sm:$0xff]   ;;  %v7918_v24 = vld [vmem:[#allocation15 + $0x24] ss:$8 sps:$4 sm:$0xff]   ;;  %6940 = vmatprep.mubr.msk.bf16.mxu1 %vm8341_vm7, %v8339_v29 }
 0xc60   : > { %v6031_v39 = vld [vmem:[#allocation4 + $0x8] sm:$0x1]  ;;  %v7916_v59 = vld [vmem:[#allocation16 + $0x20] sm:$0xff]   ;;  %v7920_v27 = vld [vmem:[#allocation16 + $0x18] sm:$0xff]  }
 0xc61   : > { %v6038_v2 = vadd.f32 %v6739_v3, %v6031_v39  ;;  %6043 = vadd.xlane.f32.xlu0 %v6039_v62  ;;  %6196 = vmatpush1.bf16.msra.mxu0 %v7905_v26  ;;  %v7921_v40 = vld [vmem:[#allocation15 + $0x20] ss:$8 sps:$4 sm:$0xff]   ;;  %v7922_v31 = vld [vmem:[#allocation15 + $0x14] ss:$8 sps:$4 sm:$0xff]   ;;  %v7925_v46 = vld [vmem:[#allocation15 + $0x10] ss:$8 sps:$4 sm:$0xff]  }
 0xc62   : > { %6197 = vmatprep.subr.bf16.mxu0 %v7906_v45  ;;  %6927 = vmatpush3.bf16.msra.mxu1 %v7908_v11  ;;  %v7924_v56 = vld [vmem:[#allocation16 + $0x10] sm:$0xff]   ;;  %v7926_v13 = vld [vmem:[#allocation15 + $0x4] ss:$8 sps:$4 sm:$0xff]   ;;  %v7929_v49 = vld [vmem:[#allocation15] ss:$8 sps:$4 sm:$0xff]  }
 0xc63   : > { %v6040_v9 = vadd.f32 %v6038_v2, %v6029_v18  ;;  %6928 = vmatprep.subr.bf16.mxu1 %v8339_v29  ;;  %v7928_v6 = vld [vmem:[#allocation16 + $0x8] sm:$0xff]   ;;  %v7930_v44 = vld [vmem:[#allocation16] sm:$0xff]   ;;  %v6081_v37 = vld [vmem:[#allocation8] sm:$0xff] }
 0xc64   : > { %v6740_v48 = vld [vmem:[%s12216_s8 + $0x2] ss:$0 sm:$0xff]  ;;  %v6741_v16 = vld [vmem:[%s12216_s8 + $0x3] ss:$0 sm:$0xff]  ;;  %v12931_v3 = vld [vmem:[#allocation137_spill] sm:$0xff] }
 0xc65   : > { %v6046_v36 = vsel %vm6045_vm6, %v6040_v9, 0.0  ;;  %6198 = vmatpush1.bf16.msra.mxu0 %v7909_v12  ;;  %v6101_v8 = vld [vmem:[#allocation17 + $0x2] ss:$4 sm:$0x3]  ;;  %v12932_v1 = vsub.s32 0, %v12931_v3  ;;  %v12933_v39 = vsub.s32 1, %v12931_v3 }
 0xc66   : > { %6047 = vadd.xlane.f32.xlu0 %v6046_v36  ;;  %6199 = vmatprep.subr.bf16.mxu0 %v7910_v61  ;;  %v6253_v36 = vld [vmem:[%s12216_s8 + $0x6] sm:$0x1] }
 0xc67   : > { %6929 = vmatpush3.bf16.msra.mxu1 %v7912_v21  ;;  %v6106_v18 = vrot.slane %v6101_v8, %v12932_v1  ;;  %v6110_v2 = vrot.slane %v6101_v8, %v12933_v39 }
 0xc68   : > { %6930 = vmatprep.subr.bf16.mxu1 %v8339_v29 }
 0xc69   : > { %6200 = vmatpush1.bf16.msra.mxu0 %v7913_v58 }
 0xc6a   : > { %6201 = vmatprep.subr.bf16.mxu0 %v7914_v63 }
 0xc6b   : > { %6931 = vmatpush3.bf16.msra.mxu1 %v7916_v59 }
 0xc6c   : > { %6932 = vmatprep.subr.bf16.mxu1 %v8339_v29 }
 0xc6d   : > { %6202 = vmatpush1.bf16.msra.mxu0 %v7917_v52 }
 0xc6e   : > { %6203 = vmatprep.subr.bf16.mxu0 %v7918_v24 }
 0xc6f   : > { %6933 = vmatpush3.bf16.msra.mxu1 %v7920_v27 }
 0xc70   : > { %6934 = vmatprep.subr.bf16.mxu1 %v8339_v29 }
 0xc71   : > { %6204 = vmatpush1.bf16.msra.mxu0 %v7921_v40 }
 0xc72   : > { %6205 = vmatprep.subr.bf16.mxu0 %v7922_v31 }
 0xc73   : > { %6935 = vmatpush3.bf16.msra.mxu1 %v7924_v56 }
 0xc74   : > { %6936 = vmatprep.subr.bf16.mxu1 %v8339_v29 }
 0xc75   : > { %6206 = vmatpush1.bf16.msra.mxu0 %v7925_v46 }
 0xc76   : > { %6207 = vmatprep.subr.bf16.mxu0 %v7926_v13 }
 0xc77   : > { %6937 = vmatpush3.bf16.msra.mxu1 %v7928_v6 }
 0xc78   : > { %6938 = vmatprep.subr.bf16.mxu1 %v8339_v29 }
 0xc79   : > { %6208 = vmatpush1.bf16.msra.mxu0 %v7929_v49 }
 0xc7b   : > { %6939 = vmatpush3.bf16.msra.mxu1 %v7930_v44 }
 0xcea   : > { %v6044_v60 = vpop.xlane.xlu0 %6043 }
 0xceb   : > { %v6050_v30 = vmul.f32 0.0078125, %v6044_v60 }
 0xced   : > { %v12140_v42 = vsub.f32 %v6039_v62, %v6050_v30 }
 0xcef   : > { %v6048_v57 = vpop.xlane.xlu0 %6047  ;;  %v6054_v7 = vmul.f32 %v12140_v42, %v12140_v42 }
 0xcf0   : > { %v6051_v47 = vmul.f32 0.0078125, %v6048_v57 }
 0xcf1   : > { %6056 = vadd.xlane.f32.xlu1 %v6054_v7 }
 0xcf2   : > { %v12144_v34 = vsub.f32 %v6040_v9, %v6051_v47 }
 0xcf4   : > { %v6055_v14 = vmul.f32 %v12144_v34, %v12144_v34 }
 0xcf6   : > { %v6058_v22 = vsel %vm6045_vm6, %v6055_v14, 0.0 }
 0xcf7   : > { %6059 = vadd.xlane.f32.xlu1 %v6058_v22 }
 0xd7a   : > { %v6057_v15 = vpop.xlane.xlu1 %6056 }
 0xd7b   : > { %v6061_v55 = vmul.f32 0.0078125, %v6057_v15 }
 0xd7d   : > { %v6063_v38 = vadd.f32 1e-05, %v6061_v55 }
 0xd7f   : > { %7931 = vrsqrt.f32 %v6063_v38 }
 0xd80   : > { %v6060_v25 = vpop.xlane.xlu1 %6059 }
 0xd81   : > { %v6062_v35 = vmul.f32 0.0078125, %v6060_v25 }
 0xd83   : > { %v6064_v51 = vadd.f32 1e-05, %v6062_v35 }
 0xd85   : > { %7933 = vrsqrt.f32 %v6064_v51 }
 0xd8c   : > { %v7932_v19 = vpop.eup %7931 }
 0xd8d   : > { %v6067_v17 = vmul.f32 %v7932_v19, %v12140_v42 }
 0xd8f   : > { %v6073_v4 = vmul.f32 %v6740_v48, %v6067_v17 }
 0xd91   : > { %v6079_v50 = vadd.f32 %v6741_v16, %v6073_v4 }
 0xd92   : > { %v7934_v10 = vpop.eup %7933 }
 0xd93   : > { %v6068_v54 = vmul.f32 %v7934_v10, %v12144_v34  ;;  %v6082_v32 = vadd.f32 %v6081_v37, %v6079_v50 }
 0xd95   : > { %v6074_v23 = vmul.f32 %v6740_v48, %v6068_v54  ;;  %v6083_v20 = vpack.c.bf16 %v6082_v32, %v6082_v32 }
 0xd97   : > { %v6080_v41 = vadd.f32 %v6741_v16, %v6074_v23  ;;  %6226 = vmatmul.mubr.bf16.vlgmr.msra.gmra.mxu0 %v6083_v20 }
 0xd99   : > { %v6236_v53 = vpack.c.bf16 %v6080_v41, %v6080_v41 }
 0xd9b   : > { %6941 = vmatmul.mubr.bf16.vlgmr.msra.gmra.mxu1 %v6236_v53 }
 0xe57   : > { %v6227_v62 = vpop.f32.mrf.mxu0 }
 0xe58   : > { %v6228_v9 = vadd.f32 %v6227_v62, %v6106_v18 }
 0xe59   : > { %v6229_v0 = vpop.f32.mrf.mxu0 }
 0xe5a   : > { %6234 = vst [vmem:[#allocation20] sm:$0xff] %v6228_v9  ;;  %v6230_v28 = vadd.f32 %v6229_v0, %v6110_v2 }
 0xe5b   : > { %v6336_v29 = vpop.f32.mrf.mxu1  ;;  %v6231_v30 = vpop.f32.mrf.mxu0 }
 0xe5c   : > { %v6337_v60 = vadd.f32 %v6336_v29, %v6253_v36  ;;  %6235 = vst [vmem:[#allocation20 + $0x8] sm:$0xff] %v6230_v28 }
 0xe5d   : > { %v6942_v42 = vpop.f32.mrf.mxu1  ;;  %v6232_v57 = vpop.f32.mrf.mxu0 }
 0xe5e   : > { %6342 = vst [vmem:[#allocation21] sm:$0x1] %v6337_v60 }
 0xe5f   : > { %v6339_v47 = vpop.f32.mrf.mxu1 }
 0xe61   : > { %v6943_v7 = vpop.f32.mrf.mxu1 }
 0xe62 PF: > { %p7053_p13 = scmp.eq.s32.totalorder %s8430_s27, 3  ;;  %s8342_s21 = smov [#allocation20]  }
 0xe63   : > { %s6350_s13 = sshll.u32 %s8342_s21, 4  ;;  %s8343_s17 = smov [#allocation21]   ;;  %s6351_s13 = int_to_ptr.vmem [resolvable:$true] %s6350_s13 }
 0xe64   : > { %s6361_s26 = sshll.u32 %s8343_s17, 4  ;;  %s8199_s25 = scalar_lea.vmem %s6351_s13, 256  ;;  %s6362_s26 = int_to_ptr.vmem [resolvable:$true] %s6361_s26 }
 0xe65   : > { %p8200_p6 = scmp.ne.s32.totalorder %s6351_s13, %s8199_s25  ;;  %p8206_p0 = scmp.lt.s32.totalorder %s6351_s13, %s6351_s13 }
 0xe66   : > { %p8207_p11 = scmp.lt.s32.totalorder %s8199_s25, %s8199_s25 }
 0xe67   : > { %p8201_p12 = pnand %p8200_p6, %p7053_p13 }
 0xe68   : > { %p8208_p2 = por %p8207_p11, %p8206_p0 }
 0xe69   : > { %p8202_p8 = pneg %p8201_p12 }
 0xe6b   : > { %p8209_p9 = pnand %p8208_p2, %p8202_p8 }
 0xe6d   : > { %8212 = shalt.err (!%p8209_p9)
}
 0xe6e   : > { %6997 = dma.vmem_to_hbm [thread:$0]  (%p7053_p13), %s6351_s13, 256, %s12219_s11, [#allocation7]  }
 0xe6f   : > { %s8223_s9 = scalar_lea.vmem %s6362_s26, 16  ;;  %s8229_s19 = scalar_lea.vmem %s6362_s26, 32 }
 0xe70   : > { %p8224_p10 = scmp.ne.s32.totalorder %s6362_s26, %s8223_s9  ;;  %p8230_p3 = scmp.lt.s32.totalorder %s6362_s26, %s6362_s26 }
 0xe71   : > { %p8231_p5 = scmp.lt.s32.totalorder %s8229_s19, %s8223_s9 }
 0xe72   : > { %p8225_p1 = pnand %p8224_p10, %p7053_p13 }
 0xe73   : > { %p8232_p4 = por %p8231_p5, %p8230_p3 }
 0xe74   : > { %p8226_p7 = pneg %p8225_p1 }
 0xe76   : > { %p8233_p6 = pnand %p8232_p4, %p8226_p7 }
 0xe78   : > { %8236 = shalt.err (!%p8233_p6)
}
 0xe79   : > { %6999 = dma.vmem_to_hbm [thread:$0]  (%p7053_p13), %s6362_s26, 16, %s12220_s12, [#allocation22]  }
 0xe7a   : > { %8292 = dma.done.wait (%p7053_p13), [#allocation7], 256  }
 0xe7b   : > { %8294 = vsyncadd (%p7053_p13), [#allocation7], 4294967040 }
 0xe7c   : > { %8296 = dma.done.wait (%p7053_p13), [#allocation22], 16  }
 0xe7d   : > { %8298 = vsyncadd (%p7053_p13), [#allocation22], 4294967280 }
 0xe7e PF: > { %s12934_s28 = sld [smem:[#allocation32_spill]]  ;;  %p26_p12 = scmp.ge.s32.totalorder %s8506_s18, 6  }
 0xe7f   : > { %s12935_s21 = smov %s8305_s22  ;;  %s12936_s22 = smov %s8309_s23 }
 0xe80   : > { %s12938_s24 = smov %s8506_s18  ;;  %28 = sbr.rel (!%p26_p12) target bundleno = 14 (0xe), region = 162 }
 0xe84   : > { %s12937_s23 = smov %s12934_s28 }
 0xe85   :  { %6378 = vsyncpa [#allocation6], 1 }
 0xe86   :  { %6380 = vsyncpa [#allocation6 + $0x1], 1 }
 0xe87   :  { %6381 = vsyncpa [#allocation9], 1 }
 0xe88   :  { %6382 = vsyncpa [#allocation12], 1 }
 0xe89   :  { %6383 = vsyncpa [#allocation18], 1 }
 0xe8a   :  { %6384 = vsyncpa [#allocation7], 1 }
 0xe8b   :  { %6386 = vsyncpa [#allocation7 + $0x1], 1 }
 0xe8c   :  { %6387 = vsyncpa [#allocation22], 1 }

</bundles_post_ra>
